<compile_context>
chip_gen: v6e
topology: v6e:2x2x1
jax: 0.10.0
libtpu: 0.0.40
codegen_flags: <defaults>
</compile_context>

<pallas_src>
import functools

import jax
import jax.numpy as jnp
from jax import lax
from jax.experimental import pallas as pl
from jax.experimental.pallas import tpu as pltpu


def _round_up(x, m):
    return (x + m - 1) // m * m


VALUE_COL = 64   # lane holding the value head inside the 128-lane fused layer-2 output
HEAD_N2 = 128    # lane-dense padded width of the fused layer-2 / readout


# ----------------------------------------------------------------------------
# Fused kernel: conv1 -> conv2 -> conv3 -> value/adv MLPs -> dueling combine
# ----------------------------------------------------------------------------
def _qnet_fused_kernel(x_ref, m1_ref, b1_ref, m2_ref, b2_ref, m3_ref, b3_ref,
                       w4_ref, b4_ref, w5_ref, b5_ref, o_ref, *,
                       num_actions, value_col):
    # conv1 (dense fold): (tm, Cin*H*W) @ (Cin*H*W, 32*Ho*Wo)
    h = jnp.dot(x_ref[...].astype(jnp.bfloat16), m1_ref[...],
                preferred_element_type=jnp.float32)
    h = jnp.maximum(h + b1_ref[...], 0.0).astype(jnp.bfloat16)
    # conv2
    h = jnp.dot(h, m2_ref[...], preferred_element_type=jnp.float32)
    h = jnp.maximum(h + b2_ref[...], 0.0).astype(jnp.bfloat16)
    # conv3 -> o1 (already in PyTorch (C, H, W) flatten order)
    h = jnp.dot(h, m3_ref[...], preferred_element_type=jnp.float32)
    h = jnp.maximum(h + b3_ref[...], 0.0).astype(jnp.bfloat16)
    # head layer-1: [value1 || adv1] -> (tm, 1024)
    h = jnp.dot(h, w4_ref[...], preferred_element_type=jnp.float32)
    h = jnp.maximum(h + b4_ref[...], 0.0).astype(jnp.bfloat16)
    # head layer-2: cols [0, A) = adv2, col value_col = value2 (block-structured)
    y = jnp.dot(h, w5_ref[...], preferred_element_type=jnp.float32)
    y = jnp.maximum(y + b5_ref[...], 0.0)                       # (tm, 128) f32
    # dueling combine: out = value + adv - mean(adv); zeros outside adv lanes
    col = lax.broadcasted_iota(jnp.int32, y.shape, 1)
    adv_mask = col < num_actions
    adv = jnp.where(adv_mask, y, 0.0)
    adv_mean = jnp.sum(adv, axis=1, keepdims=True) * (1.0 / num_actions)
    value = y[:, value_col:value_col + 1]                       # static lane slice
    o_ref[...] = jnp.where(adv_mask, value + (adv - adv_mean), 0.0)


def qnet_fused(x, prep, *, num_actions, block_m=512):
    """Full QNetwork forward on flattened obs.

    x: (B, Cin*H*W) f32.  Returns the lane-dense padded readout (B, HEAD_N2)
    f32; columns [0, num_actions) hold the Q-values.
    """
    B, K1 = x.shape
    assert K1 == prep["m1"].shape[0], (K1, prep["m1"].shape)
    tm = min(_round_up(B, 8), block_m)
    Bp = _round_up(B, tm)
    if Bp != B:
        x = jnp.pad(x, ((0, Bp - B), (0, 0)))

    def full(shape):
        return pl.BlockSpec(shape, lambda i: (0, 0))

    out = pl.pallas_call(
        functools.partial(_qnet_fused_kernel,
                          num_actions=num_actions, value_col=VALUE_COL),
        out_shape=jax.ShapeDtypeStruct((Bp, HEAD_N2), jnp.float32),
        grid=(Bp // tm,),
        in_specs=[
            pl.BlockSpec((tm, K1), lambda i: (i, 0)),
            full(prep["m1"].shape), full(prep["b1"].shape),
            full(prep["m2"].shape), full(prep["b2"].shape),
            full(prep["m3"].shape), full(prep["b3"].shape),
            full(prep["w4"].shape), full(prep["b4"].shape),
            full(prep["w5"].shape), full(prep["b5"].shape),
        ],
        out_specs=pl.BlockSpec((tm, HEAD_N2), lambda i: (i, 0)),
        compiler_params=pltpu.CompilerParams(
            dimension_semantics=("parallel",),
            vmem_limit_bytes=32 * 1024 * 1024),
    )(x, prep["m1"], prep["b1"], prep["m2"], prep["b2"], prep["m3"],
      prep["b3"], prep["w4"], prep["b4"], prep["w5"], prep["b5"])
    return out[:B]


# ----------------------------------------------------------------------------
# Parameter init (PyTorch-style) + one-time conversion to kernel layout
# ----------------------------------------------------------------------------
def _xavier_uniform(key, shape):
    fan_in, fan_out = shape
    bound = (6.0 / (fan_in + fan_out)) ** 0.5
    return jax.random.uniform(key, shape, jnp.float32, -bound, bound)


def _conv_init(key, shape):
    _, cin, kh, kw = shape
    fan_in = cin * kh * kw
    bound = (1.0 / fan_in) ** 0.5
    return jax.random.uniform(key, shape, jnp.float32, -bound, bound)


def init_params(key, num_obs, num_actions, hidden_dim):
    ks = jax.random.split(key, 8)
    return {
        "conv1_w": _conv_init(ks[0], (32, num_obs, 10, 14)),
        "conv1_b": jnp.zeros((32,), jnp.float32),
        "conv2_w": _conv_init(ks[1], (64, 32, 4, 4)),
        "conv2_b": jnp.zeros((64,), jnp.float32),
        "conv3_w": _conv_init(ks[2], (64, 64, 3, 3)),
        "conv3_b": jnp.zeros((64,), jnp.float32),
        "value1_w": _xavier_uniform(ks[3], (hidden_dim, 512)),
        "value1_b": jnp.zeros((512,), jnp.float32),
        "value2_w": _xavier_uniform(ks[4], (512, 1)),
        "value2_b": jnp.zeros((1,), jnp.float32),
        "adv1_w": _xavier_uniform(ks[5], (hidden_dim, 512)),
        "adv1_b": jnp.zeros((512,), jnp.float32),
        "adv2_w": _xavier_uniform(ks[6], (512, num_actions)),
        "adv2_b": jnp.zeros((num_actions,), jnp.float32),
    }


def _conv_as_dense(w, cin, h, w_in, stride, pad):
    """Fold a Conv2d (no bias) into a dense (cin*h*w, cout*ho*wo) matrix, both
    sides in PyTorch contiguous (C, H, W) flat order, by pushing basis vectors
    through the conv.  Runs once at prepare time (not part of the forward)."""
    cout, cin_w, kh, kw = w.shape
    assert cin_w == cin, (cin_w, cin)
    n_in = cin * h * w_in
    eye = jnp.eye(n_in, dtype=jnp.float32).reshape(n_in, cin, h, w_in)
    out = lax.conv_general_dilated(
        eye, w, window_strides=(stride, stride),
        padding=[(pad, pad), (pad, pad)],
        dimension_numbers=("NCHW", "OIHW", "NCHW"))
    _, co, ho, wo = out.shape
    return out.reshape(n_in, co * ho * wo), ho, wo


def prepare_params(params, num_obs, num_actions, obs_hw):
    """One-time conversion: conv layers folded to dense bf16 matrices, dueling
    head fused into two lane-dense matrices (value col at VALUE_COL)."""
    assert num_actions < VALUE_COL < HEAD_N2
    h0, w0 = obs_hw

    m1, h1, w1 = _conv_as_dense(params["conv1_w"], num_obs, h0, w0, 8, 1)
    b1 = jnp.repeat(params["conv1_b"], h1 * w1)
    m2, h2, w2 = _conv_as_dense(params["conv2_w"], 32, h1, w1, 2, 1)
    b2 = jnp.repeat(params["conv2_b"], h2 * w2)
    m3, h3, w3 = _conv_as_dense(params["conv3_w"], 64, h2, w2, 1, 1)
    b3 = jnp.repeat(params["conv3_b"], h3 * w3)
    hidden_dim = 64 * h3 * w3
    assert params["value1_w"].shape[0] == hidden_dim, (
        params["value1_w"].shape, hidden_dim)

    # head layer-1: value1 || adv1 -> (hidden, 1024)
    w4 = jnp.concatenate([params["value1_w"], params["adv1_w"]], axis=1)
    b4 = jnp.concatenate([params["value1_b"], params["adv1_b"]], axis=0)
    # head layer-2: block-structured (1024, 128): adv2 -> cols [0, A),
    # value2 -> col VALUE_COL (fed by the value-path half of layer-1).
    w5 = jnp.zeros((1024, HEAD_N2), jnp.float32)
    w5 = w5.at[512:, :num_actions].set(params["adv2_w"])
    w5 = w5.at[:512, VALUE_COL].set(params["value2_w"][:, 0])
    b5 = jnp.zeros((HEAD_N2,), jnp.float32)
    b5 = b5.at[:num_actions].set(params["adv2_b"])
    b5 = b5.at[VALUE_COL].set(params["value2_b"][0])

    bf16, f32 = jnp.bfloat16, jnp.float32
    return {
        "m1": m1.astype(bf16), "b1": b1.reshape(1, -1).astype(f32),
        "m2": m2.astype(bf16), "b2": b2.reshape(1, -1).astype(f32),
        "m3": m3.astype(bf16), "b3": b3.reshape(1, -1).astype(f32),
        "w4": w4.astype(bf16), "b4": b4.reshape(1, -1).astype(f32),
        "w5": w5.astype(bf16), "b5": b5.reshape(1, -1).astype(f32),
    }


# ----------------------------------------------------------------------------
# QNetwork forward
# ----------------------------------------------------------------------------
def qnetwork_forward(prep, obs, num_actions):
    """obs: (B, num_obs, H, W) NCHW (PyTorch API).  Returns readout[0], (num_actions,)."""
    B = obs.shape[0]
    # NCHW contiguous flatten == PyTorch (C, H, W) order: a free view, no transpose.
    x = obs.reshape(B, -1)
    readout = qnet_fused(x, prep, num_actions=num_actions)     # (B, 128) f32
    # NOTE: readout[0] only depends on obs[0]; the full batch is still computed
    # to mirror the reference module's forward.
    return readout[0, :num_actions]


if __name__ == "__main__":
    # (B=2, num_obs=4, H=32, W=38) -> conv1 -> (2,32,4,4) -> conv2 -> (2,64,2,2)
    # -> conv3 -> (2,64,2,2) -> flatten -> hidden_dim = 64*2*2 = 256
    B, num_obs, H, W = 2, 4, 32, 38
    num_actions = 6
    hidden_dim = 256

    key = jax.random.PRNGKey(0)
    k_obs, k_params = jax.random.split(key)
    obs = jax.random.normal(k_obs, (B, num_obs, H, W), jnp.float32)
    raw_params = init_params(k_params, num_obs, num_actions, hidden_dim)
    prep = prepare_params(raw_params, num_obs, num_actions, (H, W))

    fwd = jax.jit(functools.partial(qnetwork_forward, num_actions=num_actions))
    action = fwd(prep, obs)
    jax.block_until_ready(action)
    assert action.shape == (num_actions,)
    assert bool(jnp.all(jnp.isfinite(action)))
    print("KERNEL_OK")
</pallas_src>

<mosaic_0001>
module attributes {stable_mosaic.version = 11 : i64} {
  func.func @_qnet_fused_kernel(%arg0: i32, %arg1: memref<8x4864xf32, #tpu.memory_space<vmem>>, %arg2: memref<4864x512xbf16, #tpu.memory_space<vmem>>, %arg3: memref<1x512xf32, #tpu.memory_space<vmem>>, %arg4: memref<512x256xbf16, #tpu.memory_space<vmem>>, %arg5: memref<1x256xf32, #tpu.memory_space<vmem>>, %arg6: memref<256x256xbf16, #tpu.memory_space<vmem>>, %arg7: memref<1x256xf32, #tpu.memory_space<vmem>>, %arg8: memref<256x1024xbf16, #tpu.memory_space<vmem>>, %arg9: memref<1x1024xf32, #tpu.memory_space<vmem>>, %arg10: memref<1024x128xbf16, #tpu.memory_space<vmem>>, %arg11: memref<1x128xf32, #tpu.memory_space<vmem>>, %arg12: memref<8x128xf32, #tpu.memory_space<vmem>>) attributes {dimension_semantics = [#tpu.dimension_semantics<parallel>], iteration_bounds = array<i64: 1>, scalar_prefetch = 0 : i64, scratch_operands = 0 : i64, tpu.core_type = #tpu.core_type<tc>, window_params = [{transform_indices = @transform_0, window_bounds = array<i64: 8, 4864>}, {pipeline_mode = #tpu.pipeline_mode<synchronous>, transform_indices = @transform_1, window_bounds = array<i64: 4864, 512>}, {pipeline_mode = #tpu.pipeline_mode<synchronous>, transform_indices = @transform_2, window_bounds = array<i64: 1, 512>}, {pipeline_mode = #tpu.pipeline_mode<synchronous>, transform_indices = @transform_3, window_bounds = array<i64: 512, 256>}, {pipeline_mode = #tpu.pipeline_mode<synchronous>, transform_indices = @transform_4, window_bounds = array<i64: 1, 256>}, {pipeline_mode = #tpu.pipeline_mode<synchronous>, transform_indices = @transform_5, window_bounds = array<i64: 256, 256>}, {pipeline_mode = #tpu.pipeline_mode<synchronous>, transform_indices = @transform_6, window_bounds = array<i64: 1, 256>}, {pipeline_mode = #tpu.pipeline_mode<synchronous>, transform_indices = @transform_7, window_bounds = array<i64: 256, 1024>}, {pipeline_mode = #tpu.pipeline_mode<synchronous>, transform_indices = @transform_8, window_bounds = array<i64: 1, 1024>}, {pipeline_mode = #tpu.pipeline_mode<synchronous>, transform_indices = @transform_9, window_bounds = array<i64: 1024, 128>}, {pipeline_mode = #tpu.pipeline_mode<synchronous>, transform_indices = @transform_10, window_bounds = array<i64: 1, 128>}, {transform_indices = @transform_11, window_bounds = array<i64: 8, 128>}]} {
    %c0 = arith.constant 0 : index
    %c0_0 = arith.constant 0 : index
    %0 = vector.load %arg1[%c0, %c0_0] : memref<8x4864xf32, #tpu.memory_space<vmem>>, vector<8x4864xf32>
    %1 = arith.truncf %0 : vector<8x4864xf32> to vector<8x4864xbf16>
    %c0_1 = arith.constant 0 : index
    %c0_2 = arith.constant 0 : index
    %2 = vector.load %arg2[%c0_1, %c0_2] : memref<4864x512xbf16, #tpu.memory_space<vmem>>, vector<4864x512xbf16>
    %cst = arith.constant dense<0.000000e+00> : vector<8x512xf32>
    %3 = tpu.matmul %1, %2, %cst {dimension_numbers = #tpu.dot_dimension_numbers<[1], [0], [0], [1], [0, 0, 1, 1], [], []>} : vector<8x4864xbf16>, vector<4864x512xbf16>, vector<8x512xf32> -> vector<8x512xf32>
    %c0_3 = arith.constant 0 : index
    %c0_4 = arith.constant 0 : index
    %4 = vector.load %arg3[%c0_3, %c0_4] : memref<1x512xf32, #tpu.memory_space<vmem>>, vector<1x512xf32>
    %5 = vector.broadcast %4 : vector<1x512xf32> to vector<8x512xf32>
    %6 = arith.addf %3, %5 : vector<8x512xf32>
    %cst_5 = arith.constant 0.000000e+00 : f32
    %7 = vector.broadcast %cst_5 : f32 to vector<8x512xf32>
    %8 = arith.maximumf %6, %7 : vector<8x512xf32>
    %9 = arith.truncf %8 : vector<8x512xf32> to vector<8x512xbf16>
    %c0_6 = arith.constant 0 : index
    %c0_7 = arith.constant 0 : index
    %10 = vector.load %arg4[%c0_6, %c0_7] : memref<512x256xbf16, #tpu.memory_space<vmem>>, vector<512x256xbf16>
    %cst_8 = arith.constant dense<0.000000e+00> : vector<8x256xf32>
    %11 = tpu.matmul %9, %10, %cst_8 {dimension_numbers = #tpu.dot_dimension_numbers<[1], [0], [0], [1], [0, 0, 1, 1], [], []>} : vector<8x512xbf16>, vector<512x256xbf16>, vector<8x256xf32> -> vector<8x256xf32>
    %c0_9 = arith.constant 0 : index
    %c0_10 = arith.constant 0 : index
    %12 = vector.load %arg5[%c0_9, %c0_10] : memref<1x256xf32, #tpu.memory_space<vmem>>, vector<1x256xf32>
    %13 = vector.broadcast %12 : vector<1x256xf32> to vector<8x256xf32>
    %14 = arith.addf %11, %13 : vector<8x256xf32>
    %cst_11 = arith.constant 0.000000e+00 : f32
    %15 = vector.broadcast %cst_11 : f32 to vector<8x256xf32>
    %16 = arith.maximumf %14, %15 : vector<8x256xf32>
    %17 = arith.truncf %16 : vector<8x256xf32> to vector<8x256xbf16>
    %c0_12 = arith.constant 0 : index
    %c0_13 = arith.constant 0 : index
    %18 = vector.load %arg6[%c0_12, %c0_13] : memref<256x256xbf16, #tpu.memory_space<vmem>>, vector<256x256xbf16>
    %cst_14 = arith.constant dense<0.000000e+00> : vector<8x256xf32>
    %19 = tpu.matmul %17, %18, %cst_14 {dimension_numbers = #tpu.dot_dimension_numbers<[1], [0], [0], [1], [0, 0, 1, 1], [], []>} : vector<8x256xbf16>, vector<256x256xbf16>, vector<8x256xf32> -> vector<8x256xf32>
    %c0_15 = arith.constant 0 : index
    %c0_16 = arith.constant 0 : index
    %20 = vector.load %arg7[%c0_15, %c0_16] : memref<1x256xf32, #tpu.memory_space<vmem>>, vector<1x256xf32>
    %21 = vector.broadcast %20 : vector<1x256xf32> to vector<8x256xf32>
    %22 = arith.addf %19, %21 : vector<8x256xf32>
    %cst_17 = arith.constant 0.000000e+00 : f32
    %23 = vector.broadcast %cst_17 : f32 to vector<8x256xf32>
    %24 = arith.maximumf %22, %23 : vector<8x256xf32>
    %25 = arith.truncf %24 : vector<8x256xf32> to vector<8x256xbf16>
    %c0_18 = arith.constant 0 : index
    %c0_19 = arith.constant 0 : index
    %26 = vector.load %arg8[%c0_18, %c0_19] : memref<256x1024xbf16, #tpu.memory_space<vmem>>, vector<256x1024xbf16>
    %cst_20 = arith.constant dense<0.000000e+00> : vector<8x1024xf32>
    %27 = tpu.matmul %25, %26, %cst_20 {dimension_numbers = #tpu.dot_dimension_numbers<[1], [0], [0], [1], [0, 0, 1, 1], [], []>} : vector<8x256xbf16>, vector<256x1024xbf16>, vector<8x1024xf32> -> vector<8x1024xf32>
    %c0_21 = arith.constant 0 : index
    %c0_22 = arith.constant 0 : index
    %28 = vector.load %arg9[%c0_21, %c0_22] : memref<1x1024xf32, #tpu.memory_space<vmem>>, vector<1x1024xf32>
    %29 = vector.broadcast %28 : vector<1x1024xf32> to vector<8x1024xf32>
    %30 = arith.addf %27, %29 : vector<8x1024xf32>
    %cst_23 = arith.constant 0.000000e+00 : f32
    %31 = vector.broadcast %cst_23 : f32 to vector<8x1024xf32>
    %32 = arith.maximumf %30, %31 : vector<8x1024xf32>
    %33 = arith.truncf %32 : vector<8x1024xf32> to vector<8x1024xbf16>
    %c0_24 = arith.constant 0 : index
    %c0_25 = arith.constant 0 : index
    %34 = vector.load %arg10[%c0_24, %c0_25] : memref<1024x128xbf16, #tpu.memory_space<vmem>>, vector<1024x128xbf16>
    %cst_26 = arith.constant dense<0.000000e+00> : vector<8x128xf32>
    %35 = tpu.matmul %33, %34, %cst_26 {dimension_numbers = #tpu.dot_dimension_numbers<[1], [0], [0], [1], [0, 0, 1, 1], [], []>} : vector<8x1024xbf16>, vector<1024x128xbf16>, vector<8x128xf32> -> vector<8x128xf32>
    %c0_27 = arith.constant 0 : index
    %c0_28 = arith.constant 0 : index
    %36 = vector.load %arg11[%c0_27, %c0_28] : memref<1x128xf32, #tpu.memory_space<vmem>>, vector<1x128xf32>
    %37 = vector.broadcast %36 : vector<1x128xf32> to vector<8x128xf32>
    %38 = arith.addf %35, %37 : vector<8x128xf32>
    %cst_29 = arith.constant 0.000000e+00 : f32
    %39 = vector.broadcast %cst_29 : f32 to vector<8x128xf32>
    %40 = arith.maximumf %38, %39 : vector<8x128xf32>
    %41 = tpu.iota {dimensions = array<i32: 1>} : vector<8x128xi32>
    %c6_i32 = arith.constant 6 : i32
    %42 = vector.broadcast %c6_i32 : i32 to vector<8x128xi32>
    %43 = arith.cmpi slt, %41, %42 : vector<8x128xi32>
    %cst_30 = arith.constant 0.000000e+00 : f32
    %44 = vector.broadcast %cst_30 : f32 to vector<8x128xf32>
    %45 = arith.select %43, %40, %44 : vector<8x128xi1>, vector<8x128xf32>
    %cst_31 = arith.constant dense<0.000000e+00> : vector<8xf32>
    %46 = vector.multi_reduction <add>, %45, %cst_31 [1] : vector<8x128xf32> to vector<8xf32>
    %47 = vector.shape_cast %46 : vector<8xf32> to vector<8x1xf32>
    %cst_32 = arith.constant 0.166666672 : f32
    %48 = vector.broadcast %cst_32 : f32 to vector<8x1xf32>
    %49 = arith.mulf %47, %48 : vector<8x1xf32>
    %50 = vector.extract_strided_slice %40 {offsets = [0, 64], sizes = [8, 1], strides = [1, 1]} : vector<8x128xf32> to vector<8x1xf32>
    %51 = vector.broadcast %49 : vector<8x1xf32> to vector<8x128xf32>
    %52 = arith.subf %45, %51 : vector<8x128xf32>
    %53 = vector.broadcast %50 : vector<8x1xf32> to vector<8x128xf32>
    %54 = arith.addf %53, %52 : vector<8x128xf32>
    %cst_33 = arith.constant 0.000000e+00 : f32
    %55 = vector.broadcast %cst_33 : f32 to vector<8x128xf32>
    %56 = arith.select %43, %54, %55 : vector<8x128xi1>, vector<8x128xf32>
    %c0_34 = arith.constant 0 : index
    %c0_35 = arith.constant 0 : index
    %57 = vector.load %arg12[%c0_34, %c0_35] : memref<8x128xf32, #tpu.memory_space<vmem>>, vector<8x128xf32>
    tpu.vector_store %arg12[%c0_34, %c0_35], %56 {strides = array<i32>} : memref<8x128xf32, #tpu.memory_space<vmem>>, vector<8x128xf32>,
    return
  }
  func.func @transform_0(%arg0: i32) -> (i32, i32) {
    %c0_i32 = arith.constant 0 : i32
    %c0_i32_0 = arith.constant 0 : i32
    return %arg0, %c0_i32 : i32, i32
  }
  func.func @transform_1(%arg0: i32) -> (i32, i32) {
    %c0_i32 = arith.constant 0 : i32
    %c0_i32_0 = arith.constant 0 : i32
    %c0_i32_1 = arith.constant 0 : i32
    return %c0_i32, %c0_i32_0 : i32, i32
  }
  func.func @transform_2(%arg0: i32) -> (i32, i32) {
    %c0_i32 = arith.constant 0 : i32
    %c0_i32_0 = arith.constant 0 : i32
    %c0_i32_1 = arith.constant 0 : i32
    return %c0_i32, %c0_i32_0 : i32, i32
  }
  func.func @transform_3(%arg0: i32) -> (i32, i32) {
    %c0_i32 = arith.constant 0 : i32
    %c0_i32_0 = arith.constant 0 : i32
    %c0_i32_1 = arith.constant 0 : i32
    return %c0_i32, %c0_i32_0 : i32, i32
  }
  func.func @transform_4(%arg0: i32) -> (i32, i32) {
    %c0_i32 = arith.constant 0 : i32
    %c0_i32_0 = arith.constant 0 : i32
    %c0_i32_1 = arith.constant 0 : i32
    return %c0_i32, %c0_i32_0 : i32, i32
  }
  func.func @transform_5(%arg0: i32) -> (i32, i32) {
    %c0_i32 = arith.constant 0 : i32
    %c0_i32_0 = arith.constant 0 : i32
    %c0_i32_1 = arith.constant 0 : i32
    return %c0_i32, %c0_i32_0 : i32, i32
  }
  func.func @transform_6(%arg0: i32) -> (i32, i32) {
    %c0_i32 = arith.constant 0 : i32
    %c0_i32_0 = arith.constant 0 : i32
    %c0_i32_1 = arith.constant 0 : i32
    return %c0_i32, %c0_i32_0 : i32, i32
  }
  func.func @transform_7(%arg0: i32) -> (i32, i32) {
    %c0_i32 = arith.constant 0 : i32
    %c0_i32_0 = arith.constant 0 : i32
    %c0_i32_1 = arith.constant 0 : i32
    return %c0_i32, %c0_i32_0 : i32, i32
  }
  func.func @transform_8(%arg0: i32) -> (i32, i32) {
    %c0_i32 = arith.constant 0 : i32
    %c0_i32_0 = arith.constant 0 : i32
    %c0_i32_1 = arith.constant 0 : i32
    return %c0_i32, %c0_i32_0 : i32, i32
  }
  func.func @transform_9(%arg0: i32) -> (i32, i32) {
    %c0_i32 = arith.constant 0 : i32
    %c0_i32_0 = arith.constant 0 : i32
    %c0_i32_1 = arith.constant 0 : i32
    return %c0_i32, %c0_i32_0 : i32, i32
  }
  func.func @transform_10(%arg0: i32) -> (i32, i32) {
    %c0_i32 = arith.constant 0 : i32
    %c0_i32_0 = arith.constant 0 : i32
    %c0_i32_1 = arith.constant 0 : i32
    return %c0_i32, %c0_i32_0 : i32, i32
  }
  func.func @transform_11(%arg0: i32) -> (i32, i32) {
    %c0_i32 = arith.constant 0 : i32
    %c0_i32_0 = arith.constant 0 : i32
    return %arg0, %c0_i32 : i32, i32
  }
}

</mosaic_0001>

<bundles_post_ra>
// kernel: qnetwork_forward.1
= control target key start
LH: loop header
LB: loop body
LE: loop exit
PB: predicated region body
PF: predicated region fallthrough
CT: control target
= control target key end

     0   :  { %16 = vsyncpa [#allocation3], 0  ;;  %s15964_s0 = inlined_call_operand.vmem [shape: f32[8,4864], index: 0, kind: input, shape index: {}]   ;;  %s15965_s1 = inlined_call_operand.hbm [shape: bf16[4864,512], index: 1, kind: input, shape index: {}]   ;;  %s15966_s2 = inlined_call_operand.hbm [shape: f32[1,512], index: 2, kind: input, shape index: {}]   ;;  %s15967_s3 = inlined_call_operand.hbm [shape: bf16[512,256], index: 3, kind: input, shape index: {}]   ;;  %s15968_s4 = inlined_call_operand.hbm [shape: f32[1,256], index: 4, kind: input, shape index: {}]   ;;  %s15969_s5 = inlined_call_operand.hbm [shape: bf16[256,256], index: 5, kind: input, shape index: {}]   ;;  %s15970_s6 = inlined_call_operand.hbm [shape: f32[1,256], index: 6, kind: input, shape index: {}]   ;;  %s15971_s7 = inlined_call_operand.hbm [shape: bf16[256,1024], index: 7, kind: input, shape index: {}]   ;;  %s15972_s8 = inlined_call_operand.hbm [shape: f32[1,1024], index: 8, kind: input, shape index: {}]   ;;  %s15973_s9 = inlined_call_operand.hbm [shape: bf16[1024,128], index: 9, kind: input, shape index: {}]   ;;  %s15974_s10 = inlined_call_operand.hbm [shape: f32[1,128], index: 10, kind: input, shape index: {}]   ;;  %s15975_s11 = inlined_call_operand.vmem [shape: f32[8,128], index: 11, kind: output, shape index: {}]  }
   0x1   :  { %17 = vsyncpa [#allocation5], 0 }
   0x2   :  { %18 = vsyncpa [#allocation8], 0 }
   0x3   :  { %19 = vsyncpa [#allocation11], 0 }
   0x4   :  { %20 = vsyncpa [#allocation14], 0 }
   0x5   :  { %21 = vsyncpa [#allocation17], 0  ;;  %s15410_s17 = smov [#allocation4]   ;;  %s15411_s19 = smov [#allocation7]  }
   0x6   :  { %s42_s18 = sshll.u32 %s15410_s17, 4  ;;  %s64_s20 = sshll.u32 %s15411_s19, 4  ;;  %s43_s18 = int_to_ptr.vmem [resolvable:$true] %s42_s18  ;;  %s65_s20 = int_to_ptr.vmem [resolvable:$true] %s64_s20 }
   0x7   :  { %s15206_s21 = scalar_lea.vmem %s43_s18, 64  ;;  %p15211_p1 = scmp.lt.s32.totalorder %s43_s18, %s43_s18 }
   0x8   :  { %p15207_p0 = scmp.ne.s32.totalorder %s43_s18, %s15206_s21  ;;  %p15212_p2 = scmp.lt.s32.totalorder %s15206_s21, %s15206_s21 }
   0xa   :  { %p15213_p3 = por %p15212_p2, %p15211_p1 }
   0xc   :  { %p15214_p4 = pnand %p15213_p3, %p15207_p0 }
   0xe   :  { %15217 = shalt.err (!%p15214_p4)
}
   0xf   :  { %45 = dma.hbm_to_vmem [thread:$0]  %s15966_s2, 64, %s43_s18, [#allocation5]  }
  0x10   :  { %s15226_s24 = scalar_lea.vmem %s65_s20, 32  ;;  %p15231_p6 = scmp.lt.s32.totalorder %s65_s20, %s65_s20 }
  0x11   :  { %p15227_p5 = scmp.ne.s32.totalorder %s65_s20, %s15226_s24  ;;  %p15232_p7 = scmp.lt.s32.totalorder %s15226_s24, %s15226_s24 }
  0x13   :  { %p15233_p8 = por %p15232_p7, %p15231_p6 }
  0x15   :  { %p15234_p9 = pnand %p15233_p8, %p15227_p5 }
  0x17   :  { %15237 = shalt.err (!%p15234_p9)
}
  0x18   :  { %67 = dma.hbm_to_vmem [thread:$0]  %s15968_s4, 32, %s65_s20, [#allocation8]  }
  0x19   :  { %s15412_s27 = smov [#allocation10]   ;;  %s15413_s29 = smov [#allocation13]  }
  0x1a   :  { %s86_s28 = sshll.u32 %s15412_s27, 4  ;;  %s108_s30 = sshll.u32 %s15413_s29, 4  ;;  %s87_s28 = int_to_ptr.vmem [resolvable:$true] %s86_s28  ;;  %s109_s30 = int_to_ptr.vmem [resolvable:$true] %s108_s30 }
  0x1b   :  { %s15246_s12 = scalar_lea.vmem %s87_s28, 32  ;;  %p15251_p11 = scmp.lt.s32.totalorder %s87_s28, %s87_s28 }
  0x1c   :  { %p15247_p10 = scmp.ne.s32.totalorder %s87_s28, %s15246_s12  ;;  %p15252_p12 = scmp.lt.s32.totalorder %s15246_s12, %s15246_s12 }
  0x1e   :  { %p15253_p13 = por %p15252_p12, %p15251_p11 }
  0x20   :  { %p15254_p0 = pnand %p15253_p13, %p15247_p10 }
  0x22   :  { %15257 = shalt.err (!%p15254_p0)
}
  0x23   :  { %89 = dma.hbm_to_vmem [thread:$0]  %s15970_s6, 32, %s87_s28, [#allocation11]  }
  0x24   :  { %s15266_s14 = scalar_lea.vmem %s109_s30, 128  ;;  %p15271_p2 = scmp.lt.s32.totalorder %s109_s30, %s109_s30 }
  0x25   :  { %p15267_p1 = scmp.ne.s32.totalorder %s109_s30, %s15266_s14  ;;  %p15272_p3 = scmp.lt.s32.totalorder %s15266_s14, %s15266_s14 }
  0x27   :  { %p15273_p4 = por %p15272_p3, %p15271_p2 }
  0x29   :  { %p15274_p5 = pnand %p15273_p4, %p15267_p1 }
  0x2b   :  { %15277 = shalt.err (!%p15274_p5)
}
  0x2c   :  { %111 = dma.hbm_to_vmem [thread:$0]  %s15972_s8, 128, %s109_s30, [#allocation14]  }
  0x2d   :  { %s15414_s16 = smov [#allocation2]  }
  0x2e   :  { %s29_s17 = sshll.u32 %s15414_s16, 4  ;;  %s30_s17 = int_to_ptr.vmem [resolvable:$true] %s29_s17 }
  0x2f   :  { %s15286_s18 = scalar_lea.vmem %s30_s17, 155648  ;;  %p15291_p7 = scmp.lt.s32.totalorder %s30_s17, %s30_s17 }
  0x30   :  { %p15287_p6 = scmp.ne.s32.totalorder %s30_s17, %s15286_s18  ;;  %p15292_p8 = scmp.lt.s32.totalorder %s15286_s18, %s15286_s18 }
  0x32   :  { %p15293_p9 = por %p15292_p8, %p15291_p7 }
  0x34   :  { %p15294_p10 = pnand %p15293_p9, %p15287_p6 }
  0x36   :  { %15297 = shalt.err (!%p15294_p10)
}
  0x37   :  { %s15415_s6 = smov 256   ;;  %s15416_s19 = smov 16  }
  0x38   :  { %35 = dma.hbm_to_vmem [thread:$0]  %s15965_s1, 155648, %s30_s17, [#allocation3], %s15415_s6, %s15415_s6, %s15416_s19  }
  0x39   :  { %s15417_s22 = smov [#allocation6]  }
  0x3a   :  { %s51_s23 = sshll.u32 %s15417_s22, 4  ;;  %s52_s23 = int_to_ptr.vmem [resolvable:$true] %s51_s23 }
  0x3b   :  { %s15306_s8 = scalar_lea.vmem %s52_s23, 8192  ;;  %p15311_p12 = scmp.lt.s32.totalorder %s52_s23, %s52_s23 }
  0x3c   :  { %p15307_p11 = scmp.ne.s32.totalorder %s52_s23, %s15306_s8  ;;  %p15312_p13 = scmp.lt.s32.totalorder %s15306_s8, %s15306_s8 }
  0x3e   :  { %p15313_p0 = por %p15312_p13, %p15311_p12 }
  0x40   :  { %p15314_p1 = pnand %p15313_p0, %p15307_p11 }
  0x42   :  { %15317 = shalt.err (!%p15314_p1)
}
  0x43   :  { %s15418_s24 = smov 128   ;;  %s15419_s25 = smov 8  }
  0x44   :  { %57 = dma.hbm_to_vmem [thread:$0]  %s15967_s3, 8192, %s52_s23, [#allocation5], %s15418_s24, %s15418_s24, %s15419_s25  }
  0x45   :  { %s15420_s28 = smov [#allocation9]   ;;  %s15421_s30 = smov [#allocation12]  }
  0x46   :  { %s73_s29 = sshll.u32 %s15420_s28, 4  ;;  %s95_s1 = sshll.u32 %s15421_s30, 4  ;;  %s74_s29 = int_to_ptr.vmem [resolvable:$true] %s73_s29  ;;  %s96_s1 = int_to_ptr.vmem [resolvable:$true] %s95_s1 }
  0x47   :  { %s15326_s12 = scalar_lea.vmem %s74_s29, 4096  ;;  %p15331_p3 = scmp.lt.s32.totalorder %s74_s29, %s74_s29 }
  0x48   :  { %p15327_p2 = scmp.ne.s32.totalorder %s74_s29, %s15326_s12  ;;  %p15332_p4 = scmp.lt.s32.totalorder %s15326_s12, %s15326_s12 }
  0x4a   :  { %p15333_p5 = por %p15332_p4, %p15331_p3 }
  0x4c   :  { %p15334_p6 = pnand %p15333_p5, %p15327_p2 }
  0x4e   :  { %15337 = shalt.err (!%p15334_p6)
}
  0x4f   :  { %79 = dma.hbm_to_vmem [thread:$0]  %s15969_s5, 4096, %s74_s29, [#allocation8], %s15418_s24, %s15418_s24, %s15419_s25  }
  0x50   :  { %s15346_s14 = scalar_lea.vmem %s96_s1, 16384  ;;  %p15351_p8 = scmp.lt.s32.totalorder %s96_s1, %s96_s1 }
  0x51   :  { %p15347_p7 = scmp.ne.s32.totalorder %s96_s1, %s15346_s14  ;;  %p15352_p9 = scmp.lt.s32.totalorder %s15346_s14, %s15346_s14 }
  0x53   :  { %p15353_p10 = por %p15352_p9, %p15351_p8 }
  0x55   :  { %p15354_p11 = pnand %p15353_p10, %p15347_p7 }
  0x57   :  { %15357 = shalt.err (!%p15354_p11)
}
  0x58   :  { %s15422_s3 = smov 512   ;;  %s15423_s4 = smov 32  }
  0x59   :  { %101 = dma.hbm_to_vmem [thread:$0]  %s15971_s7, 16384, %s96_s1, [#allocation11], %s15422_s3, %s15422_s3, %s15423_s4  }
  0x5a   :  { %s15424_s17 = smov [#allocation15]  }
  0x5b   :  { %s117_s18 = sshll.u32 %s15424_s17, 4  ;;  %s118_s18 = int_to_ptr.vmem [resolvable:$true] %s117_s18 }
  0x5c   :  { %s15366_s6 = scalar_lea.vmem %s118_s18, 8192  ;;  %p15371_p13 = scmp.lt.s32.totalorder %s118_s18, %s118_s18 }
  0x5d   :  { %p15367_p12 = scmp.ne.s32.totalorder %s118_s18, %s15366_s6  ;;  %p15372_p0 = scmp.lt.s32.totalorder %s15366_s6, %s15366_s6 }
  0x5f   :  { %p15373_p1 = por %p15372_p0, %p15371_p13 }
  0x61   :  { %p15374_p2 = pnand %p15373_p1, %p15367_p12 }
  0x63   :  { %15377 = shalt.err (!%p15374_p2)
}
  0x64   :  { %s15425_s5 = smov 64   ;;  %s15426_s19 = smov 4  }
  0x65   :  { %123 = dma.hbm_to_vmem [thread:$0]  %s15973_s9, 8192, %s118_s18, [#allocation14], %s15425_s5, %s15425_s5, %s15426_s19  }
  0x66   :  { %s15427_s22 = smov [#allocation16]  }
  0x67   :  { %s130_s23 = sshll.u32 %s15427_s22, 4  ;;  %s131_s23 = int_to_ptr.vmem [resolvable:$true] %s130_s23 }
  0x68   :  { %s15386_s7 = scalar_lea.vmem %s131_s23, 16  ;;  %s15390_s8 = scalar_lea.vmem %s131_s23, 32 }
  0x69   :  { %p15387_p3 = scmp.ne.s32.totalorder %s131_s23, %s15386_s7  ;;  %p15391_p4 = scmp.lt.s32.totalorder %s131_s23, %s131_s23 }
  0x6a   :  { %p15392_p5 = scmp.lt.s32.totalorder %s15390_s8, %s15386_s7 }
  0x6c   :  { %p15393_p6 = por %p15392_p5, %p15391_p4 }
  0x6e   :  { %p15394_p7 = pnand %p15393_p6, %p15387_p3 }
  0x70   :  { %15397 = shalt.err (!%p15394_p7)
}
  0x71   :  { %133 = dma.hbm_to_vmem [thread:$0]  %s15974_s10, 16, %s131_s23, [#allocation17]  }
  0x72   :  { %15398 = dma.done.wait [#allocation3], 155648  }
  0x73   :  { %15399 = vsyncadd [#allocation3], 4294811648 }
  0x74   :  { %15400 = dma.done.wait [#allocation5], 8256  }
  0x75   :  { %15401 = vsyncadd [#allocation5], 4294959040 }
  0x76   :  { %15402 = dma.done.wait [#allocation8], 4128  }
  0x77   :  { %15403 = vsyncadd [#allocation8], 4294963168 }
  0x78   :  { %15404 = dma.done.wait [#allocation11], 16416  }
  0x79   :  { %15405 = vsyncadd [#allocation11], 4294950880 }
  0x7a   :  { %15406 = dma.done.wait [#allocation14], 8320  }
  0x7b   :  { %15407 = vsyncadd [#allocation14], 4294958976 }
  0x7c   :  { %15408 = dma.done.wait [#allocation17], 16  }
  0x7d   :  { %15409 = vsyncadd [#allocation17], 4294967280  ;;  %v13165_v0 = vld [vmem:[#allocation2 + $0xe4] ss:$16 sps:$4 sm:$0xff]   ;;  %v13169_v2 = vld [vmem:[#allocation2 + $0xe0] ss:$16 sps:$4 sm:$0xff]  }
  0x7e   :  { %v13167_v1 = vld [vmem:[#allocation2 + $0x2e4] ss:$16 sps:$4 sm:$0xff]   ;;  %7559 = vmatprep.subr.bf16.mxu0 %v13165_v0  ;;  %v13170_v3 = vld [vmem:[#allocation2 + $0x2e0] ss:$16 sps:$4 sm:$0xff]   ;;  %v166_v46 = vld [vmem:[%s15964_s0 + $0x8] sm:$0xff] }
  0x7f   :  { %7600 = vmatprep.subr.bf16.mxu1 %v13167_v1  ;;  %v13171_v4 = vld [vmem:[#allocation2 + $0xc4] ss:$16 sps:$4 sm:$0xff]   ;;  %7560 = vmatpush1.bf16.msra.mxu0 %v13169_v2  ;;  %v13175_v6 = vld [vmem:[#allocation2 + $0xc0] ss:$16 sps:$4 sm:$0xff]   ;;  %v15522_v49 = vpack.c.bf16 %v166_v46, %v166_v46  ;;  %v168_v50 = vld [vmem:[%s15964_s0 + $0x18] sm:$0xff] }
  0x80   :  { %7601 = vmatpush1.bf16.msra.mxu1 %v13170_v3  ;;  %v13173_v5 = vld [vmem:[#allocation2 + $0x2c4] ss:$16 sps:$4 sm:$0xff]   ;;  %7561 = vmatprep.subr.bf16.mxu0 %v13171_v4  ;;  %v13176_v7 = vld [vmem:[#allocation2 + $0x2c0] ss:$16 sps:$4 sm:$0xff]   ;;  %v15527_v52 = vpack.c.bf16 %v168_v50, %v168_v50 }
  0x81   :  { %7602 = vmatprep.subr.bf16.mxu1 %v13173_v5  ;;  %v13177_v8 = vld [vmem:[#allocation2 + $0xa4] ss:$16 sps:$4 sm:$0xff]   ;;  %v13181_v10 = vld [vmem:[#allocation2 + $0xa0] ss:$16 sps:$4 sm:$0xff]   ;;  %7591 = vmatprep.mubr.bf16.mxu0 %v15522_v49 }
  0x82   :  { %v13179_v9 = vld [vmem:[#allocation2 + $0x2a4] ss:$16 sps:$4 sm:$0xff]   ;;  %v13182_v11 = vld [vmem:[#allocation2 + $0x2a0] ss:$16 sps:$4 sm:$0xff]   ;;  %7632 = vmatprep.mubr.bf16.mxu1 %v15527_v52 }
  0x83   :  { %7562 = vmatpush1.bf16.msra.mxu0 %v13175_v6  ;;  %v13183_v12 = vld [vmem:[#allocation2 + $0x84] ss:$16 sps:$4 sm:$0xff]   ;;  %v13187_v14 = vld [vmem:[#allocation2 + $0x80] ss:$16 sps:$4 sm:$0xff]  }
  0x84   :  { %7603 = vmatpush1.bf16.msra.mxu1 %v13176_v7  ;;  %7563 = vmatprep.subr.bf16.mxu0 %v13177_v8  ;;  %v13185_v13 = vld [vmem:[#allocation2 + $0x284] ss:$16 sps:$4 sm:$0xff]   ;;  %v13188_v15 = vld [vmem:[#allocation2 + $0x280] ss:$16 sps:$4 sm:$0xff]  }
  0x85   :  { %7604 = vmatprep.subr.bf16.mxu1 %v13179_v9  ;;  %v13189_v16 = vld [vmem:[#allocation2 + $0x64] ss:$16 sps:$4 sm:$0xff]   ;;  %v13193_v18 = vld [vmem:[#allocation2 + $0x60] ss:$16 sps:$4 sm:$0xff]  }
  0x86   :  { %v13191_v17 = vld [vmem:[#allocation2 + $0x264] ss:$16 sps:$4 sm:$0xff]   ;;  %v13194_v19 = vld [vmem:[#allocation2 + $0x260] ss:$16 sps:$4 sm:$0xff]  }
  0x87   :  { %7564 = vmatpush1.bf16.msra.mxu0 %v13181_v10  ;;  %v13195_v20 = vld [vmem:[#allocation2 + $0x44] ss:$16 sps:$4 sm:$0xff]   ;;  %v13199_v22 = vld [vmem:[#allocation2 + $0x40] ss:$16 sps:$4 sm:$0xff]  }
  0x88   :  { %7605 = vmatpush1.bf16.msra.mxu1 %v13182_v11  ;;  %7565 = vmatprep.subr.bf16.mxu0 %v13183_v12  ;;  %v13197_v21 = vld [vmem:[#allocation2 + $0x244] ss:$16 sps:$4 sm:$0xff]   ;;  %v13200_v23 = vld [vmem:[#allocation2 + $0x240] ss:$16 sps:$4 sm:$0xff]  }
  0x89   :  { %7606 = vmatprep.subr.bf16.mxu1 %v13185_v13  ;;  %v13201_v24 = vld [vmem:[#allocation2 + $0x24] ss:$16 sps:$4 sm:$0xff]   ;;  %v13205_v26 = vld [vmem:[#allocation2 + $0x20] ss:$16 sps:$4 sm:$0xff]  }
  0x8a   :  { %v13203_v25 = vld [vmem:[#allocation2 + $0x224] ss:$16 sps:$4 sm:$0xff]   ;;  %v13206_v27 = vld [vmem:[#allocation2 + $0x220] ss:$16 sps:$4 sm:$0xff]  }
  0x8b   :  { %7566 = vmatpush1.bf16.msra.mxu0 %v13187_v14  ;;  %v13207_v28 = vld [vmem:[#allocation2 + $0x4] ss:$16 sps:$4 sm:$0xff]   ;;  %v13211_v30 = vld [vmem:[#allocation2] ss:$16 sps:$4 sm:$0xff]  }
  0x8c   :  { %7607 = vmatpush1.bf16.msra.mxu1 %v13188_v15  ;;  %7567 = vmatprep.subr.bf16.mxu0 %v13189_v16  ;;  %v13209_v29 = vld [vmem:[#allocation2 + $0x204] ss:$16 sps:$4 sm:$0xff]   ;;  %v13212_v31 = vld [vmem:[#allocation2 + $0x200] ss:$16 sps:$4 sm:$0xff]  }
  0x8d   :  { %7608 = vmatprep.subr.bf16.mxu1 %v13191_v17  ;;  %v13213_v32 = vld [vmem:[#allocation2 + $0x1e4] ss:$16 sps:$4 sm:$0xff]   ;;  %v13217_v34 = vld [vmem:[#allocation2 + $0x1e0] ss:$16 sps:$4 sm:$0xff]  }
  0x8e   :  { %v13215_v33 = vld [vmem:[#allocation2 + $0x3e4] ss:$16 sps:$4 sm:$0xff]   ;;  %v13218_v35 = vld [vmem:[#allocation2 + $0x3e0] ss:$16 sps:$4 sm:$0xff]  }
  0x8f   :  { %7568 = vmatpush1.bf16.msra.mxu0 %v13193_v18  ;;  %v13219_v36 = vld [vmem:[#allocation2 + $0x1c4] ss:$16 sps:$4 sm:$0xff]   ;;  %v13223_v38 = vld [vmem:[#allocation2 + $0x1c0] ss:$16 sps:$4 sm:$0xff]  }
  0x90   :  { %7609 = vmatpush1.bf16.msra.mxu1 %v13194_v19  ;;  %7569 = vmatprep.subr.bf16.mxu0 %v13195_v20  ;;  %v13221_v37 = vld [vmem:[#allocation2 + $0x3c4] ss:$16 sps:$4 sm:$0xff]   ;;  %v13224_v39 = vld [vmem:[#allocation2 + $0x3c0] ss:$16 sps:$4 sm:$0xff]  }
  0x91   :  { %7610 = vmatprep.subr.bf16.mxu1 %v13197_v21  ;;  %v13225_v40 = vld [vmem:[#allocation2 + $0x1a4] ss:$16 sps:$4 sm:$0xff]   ;;  %v13229_v42 = vld [vmem:[#allocation2 + $0x1a0] ss:$16 sps:$4 sm:$0xff]  }
  0x92   :  { %v13227_v41 = vld [vmem:[#allocation2 + $0x3a4] ss:$16 sps:$4 sm:$0xff]   ;;  %v13230_v43 = vld [vmem:[#allocation2 + $0x3a0] ss:$16 sps:$4 sm:$0xff]  }
  0x93   :  { %7570 = vmatpush1.bf16.msra.mxu0 %v13199_v22  ;;  %v13231_v44 = vld [vmem:[#allocation2 + $0x184] ss:$16 sps:$4 sm:$0xff]   ;;  %v13235_v47 = vld [vmem:[#allocation2 + $0x180] ss:$16 sps:$4 sm:$0xff]  }
  0x94   :  { %7611 = vmatpush1.bf16.msra.mxu1 %v13200_v23  ;;  %7571 = vmatprep.subr.bf16.mxu0 %v13201_v24  ;;  %v13233_v45 = vld [vmem:[#allocation2 + $0x384] ss:$16 sps:$4 sm:$0xff]   ;;  %v13236_v48 = vld [vmem:[#allocation2 + $0x380] ss:$16 sps:$4 sm:$0xff]  }
  0x95   :  { %7612 = vmatprep.subr.bf16.mxu1 %v13203_v25  ;;  %v13237_v51 = vld [vmem:[#allocation2 + $0x164] ss:$16 sps:$4 sm:$0xff]   ;;  %v13241_v54 = vld [vmem:[#allocation2 + $0x160] ss:$16 sps:$4 sm:$0xff]  }
  0x96   :  { %v13239_v53 = vld [vmem:[#allocation2 + $0x364] ss:$16 sps:$4 sm:$0xff]   ;;  %v13242_v55 = vld [vmem:[#allocation2 + $0x360] ss:$16 sps:$4 sm:$0xff]  }
  0x97   :  { %7572 = vmatpush1.bf16.msra.mxu0 %v13205_v26  ;;  %v13243_v56 = vld [vmem:[#allocation2 + $0x144] ss:$16 sps:$4 sm:$0xff]   ;;  %v13247_v58 = vld [vmem:[#allocation2 + $0x140] ss:$16 sps:$4 sm:$0xff]  }
  0x98   :  { %7613 = vmatpush1.bf16.msra.mxu1 %v13206_v27  ;;  %7573 = vmatprep.subr.bf16.mxu0 %v13207_v28  ;;  %v13245_v57 = vld [vmem:[#allocation2 + $0x344] ss:$16 sps:$4 sm:$0xff]   ;;  %v13248_v59 = vld [vmem:[#allocation2 + $0x340] ss:$16 sps:$4 sm:$0xff]  }
  0x99   :  { %7614 = vmatprep.subr.bf16.mxu1 %v13209_v29  ;;  %v13249_v60 = vld [vmem:[#allocation2 + $0x124] ss:$16 sps:$4 sm:$0xff]   ;;  %v13253_v62 = vld [vmem:[#allocation2 + $0x120] ss:$16 sps:$4 sm:$0xff]  }
  0x9a   :  { %v13251_v61 = vld [vmem:[#allocation2 + $0x324] ss:$16 sps:$4 sm:$0xff]   ;;  %v13254_v63 = vld [vmem:[#allocation2 + $0x320] ss:$16 sps:$4 sm:$0xff]  }
  0x9b   :  { %7574 = vmatpush1.bf16.msra.mxu0 %v13211_v30  ;;  %v13255_v0 = vld [vmem:[#allocation2 + $0x104] ss:$16 sps:$4 sm:$0xff]   ;;  %v13259_v2 = vld [vmem:[#allocation2 + $0x100] ss:$16 sps:$4 sm:$0xff]  }
  0x9c   :  { %7615 = vmatpush1.bf16.msra.mxu1 %v13212_v31  ;;  %7575 = vmatprep.subr.bf16.mxu0 %v13213_v32  ;;  %v13257_v1 = vld [vmem:[#allocation2 + $0x304] ss:$16 sps:$4 sm:$0xff]   ;;  %v13260_v3 = vld [vmem:[#allocation2 + $0x300] ss:$16 sps:$4 sm:$0xff]  }
  0x9d   :  { %7616 = vmatprep.subr.bf16.mxu1 %v13215_v33  ;;  %v165_v4 = vld [vmem:[%s15964_s0] sm:$0xff]  ;;  %v167_v5 = vld [vmem:[%s15964_s0 + $0x10] sm:$0xff] }
  0x9e   :  { %v13263_v6 = vld [vmem:[#allocation2 + $0x4e4] ss:$16 sps:$4 sm:$0xff]   ;;  %v15537_v8 = vpack.c.bf16 %v165_v4, %v165_v4  ;;  %v15539_v9 = vpack.c.bf16 %v167_v5, %v167_v5  ;;  %v13261_v10 = vld [vmem:[#allocation2 + $0x4e0] ss:$16 sps:$4 sm:$0xff]  }
  0x9f   :  { %7576 = vmatpush2.bf16.msra.mxu0 %v13217_v34  ;;  %v13266_v7 = vld [vmem:[#allocation2 + $0x6e4] ss:$16 sps:$4 sm:$0xff]   ;;  %v13264_v11 = vld [vmem:[#allocation2 + $0x6e0] ss:$16 sps:$4 sm:$0xff]   ;;  %v170_v34 = vld [vmem:[%s15964_s0 + $0x28] sm:$0xff] }
  0xa0   :  { %7617 = vmatpush2.bf16.msra.mxu1 %v13218_v35  ;;  %7577 = vmatprep.subr.bf16.mxu0 %v13219_v36  ;;  %v13269_v12 = vld [vmem:[#allocation2 + $0x4c4] ss:$16 sps:$4 sm:$0xff]   ;;  %v13267_v14 = vld [vmem:[#allocation2 + $0x4c0] ss:$16 sps:$4 sm:$0xff]  }
  0xa1   :  { %7618 = vmatprep.subr.bf16.mxu1 %v13221_v37  ;;  %v13272_v13 = vld [vmem:[#allocation2 + $0x6c4] ss:$16 sps:$4 sm:$0xff]   ;;  %v13270_v15 = vld [vmem:[#allocation2 + $0x6c0] ss:$16 sps:$4 sm:$0xff]   ;;  %v15546_v37 = vpack.c.bf16 %v170_v34, %v170_v34 }
  0xa2   :  { %v13275_v16 = vld [vmem:[#allocation2 + $0x4a4] ss:$16 sps:$4 sm:$0xff]   ;;  %v13273_v18 = vld [vmem:[#allocation2 + $0x4a0] ss:$16 sps:$4 sm:$0xff]  }
  0xa3   :  { %7578 = vmatpush2.bf16.msra.mxu0 %v13223_v38  ;;  %v13278_v17 = vld [vmem:[#allocation2 + $0x6a4] ss:$16 sps:$4 sm:$0xff]   ;;  %v13276_v19 = vld [vmem:[#allocation2 + $0x6a0] ss:$16 sps:$4 sm:$0xff]   ;;  %v172_v38 = vld [vmem:[%s15964_s0 + $0x38] sm:$0xff] }
  0xa4   :  { %7619 = vmatpush2.bf16.msra.mxu1 %v13224_v39  ;;  %7579 = vmatprep.subr.bf16.mxu0 %v13225_v40  ;;  %v13281_v20 = vld [vmem:[#allocation2 + $0x484] ss:$16 sps:$4 sm:$0xff]   ;;  %v13279_v22 = vld [vmem:[#allocation2 + $0x480] ss:$16 sps:$4 sm:$0xff]   ;;  %v15551_v40 = vpack.c.bf16 %v172_v38, %v172_v38 }
  0xa5   :  { %7620 = vmatprep.subr.bf16.mxu1 %v13227_v41  ;;  %v13284_v21 = vld [vmem:[#allocation2 + $0x684] ss:$16 sps:$4 sm:$0xff]   ;;  %v13282_v23 = vld [vmem:[#allocation2 + $0x680] ss:$16 sps:$4 sm:$0xff]  }
  0xa6   :  { %v13287_v24 = vld [vmem:[#allocation2 + $0x464] ss:$16 sps:$4 sm:$0xff]   ;;  %v13285_v26 = vld [vmem:[#allocation2 + $0x460] ss:$16 sps:$4 sm:$0xff]  }
  0xa7   :  { %7580 = vmatpush2.bf16.msra.mxu0 %v13229_v42  ;;  %v13290_v25 = vld [vmem:[#allocation2 + $0x664] ss:$16 sps:$4 sm:$0xff]   ;;  %v13288_v27 = vld [vmem:[#allocation2 + $0x660] ss:$16 sps:$4 sm:$0xff]  }
  0xa8   :  { %7621 = vmatpush2.bf16.msra.mxu1 %v13230_v43  ;;  %7581 = vmatprep.subr.bf16.mxu0 %v13231_v44  ;;  %v13293_v28 = vld [vmem:[#allocation2 + $0x444] ss:$16 sps:$4 sm:$0xff]   ;;  %v13291_v30 = vld [vmem:[#allocation2 + $0x440] ss:$16 sps:$4 sm:$0xff]  }
  0xa9   :  { %7622 = vmatprep.subr.bf16.mxu1 %v13233_v45  ;;  %v13296_v29 = vld [vmem:[#allocation2 + $0x644] ss:$16 sps:$4 sm:$0xff]   ;;  %v13294_v31 = vld [vmem:[#allocation2 + $0x640] ss:$16 sps:$4 sm:$0xff]  }
  0xaa   :  { %v13299_v32 = vld [vmem:[#allocation2 + $0x424] ss:$16 sps:$4 sm:$0xff]   ;;  %v13297_v35 = vld [vmem:[#allocation2 + $0x420] ss:$16 sps:$4 sm:$0xff]  }
  0xab   :  { %7582 = vmatpush2.bf16.msra.mxu0 %v13235_v47  ;;  %v13302_v33 = vld [vmem:[#allocation2 + $0x624] ss:$16 sps:$4 sm:$0xff]   ;;  %v13300_v36 = vld [vmem:[#allocation2 + $0x620] ss:$16 sps:$4 sm:$0xff]  }
  0xac   :  { %7623 = vmatpush2.bf16.msra.mxu1 %v13236_v48  ;;  %7583 = vmatprep.subr.bf16.mxu0 %v13237_v51  ;;  %v13305_v39 = vld [vmem:[#allocation2 + $0x404] ss:$16 sps:$4 sm:$0xff]   ;;  %v13303_v42 = vld [vmem:[#allocation2 + $0x400] ss:$16 sps:$4 sm:$0xff]  }
  0xad   :  { %7624 = vmatprep.subr.bf16.mxu1 %v13239_v53  ;;  %v13308_v41 = vld [vmem:[#allocation2 + $0x604] ss:$16 sps:$4 sm:$0xff]   ;;  %v13306_v43 = vld [vmem:[#allocation2 + $0x600] ss:$16 sps:$4 sm:$0xff]  }
  0xae   :  { %v13311_v44 = vld [vmem:[#allocation2 + $0x5e4] ss:$16 sps:$4 sm:$0xff]   ;;  %v13309_v46 = vld [vmem:[#allocation2 + $0x5e0] ss:$16 sps:$4 sm:$0xff]  }
  0xaf   :  { %7584 = vmatpush2.bf16.msra.mxu0 %v13241_v54  ;;  %v13314_v45 = vld [vmem:[#allocation2 + $0x7e4] ss:$16 sps:$4 sm:$0xff]   ;;  %v13312_v47 = vld [vmem:[#allocation2 + $0x7e0] ss:$16 sps:$4 sm:$0xff]  }
  0xb0   :  { %7625 = vmatpush2.bf16.msra.mxu1 %v13242_v55  ;;  %7585 = vmatprep.subr.bf16.mxu0 %v13243_v56  ;;  %v13317_v48 = vld [vmem:[#allocation2 + $0x5c4] ss:$16 sps:$4 sm:$0xff]   ;;  %v13315_v51 = vld [vmem:[#allocation2 + $0x5c0] ss:$16 sps:$4 sm:$0xff]  }
  0xb1   :  { %7626 = vmatprep.subr.bf16.mxu1 %v13245_v57  ;;  %v13320_v50 = vld [vmem:[#allocation2 + $0x7c4] ss:$16 sps:$4 sm:$0xff]   ;;  %v13318_v53 = vld [vmem:[#allocation2 + $0x7c0] ss:$16 sps:$4 sm:$0xff]  }
  0xb2   :  { %v13323_v54 = vld [vmem:[#allocation2 + $0x5a4] ss:$16 sps:$4 sm:$0xff]   ;;  %v13321_v56 = vld [vmem:[#allocation2 + $0x5a0] ss:$16 sps:$4 sm:$0xff]  }
  0xb3   :  { %7586 = vmatpush2.bf16.msra.mxu0 %v13247_v58  ;;  %v13326_v55 = vld [vmem:[#allocation2 + $0x7a4] ss:$16 sps:$4 sm:$0xff]   ;;  %v13324_v57 = vld [vmem:[#allocation2 + $0x7a0] ss:$16 sps:$4 sm:$0xff]  }
  0xb4   :  { %7627 = vmatpush2.bf16.msra.mxu1 %v13248_v59  ;;  %7587 = vmatprep.subr.bf16.mxu0 %v13249_v60  ;;  %v13329_v58 = vld [vmem:[#allocation2 + $0x584] ss:$16 sps:$4 sm:$0xff]   ;;  %v13327_v60 = vld [vmem:[#allocation2 + $0x580] ss:$16 sps:$4 sm:$0xff]  }
  0xb5   :  { %7628 = vmatprep.subr.bf16.mxu1 %v13251_v61  ;;  %v13332_v59 = vld [vmem:[#allocation2 + $0x784] ss:$16 sps:$4 sm:$0xff]   ;;  %v13330_v61 = vld [vmem:[#allocation2 + $0x780] ss:$16 sps:$4 sm:$0xff]  }
  0xb6   :  { %v13339_v4 = vld [vmem:[#allocation2 + $0x540] ss:$16 sps:$4 sm:$0xff]   ;;  %v13380_v38 = vld [vmem:[#allocation2 + $0xa84] ss:$16 sps:$4 sm:$0xff]  }
  0xb7   :  { %7588 = vmatpush2.bf16.msra.mxu0 %v13253_v62  ;;  %v13335_v62 = vld [vmem:[#allocation2 + $0x564] ss:$16 sps:$4 sm:$0xff]   ;;  %v13342_v5 = vld [vmem:[#allocation2 + $0x740] ss:$16 sps:$4 sm:$0xff]  }
  0xb8   :  { %7629 = vmatpush2.bf16.msra.mxu1 %v13254_v63  ;;  %7589 = vmatprep.subr.bf16.mxu0 %v13255_v0  ;;  %v13338_v63 = vld [vmem:[#allocation2 + $0x764] ss:$16 sps:$4 sm:$0xff]   ;;  %v13333_v0 = vld [vmem:[#allocation2 + $0x560] ss:$16 sps:$4 sm:$0xff]  }
  0xb9   :  { %7630 = vmatprep.subr.bf16.mxu1 %v13257_v1  ;;  %v13336_v1 = vld [vmem:[#allocation2 + $0x760] ss:$16 sps:$4 sm:$0xff]  }
  0xba   :  { %v13369_v34 = vld [vmem:[#allocation2 + $0x8a0] ss:$16 sps:$4 sm:$0xff]  }
  0xbb   :  { %7590 = vmatpush2.bf16.msra.mxu0 %v13259_v2  ;;  %v13341_v2 = vld [vmem:[#allocation2 + $0x544] ss:$16 sps:$4 sm:$0xff]  }
  0xbc   :  { %7631 = vmatpush2.bf16.msra.mxu1 %v13260_v3  ;;  %7641 = vmatprep.subr.bf16.mxu0 %v13263_v6  ;;  %v13344_v3 = vld [vmem:[#allocation2 + $0x744] ss:$16 sps:$4 sm:$0xff]  }
  0xbd   :  { %7682 = vmatprep.subr.bf16.mxu1 %v13266_v7  ;;  %v13347_v6 = vld [vmem:[#allocation2 + $0x524] ss:$16 sps:$4 sm:$0xff]  }
  0xbe   :  { %7592 = vmatmul.mubr.bf16.vlgmr.msra.gmra.mxu0 %v15537_v8  ;;  %v13350_v7 = vld [vmem:[#allocation2 + $0x724] ss:$16 sps:$4 sm:$0xff]  }
  0xbf   :  { %7633 = vmatmul.mubr.bf16.vlgmr.msra.gmra.mxu1 %v15539_v9  ;;  %7642 = vmatpush1.bf16.msra.mxu0 %v13261_v10  ;;  %v13345_v10 = vld [vmem:[#allocation2 + $0x520] ss:$16 sps:$4 sm:$0xff]  }
  0xc0   :  { %7683 = vmatpush1.bf16.msra.mxu1 %v13264_v11  ;;  %7643 = vmatprep.subr.bf16.mxu0 %v13269_v12  ;;  %v13348_v11 = vld [vmem:[#allocation2 + $0x720] ss:$16 sps:$4 sm:$0xff]   ;;  %v13353_v12 = vld [vmem:[#allocation2 + $0x504] ss:$16 sps:$4 sm:$0xff]  }
  0xc1   :  { %7684 = vmatprep.subr.bf16.mxu1 %v13272_v13  ;;  %7673 = vmatprep.mubr.bf16.mxu0 %v15546_v37  ;;  %v13356_v13 = vld [vmem:[#allocation2 + $0x704] ss:$16 sps:$4 sm:$0xff]  }
  0xc2   :  { %7714 = vmatprep.mubr.bf16.mxu1 %v15551_v40 }
  0xc3   :  { %7644 = vmatpush1.bf16.msra.mxu0 %v13267_v14  ;;  %v13351_v14 = vld [vmem:[#allocation2 + $0x500] ss:$16 sps:$4 sm:$0xff]  }
  0xc4   :  { %7685 = vmatpush1.bf16.msra.mxu1 %v13270_v15  ;;  %7645 = vmatprep.subr.bf16.mxu0 %v13275_v16  ;;  %v13354_v15 = vld [vmem:[#allocation2 + $0x700] ss:$16 sps:$4 sm:$0xff]  }
  0xc5   :  { %7686 = vmatprep.subr.bf16.mxu1 %v13278_v17  ;;  %v169_v16 = vld [vmem:[%s15964_s0 + $0x20] sm:$0xff]  ;;  %v171_v17 = vld [vmem:[%s15964_s0 + $0x30] sm:$0xff] }
  0xc7   :  { %7646 = vmatpush1.bf16.msra.mxu0 %v13273_v18  ;;  %v13359_v18 = vld [vmem:[#allocation2 + $0x8e4] ss:$16 sps:$4 sm:$0xff]  }
  0xc8   :  { %7687 = vmatpush1.bf16.msra.mxu1 %v13276_v19  ;;  %7647 = vmatprep.subr.bf16.mxu0 %v13281_v20  ;;  %v13362_v19 = vld [vmem:[#allocation2 + $0xae4] ss:$16 sps:$4 sm:$0xff]   ;;  %v15561_v20 = vpack.c.bf16 %v169_v16, %v169_v16  ;;  %v13429_v16 = vld [vmem:[#allocation2 + $0x960] ss:$16 sps:$4 sm:$0xff]  }
  0xc9   :  { %7688 = vmatprep.subr.bf16.mxu1 %v13284_v21  ;;  %v15563_v21 = vpack.c.bf16 %v171_v17, %v171_v17  ;;  %v13432_v17 = vld [vmem:[#allocation2 + $0xb60] ss:$16 sps:$4 sm:$0xff]  }
  0xcb   :  { %7648 = vmatpush1.bf16.msra.mxu0 %v13279_v22  ;;  %v13357_v22 = vld [vmem:[#allocation2 + $0x8e0] ss:$16 sps:$4 sm:$0xff]  }
  0xcc   :  { %7689 = vmatpush1.bf16.msra.mxu1 %v13282_v23  ;;  %7649 = vmatprep.subr.bf16.mxu0 %v13287_v24  ;;  %v13360_v23 = vld [vmem:[#allocation2 + $0xae0] ss:$16 sps:$4 sm:$0xff]   ;;  %v13365_v24 = vld [vmem:[#allocation2 + $0x8c4] ss:$16 sps:$4 sm:$0xff]  }
  0xcd   :  { %7690 = vmatprep.subr.bf16.mxu1 %v13290_v25  ;;  %v13368_v25 = vld [vmem:[#allocation2 + $0xac4] ss:$16 sps:$4 sm:$0xff]  }
  0xcf   :  { %7650 = vmatpush1.bf16.msra.mxu0 %v13285_v26  ;;  %v174_v26 = vld [vmem:[%s15964_s0 + $0x48] sm:$0xff] }
  0xd0   :  { %7691 = vmatpush1.bf16.msra.mxu1 %v13288_v27  ;;  %7651 = vmatprep.subr.bf16.mxu0 %v13293_v28  ;;  %v13363_v27 = vld [vmem:[#allocation2 + $0x8c0] ss:$16 sps:$4 sm:$0xff]  }
  0xd1   :  { %7692 = vmatprep.subr.bf16.mxu1 %v13296_v29  ;;  %v13366_v28 = vld [vmem:[#allocation2 + $0xac0] ss:$16 sps:$4 sm:$0xff]   ;;  %v15570_v29 = vpack.c.bf16 %v174_v26, %v174_v26 }
  0xd2   :  { %v13441_v26 = vld [vmem:[#allocation2 + $0x920] ss:$16 sps:$4 sm:$0xff]  }
  0xd3   :  { %7652 = vmatpush1.bf16.msra.mxu0 %v13291_v30  ;;  %v176_v30 = vld [vmem:[%s15964_s0 + $0x58] sm:$0xff] }
  0xd4   :  { %7693 = vmatpush1.bf16.msra.mxu1 %v13294_v31  ;;  %7653 = vmatprep.subr.bf16.mxu0 %v13299_v32  ;;  %v13371_v31 = vld [vmem:[#allocation2 + $0x8a4] ss:$16 sps:$4 sm:$0xff]   ;;  %v15575_v32 = vpack.c.bf16 %v176_v30, %v176_v30 }
  0xd5   :  { %7694 = vmatprep.subr.bf16.mxu1 %v13302_v33  ;;  %v13374_v33 = vld [vmem:[#allocation2 + $0xaa4] ss:$16 sps:$4 sm:$0xff]  }
  0xd6   :  { %v13452_v30 = vld [vmem:[#allocation2 + $0xb04] ss:$16 sps:$4 sm:$0xff]  }
  0xd7   :  { %7654 = vmatpush1.bf16.msra.mxu0 %v13297_v35  ;;  %v13372_v35 = vld [vmem:[#allocation2 + $0xaa0] ss:$16 sps:$4 sm:$0xff]  }
  0xd8   :  { %7695 = vmatpush1.bf16.msra.mxu1 %v13300_v36  ;;  %7655 = vmatprep.subr.bf16.mxu0 %v13305_v39  ;;  %v13377_v36 = vld [vmem:[#allocation2 + $0x884] ss:$16 sps:$4 sm:$0xff]   ;;  %v13375_v39 = vld [vmem:[#allocation2 + $0x880] ss:$16 sps:$4 sm:$0xff]  }
  0xd9   :  { %7696 = vmatprep.subr.bf16.mxu1 %v13308_v41  ;;  %v13378_v41 = vld [vmem:[#allocation2 + $0xa80] ss:$16 sps:$4 sm:$0xff]  }
  0xdb   :  { %7656 = vmatpush1.bf16.msra.mxu0 %v13303_v42  ;;  %v13383_v42 = vld [vmem:[#allocation2 + $0x864] ss:$16 sps:$4 sm:$0xff]  }
  0xdc   :  { %7697 = vmatpush1.bf16.msra.mxu1 %v13306_v43  ;;  %7657 = vmatprep.subr.bf16.mxu0 %v13311_v44  ;;  %v13386_v43 = vld [vmem:[#allocation2 + $0xa64] ss:$16 sps:$4 sm:$0xff]   ;;  %v13381_v44 = vld [vmem:[#allocation2 + $0x860] ss:$16 sps:$4 sm:$0xff]  }
  0xdd   :  { %7698 = vmatprep.subr.bf16.mxu1 %v13314_v45  ;;  %v13384_v45 = vld [vmem:[#allocation2 + $0xa60] ss:$16 sps:$4 sm:$0xff]  }
  0xdf   :  { %7658 = vmatpush2.bf16.msra.mxu0 %v13309_v46  ;;  %v13389_v46 = vld [vmem:[#allocation2 + $0x844] ss:$16 sps:$4 sm:$0xff]  }
  0xe0   :  { %7699 = vmatpush2.bf16.msra.mxu1 %v13312_v47  ;;  %7659 = vmatprep.subr.bf16.mxu0 %v13317_v48  ;;  %v13392_v47 = vld [vmem:[#allocation2 + $0xa44] ss:$16 sps:$4 sm:$0xff]   ;;  %v13387_v48 = vld [vmem:[#allocation2 + $0x840] ss:$16 sps:$4 sm:$0xff]  }
  0xe1   :  { %7700 = vmatprep.subr.bf16.mxu1 %v13320_v50  ;;  %v13390_v50 = vld [vmem:[#allocation2 + $0xa40] ss:$16 sps:$4 sm:$0xff]  }
  0xe3   :  { %7660 = vmatpush2.bf16.msra.mxu0 %v13315_v51  ;;  %v13395_v51 = vld [vmem:[#allocation2 + $0x824] ss:$16 sps:$4 sm:$0xff]  }
  0xe4   :  { %7701 = vmatpush2.bf16.msra.mxu1 %v13318_v53  ;;  %7661 = vmatprep.subr.bf16.mxu0 %v13323_v54  ;;  %v13398_v53 = vld [vmem:[#allocation2 + $0xa24] ss:$16 sps:$4 sm:$0xff]   ;;  %v13393_v54 = vld [vmem:[#allocation2 + $0x820] ss:$16 sps:$4 sm:$0xff]  }
  0xe5   :  { %7702 = vmatprep.subr.bf16.mxu1 %v13326_v55  ;;  %v13396_v55 = vld [vmem:[#allocation2 + $0xa20] ss:$16 sps:$4 sm:$0xff]  }
  0xe7   :  { %7662 = vmatpush2.bf16.msra.mxu0 %v13321_v56  ;;  %v13401_v56 = vld [vmem:[#allocation2 + $0x804] ss:$16 sps:$4 sm:$0xff]  }
  0xe8   :  { %7703 = vmatpush2.bf16.msra.mxu1 %v13324_v57  ;;  %7663 = vmatprep.subr.bf16.mxu0 %v13329_v58  ;;  %v13404_v57 = vld [vmem:[#allocation2 + $0xa04] ss:$16 sps:$4 sm:$0xff]   ;;  %v13399_v58 = vld [vmem:[#allocation2 + $0x800] ss:$16 sps:$4 sm:$0xff]  }
  0xe9   :  { %7704 = vmatprep.subr.bf16.mxu1 %v13332_v59  ;;  %v13402_v59 = vld [vmem:[#allocation2 + $0xa00] ss:$16 sps:$4 sm:$0xff]  }
  0xeb   :  { %7664 = vmatpush2.bf16.msra.mxu0 %v13327_v60  ;;  %v13407_v60 = vld [vmem:[#allocation2 + $0x9e4] ss:$16 sps:$4 sm:$0xff]  }
  0xec   :  { %7705 = vmatpush2.bf16.msra.mxu1 %v13330_v61  ;;  %7665 = vmatprep.subr.bf16.mxu0 %v13335_v62  ;;  %v13410_v61 = vld [vmem:[#allocation2 + $0xbe4] ss:$16 sps:$4 sm:$0xff]   ;;  %v13405_v62 = vld [vmem:[#allocation2 + $0x9e0] ss:$16 sps:$4 sm:$0xff]  }
  0xed   :  { %7706 = vmatprep.subr.bf16.mxu1 %v13338_v63  ;;  %v13408_v63 = vld [vmem:[#allocation2 + $0xbe0] ss:$16 sps:$4 sm:$0xff]  }
  0xef   :  { %7666 = vmatpush2.bf16.msra.mxu0 %v13333_v0  ;;  %v13413_v0 = vld [vmem:[#allocation2 + $0x9c4] ss:$16 sps:$4 sm:$0xff]  }
  0xf0   :  { %7707 = vmatpush2.bf16.msra.mxu1 %v13336_v1  ;;  %7667 = vmatprep.subr.bf16.mxu0 %v13341_v2  ;;  %v13416_v1 = vld [vmem:[#allocation2 + $0xbc4] ss:$16 sps:$4 sm:$0xff]   ;;  %v13411_v2 = vld [vmem:[#allocation2 + $0x9c0] ss:$16 sps:$4 sm:$0xff]  }
  0xf1   :  { %7708 = vmatprep.subr.bf16.mxu1 %v13344_v3  ;;  %v13414_v3 = vld [vmem:[#allocation2 + $0xbc0] ss:$16 sps:$4 sm:$0xff]  }
  0xf3   :  { %7668 = vmatpush2.bf16.msra.mxu0 %v13339_v4  ;;  %v13419_v4 = vld [vmem:[#allocation2 + $0x9a4] ss:$16 sps:$4 sm:$0xff]  }
  0xf4   :  { %7709 = vmatpush2.bf16.msra.mxu1 %v13342_v5  ;;  %7669 = vmatprep.subr.bf16.mxu0 %v13347_v6  ;;  %v13422_v5 = vld [vmem:[#allocation2 + $0xba4] ss:$16 sps:$4 sm:$0xff]   ;;  %v13417_v6 = vld [vmem:[#allocation2 + $0x9a0] ss:$16 sps:$4 sm:$0xff]  }
  0xf5   :  { %7710 = vmatprep.subr.bf16.mxu1 %v13350_v7  ;;  %v13420_v7 = vld [vmem:[#allocation2 + $0xba0] ss:$16 sps:$4 sm:$0xff]  }
  0xf7   :  { %7670 = vmatpush2.bf16.msra.mxu0 %v13345_v10  ;;  %v13425_v10 = vld [vmem:[#allocation2 + $0x984] ss:$16 sps:$4 sm:$0xff]  }
  0xf8   :  { %7711 = vmatpush2.bf16.msra.mxu1 %v13348_v11  ;;  %7671 = vmatprep.subr.bf16.mxu0 %v13353_v12  ;;  %v13428_v11 = vld [vmem:[#allocation2 + $0xb84] ss:$16 sps:$4 sm:$0xff]   ;;  %v13423_v12 = vld [vmem:[#allocation2 + $0x980] ss:$16 sps:$4 sm:$0xff]  }
  0xf9   :  { %7712 = vmatprep.subr.bf16.mxu1 %v13356_v13  ;;  %v13426_v13 = vld [vmem:[#allocation2 + $0xb80] ss:$16 sps:$4 sm:$0xff]  }
  0xfb   :  { %7672 = vmatpush2.bf16.msra.mxu0 %v13351_v14  ;;  %v13431_v14 = vld [vmem:[#allocation2 + $0x964] ss:$16 sps:$4 sm:$0xff]  }
  0xfc   :  { %7713 = vmatpush2.bf16.msra.mxu1 %v13354_v15  ;;  %7723 = vmatprep.subr.bf16.mxu0 %v13359_v18  ;;  %v13434_v15 = vld [vmem:[#allocation2 + $0xb64] ss:$16 sps:$4 sm:$0xff]  }
  0xfd   :  { %7764 = vmatprep.subr.bf16.mxu1 %v13362_v19  ;;  %v13437_v18 = vld [vmem:[#allocation2 + $0x944] ss:$16 sps:$4 sm:$0xff]  }
  0xfe   :  { %7674 = vmatmul.mubr.bf16.vlgmr.msra.gmra.mxu0 %v15561_v20  ;;  %v13440_v19 = vld [vmem:[#allocation2 + $0xb44] ss:$16 sps:$4 sm:$0xff]  }
  0xff   :  { %7715 = vmatmul.mubr.bf16.vlgmr.msra.gmra.mxu1 %v15563_v21  ;;  %7724 = vmatpush1.bf16.msra.mxu0 %v13357_v22  ;;  %v13435_v22 = vld [vmem:[#allocation2 + $0x940] ss:$16 sps:$4 sm:$0xff]  }
 0x100   :  { %7765 = vmatpush1.bf16.msra.mxu1 %v13360_v23  ;;  %7725 = vmatprep.subr.bf16.mxu0 %v13365_v24  ;;  %v13438_v23 = vld [vmem:[#allocation2 + $0xb40] ss:$16 sps:$4 sm:$0xff]   ;;  %v13443_v24 = vld [vmem:[#allocation2 + $0x924] ss:$16 sps:$4 sm:$0xff]  }
 0x101   :  { %7766 = vmatprep.subr.bf16.mxu1 %v13368_v25  ;;  %7755 = vmatprep.mubr.bf16.mxu0 %v15570_v29  ;;  %v13446_v25 = vld [vmem:[#allocation2 + $0xb24] ss:$16 sps:$4 sm:$0xff]  }
 0x102   :  { %7796 = vmatprep.mubr.bf16.mxu1 %v15575_v32 }
 0x103   :  { %7726 = vmatpush1.bf16.msra.mxu0 %v13363_v27  ;;  %v13444_v27 = vld [vmem:[#allocation2 + $0xb20] ss:$16 sps:$4 sm:$0xff]  }
 0x104   :  { %7767 = vmatpush1.bf16.msra.mxu1 %v13366_v28  ;;  %7727 = vmatprep.subr.bf16.mxu0 %v13371_v31  ;;  %v13449_v28 = vld [vmem:[#allocation2 + $0x904] ss:$16 sps:$4 sm:$0xff]   ;;  %v13447_v31 = vld [vmem:[#allocation2 + $0x900] ss:$16 sps:$4 sm:$0xff]  }
 0x105   :  { %7768 = vmatprep.subr.bf16.mxu1 %v13374_v33  ;;  %v13450_v33 = vld [vmem:[#allocation2 + $0xb00] ss:$16 sps:$4 sm:$0xff]  }
 0x107   :  { %7728 = vmatpush1.bf16.msra.mxu0 %v13369_v34  ;;  %v173_v34 = vld [vmem:[%s15964_s0 + $0x40] sm:$0xff] }
 0x108   :  { %7769 = vmatpush1.bf16.msra.mxu1 %v13372_v35  ;;  %7729 = vmatprep.subr.bf16.mxu0 %v13377_v36  ;;  %v175_v35 = vld [vmem:[%s15964_s0 + $0x50] sm:$0xff] }
 0x109   :  { %7770 = vmatprep.subr.bf16.mxu1 %v13380_v38  ;;  %v13455_v36 = vld [vmem:[#allocation2 + $0xce4] ss:$16 sps:$4 sm:$0xff]  }
 0x10a   :  { %v13458_v38 = vld [vmem:[#allocation2 + $0xee4] ss:$16 sps:$4 sm:$0xff]  }
 0x10b   :  { %7730 = vmatpush1.bf16.msra.mxu0 %v13375_v39  ;;  %v13453_v39 = vld [vmem:[#allocation2 + $0xce0] ss:$16 sps:$4 sm:$0xff]  }
 0x10c   :  { %7771 = vmatpush1.bf16.msra.mxu1 %v13378_v41  ;;  %7731 = vmatprep.subr.bf16.mxu0 %v13383_v42  ;;  %v178_v41 = vld [vmem:[%s15964_s0 + $0x68] sm:$0xff]  ;;  %v15588_v42 = vpack.c.bf16 %v173_v34, %v173_v34  ;;  %v13519_v34 = vld [vmem:[#allocation2 + $0xd80] ss:$16 sps:$4 sm:$0xff]  }
 0x10d   :  { %7772 = vmatprep.subr.bf16.mxu1 %v13386_v43  ;;  %v15590_v43 = vpack.c.bf16 %v175_v35, %v175_v35  ;;  %v13522_v35 = vld [vmem:[#allocation2 + $0xf80] ss:$16 sps:$4 sm:$0xff]  }
 0x10f   :  { %7732 = vmatpush1.bf16.msra.mxu0 %v13381_v44  ;;  %v180_v44 = vld [vmem:[%s15964_s0 + $0x78] sm:$0xff] }
 0x110   :  { %7773 = vmatpush1.bf16.msra.mxu1 %v13384_v45  ;;  %7733 = vmatprep.subr.bf16.mxu0 %v13389_v46  ;;  %v13456_v45 = vld [vmem:[#allocation2 + $0xee0] ss:$16 sps:$4 sm:$0xff]   ;;  %v13461_v46 = vld [vmem:[#allocation2 + $0xcc4] ss:$16 sps:$4 sm:$0xff]  }
 0x111   :  { %7774 = vmatprep.subr.bf16.mxu1 %v13392_v47  ;;  %v13464_v47 = vld [vmem:[#allocation2 + $0xec4] ss:$16 sps:$4 sm:$0xff]  }
 0x113   :  { %7734 = vmatpush1.bf16.msra.mxu0 %v13387_v48  ;;  %v15595_v48 = vpack.c.bf16 %v178_v41, %v178_v41  ;;  %v13528_v41 = vld [vmem:[#allocation2 + $0xf60] ss:$16 sps:$4 sm:$0xff]  }
 0x114   :  { %7775 = vmatpush1.bf16.msra.mxu1 %v13390_v50  ;;  %7735 = vmatprep.subr.bf16.mxu0 %v13395_v51  ;;  %v15597_v50 = vpack.c.bf16 %v180_v44, %v180_v44  ;;  %v13459_v51 = vld [vmem:[#allocation2 + $0xcc0] ss:$16 sps:$4 sm:$0xff]   ;;  %v13533_v44 = vld [vmem:[#allocation2 + $0xd44] ss:$16 sps:$4 sm:$0xff]  }
 0x115   :  { %7776 = vmatprep.subr.bf16.mxu1 %v13398_v53  ;;  %v13462_v53 = vld [vmem:[#allocation2 + $0xec0] ss:$16 sps:$4 sm:$0xff]  }
 0x117   :  { %7736 = vmatpush1.bf16.msra.mxu0 %v13393_v54  ;;  %v13467_v54 = vld [vmem:[#allocation2 + $0xca4] ss:$16 sps:$4 sm:$0xff]  }
 0x118   :  { %7777 = vmatpush1.bf16.msra.mxu1 %v13396_v55  ;;  %7737 = vmatprep.subr.bf16.mxu0 %v13401_v56  ;;  %v13470_v55 = vld [vmem:[#allocation2 + $0xea4] ss:$16 sps:$4 sm:$0xff]   ;;  %v13465_v56 = vld [vmem:[#allocation2 + $0xca0] ss:$16 sps:$4 sm:$0xff]  }
 0x119   :  { %7778 = vmatprep.subr.bf16.mxu1 %v13404_v57  ;;  %v13468_v57 = vld [vmem:[#allocation2 + $0xea0] ss:$16 sps:$4 sm:$0xff]  }
 0x11b   :  { %7738 = vmatpush1.bf16.msra.mxu0 %v13399_v58  ;;  %v13473_v58 = vld [vmem:[#allocation2 + $0xc84] ss:$16 sps:$4 sm:$0xff]  }
 0x11c   :  { %7779 = vmatpush1.bf16.msra.mxu1 %v13402_v59  ;;  %7739 = vmatprep.subr.bf16.mxu0 %v13407_v60  ;;  %v13476_v59 = vld [vmem:[#allocation2 + $0xe84] ss:$16 sps:$4 sm:$0xff]   ;;  %v13471_v60 = vld [vmem:[#allocation2 + $0xc80] ss:$16 sps:$4 sm:$0xff]  }
 0x11d   :  { %7780 = vmatprep.subr.bf16.mxu1 %v13410_v61  ;;  %v13474_v61 = vld [vmem:[#allocation2 + $0xe80] ss:$16 sps:$4 sm:$0xff]  }
 0x11f   :  { %7740 = vmatpush2.bf16.msra.mxu0 %v13405_v62  ;;  %v13479_v62 = vld [vmem:[#allocation2 + $0xc64] ss:$16 sps:$4 sm:$0xff]  }
 0x120   :  { %7781 = vmatpush2.bf16.msra.mxu1 %v13408_v63  ;;  %7741 = vmatprep.subr.bf16.mxu0 %v13413_v0  ;;  %v13482_v63 = vld [vmem:[#allocation2 + $0xe64] ss:$16 sps:$4 sm:$0xff]   ;;  %v13477_v0 = vld [vmem:[#allocation2 + $0xc60] ss:$16 sps:$4 sm:$0xff]  }
 0x121   :  { %7782 = vmatprep.subr.bf16.mxu1 %v13416_v1  ;;  %v13480_v1 = vld [vmem:[#allocation2 + $0xe60] ss:$16 sps:$4 sm:$0xff]  }
 0x123   :  { %7742 = vmatpush2.bf16.msra.mxu0 %v13411_v2  ;;  %v13485_v2 = vld [vmem:[#allocation2 + $0xc44] ss:$16 sps:$4 sm:$0xff]  }
 0x124   :  { %7783 = vmatpush2.bf16.msra.mxu1 %v13414_v3  ;;  %7743 = vmatprep.subr.bf16.mxu0 %v13419_v4  ;;  %v13488_v3 = vld [vmem:[#allocation2 + $0xe44] ss:$16 sps:$4 sm:$0xff]   ;;  %v13483_v4 = vld [vmem:[#allocation2 + $0xc40] ss:$16 sps:$4 sm:$0xff]  }
 0x125   :  { %7784 = vmatprep.subr.bf16.mxu1 %v13422_v5  ;;  %v13486_v5 = vld [vmem:[#allocation2 + $0xe40] ss:$16 sps:$4 sm:$0xff]  }
 0x127   :  { %7744 = vmatpush2.bf16.msra.mxu0 %v13417_v6  ;;  %v13491_v6 = vld [vmem:[#allocation2 + $0xc24] ss:$16 sps:$4 sm:$0xff]  }
 0x128   :  { %7785 = vmatpush2.bf16.msra.mxu1 %v13420_v7  ;;  %7745 = vmatprep.subr.bf16.mxu0 %v13425_v10  ;;  %v13494_v7 = vld [vmem:[#allocation2 + $0xe24] ss:$16 sps:$4 sm:$0xff]   ;;  %v13489_v10 = vld [vmem:[#allocation2 + $0xc20] ss:$16 sps:$4 sm:$0xff]  }
 0x129   :  { %7786 = vmatprep.subr.bf16.mxu1 %v13428_v11  ;;  %v13492_v11 = vld [vmem:[#allocation2 + $0xe20] ss:$16 sps:$4 sm:$0xff]  }
 0x12b   :  { %7746 = vmatpush2.bf16.msra.mxu0 %v13423_v12  ;;  %v13497_v12 = vld [vmem:[#allocation2 + $0xc04] ss:$16 sps:$4 sm:$0xff]  }
 0x12c   :  { %7787 = vmatpush2.bf16.msra.mxu1 %v13426_v13  ;;  %7747 = vmatprep.subr.bf16.mxu0 %v13431_v14  ;;  %v13500_v13 = vld [vmem:[#allocation2 + $0xe04] ss:$16 sps:$4 sm:$0xff]   ;;  %v13495_v14 = vld [vmem:[#allocation2 + $0xc00] ss:$16 sps:$4 sm:$0xff]  }
 0x12d   :  { %7788 = vmatprep.subr.bf16.mxu1 %v13434_v15  ;;  %v13498_v15 = vld [vmem:[#allocation2 + $0xe00] ss:$16 sps:$4 sm:$0xff]  }
 0x12f   :  { %7748 = vmatpush2.bf16.msra.mxu0 %v13429_v16  ;;  %v13503_v16 = vld [vmem:[#allocation2 + $0xde4] ss:$16 sps:$4 sm:$0xff]  }
 0x130   :  { %7789 = vmatpush2.bf16.msra.mxu1 %v13432_v17  ;;  %7749 = vmatprep.subr.bf16.mxu0 %v13437_v18  ;;  %v13506_v17 = vld [vmem:[#allocation2 + $0xfe4] ss:$16 sps:$4 sm:$0xff]   ;;  %v13501_v18 = vld [vmem:[#allocation2 + $0xde0] ss:$16 sps:$4 sm:$0xff]  }
 0x131   :  { %7790 = vmatprep.subr.bf16.mxu1 %v13440_v19  ;;  %v13504_v19 = vld [vmem:[#allocation2 + $0xfe0] ss:$16 sps:$4 sm:$0xff]  }
 0x133   :  { %7750 = vmatpush2.bf16.msra.mxu0 %v13435_v22  ;;  %v13509_v22 = vld [vmem:[#allocation2 + $0xdc4] ss:$16 sps:$4 sm:$0xff]  }
 0x134   :  { %7791 = vmatpush2.bf16.msra.mxu1 %v13438_v23  ;;  %7751 = vmatprep.subr.bf16.mxu0 %v13443_v24  ;;  %v13512_v23 = vld [vmem:[#allocation2 + $0xfc4] ss:$16 sps:$4 sm:$0xff]   ;;  %v13507_v24 = vld [vmem:[#allocation2 + $0xdc0] ss:$16 sps:$4 sm:$0xff]  }
 0x135   :  { %7792 = vmatprep.subr.bf16.mxu1 %v13446_v25  ;;  %v13510_v25 = vld [vmem:[#allocation2 + $0xfc0] ss:$16 sps:$4 sm:$0xff]  }
 0x137   :  { %7752 = vmatpush2.bf16.msra.mxu0 %v13441_v26  ;;  %v13515_v26 = vld [vmem:[#allocation2 + $0xda4] ss:$16 sps:$4 sm:$0xff]  }
 0x138   :  { %7793 = vmatpush2.bf16.msra.mxu1 %v13444_v27  ;;  %7753 = vmatprep.subr.bf16.mxu0 %v13449_v28  ;;  %v13518_v27 = vld [vmem:[#allocation2 + $0xfa4] ss:$16 sps:$4 sm:$0xff]   ;;  %v13513_v28 = vld [vmem:[#allocation2 + $0xda0] ss:$16 sps:$4 sm:$0xff]  }
 0x139   :  { %7794 = vmatprep.subr.bf16.mxu1 %v13452_v30  ;;  %v13516_v30 = vld [vmem:[#allocation2 + $0xfa0] ss:$16 sps:$4 sm:$0xff]  }
 0x13b   :  { %7754 = vmatpush2.bf16.msra.mxu0 %v13447_v31  ;;  %v13521_v31 = vld [vmem:[#allocation2 + $0xd84] ss:$16 sps:$4 sm:$0xff]  }
 0x13c   :  { %7795 = vmatpush2.bf16.msra.mxu1 %v13450_v33  ;;  %7805 = vmatprep.subr.bf16.mxu0 %v13455_v36  ;;  %v13524_v33 = vld [vmem:[#allocation2 + $0xf84] ss:$16 sps:$4 sm:$0xff]  }
 0x13d   :  { %7846 = vmatprep.subr.bf16.mxu1 %v13458_v38  ;;  %v13527_v36 = vld [vmem:[#allocation2 + $0xd64] ss:$16 sps:$4 sm:$0xff]  }
 0x13e   :  { %7756 = vmatmul.mubr.bf16.vlgmr.msra.gmra.mxu0 %v15588_v42  ;;  %v13530_v38 = vld [vmem:[#allocation2 + $0xf64] ss:$16 sps:$4 sm:$0xff]  }
 0x13f   :  { %7797 = vmatmul.mubr.bf16.vlgmr.msra.gmra.mxu1 %v15590_v43  ;;  %7806 = vmatpush1.bf16.msra.mxu0 %v13453_v39  ;;  %v13525_v39 = vld [vmem:[#allocation2 + $0xd60] ss:$16 sps:$4 sm:$0xff]  }
 0x140   :  { %7847 = vmatpush1.bf16.msra.mxu1 %v13456_v45  ;;  %7807 = vmatprep.subr.bf16.mxu0 %v13461_v46  ;;  %v13536_v45 = vld [vmem:[#allocation2 + $0xf44] ss:$16 sps:$4 sm:$0xff]   ;;  %v13531_v46 = vld [vmem:[#allocation2 + $0xd40] ss:$16 sps:$4 sm:$0xff]  }
 0x141   :  { %7848 = vmatprep.subr.bf16.mxu1 %v13464_v47  ;;  %7837 = vmatprep.mubr.bf16.mxu0 %v15595_v48  ;;  %v13534_v47 = vld [vmem:[#allocation2 + $0xf40] ss:$16 sps:$4 sm:$0xff]  }
 0x142   :  { %7878 = vmatprep.mubr.bf16.mxu1 %v15597_v50 }
 0x143   :  { %7808 = vmatpush1.bf16.msra.mxu0 %v13459_v51  ;;  %v1459_v51 = vlaneseq }
 0x144   :  { %7849 = vmatpush1.bf16.msra.mxu1 %v13462_v53  ;;  %7809 = vmatprep.subr.bf16.mxu0 %v13467_v54  ;;  %v13539_v53 = vld [vmem:[#allocation2 + $0xd24] ss:$16 sps:$4 sm:$0xff]  }
 0x145   :  { %7850 = vmatprep.subr.bf16.mxu1 %v13470_v55  ;;  %v13542_v54 = vld [vmem:[#allocation2 + $0xf24] ss:$16 sps:$4 sm:$0xff]   ;;  %v13537_v55 = vld [vmem:[#allocation2 + $0xd20] ss:$16 sps:$4 sm:$0xff]  }
 0x147   :  { %7810 = vmatpush1.bf16.msra.mxu0 %v13465_v56  ;;  %v13540_v56 = vld [vmem:[#allocation2 + $0xf20] ss:$16 sps:$4 sm:$0xff]  }
 0x148   :  { %7851 = vmatpush1.bf16.msra.mxu1 %v13468_v57  ;;  %7811 = vmatprep.subr.bf16.mxu0 %v13473_v58  ;;  %v15604_v57 = vshrl.u32 %v1459_v51, 7  ;;  %v13545_v58 = vld [vmem:[#allocation2 + $0xd04] ss:$16 sps:$4 sm:$0xff]  }
 0x149   :  { %7852 = vmatprep.subr.bf16.mxu1 %v13476_v59  ;;  %v13548_v59 = vld [vmem:[#allocation2 + $0xf04] ss:$16 sps:$4 sm:$0xff]  }
 0x14b   :  { %7812 = vmatpush1.bf16.msra.mxu0 %v13471_v60  ;;  %v13543_v60 = vld [vmem:[#allocation2 + $0xd00] ss:$16 sps:$4 sm:$0xff]  }
 0x14c   :  { %7853 = vmatpush1.bf16.msra.mxu1 %v13474_v61  ;;  %7813 = vmatprep.subr.bf16.mxu0 %v13479_v62  ;;  %v13546_v61 = vld [vmem:[#allocation2 + $0xf00] ss:$16 sps:$4 sm:$0xff]  }
 0x14d   :  { %7854 = vmatprep.subr.bf16.mxu1 %v13482_v63  ;;  %v1457_v62 = vld [vmem:[#allocation4] sm:$0xf] }
 0x14e   :  { %v177_v63 = vld [vmem:[%s15964_s0 + $0x60] sm:$0xff] }
 0x14f   :  { %7814 = vmatpush1.bf16.msra.mxu0 %v13477_v0  ;;  %v15610_v0 = vsub.s32 0, %v15604_v57 }
 0x150   :  { %7855 = vmatpush1.bf16.msra.mxu1 %v13480_v1  ;;  %7815 = vmatprep.subr.bf16.mxu0 %v13485_v2  ;;  %v179_v1 = vld [vmem:[%s15964_s0 + $0x70] sm:$0xff] }
 0x151   :  { %7856 = vmatprep.subr.bf16.mxu1 %v13488_v3  ;;  %v13551_v2 = vld [vmem:[#allocation2 + $0x10e4] ss:$16 sps:$4 sm:$0xff]  }
 0x152   :  { %v13554_v3 = vld [vmem:[#allocation2 + $0x12e4] ss:$16 sps:$4 sm:$0xff]  }
 0x153   :  { %7816 = vmatpush1.bf16.msra.mxu0 %v13483_v4  ;;  %v13549_v4 = vld [vmem:[#allocation2 + $0x10e0] ss:$16 sps:$4 sm:$0xff]  }
 0x154   :  { %7857 = vmatpush1.bf16.msra.mxu1 %v13486_v5  ;;  %7817 = vmatprep.subr.bf16.mxu0 %v13491_v6  ;;  %v15616_v5 = vsub.s32 1, %v15604_v57  ;;  %v182_v6 = vld [vmem:[%s15964_s0 + $0x88] sm:$0xff] }
 0x155   :  { %7858 = vmatprep.subr.bf16.mxu1 %v13494_v7  ;;  %v15621_v7 = vpack.c.bf16 %v177_v63, %v177_v63  ;;  %v13587_v63 = vld [vmem:[#allocation2 + $0x1024] ss:$16 sps:$4 sm:$0xff]  }
 0x157   :  { %7818 = vmatpush1.bf16.msra.mxu0 %v13489_v10  ;;  %v15623_v10 = vpack.c.bf16 %v179_v1, %v179_v1  ;;  %v13590_v1 = vld [vmem:[#allocation2 + $0x1224] ss:$16 sps:$4 sm:$0xff]  }
 0x158   :  { %7859 = vmatpush1.bf16.msra.mxu1 %v13492_v11  ;;  %7819 = vmatprep.subr.bf16.mxu0 %v13497_v12  ;;  %v184_v11 = vld [vmem:[%s15964_s0 + $0x98] sm:$0xff]  ;;  %v1462_v12 = vrot.slane %v1457_v62, %v15610_v0 }
 0x159   :  { %7860 = vmatprep.subr.bf16.mxu1 %v13500_v13  ;;  %v13552_v13 = vld [vmem:[#allocation2 + $0x12e0] ss:$16 sps:$4 sm:$0xff]  }
 0x15b   :  { %7820 = vmatpush1.bf16.msra.mxu0 %v13495_v14  ;;  %v13557_v14 = vld [vmem:[#allocation2 + $0x10c4] ss:$16 sps:$4 sm:$0xff]  }
 0x15c   :  { %7861 = vmatpush1.bf16.msra.mxu1 %v13498_v15  ;;  %7821 = vmatprep.subr.bf16.mxu0 %v13503_v16  ;;  %v13560_v15 = vld [vmem:[#allocation2 + $0x12c4] ss:$16 sps:$4 sm:$0xff]   ;;  %v1466_v16 = vrot.slane %v1457_v62, %v15616_v5  ;;  %v13582_v62 = vld [vmem:[#allocation2 + $0x1240] ss:$16 sps:$4 sm:$0xff]  }
 0x15d   :  { %7862 = vmatprep.subr.bf16.mxu1 %v13506_v17  ;;  %v15630_v17 = vpack.c.bf16 %v182_v6, %v182_v6  ;;  %v13596_v6 = vld [vmem:[#allocation2 + $0x1204] ss:$16 sps:$4 sm:$0xff]  }
 0x15f   :  { %7822 = vmatpush2.bf16.msra.mxu0 %v13501_v18  ;;  %v15632_v18 = vpack.c.bf16 %v184_v11, %v184_v11  ;;  %v13591_v11 = vld [vmem:[#allocation2 + $0x1000] ss:$16 sps:$4 sm:$0xff]  }
 0x160   :  { %7863 = vmatpush2.bf16.msra.mxu1 %v13504_v19  ;;  %7823 = vmatprep.subr.bf16.mxu0 %v13509_v22 }
 0x161   :  { %7864 = vmatprep.subr.bf16.mxu1 %v13512_v23  ;;  %v13555_v23 = vld [vmem:[#allocation2 + $0x10c0] ss:$16 sps:$4 sm:$0xff]  }
 0x163   :  { %7824 = vmatpush2.bf16.msra.mxu0 %v13507_v24 }
 0x164   :  { %7865 = vmatpush2.bf16.msra.mxu1 %v13510_v25  ;;  %7825 = vmatprep.subr.bf16.mxu0 %v13515_v26  ;;  %v13558_v25 = vld [vmem:[#allocation2 + $0x12c0] ss:$16 sps:$4 sm:$0xff]  }
 0x165   :  { %7866 = vmatprep.subr.bf16.mxu1 %v13518_v27 }
 0x167   :  { %7826 = vmatpush2.bf16.msra.mxu0 %v13513_v28  ;;  %v13563_v28 = vld [vmem:[#allocation2 + $0x10a4] ss:$16 sps:$4 sm:$0xff]  }
 0x168   :  { %7867 = vmatpush2.bf16.msra.mxu1 %v13516_v30  ;;  %7827 = vmatprep.subr.bf16.mxu0 %v13521_v31  ;;  %v13566_v30 = vld [vmem:[#allocation2 + $0x12a4] ss:$16 sps:$4 sm:$0xff]  }
 0x169   :  { %7868 = vmatprep.subr.bf16.mxu1 %v13524_v33 }
 0x16b   :  { %7828 = vmatpush2.bf16.msra.mxu0 %v13519_v34 }
 0x16c   :  { %7869 = vmatpush2.bf16.msra.mxu1 %v13522_v35  ;;  %7829 = vmatprep.subr.bf16.mxu0 %v13527_v36  ;;  %v13561_v36 = vld [vmem:[#allocation2 + $0x10a0] ss:$16 sps:$4 sm:$0xff]  }
 0x16d   :  { %7870 = vmatprep.subr.bf16.mxu1 %v13530_v38 }
 0x16f   :  { %7830 = vmatpush2.bf16.msra.mxu0 %v13525_v39  ;;  %v13564_v39 = vld [vmem:[#allocation2 + $0x12a0] ss:$16 sps:$4 sm:$0xff]  }
 0x170   :  { %7871 = vmatpush2.bf16.msra.mxu1 %v13528_v41  ;;  %7831 = vmatprep.subr.bf16.mxu0 %v13533_v44 }
 0x171   :  { %7872 = vmatprep.subr.bf16.mxu1 %v13536_v45  ;;  %v13569_v45 = vld [vmem:[#allocation2 + $0x1084] ss:$16 sps:$4 sm:$0xff]  }
 0x173   :  { %7832 = vmatpush2.bf16.msra.mxu0 %v13531_v46  ;;  %v13572_v46 = vld [vmem:[#allocation2 + $0x1284] ss:$16 sps:$4 sm:$0xff]  }
 0x174   :  { %7873 = vmatpush2.bf16.msra.mxu1 %v13534_v47  ;;  %7833 = vmatprep.subr.bf16.mxu0 %v13539_v53  ;;  %v13567_v47 = vld [vmem:[#allocation2 + $0x1080] ss:$16 sps:$4 sm:$0xff]  }
 0x175   :  { %7874 = vmatprep.subr.bf16.mxu1 %v13542_v54  ;;  %v13570_v53 = vld [vmem:[#allocation2 + $0x1280] ss:$16 sps:$4 sm:$0xff]   ;;  %v13575_v54 = vld [vmem:[#allocation2 + $0x1064] ss:$16 sps:$4 sm:$0xff]  }
 0x177   :  { %7834 = vmatpush2.bf16.msra.mxu0 %v13537_v55  ;;  %v13578_v55 = vld [vmem:[#allocation2 + $0x1264] ss:$16 sps:$4 sm:$0xff]  }
 0x178   :  { %7875 = vmatpush2.bf16.msra.mxu1 %v13540_v56  ;;  %7835 = vmatprep.subr.bf16.mxu0 %v13545_v58  ;;  %v13573_v56 = vld [vmem:[#allocation2 + $0x1060] ss:$16 sps:$4 sm:$0xff]  }
 0x179   :  { %7876 = vmatprep.subr.bf16.mxu1 %v13548_v59  ;;  %v13576_v58 = vld [vmem:[#allocation2 + $0x1260] ss:$16 sps:$4 sm:$0xff]   ;;  %v13581_v59 = vld [vmem:[#allocation2 + $0x1044] ss:$16 sps:$4 sm:$0xff]  }
 0x17b   :  { %7836 = vmatpush2.bf16.msra.mxu0 %v13543_v60  ;;  %v13584_v60 = vld [vmem:[#allocation2 + $0x1244] ss:$16 sps:$4 sm:$0xff]  }
 0x17c   :  { %7877 = vmatpush2.bf16.msra.mxu1 %v13546_v61  ;;  %7887 = vmatprep.subr.bf16.mxu0 %v13551_v2  ;;  %v13579_v61 = vld [vmem:[#allocation2 + $0x1040] ss:$16 sps:$4 sm:$0xff]  }
 0x17d   :  { %7928 = vmatprep.subr.bf16.mxu1 %v13554_v3  ;;  %v13585_v2 = vld [vmem:[#allocation2 + $0x1020] ss:$16 sps:$4 sm:$0xff]  }
 0x17e   :  { %v7593_v19 = vpop.f32.mrf.mxu0  ;;  %7838 = vmatmul.mubr.bf16.vlgmr.msra.gmra.mxu0 %v15621_v7  ;;  %v13588_v3 = vld [vmem:[#allocation2 + $0x1220] ss:$16 sps:$4 sm:$0xff]  }
 0x17f   :  { %v7634_v22 = vpop.f32.mrf.mxu1  ;;  %7879 = vmatmul.mubr.bf16.vlgmr.msra.gmra.mxu1 %v15623_v10  ;;  %v7594_v24 = vadd.f32 %v7593_v19, %v1462_v12  ;;  %7888 = vmatpush1.bf16.msra.mxu0 %v13549_v4  ;;  %v13593_v4 = vld [vmem:[#allocation2 + $0x1004] ss:$16 sps:$4 sm:$0xff]   ;;  %v13594_v12 = vld [vmem:[#allocation2 + $0x1200] ss:$16 sps:$4 sm:$0xff]  }
 0x180   :  { %7929 = vmatpush1.bf16.msra.mxu1 %v13552_v13  ;;  %v7595_v26 = vpop.f32.mrf.mxu0  ;;  %7889 = vmatprep.subr.bf16.mxu0 %v13557_v14  ;;  %v13599_v13 = vld [vmem:[#allocation2 + $0x11e4] ss:$16 sps:$4 sm:$0xff]  }
 0x181   :  { %v7636_v27 = vpop.f32.mrf.mxu1  ;;  %7930 = vmatprep.subr.bf16.mxu1 %v13560_v15  ;;  %v15636_v31 = vadd.f32 %v7634_v22, %v7594_v24  ;;  %v7596_v33 = vadd.f32 %v7595_v26, %v1466_v16  ;;  %7919 = vmatprep.mubr.bf16.mxu0 %v15630_v17  ;;  %v13602_v14 = vld [vmem:[#allocation2 + $0x13e4] ss:$16 sps:$4 sm:$0xff]   ;;  %v13597_v15 = vld [vmem:[#allocation2 + $0x11e0] ss:$16 sps:$4 sm:$0xff]  }
 0x182   :  { %7960 = vmatprep.mubr.bf16.mxu1 %v15632_v18  ;;  %v7597_v34 = vpop.f32.mrf.mxu0  ;;  %v13600_v16 = vld [vmem:[#allocation2 + $0x13e0] ss:$16 sps:$4 sm:$0xff]   ;;  %v13605_v19 = vld [vmem:[#allocation2 + $0x11c4] ss:$16 sps:$4 sm:$0xff]  }
 0x183   :  { %v7638_v35 = vpop.f32.mrf.mxu1  ;;  %v15640_v38 = vadd.f32 %v7636_v27, %v7596_v33  ;;  %7890 = vmatpush1.bf16.msra.mxu0 %v13555_v23  ;;  %v13608_v22 = vld [vmem:[#allocation2 + $0x13c4] ss:$16 sps:$4 sm:$0xff]   ;;  %v13603_v23 = vld [vmem:[#allocation2 + $0x11c0] ss:$16 sps:$4 sm:$0xff]  }
 0x184   :  { %7931 = vmatpush1.bf16.msra.mxu1 %v13558_v25  ;;  %v7598_v41 = vpop.f32.mrf.mxu0  ;;  %7891 = vmatprep.subr.bf16.mxu0 %v13563_v28  ;;  %v13606_v24 = vld [vmem:[#allocation2 + $0x13c0] ss:$16 sps:$4 sm:$0xff]   ;;  %v13611_v25 = vld [vmem:[#allocation2 + $0x11a4] ss:$16 sps:$4 sm:$0xff]  }
 0x185   :  { %v7639_v44 = vpop.f32.mrf.mxu1  ;;  %7932 = vmatprep.subr.bf16.mxu1 %v13566_v30  ;;  %v13614_v26 = vld [vmem:[#allocation2 + $0x13a4] ss:$16 sps:$4 sm:$0xff]   ;;  %v13609_v27 = vld [vmem:[#allocation2 + $0x11a0] ss:$16 sps:$4 sm:$0xff]  }
 0x186   :  { %v13612_v28 = vld [vmem:[#allocation2 + $0x13a0] ss:$16 sps:$4 sm:$0xff]   ;;  %v13617_v30 = vld [vmem:[#allocation2 + $0x1184] ss:$16 sps:$4 sm:$0xff]  }
 0x187   :  { %7892 = vmatpush1.bf16.msra.mxu0 %v13561_v36  ;;  %v13620_v33 = vld [vmem:[#allocation2 + $0x1384] ss:$16 sps:$4 sm:$0xff]   ;;  %v13615_v34 = vld [vmem:[#allocation2 + $0x1180] ss:$16 sps:$4 sm:$0xff]  }
 0x188   :  { %7933 = vmatpush1.bf16.msra.mxu1 %v13564_v39  ;;  %7893 = vmatprep.subr.bf16.mxu0 %v13569_v45  ;;  %v13618_v35 = vld [vmem:[#allocation2 + $0x1380] ss:$16 sps:$4 sm:$0xff]   ;;  %v13623_v36 = vld [vmem:[#allocation2 + $0x1164] ss:$16 sps:$4 sm:$0xff]  }
 0x189   :  { %7934 = vmatprep.subr.bf16.mxu1 %v13572_v46  ;;  %v13626_v39 = vld [vmem:[#allocation2 + $0x1364] ss:$16 sps:$4 sm:$0xff]   ;;  %v13621_v41 = vld [vmem:[#allocation2 + $0x1160] ss:$16 sps:$4 sm:$0xff]  }
 0x18a   :  { %v13624_v44 = vld [vmem:[#allocation2 + $0x1360] ss:$16 sps:$4 sm:$0xff]   ;;  %v13629_v45 = vld [vmem:[#allocation2 + $0x1144] ss:$16 sps:$4 sm:$0xff]  }
 0x18b   :  { %7894 = vmatpush1.bf16.msra.mxu0 %v13567_v47  ;;  %v13632_v46 = vld [vmem:[#allocation2 + $0x1344] ss:$16 sps:$4 sm:$0xff]   ;;  %v13627_v47 = vld [vmem:[#allocation2 + $0x1140] ss:$16 sps:$4 sm:$0xff]  }
 0x18c   :  { %7935 = vmatpush1.bf16.msra.mxu1 %v13570_v53  ;;  %7895 = vmatprep.subr.bf16.mxu0 %v13575_v54  ;;  %v13630_v53 = vld [vmem:[#allocation2 + $0x1340] ss:$16 sps:$4 sm:$0xff]   ;;  %v13635_v54 = vld [vmem:[#allocation2 + $0x1124] ss:$16 sps:$4 sm:$0xff]  }
 0x18d   :  { %7936 = vmatprep.subr.bf16.mxu1 %v13578_v55  ;;  %v13638_v55 = vld [vmem:[#allocation2 + $0x1324] ss:$16 sps:$4 sm:$0xff]  }
 0x18f   :  { %7896 = vmatpush1.bf16.msra.mxu0 %v13573_v56  ;;  %v13633_v56 = vld [vmem:[#allocation2 + $0x1120] ss:$16 sps:$4 sm:$0xff]  }
 0x190   :  { %7937 = vmatpush1.bf16.msra.mxu1 %v13576_v58  ;;  %7897 = vmatprep.subr.bf16.mxu0 %v13581_v59  ;;  %v13636_v58 = vld [vmem:[#allocation2 + $0x1320] ss:$16 sps:$4 sm:$0xff]   ;;  %v13641_v59 = vld [vmem:[#allocation2 + $0x1104] ss:$16 sps:$4 sm:$0xff]  }
 0x191   :  { %7938 = vmatprep.subr.bf16.mxu1 %v13584_v60  ;;  %v13644_v60 = vld [vmem:[#allocation2 + $0x1304] ss:$16 sps:$4 sm:$0xff]  }
 0x193   :  { %7898 = vmatpush1.bf16.msra.mxu0 %v13579_v61  ;;  %v13639_v61 = vld [vmem:[#allocation2 + $0x1100] ss:$16 sps:$4 sm:$0xff]  }
 0x194   :  { %7939 = vmatpush1.bf16.msra.mxu1 %v13582_v62  ;;  %7899 = vmatprep.subr.bf16.mxu0 %v13587_v63  ;;  %v13642_v62 = vld [vmem:[#allocation2 + $0x1300] ss:$16 sps:$4 sm:$0xff]  }
 0x195   :  { %7940 = vmatprep.subr.bf16.mxu1 %v13590_v1  ;;  %v181_v63 = vld [vmem:[%s15964_s0 + $0x80] sm:$0xff]  ;;  %v183_v1 = vld [vmem:[%s15964_s0 + $0x90] sm:$0xff] }
 0x197   :  { %7900 = vmatpush1.bf16.msra.mxu0 %v13585_v2  ;;  %v13647_v2 = vld [vmem:[#allocation2 + $0x14e4] ss:$16 sps:$4 sm:$0xff]  }
 0x198   :  { %7941 = vmatpush1.bf16.msra.mxu1 %v13588_v3  ;;  %7901 = vmatprep.subr.bf16.mxu0 %v13593_v4  ;;  %v13650_v3 = vld [vmem:[#allocation2 + $0x16e4] ss:$16 sps:$4 sm:$0xff]   ;;  %v15648_v4 = vpack.c.bf16 %v181_v63, %v181_v63  ;;  %v13675_v63 = vld [vmem:[#allocation2 + $0x1440] ss:$16 sps:$4 sm:$0xff]  }
 0x199   :  { %7942 = vmatprep.subr.bf16.mxu1 %v13596_v6  ;;  %v15650_v6 = vpack.c.bf16 %v183_v1, %v183_v1  ;;  %v13678_v1 = vld [vmem:[#allocation2 + $0x1640] ss:$16 sps:$4 sm:$0xff]  }
 0x19b   :  { %7902 = vmatpush1.bf16.msra.mxu0 %v13591_v11  ;;  %v186_v11 = vld [vmem:[%s15964_s0 + $0xa8] sm:$0xff] }
 0x19c   :  { %7943 = vmatpush1.bf16.msra.mxu1 %v13594_v12  ;;  %7903 = vmatprep.subr.bf16.mxu0 %v13599_v13  ;;  %v188_v12 = vld [vmem:[%s15964_s0 + $0xb8] sm:$0xff]  ;;  %v13645_v13 = vld [vmem:[#allocation2 + $0x14e0] ss:$16 sps:$4 sm:$0xff]  }
 0x19d   :  { %7944 = vmatprep.subr.bf16.mxu1 %v13602_v14  ;;  %v13648_v14 = vld [vmem:[#allocation2 + $0x16e0] ss:$16 sps:$4 sm:$0xff]  }
 0x19f   :  { %7904 = vmatpush2.bf16.msra.mxu0 %v13597_v15  ;;  %v13653_v15 = vld [vmem:[#allocation2 + $0x14c4] ss:$16 sps:$4 sm:$0xff]  }
 0x1a0   :  { %7945 = vmatpush2.bf16.msra.mxu1 %v13600_v16  ;;  %7905 = vmatprep.subr.bf16.mxu0 %v13605_v19  ;;  %v13656_v16 = vld [vmem:[#allocation2 + $0x16c4] ss:$16 sps:$4 sm:$0xff]   ;;  %v13651_v19 = vld [vmem:[#allocation2 + $0x14c0] ss:$16 sps:$4 sm:$0xff]  }
 0x1a1   :  { %7946 = vmatprep.subr.bf16.mxu1 %v13608_v22  ;;  %v13654_v22 = vld [vmem:[#allocation2 + $0x16c0] ss:$16 sps:$4 sm:$0xff]  }
 0x1a3   :  { %7906 = vmatpush2.bf16.msra.mxu0 %v13603_v23  ;;  %v15658_v23 = vpack.c.bf16 %v186_v11, %v186_v11  ;;  %v13681_v11 = vld [vmem:[#allocation2 + $0x1420] ss:$16 sps:$4 sm:$0xff]  }
 0x1a4   :  { %7947 = vmatpush2.bf16.msra.mxu1 %v13606_v24  ;;  %7907 = vmatprep.subr.bf16.mxu0 %v13611_v25  ;;  %v15660_v24 = vpack.c.bf16 %v188_v12, %v188_v12  ;;  %v13684_v12 = vld [vmem:[#allocation2 + $0x1620] ss:$16 sps:$4 sm:$0xff]  }
 0x1a5   :  { %7948 = vmatprep.subr.bf16.mxu1 %v13614_v26 }
 0x1a7   :  { %7908 = vmatpush2.bf16.msra.mxu0 %v13609_v27 }
 0x1a8   :  { %7949 = vmatpush2.bf16.msra.mxu1 %v13612_v28  ;;  %7909 = vmatprep.subr.bf16.mxu0 %v13617_v30 }
 0x1a9   :  { %7950 = vmatprep.subr.bf16.mxu1 %v13620_v33  ;;  %v13659_v33 = vld [vmem:[#allocation2 + $0x14a4] ss:$16 sps:$4 sm:$0xff]  }
 0x1ab   :  { %7910 = vmatpush2.bf16.msra.mxu0 %v13615_v34  ;;  %v13662_v34 = vld [vmem:[#allocation2 + $0x16a4] ss:$16 sps:$4 sm:$0xff]  }
 0x1ac   :  { %7951 = vmatpush2.bf16.msra.mxu1 %v13618_v35  ;;  %7911 = vmatprep.subr.bf16.mxu0 %v13623_v36 }
 0x1ad   :  { %7952 = vmatprep.subr.bf16.mxu1 %v13626_v39  ;;  %v13657_v39 = vld [vmem:[#allocation2 + $0x14a0] ss:$16 sps:$4 sm:$0xff]  }
 0x1af   :  { %7912 = vmatpush2.bf16.msra.mxu0 %v13621_v41  ;;  %v13660_v41 = vld [vmem:[#allocation2 + $0x16a0] ss:$16 sps:$4 sm:$0xff]  }
 0x1b0   :  { %7953 = vmatpush2.bf16.msra.mxu1 %v13624_v44  ;;  %7913 = vmatprep.subr.bf16.mxu0 %v13629_v45 }
 0x1b1   :  { %7954 = vmatprep.subr.bf16.mxu1 %v13632_v46 }
 0x1b3   :  { %7914 = vmatpush2.bf16.msra.mxu0 %v13627_v47 }
 0x1b4   :  { %7955 = vmatpush2.bf16.msra.mxu1 %v13630_v53  ;;  %7915 = vmatprep.subr.bf16.mxu0 %v13635_v54  ;;  %v13665_v53 = vld [vmem:[#allocation2 + $0x1484] ss:$16 sps:$4 sm:$0xff]  }
 0x1b5   :  { %7956 = vmatprep.subr.bf16.mxu1 %v13638_v55  ;;  %v13668_v54 = vld [vmem:[#allocation2 + $0x1684] ss:$16 sps:$4 sm:$0xff]   ;;  %v13666_v55 = vld [vmem:[#allocation2 + $0x1680] ss:$16 sps:$4 sm:$0xff]  }
 0x1b7   :  { %7916 = vmatpush2.bf16.msra.mxu0 %v13633_v56  ;;  %v13671_v56 = vld [vmem:[#allocation2 + $0x1464] ss:$16 sps:$4 sm:$0xff]  }
 0x1b8   :  { %7957 = vmatpush2.bf16.msra.mxu1 %v13636_v58  ;;  %7917 = vmatprep.subr.bf16.mxu0 %v13641_v59  ;;  %v13674_v58 = vld [vmem:[#allocation2 + $0x1664] ss:$16 sps:$4 sm:$0xff]   ;;  %v13669_v59 = vld [vmem:[#allocation2 + $0x1460] ss:$16 sps:$4 sm:$0xff]  }
 0x1b9   :  { %7958 = vmatprep.subr.bf16.mxu1 %v13644_v60  ;;  %v13672_v60 = vld [vmem:[#allocation2 + $0x1660] ss:$16 sps:$4 sm:$0xff]  }
 0x1bb   :  { %7918 = vmatpush2.bf16.msra.mxu0 %v13639_v61  ;;  %v13677_v61 = vld [vmem:[#allocation2 + $0x1444] ss:$16 sps:$4 sm:$0xff]  }
 0x1bc   :  { %7959 = vmatpush2.bf16.msra.mxu1 %v13642_v62  ;;  %7969 = vmatprep.subr.bf16.mxu0 %v13647_v2  ;;  %v13680_v62 = vld [vmem:[#allocation2 + $0x1644] ss:$16 sps:$4 sm:$0xff]  }
 0x1bd   :  { %8010 = vmatprep.subr.bf16.mxu1 %v13650_v3  ;;  %v13683_v2 = vld [vmem:[#allocation2 + $0x1424] ss:$16 sps:$4 sm:$0xff]  }
 0x1be   :  { %v7675_v25 = vpop.f32.mrf.mxu0  ;;  %7920 = vmatmul.mubr.bf16.vlgmr.msra.gmra.mxu0 %v15648_v4  ;;  %v13686_v3 = vld [vmem:[#allocation2 + $0x1624] ss:$16 sps:$4 sm:$0xff]  }
 0x1bf   :  { %v7716_v26 = vpop.f32.mrf.mxu1  ;;  %7961 = vmatmul.mubr.bf16.vlgmr.msra.gmra.mxu1 %v15650_v6  ;;  %v7676_v27 = vadd.f32 %v7675_v25, %v15636_v31  ;;  %7970 = vmatpush1.bf16.msra.mxu0 %v13645_v13  ;;  %v13689_v13 = vld [vmem:[#allocation2 + $0x1404] ss:$16 sps:$4 sm:$0xff]   ;;  %v13693_v25 = vld [vmem:[#allocation2 + $0x15e0] ss:$16 sps:$4 sm:$0xff]  }
 0x1c0   :  { %8011 = vmatpush1.bf16.msra.mxu1 %v13648_v14  ;;  %v7677_v28 = vpop.f32.mrf.mxu0  ;;  %7971 = vmatprep.subr.bf16.mxu0 %v13653_v15  ;;  %v13692_v14 = vld [vmem:[#allocation2 + $0x1604] ss:$16 sps:$4 sm:$0xff]   ;;  %v13687_v15 = vld [vmem:[#allocation2 + $0x1400] ss:$16 sps:$4 sm:$0xff]  }
 0x1c1   :  { %v7718_v30 = vpop.f32.mrf.mxu1  ;;  %8012 = vmatprep.subr.bf16.mxu1 %v13656_v16  ;;  %v15665_v35 = vadd.f32 %v7716_v26, %v7676_v27  ;;  %v7678_v36 = vadd.f32 %v7677_v28, %v15640_v38  ;;  %8001 = vmatprep.mubr.bf16.mxu0 %v15658_v23  ;;  %v13663_v38 = vld [vmem:[#allocation2 + $0x1480] ss:$16 sps:$4 sm:$0xff]   ;;  %v13701_v27 = vld [vmem:[#allocation2 + $0x15c4] ss:$16 sps:$4 sm:$0xff]  }
 0x1c2   :  { %8042 = vmatprep.mubr.bf16.mxu1 %v15660_v24  ;;  %v7679_v44 = vpop.f32.mrf.mxu0  ;;  %v13690_v16 = vld [vmem:[#allocation2 + $0x1600] ss:$16 sps:$4 sm:$0xff]   ;;  %v13704_v28 = vld [vmem:[#allocation2 + $0x17c4] ss:$16 sps:$4 sm:$0xff]  }
 0x1c3   :  { %v7720_v31 = vpop.f32.mrf.mxu1  ;;  %v15670_v45 = vadd.f32 %v7718_v30, %v7678_v36  ;;  %7972 = vmatpush1.bf16.msra.mxu0 %v13651_v19  ;;  %v13695_v19 = vld [vmem:[#allocation2 + $0x15e4] ss:$16 sps:$4 sm:$0xff]   ;;  %v13696_v26 = vld [vmem:[#allocation2 + $0x17e0] ss:$16 sps:$4 sm:$0xff]  }
 0x1c4   :  { %8013 = vmatpush1.bf16.msra.mxu1 %v13654_v22  ;;  %v7680_v46 = vpop.f32.mrf.mxu0  ;;  %7973 = vmatprep.subr.bf16.mxu0 %v13659_v33  ;;  %v13698_v22 = vld [vmem:[#allocation2 + $0x17e4] ss:$16 sps:$4 sm:$0xff]   ;;  %v13699_v30 = vld [vmem:[#allocation2 + $0x15c0] ss:$16 sps:$4 sm:$0xff]  }
 0x1c5   :  { %v7721_v47 = vpop.f32.mrf.mxu1  ;;  %8014 = vmatprep.subr.bf16.mxu1 %v13662_v34  ;;  %v13702_v33 = vld [vmem:[#allocation2 + $0x17c0] ss:$16 sps:$4 sm:$0xff]   ;;  %v13707_v34 = vld [vmem:[#allocation2 + $0x15a4] ss:$16 sps:$4 sm:$0xff]  }
 0x1c6   :  { %v13710_v36 = vld [vmem:[#allocation2 + $0x17a4] ss:$16 sps:$4 sm:$0xff]   ;;  %v13711_v46 = vld [vmem:[#allocation2 + $0x1580] ss:$16 sps:$4 sm:$0xff]  }
 0x1c7   :  { %7974 = vmatpush1.bf16.msra.mxu0 %v13657_v39  ;;  %v13705_v39 = vld [vmem:[#allocation2 + $0x15a0] ss:$16 sps:$4 sm:$0xff]   ;;  %v13713_v44 = vld [vmem:[#allocation2 + $0x1584] ss:$16 sps:$4 sm:$0xff]  }
 0x1c8   :  { %8015 = vmatpush1.bf16.msra.mxu1 %v13660_v41  ;;  %7975 = vmatprep.subr.bf16.mxu0 %v13665_v53  ;;  %v13708_v41 = vld [vmem:[#allocation2 + $0x17a0] ss:$16 sps:$4 sm:$0xff]   ;;  %v13716_v31 = vld [vmem:[#allocation2 + $0x1784] ss:$16 sps:$4 sm:$0xff]  }
 0x1c9   :  { %8016 = vmatprep.subr.bf16.mxu1 %v13668_v54  ;;  %v13714_v47 = vld [vmem:[#allocation2 + $0x1780] ss:$16 sps:$4 sm:$0xff]   ;;  %v13719_v53 = vld [vmem:[#allocation2 + $0x1564] ss:$16 sps:$4 sm:$0xff]  }
 0x1ca   :  { %v13722_v54 = vld [vmem:[#allocation2 + $0x1764] ss:$16 sps:$4 sm:$0xff]  }
 0x1cb   :  { %7976 = vmatpush1.bf16.msra.mxu0 %v13663_v38  ;;  %v13717_v38 = vld [vmem:[#allocation2 + $0x1560] ss:$16 sps:$4 sm:$0xff]  }
 0x1cc   :  { %8017 = vmatpush1.bf16.msra.mxu1 %v13666_v55  ;;  %7977 = vmatprep.subr.bf16.mxu0 %v13671_v56  ;;  %v13720_v55 = vld [vmem:[#allocation2 + $0x1760] ss:$16 sps:$4 sm:$0xff]   ;;  %v13725_v56 = vld [vmem:[#allocation2 + $0x1544] ss:$16 sps:$4 sm:$0xff]  }
 0x1cd   :  { %8018 = vmatprep.subr.bf16.mxu1 %v13674_v58  ;;  %v13728_v58 = vld [vmem:[#allocation2 + $0x1744] ss:$16 sps:$4 sm:$0xff]  }
 0x1cf   :  { %7978 = vmatpush1.bf16.msra.mxu0 %v13669_v59  ;;  %v13723_v59 = vld [vmem:[#allocation2 + $0x1540] ss:$16 sps:$4 sm:$0xff]  }
 0x1d0   :  { %8019 = vmatpush1.bf16.msra.mxu1 %v13672_v60  ;;  %7979 = vmatprep.subr.bf16.mxu0 %v13677_v61  ;;  %v13726_v60 = vld [vmem:[#allocation2 + $0x1740] ss:$16 sps:$4 sm:$0xff]   ;;  %v13731_v61 = vld [vmem:[#allocation2 + $0x1524] ss:$16 sps:$4 sm:$0xff]  }
 0x1d1   :  { %8020 = vmatprep.subr.bf16.mxu1 %v13680_v62  ;;  %v13734_v62 = vld [vmem:[#allocation2 + $0x1724] ss:$16 sps:$4 sm:$0xff]  }
 0x1d3   :  { %7980 = vmatpush1.bf16.msra.mxu0 %v13675_v63  ;;  %v13729_v63 = vld [vmem:[#allocation2 + $0x1520] ss:$16 sps:$4 sm:$0xff]  }
 0x1d4   :  { %8021 = vmatpush1.bf16.msra.mxu1 %v13678_v1  ;;  %7981 = vmatprep.subr.bf16.mxu0 %v13683_v2  ;;  %v13732_v1 = vld [vmem:[#allocation2 + $0x1720] ss:$16 sps:$4 sm:$0xff]   ;;  %v13737_v2 = vld [vmem:[#allocation2 + $0x1504] ss:$16 sps:$4 sm:$0xff]  }
 0x1d5   :  { %8022 = vmatprep.subr.bf16.mxu1 %v13686_v3  ;;  %v13740_v3 = vld [vmem:[#allocation2 + $0x1704] ss:$16 sps:$4 sm:$0xff]  }
 0x1d7   :  { %7982 = vmatpush1.bf16.msra.mxu0 %v13681_v11  ;;  %v13735_v11 = vld [vmem:[#allocation2 + $0x1500] ss:$16 sps:$4 sm:$0xff]  }
 0x1d8   :  { %8023 = vmatpush1.bf16.msra.mxu1 %v13684_v12  ;;  %7983 = vmatprep.subr.bf16.mxu0 %v13689_v13  ;;  %v13738_v12 = vld [vmem:[#allocation2 + $0x1700] ss:$16 sps:$4 sm:$0xff]  }
 0x1d9   :  { %8024 = vmatprep.subr.bf16.mxu1 %v13692_v14  ;;  %v185_v13 = vld [vmem:[%s15964_s0 + $0xa0] sm:$0xff]  ;;  %v187_v14 = vld [vmem:[%s15964_s0 + $0xb0] sm:$0xff] }
 0x1db   :  { %7984 = vmatpush1.bf16.msra.mxu0 %v13687_v15  ;;  %v13743_v15 = vld [vmem:[#allocation2 + $0x18e4] ss:$16 sps:$4 sm:$0xff]  }
 0x1dc   :  { %8025 = vmatpush1.bf16.msra.mxu1 %v13690_v16  ;;  %7985 = vmatprep.subr.bf16.mxu0 %v13695_v19  ;;  %v13746_v16 = vld [vmem:[#allocation2 + $0x1ae4] ss:$16 sps:$4 sm:$0xff]   ;;  %v15678_v19 = vpack.c.bf16 %v185_v13, %v185_v13  ;;  %v13765_v13 = vld [vmem:[#allocation2 + $0x1860] ss:$16 sps:$4 sm:$0xff]  }
 0x1dd   :  { %8026 = vmatprep.subr.bf16.mxu1 %v13698_v22  ;;  %v15680_v22 = vpack.c.bf16 %v187_v14, %v187_v14  ;;  %v13768_v14 = vld [vmem:[#allocation2 + $0x1a60] ss:$16 sps:$4 sm:$0xff]  }
 0x1df   :  { %7986 = vmatpush2.bf16.msra.mxu0 %v13693_v25  ;;  %v190_v25 = vld [vmem:[%s15964_s0 + $0xc8] sm:$0xff] }
 0x1e0   :  { %8027 = vmatpush2.bf16.msra.mxu1 %v13696_v26  ;;  %7987 = vmatprep.subr.bf16.mxu0 %v13701_v27  ;;  %v192_v26 = vld [vmem:[%s15964_s0 + $0xd8] sm:$0xff]  ;;  %v13741_v27 = vld [vmem:[#allocation2 + $0x18e0] ss:$16 sps:$4 sm:$0xff]  }
 0x1e1   :  { %8028 = vmatprep.subr.bf16.mxu1 %v13704_v28  ;;  %v13744_v28 = vld [vmem:[#allocation2 + $0x1ae0] ss:$16 sps:$4 sm:$0xff]  }
 0x1e3   :  { %7988 = vmatpush2.bf16.msra.mxu0 %v13699_v30  ;;  %v13749_v30 = vld [vmem:[#allocation2 + $0x18c4] ss:$16 sps:$4 sm:$0xff]  }
 0x1e4   :  { %8029 = vmatpush2.bf16.msra.mxu1 %v13702_v33  ;;  %7989 = vmatprep.subr.bf16.mxu0 %v13707_v34  ;;  %v13752_v33 = vld [vmem:[#allocation2 + $0x1ac4] ss:$16 sps:$4 sm:$0xff]   ;;  %v13747_v34 = vld [vmem:[#allocation2 + $0x18c0] ss:$16 sps:$4 sm:$0xff]  }
 0x1e5   :  { %8030 = vmatprep.subr.bf16.mxu1 %v13710_v36  ;;  %v13750_v36 = vld [vmem:[#allocation2 + $0x1ac0] ss:$16 sps:$4 sm:$0xff]  }
 0x1e7   :  { %7990 = vmatpush2.bf16.msra.mxu0 %v13705_v39  ;;  %v15688_v39 = vpack.c.bf16 %v190_v25, %v190_v25  ;;  %v13771_v25 = vld [vmem:[#allocation2 + $0x1840] ss:$16 sps:$4 sm:$0xff]  }
 0x1e8   :  { %8031 = vmatpush2.bf16.msra.mxu1 %v13708_v41  ;;  %7991 = vmatprep.subr.bf16.mxu0 %v13713_v44  ;;  %v15690_v41 = vpack.c.bf16 %v192_v26, %v192_v26  ;;  %v13774_v26 = vld [vmem:[#allocation2 + $0x1a40] ss:$16 sps:$4 sm:$0xff]  }
 0x1e9   :  { %8032 = vmatprep.subr.bf16.mxu1 %v13716_v31 }
 0x1eb   :  { %7992 = vmatpush2.bf16.msra.mxu0 %v13711_v46 }
 0x1ec   :  { %8033 = vmatpush2.bf16.msra.mxu1 %v13714_v47  ;;  %7993 = vmatprep.subr.bf16.mxu0 %v13719_v53 }
 0x1ed   :  { %8034 = vmatprep.subr.bf16.mxu1 %v13722_v54  ;;  %v13755_v54 = vld [vmem:[#allocation2 + $0x18a4] ss:$16 sps:$4 sm:$0xff]  }
 0x1ef   :  { %7994 = vmatpush2.bf16.msra.mxu0 %v13717_v38  ;;  %v13758_v38 = vld [vmem:[#allocation2 + $0x1aa4] ss:$16 sps:$4 sm:$0xff]  }
 0x1f0   :  { %8035 = vmatpush2.bf16.msra.mxu1 %v13720_v55  ;;  %7995 = vmatprep.subr.bf16.mxu0 %v13725_v56 }
 0x1f1   :  { %8036 = vmatprep.subr.bf16.mxu1 %v13728_v58  ;;  %v13753_v58 = vld [vmem:[#allocation2 + $0x18a0] ss:$16 sps:$4 sm:$0xff]  }
 0x1f3   :  { %7996 = vmatpush2.bf16.msra.mxu0 %v13723_v59  ;;  %v13756_v59 = vld [vmem:[#allocation2 + $0x1aa0] ss:$16 sps:$4 sm:$0xff]  }
 0x1f4   :  { %8037 = vmatpush2.bf16.msra.mxu1 %v13726_v60  ;;  %7997 = vmatprep.subr.bf16.mxu0 %v13731_v61 }
 0x1f5   :  { %8038 = vmatprep.subr.bf16.mxu1 %v13734_v62 }
 0x1f7   :  { %7998 = vmatpush2.bf16.msra.mxu0 %v13729_v63 }
 0x1f8   :  { %8039 = vmatpush2.bf16.msra.mxu1 %v13732_v1  ;;  %7999 = vmatprep.subr.bf16.mxu0 %v13737_v2  ;;  %v13761_v1 = vld [vmem:[#allocation2 + $0x1884] ss:$16 sps:$4 sm:$0xff]  }
 0x1f9   :  { %8040 = vmatprep.subr.bf16.mxu1 %v13740_v3  ;;  %v13764_v2 = vld [vmem:[#allocation2 + $0x1a84] ss:$16 sps:$4 sm:$0xff]   ;;  %v13762_v3 = vld [vmem:[#allocation2 + $0x1a80] ss:$16 sps:$4 sm:$0xff]  }
 0x1fb   :  { %8000 = vmatpush2.bf16.msra.mxu0 %v13735_v11  ;;  %v13767_v11 = vld [vmem:[#allocation2 + $0x1864] ss:$16 sps:$4 sm:$0xff]  }
 0x1fc   :  { %8041 = vmatpush2.bf16.msra.mxu1 %v13738_v12  ;;  %8051 = vmatprep.subr.bf16.mxu0 %v13743_v15  ;;  %v13770_v12 = vld [vmem:[#allocation2 + $0x1a64] ss:$16 sps:$4 sm:$0xff]  }
 0x1fd   :  { %8092 = vmatprep.subr.bf16.mxu1 %v13746_v16  ;;  %v13773_v15 = vld [vmem:[#allocation2 + $0x1844] ss:$16 sps:$4 sm:$0xff]  }
 0x1fe   :  { %v7757_v44 = vpop.f32.mrf.mxu0  ;;  %8002 = vmatmul.mubr.bf16.vlgmr.msra.gmra.mxu0 %v15678_v19  ;;  %v13776_v16 = vld [vmem:[#allocation2 + $0x1a44] ss:$16 sps:$4 sm:$0xff]  }
 0x1ff   :  { %v7798_v31 = vpop.f32.mrf.mxu1  ;;  %8043 = vmatmul.mubr.bf16.vlgmr.msra.gmra.mxu1 %v15680_v22  ;;  %v7758_v46 = vadd.f32 %v7757_v44, %v15665_v35  ;;  %8052 = vmatpush1.bf16.msra.mxu0 %v13741_v27  ;;  %v13779_v27 = vld [vmem:[#allocation2 + $0x1824] ss:$16 sps:$4 sm:$0xff]   ;;  %v13783_v44 = vld [vmem:[#allocation2 + $0x1800] ss:$16 sps:$4 sm:$0xff]  }
 0x200   :  { %8093 = vmatpush1.bf16.msra.mxu1 %v13744_v28  ;;  %v7759_v47 = vpop.f32.mrf.mxu0  ;;  %8053 = vmatprep.subr.bf16.mxu0 %v13749_v30  ;;  %v13782_v28 = vld [vmem:[#allocation2 + $0x1a24] ss:$16 sps:$4 sm:$0xff]   ;;  %v13777_v30 = vld [vmem:[#allocation2 + $0x1820] ss:$16 sps:$4 sm:$0xff]  }
 0x201   :  { %v7800_v53 = vpop.f32.mrf.mxu1  ;;  %8094 = vmatprep.subr.bf16.mxu1 %v13752_v33  ;;  %v15695_v55 = vadd.f32 %v7798_v31, %v7758_v46  ;;  %v7760_v56 = vadd.f32 %v7759_v47, %v15670_v45  ;;  %8083 = vmatprep.mubr.bf16.mxu0 %v15688_v39  ;;  %v13759_v45 = vld [vmem:[#allocation2 + $0x1880] ss:$16 sps:$4 sm:$0xff]   ;;  %v13791_v46 = vld [vmem:[#allocation2 + $0x19e4] ss:$16 sps:$4 sm:$0xff]  }
 0x202   :  { %8124 = vmatprep.mubr.bf16.mxu1 %v15690_v41  ;;  %v7761_v60 = vpop.f32.mrf.mxu0  ;;  %v13780_v33 = vld [vmem:[#allocation2 + $0x1a20] ss:$16 sps:$4 sm:$0xff]   ;;  %v13794_v47 = vld [vmem:[#allocation2 + $0x1be4] ss:$16 sps:$4 sm:$0xff]  }
 0x203   :  { %v7802_v35 = vpop.f32.mrf.mxu1  ;;  %v15700_v61 = vadd.f32 %v7800_v53, %v7760_v56  ;;  %8054 = vmatpush1.bf16.msra.mxu0 %v13747_v34  ;;  %v13785_v34 = vld [vmem:[#allocation2 + $0x1804] ss:$16 sps:$4 sm:$0xff]   ;;  %v13786_v31 = vld [vmem:[#allocation2 + $0x1a00] ss:$16 sps:$4 sm:$0xff]  }
 0x204   :  { %8095 = vmatpush1.bf16.msra.mxu1 %v13750_v36  ;;  %v7762_v62 = vpop.f32.mrf.mxu0  ;;  %8055 = vmatprep.subr.bf16.mxu0 %v13755_v54  ;;  %v13788_v36 = vld [vmem:[#allocation2 + $0x1a04] ss:$16 sps:$4 sm:$0xff]   ;;  %v13789_v53 = vld [vmem:[#allocation2 + $0x19e0] ss:$16 sps:$4 sm:$0xff]  }
 0x205   :  { %v7803_v63 = vpop.f32.mrf.mxu1  ;;  %8096 = vmatprep.subr.bf16.mxu1 %v13758_v38  ;;  %v13792_v54 = vld [vmem:[#allocation2 + $0x1be0] ss:$16 sps:$4 sm:$0xff]   ;;  %v13797_v38 = vld [vmem:[#allocation2 + $0x19c4] ss:$16 sps:$4 sm:$0xff]  }
 0x206   :  { %v13800_v56 = vld [vmem:[#allocation2 + $0x1bc4] ss:$16 sps:$4 sm:$0xff]   ;;  %v13801_v62 = vld [vmem:[#allocation2 + $0x19a0] ss:$16 sps:$4 sm:$0xff]  }
 0x207   :  { %8056 = vmatpush1.bf16.msra.mxu0 %v13753_v58  ;;  %v13795_v58 = vld [vmem:[#allocation2 + $0x19c0] ss:$16 sps:$4 sm:$0xff]   ;;  %v13803_v60 = vld [vmem:[#allocation2 + $0x19a4] ss:$16 sps:$4 sm:$0xff]  }
 0x208   :  { %8097 = vmatpush1.bf16.msra.mxu1 %v13756_v59  ;;  %8057 = vmatprep.subr.bf16.mxu0 %v13761_v1  ;;  %v13798_v59 = vld [vmem:[#allocation2 + $0x1bc0] ss:$16 sps:$4 sm:$0xff]   ;;  %v13806_v35 = vld [vmem:[#allocation2 + $0x1ba4] ss:$16 sps:$4 sm:$0xff]  }
 0x209   :  { %8098 = vmatprep.subr.bf16.mxu1 %v13764_v2  ;;  %v13804_v63 = vld [vmem:[#allocation2 + $0x1ba0] ss:$16 sps:$4 sm:$0xff]   ;;  %v13809_v1 = vld [vmem:[#allocation2 + $0x1984] ss:$16 sps:$4 sm:$0xff]  }
 0x20a   :  { %v13812_v2 = vld [vmem:[#allocation2 + $0x1b84] ss:$16 sps:$4 sm:$0xff]  }
 0x20b   :  { %8058 = vmatpush1.bf16.msra.mxu0 %v13759_v45  ;;  %v13807_v45 = vld [vmem:[#allocation2 + $0x1980] ss:$16 sps:$4 sm:$0xff]  }
 0x20c   :  { %8099 = vmatpush1.bf16.msra.mxu1 %v13762_v3  ;;  %8059 = vmatprep.subr.bf16.mxu0 %v13767_v11  ;;  %v13810_v3 = vld [vmem:[#allocation2 + $0x1b80] ss:$16 sps:$4 sm:$0xff]   ;;  %v13815_v11 = vld [vmem:[#allocation2 + $0x1964] ss:$16 sps:$4 sm:$0xff]  }
 0x20d   :  { %8100 = vmatprep.subr.bf16.mxu1 %v13770_v12  ;;  %v13818_v12 = vld [vmem:[#allocation2 + $0x1b64] ss:$16 sps:$4 sm:$0xff]  }
 0x20f   :  { %8060 = vmatpush1.bf16.msra.mxu0 %v13765_v13  ;;  %v13813_v13 = vld [vmem:[#allocation2 + $0x1960] ss:$16 sps:$4 sm:$0xff]  }
 0x210   :  { %8101 = vmatpush1.bf16.msra.mxu1 %v13768_v14  ;;  %8061 = vmatprep.subr.bf16.mxu0 %v13773_v15  ;;  %v13816_v14 = vld [vmem:[#allocation2 + $0x1b60] ss:$16 sps:$4 sm:$0xff]   ;;  %v13821_v15 = vld [vmem:[#allocation2 + $0x1944] ss:$16 sps:$4 sm:$0xff]  }
 0x211   :  { %8102 = vmatprep.subr.bf16.mxu1 %v13776_v16  ;;  %v13824_v16 = vld [vmem:[#allocation2 + $0x1b44] ss:$16 sps:$4 sm:$0xff]  }
 0x213   :  { %8062 = vmatpush1.bf16.msra.mxu0 %v13771_v25  ;;  %v13819_v25 = vld [vmem:[#allocation2 + $0x1940] ss:$16 sps:$4 sm:$0xff]  }
 0x214   :  { %8103 = vmatpush1.bf16.msra.mxu1 %v13774_v26  ;;  %8063 = vmatprep.subr.bf16.mxu0 %v13779_v27  ;;  %v13822_v26 = vld [vmem:[#allocation2 + $0x1b40] ss:$16 sps:$4 sm:$0xff]   ;;  %v13827_v27 = vld [vmem:[#allocation2 + $0x1924] ss:$16 sps:$4 sm:$0xff]  }
 0x215   :  { %8104 = vmatprep.subr.bf16.mxu1 %v13782_v28  ;;  %v13830_v28 = vld [vmem:[#allocation2 + $0x1b24] ss:$16 sps:$4 sm:$0xff]  }
 0x217   :  { %8064 = vmatpush1.bf16.msra.mxu0 %v13777_v30  ;;  %v13825_v30 = vld [vmem:[#allocation2 + $0x1920] ss:$16 sps:$4 sm:$0xff]  }
 0x218   :  { %8105 = vmatpush1.bf16.msra.mxu1 %v13780_v33  ;;  %8065 = vmatprep.subr.bf16.mxu0 %v13785_v34  ;;  %v13828_v33 = vld [vmem:[#allocation2 + $0x1b20] ss:$16 sps:$4 sm:$0xff]   ;;  %v13833_v34 = vld [vmem:[#allocation2 + $0x1904] ss:$16 sps:$4 sm:$0xff]  }
 0x219   :  { %8106 = vmatprep.subr.bf16.mxu1 %v13788_v36  ;;  %v13836_v36 = vld [vmem:[#allocation2 + $0x1b04] ss:$16 sps:$4 sm:$0xff]  }
 0x21b   :  { %8066 = vmatpush1.bf16.msra.mxu0 %v13783_v44  ;;  %v13831_v44 = vld [vmem:[#allocation2 + $0x1900] ss:$16 sps:$4 sm:$0xff]  }
 0x21c   :  { %8107 = vmatpush1.bf16.msra.mxu1 %v13786_v31  ;;  %8067 = vmatprep.subr.bf16.mxu0 %v13791_v46  ;;  %v13834_v31 = vld [vmem:[#allocation2 + $0x1b00] ss:$16 sps:$4 sm:$0xff]  }
 0x21d   :  { %8108 = vmatprep.subr.bf16.mxu1 %v13794_v47  ;;  %v189_v46 = vld [vmem:[%s15964_s0 + $0xc0] sm:$0xff]  ;;  %v191_v47 = vld [vmem:[%s15964_s0 + $0xd0] sm:$0xff] }
 0x21f   :  { %8068 = vmatpush2.bf16.msra.mxu0 %v13789_v53  ;;  %v13839_v53 = vld [vmem:[#allocation2 + $0x1ce4] ss:$16 sps:$4 sm:$0xff]  }
 0x220   :  { %8109 = vmatpush2.bf16.msra.mxu1 %v13792_v54  ;;  %8069 = vmatprep.subr.bf16.mxu0 %v13797_v38  ;;  %v13842_v54 = vld [vmem:[#allocation2 + $0x1ee4] ss:$16 sps:$4 sm:$0xff]   ;;  %v15708_v38 = vpack.c.bf16 %v189_v46, %v189_v46 }
 0x221   :  { %8110 = vmatprep.subr.bf16.mxu1 %v13800_v56  ;;  %v15710_v56 = vpack.c.bf16 %v191_v47, %v191_v47  ;;  %v13860_v46 = vld [vmem:[#allocation2 + $0x1e84] ss:$16 sps:$4 sm:$0xff]   ;;  %v13858_v47 = vld [vmem:[#allocation2 + $0x1e80] ss:$16 sps:$4 sm:$0xff]  }
 0x223   :  { %8070 = vmatpush2.bf16.msra.mxu0 %v13795_v58  ;;  %v194_v58 = vld [vmem:[%s15964_s0 + $0xe8] sm:$0xff] }
 0x224   :  { %8111 = vmatpush2.bf16.msra.mxu1 %v13798_v59  ;;  %8071 = vmatprep.subr.bf16.mxu0 %v13803_v60  ;;  %v196_v59 = vld [vmem:[%s15964_s0 + $0xf8] sm:$0xff]  ;;  %v13837_v60 = vld [vmem:[#allocation2 + $0x1ce0] ss:$16 sps:$4 sm:$0xff]  }
 0x225   :  { %8112 = vmatprep.subr.bf16.mxu1 %v13806_v35  ;;  %v13840_v35 = vld [vmem:[#allocation2 + $0x1ee0] ss:$16 sps:$4 sm:$0xff]  }
 0x227   :  { %8072 = vmatpush2.bf16.msra.mxu0 %v13801_v62  ;;  %v13845_v62 = vld [vmem:[#allocation2 + $0x1cc4] ss:$16 sps:$4 sm:$0xff]  }
 0x228   :  { %8113 = vmatpush2.bf16.msra.mxu1 %v13804_v63  ;;  %8073 = vmatprep.subr.bf16.mxu0 %v13809_v1  ;;  %v13848_v63 = vld [vmem:[#allocation2 + $0x1ec4] ss:$16 sps:$4 sm:$0xff]   ;;  %v13843_v1 = vld [vmem:[#allocation2 + $0x1cc0] ss:$16 sps:$4 sm:$0xff]  }
 0x229   :  { %8114 = vmatprep.subr.bf16.mxu1 %v13812_v2  ;;  %v13846_v2 = vld [vmem:[#allocation2 + $0x1ec0] ss:$16 sps:$4 sm:$0xff]  }
 0x22b   :  { %8074 = vmatpush2.bf16.msra.mxu0 %v13807_v45  ;;  %v15718_v45 = vpack.c.bf16 %v194_v58, %v194_v58  ;;  %v13861_v58 = vld [vmem:[#allocation2 + $0x1c60] ss:$16 sps:$4 sm:$0xff]  }
 0x22c   :  { %8115 = vmatpush2.bf16.msra.mxu1 %v13810_v3  ;;  %8075 = vmatprep.subr.bf16.mxu0 %v13815_v11  ;;  %v15720_v3 = vpack.c.bf16 %v196_v59, %v196_v59  ;;  %v13864_v59 = vld [vmem:[#allocation2 + $0x1e60] ss:$16 sps:$4 sm:$0xff]  }
 0x22d   :  { %8116 = vmatprep.subr.bf16.mxu1 %v13818_v12 }
 0x22f   :  { %8076 = vmatpush2.bf16.msra.mxu0 %v13813_v13 }
 0x230   :  { %8117 = vmatpush2.bf16.msra.mxu1 %v13816_v14  ;;  %8077 = vmatprep.subr.bf16.mxu0 %v13821_v15 }
 0x231   :  { %8118 = vmatprep.subr.bf16.mxu1 %v13824_v16  ;;  %v13851_v16 = vld [vmem:[#allocation2 + $0x1ca4] ss:$16 sps:$4 sm:$0xff]  }
 0x233   :  { %8078 = vmatpush2.bf16.msra.mxu0 %v13819_v25  ;;  %v13854_v25 = vld [vmem:[#allocation2 + $0x1ea4] ss:$16 sps:$4 sm:$0xff]  }
 0x234   :  { %8119 = vmatpush2.bf16.msra.mxu1 %v13822_v26  ;;  %8079 = vmatprep.subr.bf16.mxu0 %v13827_v27 }
 0x235   :  { %8120 = vmatprep.subr.bf16.mxu1 %v13830_v28  ;;  %v13849_v28 = vld [vmem:[#allocation2 + $0x1ca0] ss:$16 sps:$4 sm:$0xff]  }
 0x237   :  { %8080 = vmatpush2.bf16.msra.mxu0 %v13825_v30  ;;  %v13852_v30 = vld [vmem:[#allocation2 + $0x1ea0] ss:$16 sps:$4 sm:$0xff]  }
 0x238   :  { %8121 = vmatpush2.bf16.msra.mxu1 %v13828_v33  ;;  %8081 = vmatprep.subr.bf16.mxu0 %v13833_v34 }
 0x239   :  { %8122 = vmatprep.subr.bf16.mxu1 %v13836_v36 }
 0x23b   :  { %8082 = vmatpush2.bf16.msra.mxu0 %v13831_v44 }
 0x23c   :  { %8123 = vmatpush2.bf16.msra.mxu1 %v13834_v31  ;;  %8133 = vmatprep.subr.bf16.mxu0 %v13839_v53  ;;  %v13857_v31 = vld [vmem:[#allocation2 + $0x1c84] ss:$16 sps:$4 sm:$0xff]  }
 0x23d   :  { %8174 = vmatprep.subr.bf16.mxu1 %v13842_v54  ;;  %v13863_v53 = vld [vmem:[#allocation2 + $0x1c64] ss:$16 sps:$4 sm:$0xff]  }
 0x23e   :  { %v7839_v11 = vpop.f32.mrf.mxu0  ;;  %8084 = vmatmul.mubr.bf16.vlgmr.msra.gmra.mxu0 %v15708_v38  ;;  %v13866_v54 = vld [vmem:[#allocation2 + $0x1e64] ss:$16 sps:$4 sm:$0xff]  }
 0x23f   :  { %v7880_v12 = vpop.f32.mrf.mxu1  ;;  %8125 = vmatmul.mubr.bf16.vlgmr.msra.gmra.mxu1 %v15710_v56  ;;  %v7840_v13 = vadd.f32 %v7839_v11, %v15695_v55  ;;  %8134 = vmatpush1.bf16.msra.mxu0 %v13837_v60  ;;  %v13869_v60 = vld [vmem:[#allocation2 + $0x1c44] ss:$16 sps:$4 sm:$0xff]   ;;  %v13873_v11 = vld [vmem:[#allocation2 + $0x1c20] ss:$16 sps:$4 sm:$0xff]  }
 0x240   :  { %8175 = vmatpush1.bf16.msra.mxu1 %v13840_v35  ;;  %v7841_v14 = vpop.f32.mrf.mxu0  ;;  %8135 = vmatprep.subr.bf16.mxu0 %v13845_v62  ;;  %v13872_v35 = vld [vmem:[#allocation2 + $0x1e44] ss:$16 sps:$4 sm:$0xff]   ;;  %v13867_v62 = vld [vmem:[#allocation2 + $0x1c40] ss:$16 sps:$4 sm:$0xff]  }
 0x241   :  { %v7882_v15 = vpop.f32.mrf.mxu1  ;;  %8176 = vmatprep.subr.bf16.mxu1 %v13848_v63  ;;  %v15725_v26 = vadd.f32 %v7880_v12, %v7840_v13  ;;  %v7842_v27 = vadd.f32 %v7841_v14, %v15700_v61  ;;  %8165 = vmatprep.mubr.bf16.mxu0 %v15718_v45  ;;  %v13855_v61 = vld [vmem:[#allocation2 + $0x1c80] ss:$16 sps:$4 sm:$0xff]   ;;  %v13881_v13 = vld [vmem:[#allocation2 + $0x1c04] ss:$16 sps:$4 sm:$0xff]  }
 0x242   :  { %8206 = vmatprep.mubr.bf16.mxu1 %v15720_v3  ;;  %v7843_v33 = vpop.f32.mrf.mxu0  ;;  %v13870_v63 = vld [vmem:[#allocation2 + $0x1e40] ss:$16 sps:$4 sm:$0xff]   ;;  %v13884_v14 = vld [vmem:[#allocation2 + $0x1e04] ss:$16 sps:$4 sm:$0xff]  }
 0x243   :  { %v7884_v55 = vpop.f32.mrf.mxu1  ;;  %v15730_v34 = vadd.f32 %v7882_v15, %v7842_v27  ;;  %8136 = vmatpush1.bf16.msra.mxu0 %v13843_v1  ;;  %v13875_v1 = vld [vmem:[#allocation2 + $0x1c24] ss:$16 sps:$4 sm:$0xff]   ;;  %v13876_v12 = vld [vmem:[#allocation2 + $0x1e20] ss:$16 sps:$4 sm:$0xff]  }
 0x244   :  { %8177 = vmatpush1.bf16.msra.mxu1 %v13846_v2  ;;  %v7844_v36 = vpop.f32.mrf.mxu0  ;;  %8137 = vmatprep.subr.bf16.mxu0 %v13851_v16  ;;  %v13878_v2 = vld [vmem:[#allocation2 + $0x1e24] ss:$16 sps:$4 sm:$0xff]   ;;  %v13879_v15 = vld [vmem:[#allocation2 + $0x1c00] ss:$16 sps:$4 sm:$0xff]  }
 0x245   :  { %v7885_v44 = vpop.f32.mrf.mxu1  ;;  %8178 = vmatprep.subr.bf16.mxu1 %v13854_v25  ;;  %v13882_v16 = vld [vmem:[#allocation2 + $0x1e00] ss:$16 sps:$4 sm:$0xff]   ;;  %v13887_v25 = vld [vmem:[#allocation2 + $0x1de4] ss:$16 sps:$4 sm:$0xff]  }
 0x246   :  { %v13890_v27 = vld [vmem:[#allocation2 + $0x1fe4] ss:$16 sps:$4 sm:$0xff]   ;;  %v13891_v36 = vld [vmem:[#allocation2 + $0x1dc0] ss:$16 sps:$4 sm:$0xff]  }
 0x247   :  { %8138 = vmatpush1.bf16.msra.mxu0 %v13849_v28  ;;  %v13885_v28 = vld [vmem:[#allocation2 + $0x1de0] ss:$16 sps:$4 sm:$0xff]   ;;  %v13893_v33 = vld [vmem:[#allocation2 + $0x1dc4] ss:$16 sps:$4 sm:$0xff]  }
 0x248   :  { %8179 = vmatpush1.bf16.msra.mxu1 %v13852_v30  ;;  %8139 = vmatprep.subr.bf16.mxu0 %v13857_v31  ;;  %v13888_v30 = vld [vmem:[#allocation2 + $0x1fe0] ss:$16 sps:$4 sm:$0xff]   ;;  %v13896_v55 = vld [vmem:[#allocation2 + $0x1fc4] ss:$16 sps:$4 sm:$0xff]  }
 0x249   :  { %8180 = vmatprep.subr.bf16.mxu1 %v13860_v46  ;;  %v13894_v44 = vld [vmem:[#allocation2 + $0x1fc0] ss:$16 sps:$4 sm:$0xff]   ;;  %v13899_v31 = vld [vmem:[#allocation2 + $0x1da4] ss:$16 sps:$4 sm:$0xff]  }
 0x24a   :  { %v13902_v46 = vld [vmem:[#allocation2 + $0x1fa4] ss:$16 sps:$4 sm:$0xff]  }
 0x24b   :  { %8140 = vmatpush1.bf16.msra.mxu0 %v13855_v61  ;;  %v13897_v61 = vld [vmem:[#allocation2 + $0x1da0] ss:$16 sps:$4 sm:$0xff]  }
 0x24c   :  { %8181 = vmatpush1.bf16.msra.mxu1 %v13858_v47  ;;  %8141 = vmatprep.subr.bf16.mxu0 %v13863_v53  ;;  %v13900_v47 = vld [vmem:[#allocation2 + $0x1fa0] ss:$16 sps:$4 sm:$0xff]   ;;  %v13905_v53 = vld [vmem:[#allocation2 + $0x1d84] ss:$16 sps:$4 sm:$0xff]  }
 0x24d   :  { %8182 = vmatprep.subr.bf16.mxu1 %v13866_v54  ;;  %v13908_v54 = vld [vmem:[#allocation2 + $0x1f84] ss:$16 sps:$4 sm:$0xff]  }
 0x24f   :  { %8142 = vmatpush1.bf16.msra.mxu0 %v13861_v58  ;;  %v13903_v58 = vld [vmem:[#allocation2 + $0x1d80] ss:$16 sps:$4 sm:$0xff]  }
 0x250   :  { %8183 = vmatpush1.bf16.msra.mxu1 %v13864_v59  ;;  %8143 = vmatprep.subr.bf16.mxu0 %v13869_v60  ;;  %v13906_v59 = vld [vmem:[#allocation2 + $0x1f80] ss:$16 sps:$4 sm:$0xff]   ;;  %v13911_v60 = vld [vmem:[#allocation2 + $0x1d64] ss:$16 sps:$4 sm:$0xff]  }
 0x251   :  { %8184 = vmatprep.subr.bf16.mxu1 %v13872_v35  ;;  %v13914_v35 = vld [vmem:[#allocation2 + $0x1f64] ss:$16 sps:$4 sm:$0xff]  }
 0x253   :  { %8144 = vmatpush1.bf16.msra.mxu0 %v13867_v62  ;;  %v13909_v62 = vld [vmem:[#allocation2 + $0x1d60] ss:$16 sps:$4 sm:$0xff]  }
 0x254   :  { %8185 = vmatpush1.bf16.msra.mxu1 %v13870_v63  ;;  %8145 = vmatprep.subr.bf16.mxu0 %v13875_v1  ;;  %v13912_v63 = vld [vmem:[#allocation2 + $0x1f60] ss:$16 sps:$4 sm:$0xff]   ;;  %v13917_v1 = vld [vmem:[#allocation2 + $0x1d44] ss:$16 sps:$4 sm:$0xff]  }
 0x255   :  { %8186 = vmatprep.subr.bf16.mxu1 %v13878_v2  ;;  %v13920_v2 = vld [vmem:[#allocation2 + $0x1f44] ss:$16 sps:$4 sm:$0xff]  }
 0x257   :  { %8146 = vmatpush1.bf16.msra.mxu0 %v13873_v11  ;;  %v13915_v11 = vld [vmem:[#allocation2 + $0x1d40] ss:$16 sps:$4 sm:$0xff]  }
 0x258   :  { %8187 = vmatpush1.bf16.msra.mxu1 %v13876_v12  ;;  %8147 = vmatprep.subr.bf16.mxu0 %v13881_v13  ;;  %v13918_v12 = vld [vmem:[#allocation2 + $0x1f40] ss:$16 sps:$4 sm:$0xff]   ;;  %v13923_v13 = vld [vmem:[#allocation2 + $0x1d24] ss:$16 sps:$4 sm:$0xff]  }
 0x259   :  { %8188 = vmatprep.subr.bf16.mxu1 %v13884_v14  ;;  %v13926_v14 = vld [vmem:[#allocation2 + $0x1f24] ss:$16 sps:$4 sm:$0xff]  }
 0x25b   :  { %8148 = vmatpush1.bf16.msra.mxu0 %v13879_v15  ;;  %v13921_v15 = vld [vmem:[#allocation2 + $0x1d20] ss:$16 sps:$4 sm:$0xff]  }
 0x25c   :  { %8189 = vmatpush1.bf16.msra.mxu1 %v13882_v16  ;;  %8149 = vmatprep.subr.bf16.mxu0 %v13887_v25  ;;  %v13924_v16 = vld [vmem:[#allocation2 + $0x1f20] ss:$16 sps:$4 sm:$0xff]   ;;  %v13929_v25 = vld [vmem:[#allocation2 + $0x1d04] ss:$16 sps:$4 sm:$0xff]  }
 0x25d   :  { %8190 = vmatprep.subr.bf16.mxu1 %v13890_v27  ;;  %v13932_v27 = vld [vmem:[#allocation2 + $0x1f04] ss:$16 sps:$4 sm:$0xff]  }
 0x25f   :  { %8150 = vmatpush2.bf16.msra.mxu0 %v13885_v28  ;;  %v13927_v28 = vld [vmem:[#allocation2 + $0x1d00] ss:$16 sps:$4 sm:$0xff]  }
 0x260   :  { %8191 = vmatpush2.bf16.msra.mxu1 %v13888_v30  ;;  %8151 = vmatprep.subr.bf16.mxu0 %v13893_v33  ;;  %v13930_v30 = vld [vmem:[#allocation2 + $0x1f00] ss:$16 sps:$4 sm:$0xff]  }
 0x261   :  { %8192 = vmatprep.subr.bf16.mxu1 %v13896_v55  ;;  %v193_v33 = vld [vmem:[%s15964_s0 + $0xe0] sm:$0xff]  ;;  %v195_v55 = vld [vmem:[%s15964_s0 + $0xf0] sm:$0xff] }
 0x263   :  { %8152 = vmatpush2.bf16.msra.mxu0 %v13891_v36  ;;  %v13935_v36 = vld [vmem:[#allocation2 + $0x20e4] ss:$16 sps:$4 sm:$0xff]  }
 0x264   :  { %8193 = vmatpush2.bf16.msra.mxu1 %v13894_v44  ;;  %8153 = vmatprep.subr.bf16.mxu0 %v13899_v31  ;;  %v13938_v44 = vld [vmem:[#allocation2 + $0x22e4] ss:$16 sps:$4 sm:$0xff]   ;;  %v198_v31 = vld [vmem:[%s15964_s0 + $0x108] sm:$0xff] }
 0x265   :  { %8194 = vmatprep.subr.bf16.mxu1 %v13902_v46  ;;  %v13933_v46 = vld [vmem:[#allocation2 + $0x20e0] ss:$16 sps:$4 sm:$0xff]  }
 0x267   :  { %8154 = vmatpush2.bf16.msra.mxu0 %v13897_v61  ;;  %v15741_v61 = vpack.c.bf16 %v193_v33, %v193_v33 }
 0x268   :  { %8195 = vmatpush2.bf16.msra.mxu1 %v13900_v47  ;;  %8155 = vmatprep.subr.bf16.mxu0 %v13905_v53  ;;  %v15743_v47 = vpack.c.bf16 %v195_v55, %v195_v55  ;;  %v200_v53 = vld [vmem:[%s15964_s0 + $0x118] sm:$0xff] }
 0x269   :  { %8196 = vmatprep.subr.bf16.mxu1 %v13908_v54  ;;  %v13936_v54 = vld [vmem:[#allocation2 + $0x22e0] ss:$16 sps:$4 sm:$0xff]  }
 0x26b   :  { %8156 = vmatpush2.bf16.msra.mxu0 %v13903_v58  ;;  %v13941_v58 = vld [vmem:[#allocation2 + $0x20c4] ss:$16 sps:$4 sm:$0xff]  }
 0x26c   :  { %8197 = vmatpush2.bf16.msra.mxu1 %v13906_v59  ;;  %8157 = vmatprep.subr.bf16.mxu0 %v13911_v60  ;;  %v13944_v59 = vld [vmem:[#allocation2 + $0x22c4] ss:$16 sps:$4 sm:$0xff]   ;;  %v13939_v60 = vld [vmem:[#allocation2 + $0x20c0] ss:$16 sps:$4 sm:$0xff]  }
 0x26d   :  { %8198 = vmatprep.subr.bf16.mxu1 %v13914_v35  ;;  %v13942_v35 = vld [vmem:[#allocation2 + $0x22c0] ss:$16 sps:$4 sm:$0xff]  }
 0x26f   :  { %8158 = vmatpush2.bf16.msra.mxu0 %v13909_v62  ;;  %v15748_v62 = vpack.c.bf16 %v198_v31, %v198_v31  ;;  %v13956_v31 = vld [vmem:[#allocation2 + $0x2284] ss:$16 sps:$4 sm:$0xff]  }
 0x270   :  { %8199 = vmatpush2.bf16.msra.mxu1 %v13912_v63  ;;  %8159 = vmatprep.subr.bf16.mxu0 %v13917_v1  ;;  %v15750_v63 = vpack.c.bf16 %v200_v53, %v200_v53  ;;  %v13959_v53 = vld [vmem:[#allocation2 + $0x2064] ss:$16 sps:$4 sm:$0xff]  }
 0x271   :  { %8200 = vmatprep.subr.bf16.mxu1 %v13920_v2 }
 0x273   :  { %8160 = vmatpush2.bf16.msra.mxu0 %v13915_v11 }
 0x274   :  { %8201 = vmatpush2.bf16.msra.mxu1 %v13918_v12  ;;  %8161 = vmatprep.subr.bf16.mxu0 %v13923_v13 }
 0x275   :  { %8202 = vmatprep.subr.bf16.mxu1 %v13926_v14  ;;  %v13947_v14 = vld [vmem:[#allocation2 + $0x20a4] ss:$16 sps:$4 sm:$0xff]  }
 0x277   :  { %8162 = vmatpush2.bf16.msra.mxu0 %v13921_v15  ;;  %v13950_v15 = vld [vmem:[#allocation2 + $0x22a4] ss:$16 sps:$4 sm:$0xff]  }
 0x278   :  { %8203 = vmatpush2.bf16.msra.mxu1 %v13924_v16  ;;  %8163 = vmatprep.subr.bf16.mxu0 %v13929_v25 }
 0x279   :  { %8204 = vmatprep.subr.bf16.mxu1 %v13932_v27  ;;  %v13945_v27 = vld [vmem:[#allocation2 + $0x20a0] ss:$16 sps:$4 sm:$0xff]  }
 0x27b   :  { %8164 = vmatpush2.bf16.msra.mxu0 %v13927_v28  ;;  %v13948_v28 = vld [vmem:[#allocation2 + $0x22a0] ss:$16 sps:$4 sm:$0xff]  }
 0x27c   :  { %8205 = vmatpush2.bf16.msra.mxu1 %v13930_v30  ;;  %8215 = vmatprep.subr.bf16.mxu0 %v13935_v36 }
 0x27d   :  { %8256 = vmatprep.subr.bf16.mxu1 %v13938_v44  ;;  %v13953_v44 = vld [vmem:[#allocation2 + $0x2084] ss:$16 sps:$4 sm:$0xff]  }
 0x27e   :  { %v7921_v1 = vpop.f32.mrf.mxu0  ;;  %8166 = vmatmul.mubr.bf16.vlgmr.msra.gmra.mxu0 %v15741_v61 }
 0x27f   :  { %v7962_v2 = vpop.f32.mrf.mxu1  ;;  %8207 = vmatmul.mubr.bf16.vlgmr.msra.gmra.mxu1 %v15743_v47  ;;  %v7922_v11 = vadd.f32 %v7921_v1, %v15725_v26  ;;  %8216 = vmatpush1.bf16.msra.mxu0 %v13933_v46  ;;  %v13954_v46 = vld [vmem:[#allocation2 + $0x2280] ss:$16 sps:$4 sm:$0xff]  }
 0x280   :  { %8257 = vmatpush1.bf16.msra.mxu1 %v13936_v54  ;;  %v7923_v12 = vpop.f32.mrf.mxu0  ;;  %8217 = vmatprep.subr.bf16.mxu0 %v13941_v58  ;;  %v13962_v54 = vld [vmem:[#allocation2 + $0x2264] ss:$16 sps:$4 sm:$0xff]   ;;  %v13957_v58 = vld [vmem:[#allocation2 + $0x2060] ss:$16 sps:$4 sm:$0xff]  }
 0x281   :  { %v7964_v13 = vpop.f32.mrf.mxu1  ;;  %8258 = vmatprep.subr.bf16.mxu1 %v13944_v59  ;;  %v15755_v16 = vadd.f32 %v7962_v2, %v7922_v11  ;;  %v7924_v25 = vadd.f32 %v7923_v12, %v15730_v34  ;;  %8247 = vmatprep.mubr.bf16.mxu0 %v15748_v62  ;;  %v13951_v34 = vld [vmem:[#allocation2 + $0x2080] ss:$16 sps:$4 sm:$0xff]   ;;  %v13971_v11 = vld [vmem:[#allocation2 + $0x2024] ss:$16 sps:$4 sm:$0xff]  }
 0x282   :  { %8288 = vmatprep.mubr.bf16.mxu1 %v15750_v63  ;;  %v7925_v30 = vpop.f32.mrf.mxu0  ;;  %v13960_v59 = vld [vmem:[#allocation2 + $0x2260] ss:$16 sps:$4 sm:$0xff]   ;;  %v13974_v12 = vld [vmem:[#allocation2 + $0x2224] ss:$16 sps:$4 sm:$0xff]  }
 0x283   :  { %v7966_v26 = vpop.f32.mrf.mxu1  ;;  %v15760_v33 = vadd.f32 %v7964_v13, %v7924_v25  ;;  %8218 = vmatpush1.bf16.msra.mxu0 %v13939_v60  ;;  %v13965_v60 = vld [vmem:[#allocation2 + $0x2044] ss:$16 sps:$4 sm:$0xff]   ;;  %v13963_v1 = vld [vmem:[#allocation2 + $0x2040] ss:$16 sps:$4 sm:$0xff]  }
 0x284   :  { %8259 = vmatpush1.bf16.msra.mxu1 %v13942_v35  ;;  %v7926_v55 = vpop.f32.mrf.mxu0  ;;  %8219 = vmatprep.subr.bf16.mxu0 %v13947_v14  ;;  %v13968_v35 = vld [vmem:[#allocation2 + $0x2244] ss:$16 sps:$4 sm:$0xff]   ;;  %v13966_v2 = vld [vmem:[#allocation2 + $0x2240] ss:$16 sps:$4 sm:$0xff]  }
 0x285   :  { %v7967_v36 = vpop.f32.mrf.mxu1  ;;  %8260 = vmatprep.subr.bf16.mxu1 %v13950_v15  ;;  %v13969_v13 = vld [vmem:[#allocation2 + $0x2020] ss:$16 sps:$4 sm:$0xff]   ;;  %v13977_v15 = vld [vmem:[#allocation2 + $0x2004] ss:$16 sps:$4 sm:$0xff]  }
 0x286   :  { %v13972_v14 = vld [vmem:[#allocation2 + $0x2220] ss:$16 sps:$4 sm:$0xff]   ;;  %v13980_v25 = vld [vmem:[#allocation2 + $0x2204] ss:$16 sps:$4 sm:$0xff]  }
 0x287   :  { %8220 = vmatpush1.bf16.msra.mxu0 %v13945_v27  ;;  %v13975_v27 = vld [vmem:[#allocation2 + $0x2000] ss:$16 sps:$4 sm:$0xff]   ;;  %v13983_v30 = vld [vmem:[#allocation2 + $0x21e4] ss:$16 sps:$4 sm:$0xff]  }
 0x288   :  { %8261 = vmatpush1.bf16.msra.mxu1 %v13948_v28  ;;  %8221 = vmatprep.subr.bf16.mxu0 %v13953_v44  ;;  %v13978_v28 = vld [vmem:[#allocation2 + $0x2200] ss:$16 sps:$4 sm:$0xff]   ;;  %v13986_v26 = vld [vmem:[#allocation2 + $0x23e4] ss:$16 sps:$4 sm:$0xff]  }
 0x289   :  { %8262 = vmatprep.subr.bf16.mxu1 %v13956_v31  ;;  %v13981_v55 = vld [vmem:[#allocation2 + $0x21e0] ss:$16 sps:$4 sm:$0xff]   ;;  %v13989_v44 = vld [vmem:[#allocation2 + $0x21c4] ss:$16 sps:$4 sm:$0xff]  }
 0x28a   :  { %v13984_v36 = vld [vmem:[#allocation2 + $0x23e0] ss:$16 sps:$4 sm:$0xff]   ;;  %v13992_v31 = vld [vmem:[#allocation2 + $0x23c4] ss:$16 sps:$4 sm:$0xff]  }
 0x28b   :  { %8222 = vmatpush1.bf16.msra.mxu0 %v13951_v34  ;;  %v13987_v34 = vld [vmem:[#allocation2 + $0x21c0] ss:$16 sps:$4 sm:$0xff]  }
 0x28c   :  { %8263 = vmatpush1.bf16.msra.mxu1 %v13954_v46  ;;  %8223 = vmatprep.subr.bf16.mxu0 %v13959_v53  ;;  %v13990_v46 = vld [vmem:[#allocation2 + $0x23c0] ss:$16 sps:$4 sm:$0xff]   ;;  %v13995_v53 = vld [vmem:[#allocation2 + $0x21a4] ss:$16 sps:$4 sm:$0xff]  }
 0x28d   :  { %8264 = vmatprep.subr.bf16.mxu1 %v13962_v54  ;;  %v13998_v54 = vld [vmem:[#allocation2 + $0x23a4] ss:$16 sps:$4 sm:$0xff]  }
 0x28f   :  { %8224 = vmatpush1.bf16.msra.mxu0 %v13957_v58  ;;  %v13993_v58 = vld [vmem:[#allocation2 + $0x21a0] ss:$16 sps:$4 sm:$0xff]  }
 0x290   :  { %8265 = vmatpush1.bf16.msra.mxu1 %v13960_v59  ;;  %8225 = vmatprep.subr.bf16.mxu0 %v13965_v60  ;;  %v13996_v59 = vld [vmem:[#allocation2 + $0x23a0] ss:$16 sps:$4 sm:$0xff]   ;;  %v14001_v60 = vld [vmem:[#allocation2 + $0x2184] ss:$16 sps:$4 sm:$0xff]  }
 0x291   :  { %8266 = vmatprep.subr.bf16.mxu1 %v13968_v35  ;;  %v14004_v35 = vld [vmem:[#allocation2 + $0x2384] ss:$16 sps:$4 sm:$0xff]  }
 0x293   :  { %8226 = vmatpush1.bf16.msra.mxu0 %v13963_v1  ;;  %v13999_v1 = vld [vmem:[#allocation2 + $0x2180] ss:$16 sps:$4 sm:$0xff]  }
 0x294   :  { %8267 = vmatpush1.bf16.msra.mxu1 %v13966_v2  ;;  %8227 = vmatprep.subr.bf16.mxu0 %v13971_v11  ;;  %v14002_v2 = vld [vmem:[#allocation2 + $0x2380] ss:$16 sps:$4 sm:$0xff]   ;;  %v14007_v11 = vld [vmem:[#allocation2 + $0x2164] ss:$16 sps:$4 sm:$0xff]  }
 0x295   :  { %8268 = vmatprep.subr.bf16.mxu1 %v13974_v12  ;;  %v14010_v12 = vld [vmem:[#allocation2 + $0x2364] ss:$16 sps:$4 sm:$0xff]  }
 0x297   :  { %8228 = vmatpush1.bf16.msra.mxu0 %v13969_v13  ;;  %v14005_v13 = vld [vmem:[#allocation2 + $0x2160] ss:$16 sps:$4 sm:$0xff]  }
 0x298   :  { %8269 = vmatpush1.bf16.msra.mxu1 %v13972_v14  ;;  %8229 = vmatprep.subr.bf16.mxu0 %v13977_v15  ;;  %v14008_v14 = vld [vmem:[#allocation2 + $0x2360] ss:$16 sps:$4 sm:$0xff]   ;;  %v14013_v15 = vld [vmem:[#allocation2 + $0x2144] ss:$16 sps:$4 sm:$0xff]  }
 0x299   :  { %8270 = vmatprep.subr.bf16.mxu1 %v13980_v25  ;;  %v14016_v25 = vld [vmem:[#allocation2 + $0x2344] ss:$16 sps:$4 sm:$0xff]  }
 0x29b   :  { %8230 = vmatpush1.bf16.msra.mxu0 %v13975_v27  ;;  %v14011_v27 = vld [vmem:[#allocation2 + $0x2140] ss:$16 sps:$4 sm:$0xff]  }
 0x29c   :  { %8271 = vmatpush1.bf16.msra.mxu1 %v13978_v28  ;;  %8231 = vmatprep.subr.bf16.mxu0 %v13983_v30  ;;  %v14014_v28 = vld [vmem:[#allocation2 + $0x2340] ss:$16 sps:$4 sm:$0xff]   ;;  %v14019_v30 = vld [vmem:[#allocation2 + $0x2124] ss:$16 sps:$4 sm:$0xff]  }
 0x29d   :  { %8272 = vmatprep.subr.bf16.mxu1 %v13986_v26  ;;  %v14022_v26 = vld [vmem:[#allocation2 + $0x2324] ss:$16 sps:$4 sm:$0xff]  }
 0x29f   :  { %8232 = vmatpush2.bf16.msra.mxu0 %v13981_v55  ;;  %v14017_v55 = vld [vmem:[#allocation2 + $0x2120] ss:$16 sps:$4 sm:$0xff]  }
 0x2a0   :  { %8273 = vmatpush2.bf16.msra.mxu1 %v13984_v36  ;;  %8233 = vmatprep.subr.bf16.mxu0 %v13989_v44  ;;  %v14020_v36 = vld [vmem:[#allocation2 + $0x2320] ss:$16 sps:$4 sm:$0xff]   ;;  %v14025_v44 = vld [vmem:[#allocation2 + $0x2104] ss:$16 sps:$4 sm:$0xff]  }
 0x2a1   :  { %8274 = vmatprep.subr.bf16.mxu1 %v13992_v31  ;;  %v14028_v31 = vld [vmem:[#allocation2 + $0x2304] ss:$16 sps:$4 sm:$0xff]  }
 0x2a3   :  { %8234 = vmatpush2.bf16.msra.mxu0 %v13987_v34  ;;  %v14023_v34 = vld [vmem:[#allocation2 + $0x2100] ss:$16 sps:$4 sm:$0xff]  }
 0x2a4   :  { %8275 = vmatpush2.bf16.msra.mxu1 %v13990_v46  ;;  %8235 = vmatprep.subr.bf16.mxu0 %v13995_v53  ;;  %v14026_v46 = vld [vmem:[#allocation2 + $0x2300] ss:$16 sps:$4 sm:$0xff]  }
 0x2a5   :  { %8276 = vmatprep.subr.bf16.mxu1 %v13998_v54  ;;  %v197_v53 = vld [vmem:[%s15964_s0 + $0x100] sm:$0xff]  ;;  %v199_v54 = vld [vmem:[%s15964_s0 + $0x110] sm:$0xff] }
 0x2a7   :  { %8236 = vmatpush2.bf16.msra.mxu0 %v13993_v58  ;;  %v14031_v58 = vld [vmem:[#allocation2 + $0x24e4] ss:$16 sps:$4 sm:$0xff]  }
 0x2a8   :  { %8277 = vmatpush2.bf16.msra.mxu1 %v13996_v59  ;;  %8237 = vmatprep.subr.bf16.mxu0 %v14001_v60  ;;  %v14034_v59 = vld [vmem:[#allocation2 + $0xec] ss:$16 sps:$4 sm:$0xff]  }
 0x2a9   :  { %8278 = vmatprep.subr.bf16.mxu1 %v14004_v35  ;;  %v202_v60 = vld [vmem:[%s15964_s0 + $0x128] sm:$0xff]  ;;  %v14029_v35 = vld [vmem:[#allocation2 + $0x24e0] ss:$16 sps:$4 sm:$0xff]  }
 0x2ab   :  { %8238 = vmatpush2.bf16.msra.mxu0 %v13999_v1  ;;  %v14032_v1 = vld [vmem:[#allocation2 + $0xe8] ss:$16 sps:$4 sm:$0xff]  }
 0x2ac   :  { %8279 = vmatpush2.bf16.msra.mxu1 %v14002_v2  ;;  %8239 = vmatprep.subr.bf16.mxu0 %v14007_v11  ;;  %v15771_v2 = vpack.c.bf16 %v197_v53, %v197_v53  ;;  %v15773_v11 = vpack.c.bf16 %v199_v54, %v199_v54  ;;  %v14044_v53 = vld [vmem:[#allocation2 + $0xa8] ss:$16 sps:$4 sm:$0xff]  }
 0x2ad   :  { %8280 = vmatprep.subr.bf16.mxu1 %v14010_v12  ;;  %v14037_v12 = vld [vmem:[#allocation2 + $0x24c4] ss:$16 sps:$4 sm:$0xff]  }
 0x2af   :  { %8240 = vmatpush2.bf16.msra.mxu0 %v14005_v13  ;;  %v14040_v13 = vld [vmem:[#allocation2 + $0xcc] ss:$16 sps:$4 sm:$0xff]  }
 0x2b0   :  { %8281 = vmatpush2.bf16.msra.mxu1 %v14008_v14  ;;  %8241 = vmatprep.subr.bf16.mxu0 %v14013_v15  ;;  %v14035_v14 = vld [vmem:[#allocation2 + $0x24c0] ss:$16 sps:$4 sm:$0xff]   ;;  %v14038_v15 = vld [vmem:[#allocation2 + $0xc8] ss:$16 sps:$4 sm:$0xff]  }
 0x2b1   :  { %8282 = vmatprep.subr.bf16.mxu1 %v14016_v25  ;;  %v15775_v25 = vpack.c.bf16 %v202_v60, %v202_v60 }
 0x2b3   :  { %8242 = vmatpush2.bf16.msra.mxu0 %v14011_v27 }
 0x2b4   :  { %8283 = vmatpush2.bf16.msra.mxu1 %v14014_v28  ;;  %8243 = vmatprep.subr.bf16.mxu0 %v14019_v30 }
 0x2b5   :  { %8284 = vmatprep.subr.bf16.mxu1 %v14022_v26 }
 0x2b7   :  { %8244 = vmatpush2.bf16.msra.mxu0 %v14017_v55 }
 0x2b8   :  { %8285 = vmatpush2.bf16.msra.mxu1 %v14020_v36  ;;  %8245 = vmatprep.subr.bf16.mxu0 %v14025_v44  ;;  %v14043_v36 = vld [vmem:[#allocation2 + $0x24a4] ss:$16 sps:$4 sm:$0xff]   ;;  %v14046_v44 = vld [vmem:[#allocation2 + $0xac] ss:$16 sps:$4 sm:$0xff]  }
 0x2b9   :  { %8286 = vmatprep.subr.bf16.mxu1 %v14028_v31 }
 0x2bb   :  { %8246 = vmatpush2.bf16.msra.mxu0 %v14023_v34 }
 0x2bc   :  { %8287 = vmatpush2.bf16.msra.mxu1 %v14026_v46  ;;  %8297 = vmatprep.subr.bf16.mxu0 %v14031_v58  ;;  %v14041_v46 = vld [vmem:[#allocation2 + $0x24a0] ss:$16 sps:$4 sm:$0xff]  }
 0x2bd   :  { %8338 = vmatprep.subr.bf16.mxu1 %v14034_v59 }
 0x2be   :  { %v8003_v27 = vpop.f32.mrf.mxu0  ;;  %8248 = vmatmul.mubr.bf16.vlgmr.msra.gmra.mxu0 %v15771_v2 }
 0x2bf   :  { %v8044_v28 = vpop.f32.mrf.mxu1  ;;  %8289 = vmatmul.mubr.bf16.vlgmr.msra.gmra.mxu1 %v15773_v11  ;;  %v8004_v30 = vadd.f32 %v8003_v27, %v15755_v16  ;;  %8298 = vmatpush1.bf16.msra.mxu0 %v14029_v35  ;;  %v14049_v35 = vld [vmem:[#allocation2 + $0x2484] ss:$16 sps:$4 sm:$0xff]   ;;  %v14053_v27 = vld [vmem:[#allocation2 + $0x2460] ss:$16 sps:$4 sm:$0xff]  }
 0x2c0   :  { %8339 = vmatpush1.bf16.msra.mxu1 %v14032_v1  ;;  %v8005_v26 = vpop.f32.mrf.mxu0  ;;  %8299 = vmatprep.subr.bf16.mxu0 %v14037_v12  ;;  %v14052_v1 = vld [vmem:[#allocation2 + $0x8c] ss:$16 sps:$4 sm:$0xff]   ;;  %v14050_v12 = vld [vmem:[#allocation2 + $0x88] ss:$16 sps:$4 sm:$0xff]  }
 0x2c1   :  { %v8046_v55 = vpop.f32.mrf.mxu1  ;;  %8340 = vmatprep.subr.bf16.mxu1 %v14040_v13  ;;  %v15780_v31 = vadd.f32 %v8044_v28, %v8004_v30  ;;  %v8006_v34 = vadd.f32 %v8005_v26, %v15760_v33  ;;  %8329 = vmatprep.mubr.bf16.mxu0 %v15775_v25  ;;  %v14047_v33 = vld [vmem:[#allocation2 + $0x2480] ss:$16 sps:$4 sm:$0xff]   ;;  %v14055_v13 = vld [vmem:[#allocation2 + $0x2464] ss:$16 sps:$4 sm:$0xff]   ;;  %v14056_v28 = vld [vmem:[#allocation2 + $0x68] ss:$16 sps:$4 sm:$0xff]  }
 0x2c2   :  { %8370 = vmatprep.mubr.bf16.mxu1 %v15522_v49  ;;  %v8007_v54 = vpop.f32.mrf.mxu0  ;;  %v14058_v49 = vld [vmem:[#allocation2 + $0x6c] ss:$16 sps:$4 sm:$0xff]   ;;  %v14059_v30 = vld [vmem:[#allocation2 + $0x2440] ss:$16 sps:$4 sm:$0xff]   ;;  %v14062_v26 = vld [vmem:[#allocation2 + $0x48] ss:$16 sps:$4 sm:$0xff]  }
 0x2c3   :  { %v8048_v16 = vpop.f32.mrf.mxu1  ;;  %v15785_v58 = vadd.f32 %v8046_v55, %v8006_v34  ;;  %8300 = vmatpush1.bf16.msra.mxu0 %v14035_v14  ;;  %v14061_v14 = vld [vmem:[#allocation2 + $0x2444] ss:$16 sps:$4 sm:$0xff]   ;;  %v14068_v34 = vld [vmem:[#allocation2 + $0x28] ss:$16 sps:$4 sm:$0xff]   ;;  %v14071_v54 = vld [vmem:[#allocation2 + $0x2400] ss:$16 sps:$4 sm:$0xff]  }
 0x2c4   :  { %8341 = vmatpush1.bf16.msra.mxu1 %v14038_v15  ;;  %v8008_v59 = vpop.f32.mrf.mxu0  ;;  %8301 = vmatprep.subr.bf16.mxu0 %v14043_v36  ;;  %v14064_v15 = vld [vmem:[#allocation2 + $0x4c] ss:$16 sps:$4 sm:$0xff]   ;;  %v14067_v55 = vld [vmem:[#allocation2 + $0x2424] ss:$16 sps:$4 sm:$0xff]   ;;  %v14074_v16 = vld [vmem:[#allocation2 + $0x8] ss:$16 sps:$4 sm:$0xff]  }
 0x2c5   :  { %v8049_v60 = vpop.f32.mrf.mxu1  ;;  %8342 = vmatprep.subr.bf16.mxu1 %v14046_v44  ;;  %v14070_v36 = vld [vmem:[#allocation2 + $0x2c] ss:$16 sps:$4 sm:$0xff]   ;;  %v14065_v44 = vld [vmem:[#allocation2 + $0x2420] ss:$16 sps:$4 sm:$0xff]   ;;  %v14079_v59 = vld [vmem:[#allocation2 + $0x25e4] ss:$16 sps:$4 sm:$0xff]  }
 0x2c6   :  { %v14082_v60 = vld [vmem:[#allocation2 + $0x1ec] ss:$16 sps:$4 sm:$0xff]  }
 0x2c7   :  { %8302 = vmatpush1.bf16.msra.mxu0 %v14041_v46  ;;  %v14073_v46 = vld [vmem:[#allocation2 + $0x2404] ss:$16 sps:$4 sm:$0xff]  }
 0x2c8   :  { %8343 = vmatpush1.bf16.msra.mxu1 %v14044_v53  ;;  %8303 = vmatprep.subr.bf16.mxu0 %v14049_v35  ;;  %v14076_v53 = vld [vmem:[#allocation2 + $0xc] ss:$16 sps:$4 sm:$0xff]   ;;  %v14077_v35 = vld [vmem:[#allocation2 + $0x25e0] ss:$16 sps:$4 sm:$0xff]  }
 0x2c9   :  { %8344 = vmatprep.subr.bf16.mxu1 %v14052_v1  ;;  %v14080_v1 = vld [vmem:[#allocation2 + $0x1e8] ss:$16 sps:$4 sm:$0xff]  }
 0x2cb   :  { %8304 = vmatpush1.bf16.msra.mxu0 %v14047_v33  ;;  %v14085_v33 = vld [vmem:[#allocation2 + $0x25c4] ss:$16 sps:$4 sm:$0xff]  }
 0x2cc   :  { %8345 = vmatpush1.bf16.msra.mxu1 %v14050_v12  ;;  %8305 = vmatprep.subr.bf16.mxu0 %v14055_v13  ;;  %v14088_v12 = vld [vmem:[#allocation2 + $0x1cc] ss:$16 sps:$4 sm:$0xff]   ;;  %v14083_v13 = vld [vmem:[#allocation2 + $0x25c0] ss:$16 sps:$4 sm:$0xff]  }
 0x2cd   :  { %8346 = vmatprep.subr.bf16.mxu1 %v14058_v49  ;;  %v14086_v49 = vld [vmem:[#allocation2 + $0x1c8] ss:$16 sps:$4 sm:$0xff]  }
 0x2cf   :  { %8306 = vmatpush1.bf16.msra.mxu0 %v14053_v27  ;;  %v14091_v27 = vld [vmem:[#allocation2 + $0x25a4] ss:$16 sps:$4 sm:$0xff]  }
 0x2d0   :  { %8347 = vmatpush1.bf16.msra.mxu1 %v14056_v28  ;;  %8307 = vmatprep.subr.bf16.mxu0 %v14061_v14  ;;  %v14094_v28 = vld [vmem:[#allocation2 + $0x1ac] ss:$16 sps:$4 sm:$0xff]   ;;  %v14089_v14 = vld [vmem:[#allocation2 + $0x25a0] ss:$16 sps:$4 sm:$0xff]  }
 0x2d1   :  { %8348 = vmatprep.subr.bf16.mxu1 %v14064_v15  ;;  %v14092_v15 = vld [vmem:[#allocation2 + $0x1a8] ss:$16 sps:$4 sm:$0xff]  }
 0x2d3   :  { %8308 = vmatpush1.bf16.msra.mxu0 %v14059_v30  ;;  %v14097_v30 = vld [vmem:[#allocation2 + $0x2584] ss:$16 sps:$4 sm:$0xff]  }
 0x2d4   :  { %8349 = vmatpush1.bf16.msra.mxu1 %v14062_v26  ;;  %8309 = vmatprep.subr.bf16.mxu0 %v14067_v55  ;;  %v14100_v26 = vld [vmem:[#allocation2 + $0x18c] ss:$16 sps:$4 sm:$0xff]   ;;  %v14095_v55 = vld [vmem:[#allocation2 + $0x2580] ss:$16 sps:$4 sm:$0xff]  }
 0x2d5   :  { %8350 = vmatprep.subr.bf16.mxu1 %v14070_v36  ;;  %v14098_v36 = vld [vmem:[#allocation2 + $0x188] ss:$16 sps:$4 sm:$0xff]  }
 0x2d7   :  { %8310 = vmatpush1.bf16.msra.mxu0 %v14065_v44  ;;  %v14103_v44 = vld [vmem:[#allocation2 + $0x2564] ss:$16 sps:$4 sm:$0xff]  }
 0x2d8   :  { %8351 = vmatpush1.bf16.msra.mxu1 %v14068_v34  ;;  %8311 = vmatprep.subr.bf16.mxu0 %v14073_v46  ;;  %v14106_v34 = vld [vmem:[#allocation2 + $0x16c] ss:$16 sps:$4 sm:$0xff]   ;;  %v14101_v46 = vld [vmem:[#allocation2 + $0x2560] ss:$16 sps:$4 sm:$0xff]  }
 0x2d9   :  { %8352 = vmatprep.subr.bf16.mxu1 %v14076_v53  ;;  %v14104_v53 = vld [vmem:[#allocation2 + $0x168] ss:$16 sps:$4 sm:$0xff]  }
 0x2db   :  { %8312 = vmatpush1.bf16.msra.mxu0 %v14071_v54  ;;  %v14109_v54 = vld [vmem:[#allocation2 + $0x2544] ss:$16 sps:$4 sm:$0xff]  }
 0x2dc   :  { %8353 = vmatpush1.bf16.msra.mxu1 %v14074_v16  ;;  %8313 = vmatprep.subr.bf16.mxu0 %v14079_v59  ;;  %v14112_v16 = vld [vmem:[#allocation2 + $0x14c] ss:$16 sps:$4 sm:$0xff]   ;;  %v14107_v59 = vld [vmem:[#allocation2 + $0x2540] ss:$16 sps:$4 sm:$0xff]  }
 0x2dd   :  { %8354 = vmatprep.subr.bf16.mxu1 %v14082_v60  ;;  %v14110_v60 = vld [vmem:[#allocation2 + $0x148] ss:$16 sps:$4 sm:$0xff]  }
 0x2df   :  { %8314 = vmatpush2.bf16.msra.mxu0 %v14077_v35  ;;  %v14115_v35 = vld [vmem:[#allocation2 + $0x2524] ss:$16 sps:$4 sm:$0xff]  }
 0x2e0   :  { %8355 = vmatpush2.bf16.msra.mxu1 %v14080_v1  ;;  %8315 = vmatprep.subr.bf16.mxu0 %v14085_v33  ;;  %v14118_v1 = vld [vmem:[#allocation2 + $0x12c] ss:$16 sps:$4 sm:$0xff]   ;;  %v14113_v33 = vld [vmem:[#allocation2 + $0x2520] ss:$16 sps:$4 sm:$0xff]  }
 0x2e1   :  { %8356 = vmatprep.subr.bf16.mxu1 %v14088_v12  ;;  %v14116_v12 = vld [vmem:[#allocation2 + $0x128] ss:$16 sps:$4 sm:$0xff]  }
 0x2e3   :  { %8316 = vmatpush2.bf16.msra.mxu0 %v14083_v13  ;;  %v14121_v13 = vld [vmem:[#allocation2 + $0x2504] ss:$16 sps:$4 sm:$0xff]  }
 0x2e4   :  { %8357 = vmatpush2.bf16.msra.mxu1 %v14086_v49  ;;  %8317 = vmatprep.subr.bf16.mxu0 %v14091_v27  ;;  %v14124_v49 = vld [vmem:[#allocation2 + $0x10c] ss:$16 sps:$4 sm:$0xff]   ;;  %v14119_v27 = vld [vmem:[#allocation2 + $0x2500] ss:$16 sps:$4 sm:$0xff]  }
 0x2e5   :  { %8358 = vmatprep.subr.bf16.mxu1 %v14094_v28  ;;  %v14122_v28 = vld [vmem:[#allocation2 + $0x108] ss:$16 sps:$4 sm:$0xff]  }
 0x2e7   :  { %8318 = vmatpush2.bf16.msra.mxu0 %v14089_v14  ;;  %v201_v14 = vld [vmem:[%s15964_s0 + $0x120] sm:$0xff] }
 0x2e8   :  { %8359 = vmatpush2.bf16.msra.mxu1 %v14092_v15  ;;  %8319 = vmatprep.subr.bf16.mxu0 %v14097_v30  ;;  %v14127_v15 = vld [vmem:[#allocation2 + $0x2ec] ss:$16 sps:$4 sm:$0xff]  }
 0x2e9   :  { %8360 = vmatprep.subr.bf16.mxu1 %v14100_v26  ;;  %v14130_v30 = vld [vmem:[#allocation2 + $0x4ec] ss:$16 sps:$4 sm:$0xff]   ;;  %v14125_v26 = vld [vmem:[#allocation2 + $0x2e8] ss:$16 sps:$4 sm:$0xff]  }
 0x2eb   :  { %8320 = vmatpush2.bf16.msra.mxu0 %v14095_v55  ;;  %v14128_v55 = vld [vmem:[#allocation2 + $0x4e8] ss:$16 sps:$4 sm:$0xff]  }
 0x2ec   :  { %8361 = vmatpush2.bf16.msra.mxu1 %v14098_v36  ;;  %8321 = vmatprep.subr.bf16.mxu0 %v14103_v44  ;;  %v15790_v36 = vpack.c.bf16 %v201_v14, %v201_v14  ;;  %v14133_v44 = vld [vmem:[#allocation2 + $0x2cc] ss:$16 sps:$4 sm:$0xff]  }
 0x2ed   :  { %8362 = vmatprep.subr.bf16.mxu1 %v14106_v34  ;;  %v14136_v34 = vld [vmem:[#allocation2 + $0x4cc] ss:$16 sps:$4 sm:$0xff]  }
 0x2ef   :  { %8322 = vmatpush2.bf16.msra.mxu0 %v14101_v46  ;;  %v14131_v46 = vld [vmem:[#allocation2 + $0x2c8] ss:$16 sps:$4 sm:$0xff]  }
 0x2f0   :  { %8363 = vmatpush2.bf16.msra.mxu1 %v14104_v53  ;;  %8323 = vmatprep.subr.bf16.mxu0 %v14109_v54  ;;  %v14134_v53 = vld [vmem:[#allocation2 + $0x4c8] ss:$16 sps:$4 sm:$0xff]  }
 0x2f1   :  { %8364 = vmatprep.subr.bf16.mxu1 %v14112_v16 }
 0x2f3   :  { %8324 = vmatpush2.bf16.msra.mxu0 %v14107_v59 }
 0x2f4   :  { %8365 = vmatpush2.bf16.msra.mxu1 %v14110_v60  ;;  %8325 = vmatprep.subr.bf16.mxu0 %v14115_v35 }
 0x2f5   :  { %8366 = vmatprep.subr.bf16.mxu1 %v14118_v1  ;;  %v14139_v1 = vld [vmem:[#allocation2 + $0x2ac] ss:$16 sps:$4 sm:$0xff]  }
 0x2f7   :  { %8326 = vmatpush2.bf16.msra.mxu0 %v14113_v33  ;;  %v14142_v33 = vld [vmem:[#allocation2 + $0x4ac] ss:$16 sps:$4 sm:$0xff]  }
 0x2f8   :  { %8367 = vmatpush2.bf16.msra.mxu1 %v14116_v12  ;;  %8327 = vmatprep.subr.bf16.mxu0 %v14121_v13 }
 0x2f9   :  { %8368 = vmatprep.subr.bf16.mxu1 %v14124_v49  ;;  %v14137_v49 = vld [vmem:[#allocation2 + $0x2a8] ss:$16 sps:$4 sm:$0xff]  }
 0x2fb   :  { %8328 = vmatpush2.bf16.msra.mxu0 %v14119_v27  ;;  %v14140_v27 = vld [vmem:[#allocation2 + $0x4a8] ss:$16 sps:$4 sm:$0xff]  }
 0x2fc   :  { %8369 = vmatpush2.bf16.msra.mxu1 %v14122_v28  ;;  %8379 = vmatprep.subr.bf16.mxu0 %v14127_v15 }
 0x2fd   :  { %8420 = vmatprep.subr.bf16.mxu1 %v14130_v30  ;;  %v14145_v30 = vld [vmem:[#allocation2 + $0x28c] ss:$16 sps:$4 sm:$0xff]  }
 0x2fe   :  { %v8085_v54 = vpop.f32.mrf.mxu0  ;;  %8330 = vmatmul.mubr.bf16.vlgmr.msra.gmra.mxu0 %v15790_v36 }
 0x2ff   :  { %v8126_v16 = vpop.f32.mrf.mxu1  ;;  %8371 = vmatmul.mubr.bf16.vlgmr.msra.gmra.mxu1 %v15537_v8  ;;  %v8086_v59 = vadd.f32 %v8085_v54, %v15780_v31  ;;  %8380 = vmatpush1.bf16.msra.mxu0 %v14125_v26  ;;  %v14148_v26 = vld [vmem:[#allocation2 + $0x48c] ss:$16 sps:$4 sm:$0xff]   ;;  %v14155_v54 = vld [vmem:[#allocation2 + $0x248] ss:$16 sps:$4 sm:$0xff]  }
 0x300   :  { %8421 = vmatpush1.bf16.msra.mxu1 %v14128_v55  ;;  %v8087_v60 = vpop.f32.mrf.mxu0  ;;  %8381 = vmatprep.subr.bf16.mxu0 %v14133_v44  ;;  %v14146_v55 = vld [vmem:[#allocation2 + $0x488] ss:$16 sps:$4 sm:$0xff]  }
 0x301   :  { %v8128_v35 = vpop.f32.mrf.mxu1  ;;  %8422 = vmatprep.subr.bf16.mxu1 %v14136_v34  ;;  %v15795_v12 = vadd.f32 %v8126_v16, %v8086_v59  ;;  %v8088_v13 = vadd.f32 %v8087_v60, %v15785_v58  ;;  %8411 = vmatprep.mubr.bf16.mxu0 %v15527_v52  ;;  %v14143_v58 = vld [vmem:[#allocation2 + $0x288] ss:$16 sps:$4 sm:$0xff]   ;;  %v14151_v52 = vld [vmem:[#allocation2 + $0x26c] ss:$16 sps:$4 sm:$0xff]  }
 0x302   :  { %8452 = vmatprep.mubr.bf16.mxu1 %v15546_v37  ;;  %v8089_v8 = vpop.f32.mrf.mxu0  ;;  %v14154_v37 = vld [vmem:[#allocation2 + $0x46c] ss:$16 sps:$4 sm:$0xff]   ;;  %v14149_v44 = vld [vmem:[#allocation2 + $0x268] ss:$16 sps:$4 sm:$0xff]  }
 0x303   :  { %v8130_v31 = vpop.f32.mrf.mxu1  ;;  %v15800_v28 = vadd.f32 %v8128_v35, %v8088_v13  ;;  %8382 = vmatpush1.bf16.msra.mxu0 %v14131_v46  ;;  %v14152_v34 = vld [vmem:[#allocation2 + $0x468] ss:$16 sps:$4 sm:$0xff]   ;;  %v14157_v46 = vld [vmem:[#allocation2 + $0x24c] ss:$16 sps:$4 sm:$0xff]  }
 0x304   :  { %8423 = vmatpush1.bf16.msra.mxu1 %v14134_v53  ;;  %v8090_v14 = vpop.f32.mrf.mxu0  ;;  %8383 = vmatprep.subr.bf16.mxu0 %v14139_v1  ;;  %v14160_v53 = vld [vmem:[#allocation2 + $0x44c] ss:$16 sps:$4 sm:$0xff]   ;;  %v14158_v16 = vld [vmem:[#allocation2 + $0x448] ss:$16 sps:$4 sm:$0xff]  }
 0x305   :  { %v8131_v15 = vpop.f32.mrf.mxu1  ;;  %8424 = vmatprep.subr.bf16.mxu1 %v14142_v33  ;;  %v14163_v59 = vld [vmem:[#allocation2 + $0x22c] ss:$16 sps:$4 sm:$0xff]   ;;  %v14161_v35 = vld [vmem:[#allocation2 + $0x228] ss:$16 sps:$4 sm:$0xff]  }
 0x306   :  { %v14166_v60 = vld [vmem:[#allocation2 + $0x42c] ss:$16 sps:$4 sm:$0xff]   ;;  %v14164_v1 = vld [vmem:[#allocation2 + $0x428] ss:$16 sps:$4 sm:$0xff]  }
 0x307   :  { %8384 = vmatpush1.bf16.msra.mxu0 %v14137_v49  ;;  %v14169_v33 = vld [vmem:[#allocation2 + $0x20c] ss:$16 sps:$4 sm:$0xff]   ;;  %v14167_v49 = vld [vmem:[#allocation2 + $0x208] ss:$16 sps:$4 sm:$0xff]  }
 0x308   :  { %8425 = vmatpush1.bf16.msra.mxu1 %v14140_v27  ;;  %8385 = vmatprep.subr.bf16.mxu0 %v14145_v30  ;;  %v14172_v13 = vld [vmem:[#allocation2 + $0x40c] ss:$16 sps:$4 sm:$0xff]   ;;  %v14170_v27 = vld [vmem:[#allocation2 + $0x408] ss:$16 sps:$4 sm:$0xff]  }
 0x309   :  { %8426 = vmatprep.subr.bf16.mxu1 %v14148_v26  ;;  %v14175_v8 = vld [vmem:[#allocation2 + $0x3ec] ss:$16 sps:$4 sm:$0xff]   ;;  %v14173_v14 = vld [vmem:[#allocation2 + $0x3e8] ss:$16 sps:$4 sm:$0xff]  }
 0x30a   :  { %v14178_v31 = vld [vmem:[#allocation2 + $0x5ec] ss:$16 sps:$4 sm:$0xff]   ;;  %v14176_v15 = vld [vmem:[#allocation2 + $0x5e8] ss:$16 sps:$4 sm:$0xff]  }
 0x30b   :  { %8386 = vmatpush1.bf16.msra.mxu0 %v14143_v58  ;;  %v14181_v30 = vld [vmem:[#allocation2 + $0x3cc] ss:$16 sps:$4 sm:$0xff]   ;;  %v14179_v58 = vld [vmem:[#allocation2 + $0x3c8] ss:$16 sps:$4 sm:$0xff]  }
 0x30c   :  { %8427 = vmatpush1.bf16.msra.mxu1 %v14146_v55  ;;  %8387 = vmatprep.subr.bf16.mxu0 %v14151_v52  ;;  %v14184_v26 = vld [vmem:[#allocation2 + $0x5cc] ss:$16 sps:$4 sm:$0xff]   ;;  %v14182_v55 = vld [vmem:[#allocation2 + $0x5c8] ss:$16 sps:$4 sm:$0xff]  }
 0x30d   :  { %8428 = vmatprep.subr.bf16.mxu1 %v14154_v37  ;;  %v14187_v52 = vld [vmem:[#allocation2 + $0x3ac] ss:$16 sps:$4 sm:$0xff]  }
 0x30e   :  { %v14190_v37 = vld [vmem:[#allocation2 + $0x5ac] ss:$16 sps:$4 sm:$0xff]  }
 0x30f   :  { %8388 = vmatpush1.bf16.msra.mxu0 %v14149_v44  ;;  %v14185_v44 = vld [vmem:[#allocation2 + $0x3a8] ss:$16 sps:$4 sm:$0xff]  }
 0x310   :  { %8429 = vmatpush1.bf16.msra.mxu1 %v14152_v34  ;;  %8389 = vmatprep.subr.bf16.mxu0 %v14157_v46  ;;  %v14188_v34 = vld [vmem:[#allocation2 + $0x5a8] ss:$16 sps:$4 sm:$0xff]   ;;  %v14193_v46 = vld [vmem:[#allocation2 + $0x38c] ss:$16 sps:$4 sm:$0xff]  }
 0x311   :  { %8430 = vmatprep.subr.bf16.mxu1 %v14160_v53  ;;  %v14196_v53 = vld [vmem:[#allocation2 + $0x58c] ss:$16 sps:$4 sm:$0xff]  }
 0x313   :  { %8390 = vmatpush1.bf16.msra.mxu0 %v14155_v54  ;;  %v14191_v54 = vld [vmem:[#allocation2 + $0x388] ss:$16 sps:$4 sm:$0xff]  }
 0x314   :  { %8431 = vmatpush1.bf16.msra.mxu1 %v14158_v16  ;;  %8391 = vmatprep.subr.bf16.mxu0 %v14163_v59  ;;  %v14194_v16 = vld [vmem:[#allocation2 + $0x588] ss:$16 sps:$4 sm:$0xff]   ;;  %v14199_v59 = vld [vmem:[#allocation2 + $0x36c] ss:$16 sps:$4 sm:$0xff]  }
 0x315   :  { %8432 = vmatprep.subr.bf16.mxu1 %v14166_v60  ;;  %v14202_v60 = vld [vmem:[#allocation2 + $0x56c] ss:$16 sps:$4 sm:$0xff]  }
 0x317   :  { %8392 = vmatpush1.bf16.msra.mxu0 %v14161_v35  ;;  %v14197_v35 = vld [vmem:[#allocation2 + $0x368] ss:$16 sps:$4 sm:$0xff]  }
 0x318   :  { %8433 = vmatpush1.bf16.msra.mxu1 %v14164_v1  ;;  %8393 = vmatprep.subr.bf16.mxu0 %v14169_v33  ;;  %v14200_v1 = vld [vmem:[#allocation2 + $0x568] ss:$16 sps:$4 sm:$0xff]   ;;  %v14205_v33 = vld [vmem:[#allocation2 + $0x34c] ss:$16 sps:$4 sm:$0xff]  }
 0x319   :  { %8434 = vmatprep.subr.bf16.mxu1 %v14172_v13  ;;  %v14208_v13 = vld [vmem:[#allocation2 + $0x54c] ss:$16 sps:$4 sm:$0xff]  }
 0x31b   :  { %8394 = vmatpush1.bf16.msra.mxu0 %v14167_v49  ;;  %v14203_v49 = vld [vmem:[#allocation2 + $0x348] ss:$16 sps:$4 sm:$0xff]  }
 0x31c   :  { %8435 = vmatpush1.bf16.msra.mxu1 %v14170_v27  ;;  %8395 = vmatprep.subr.bf16.mxu0 %v14175_v8  ;;  %v14206_v27 = vld [vmem:[#allocation2 + $0x548] ss:$16 sps:$4 sm:$0xff]   ;;  %v14211_v8 = vld [vmem:[#allocation2 + $0x32c] ss:$16 sps:$4 sm:$0xff]  }
 0x31d   :  { %8436 = vmatprep.subr.bf16.mxu1 %v14178_v31  ;;  %v14214_v31 = vld [vmem:[#allocation2 + $0x52c] ss:$16 sps:$4 sm:$0xff]  }
 0x31f   :  { %8396 = vmatpush2.bf16.msra.mxu0 %v14173_v14  ;;  %v14209_v14 = vld [vmem:[#allocation2 + $0x328] ss:$16 sps:$4 sm:$0xff]  }
 0x320   :  { %8437 = vmatpush2.bf16.msra.mxu1 %v14176_v15  ;;  %8397 = vmatprep.subr.bf16.mxu0 %v14181_v30  ;;  %v14212_v15 = vld [vmem:[#allocation2 + $0x528] ss:$16 sps:$4 sm:$0xff]   ;;  %v14217_v30 = vld [vmem:[#allocation2 + $0x30c] ss:$16 sps:$4 sm:$0xff]  }
 0x321   :  { %8438 = vmatprep.subr.bf16.mxu1 %v14184_v26  ;;  %v14220_v26 = vld [vmem:[#allocation2 + $0x50c] ss:$16 sps:$4 sm:$0xff]  }
 0x323   :  { %8398 = vmatpush2.bf16.msra.mxu0 %v14179_v58  ;;  %v14215_v58 = vld [vmem:[#allocation2 + $0x308] ss:$16 sps:$4 sm:$0xff]  }
 0x324   :  { %8439 = vmatpush2.bf16.msra.mxu1 %v14182_v55  ;;  %8399 = vmatprep.subr.bf16.mxu0 %v14187_v52  ;;  %v14218_v55 = vld [vmem:[#allocation2 + $0x508] ss:$16 sps:$4 sm:$0xff]   ;;  %v14223_v52 = vld [vmem:[#allocation2 + $0x6ec] ss:$16 sps:$4 sm:$0xff]  }
 0x325   :  { %8440 = vmatprep.subr.bf16.mxu1 %v14190_v37  ;;  %v14226_v37 = vld [vmem:[#allocation2 + $0x8ec] ss:$16 sps:$4 sm:$0xff]  }
 0x327   :  { %8400 = vmatpush2.bf16.msra.mxu0 %v14185_v44  ;;  %v14221_v44 = vld [vmem:[#allocation2 + $0x6e8] ss:$16 sps:$4 sm:$0xff]  }
 0x328   :  { %8441 = vmatpush2.bf16.msra.mxu1 %v14188_v34  ;;  %8401 = vmatprep.subr.bf16.mxu0 %v14193_v46  ;;  %v14224_v34 = vld [vmem:[#allocation2 + $0x8e8] ss:$16 sps:$4 sm:$0xff]   ;;  %v14229_v46 = vld [vmem:[#allocation2 + $0x6cc] ss:$16 sps:$4 sm:$0xff]  }
 0x329   :  { %8442 = vmatprep.subr.bf16.mxu1 %v14196_v53  ;;  %v14232_v53 = vld [vmem:[#allocation2 + $0x8cc] ss:$16 sps:$4 sm:$0xff]  }
 0x32b   :  { %8402 = vmatpush2.bf16.msra.mxu0 %v14191_v54  ;;  %v14227_v54 = vld [vmem:[#allocation2 + $0x6c8] ss:$16 sps:$4 sm:$0xff]  }
 0x32c   :  { %8443 = vmatpush2.bf16.msra.mxu1 %v14194_v16  ;;  %8403 = vmatprep.subr.bf16.mxu0 %v14199_v59  ;;  %v14230_v16 = vld [vmem:[#allocation2 + $0x8c8] ss:$16 sps:$4 sm:$0xff]  }
 0x32d   :  { %8444 = vmatprep.subr.bf16.mxu1 %v14202_v60 }
 0x32f   :  { %8404 = vmatpush2.bf16.msra.mxu0 %v14197_v35 }
 0x330   :  { %8445 = vmatpush2.bf16.msra.mxu1 %v14200_v1  ;;  %8405 = vmatprep.subr.bf16.mxu0 %v14205_v33 }
 0x331   :  { %8446 = vmatprep.subr.bf16.mxu1 %v14208_v13  ;;  %v14235_v13 = vld [vmem:[#allocation2 + $0x6ac] ss:$16 sps:$4 sm:$0xff]  }
 0x333   :  { %8406 = vmatpush2.bf16.msra.mxu0 %v14203_v49  ;;  %v14238_v49 = vld [vmem:[#allocation2 + $0x8ac] ss:$16 sps:$4 sm:$0xff]  }
 0x334   :  { %8447 = vmatpush2.bf16.msra.mxu1 %v14206_v27  ;;  %8407 = vmatprep.subr.bf16.mxu0 %v14211_v8 }
 0x335   :  { %8448 = vmatprep.subr.bf16.mxu1 %v14214_v31  ;;  %v14233_v31 = vld [vmem:[#allocation2 + $0x6a8] ss:$16 sps:$4 sm:$0xff]  }
 0x337   :  { %8408 = vmatpush2.bf16.msra.mxu0 %v14209_v14  ;;  %v14236_v14 = vld [vmem:[#allocation2 + $0x8a8] ss:$16 sps:$4 sm:$0xff]  }
 0x338   :  { %8449 = vmatpush2.bf16.msra.mxu1 %v14212_v15  ;;  %8409 = vmatprep.subr.bf16.mxu0 %v14217_v30 }
 0x339   :  { %8450 = vmatprep.subr.bf16.mxu1 %v14220_v26  ;;  %v14241_v26 = vld [vmem:[#allocation2 + $0x68c] ss:$16 sps:$4 sm:$0xff]  }
 0x33b   :  { %8410 = vmatpush2.bf16.msra.mxu0 %v14215_v58  ;;  %v14244_v58 = vld [vmem:[#allocation2 + $0x88c] ss:$16 sps:$4 sm:$0xff]  }
 0x33c   :  { %8451 = vmatpush2.bf16.msra.mxu1 %v14218_v55  ;;  %8461 = vmatprep.subr.bf16.mxu0 %v14223_v52  ;;  %v14242_v55 = vld [vmem:[#allocation2 + $0x888] ss:$16 sps:$4 sm:$0xff]  }
 0x33d   :  { %8502 = vmatprep.subr.bf16.mxu1 %v14226_v37  ;;  %v14245_v52 = vld [vmem:[#allocation2 + $0x668] ss:$16 sps:$4 sm:$0xff]  }
 0x33e   :  { %v8167_v59 = vpop.f32.mrf.mxu0  ;;  %8412 = vmatmul.mubr.bf16.vlgmr.msra.gmra.mxu0 %v15539_v9  ;;  %v14248_v37 = vld [vmem:[#allocation2 + $0x868] ss:$16 sps:$4 sm:$0xff]  }
 0x33f   :  { %v8208_v60 = vpop.f32.mrf.mxu1  ;;  %8453 = vmatmul.mubr.bf16.vlgmr.msra.gmra.mxu1 %v15561_v20  ;;  %v8168_v35 = vadd.f32 %v8167_v59, %v15795_v12  ;;  %8462 = vmatpush1.bf16.msra.mxu0 %v14221_v44  ;;  %v14253_v44 = vld [vmem:[#allocation2 + $0x64c] ss:$16 sps:$4 sm:$0xff]   ;;  %v14257_v59 = vld [vmem:[#allocation2 + $0x628] ss:$16 sps:$4 sm:$0xff]  }
 0x340   :  { %8503 = vmatpush1.bf16.msra.mxu1 %v14224_v34  ;;  %v8169_v1 = vpop.f32.mrf.mxu0  ;;  %8463 = vmatprep.subr.bf16.mxu0 %v14229_v46  ;;  %v14256_v34 = vld [vmem:[#allocation2 + $0x84c] ss:$16 sps:$4 sm:$0xff]   ;;  %v14251_v46 = vld [vmem:[#allocation2 + $0x648] ss:$16 sps:$4 sm:$0xff]  }
 0x341   :  { %v8210_v33 = vpop.f32.mrf.mxu1  ;;  %8504 = vmatprep.subr.bf16.mxu1 %v14232_v53  ;;  %v15805_v27 = vadd.f32 %v8208_v60, %v8168_v35  ;;  %v8170_v8 = vadd.f32 %v8169_v1, %v15800_v28  ;;  %8493 = vmatprep.mubr.bf16.mxu0 %v15551_v40  ;;  %v14239_v28 = vld [vmem:[#allocation2 + $0x688] ss:$16 sps:$4 sm:$0xff]   ;;  %v14247_v40 = vld [vmem:[#allocation2 + $0x66c] ss:$16 sps:$4 sm:$0xff]  }
 0x342   :  { %8534 = vmatprep.mubr.bf16.mxu1 %v15570_v29  ;;  %v8171_v9 = vpop.f32.mrf.mxu0  ;;  %v14250_v29 = vld [vmem:[#allocation2 + $0x86c] ss:$16 sps:$4 sm:$0xff]   ;;  %v14254_v53 = vld [vmem:[#allocation2 + $0x848] ss:$16 sps:$4 sm:$0xff]  }
 0x343   :  { %v8212_v20 = vpop.f32.mrf.mxu1  ;;  %v15810_v12 = vadd.f32 %v8210_v33, %v8170_v8  ;;  %8464 = vmatpush1.bf16.msra.mxu0 %v14227_v54  ;;  %v14259_v54 = vld [vmem:[#allocation2 + $0x62c] ss:$16 sps:$4 sm:$0xff]   ;;  %v14260_v60 = vld [vmem:[#allocation2 + $0x828] ss:$16 sps:$4 sm:$0xff]  }
 0x344   :  { %8505 = vmatpush1.bf16.msra.mxu1 %v14230_v16  ;;  %v8172_v15 = vpop.f32.mrf.mxu0  ;;  %8465 = vmatprep.subr.bf16.mxu0 %v14235_v13  ;;  %v14262_v16 = vld [vmem:[#allocation2 + $0x82c] ss:$16 sps:$4 sm:$0xff]   ;;  %v14263_v33 = vld [vmem:[#allocation2 + $0x608] ss:$16 sps:$4 sm:$0xff]  }
 0x345   :  { %v8213_v30 = vpop.f32.mrf.mxu1  ;;  %8506 = vmatprep.subr.bf16.mxu1 %v14238_v49  ;;  %v14265_v35 = vld [vmem:[#allocation2 + $0x60c] ss:$16 sps:$4 sm:$0xff]   ;;  %v14266_v13 = vld [vmem:[#allocation2 + $0x808] ss:$16 sps:$4 sm:$0xff]  }
 0x346   :  { %v14268_v1 = vld [vmem:[#allocation2 + $0x80c] ss:$16 sps:$4 sm:$0xff]   ;;  %v14275_v15 = vld [vmem:[#allocation2 + $0x7c8] ss:$16 sps:$4 sm:$0xff]  }
 0x347   :  { %8466 = vmatpush1.bf16.msra.mxu0 %v14233_v31  ;;  %v14271_v49 = vld [vmem:[#allocation2 + $0x7ec] ss:$16 sps:$4 sm:$0xff]   ;;  %v14269_v31 = vld [vmem:[#allocation2 + $0x7e8] ss:$16 sps:$4 sm:$0xff]  }
 0x348   :  { %8507 = vmatpush1.bf16.msra.mxu1 %v14236_v14  ;;  %8467 = vmatprep.subr.bf16.mxu0 %v14241_v26  ;;  %v14274_v8 = vld [vmem:[#allocation2 + $0x9ec] ss:$16 sps:$4 sm:$0xff]   ;;  %v14272_v14 = vld [vmem:[#allocation2 + $0x9e8] ss:$16 sps:$4 sm:$0xff]  }
 0x349   :  { %8508 = vmatprep.subr.bf16.mxu1 %v14244_v58  ;;  %v14277_v9 = vld [vmem:[#allocation2 + $0x7cc] ss:$16 sps:$4 sm:$0xff]   ;;  %v14278_v30 = vld [vmem:[#allocation2 + $0x9c8] ss:$16 sps:$4 sm:$0xff]  }
 0x34a   :  { %v14280_v20 = vld [vmem:[#allocation2 + $0x9cc] ss:$16 sps:$4 sm:$0xff]  }
 0x34b   :  { %8468 = vmatpush1.bf16.msra.mxu0 %v14239_v28  ;;  %v14283_v26 = vld [vmem:[#allocation2 + $0x7ac] ss:$16 sps:$4 sm:$0xff]   ;;  %v14281_v28 = vld [vmem:[#allocation2 + $0x7a8] ss:$16 sps:$4 sm:$0xff]  }
 0x34c   :  { %8509 = vmatpush1.bf16.msra.mxu1 %v14242_v55  ;;  %8469 = vmatprep.subr.bf16.mxu0 %v14247_v40  ;;  %v14286_v58 = vld [vmem:[#allocation2 + $0x9ac] ss:$16 sps:$4 sm:$0xff]   ;;  %v14284_v55 = vld [vmem:[#allocation2 + $0x9a8] ss:$16 sps:$4 sm:$0xff]  }
 0x34d   :  { %8510 = vmatprep.subr.bf16.mxu1 %v14250_v29  ;;  %v14289_v40 = vld [vmem:[#allocation2 + $0x78c] ss:$16 sps:$4 sm:$0xff]  }
 0x34e   :  { %v14292_v29 = vld [vmem:[#allocation2 + $0x98c] ss:$16 sps:$4 sm:$0xff]  }
 0x34f   :  { %8470 = vmatpush1.bf16.msra.mxu0 %v14245_v52  ;;  %v14287_v52 = vld [vmem:[#allocation2 + $0x788] ss:$16 sps:$4 sm:$0xff]  }
 0x350   :  { %8511 = vmatpush1.bf16.msra.mxu1 %v14248_v37  ;;  %8471 = vmatprep.subr.bf16.mxu0 %v14253_v44  ;;  %v14290_v37 = vld [vmem:[#allocation2 + $0x988] ss:$16 sps:$4 sm:$0xff]   ;;  %v14295_v44 = vld [vmem:[#allocation2 + $0x76c] ss:$16 sps:$4 sm:$0xff]  }
 0x351   :  { %8512 = vmatprep.subr.bf16.mxu1 %v14256_v34  ;;  %v14298_v34 = vld [vmem:[#allocation2 + $0x96c] ss:$16 sps:$4 sm:$0xff]  }
 0x353   :  { %8472 = vmatpush1.bf16.msra.mxu0 %v14251_v46  ;;  %v14293_v46 = vld [vmem:[#allocation2 + $0x768] ss:$16 sps:$4 sm:$0xff]  }
 0x354   :  { %8513 = vmatpush1.bf16.msra.mxu1 %v14254_v53  ;;  %8473 = vmatprep.subr.bf16.mxu0 %v14259_v54  ;;  %v14296_v53 = vld [vmem:[#allocation2 + $0x968] ss:$16 sps:$4 sm:$0xff]   ;;  %v14301_v54 = vld [vmem:[#allocation2 + $0x74c] ss:$16 sps:$4 sm:$0xff]  }
 0x355   :  { %8514 = vmatprep.subr.bf16.mxu1 %v14262_v16  ;;  %v14304_v16 = vld [vmem:[#allocation2 + $0x94c] ss:$16 sps:$4 sm:$0xff]  }
 0x357   :  { %8474 = vmatpush1.bf16.msra.mxu0 %v14257_v59  ;;  %v14299_v59 = vld [vmem:[#allocation2 + $0x748] ss:$16 sps:$4 sm:$0xff]  }
 0x358   :  { %8515 = vmatpush1.bf16.msra.mxu1 %v14260_v60  ;;  %8475 = vmatprep.subr.bf16.mxu0 %v14265_v35  ;;  %v14302_v60 = vld [vmem:[#allocation2 + $0x948] ss:$16 sps:$4 sm:$0xff]   ;;  %v14307_v35 = vld [vmem:[#allocation2 + $0x72c] ss:$16 sps:$4 sm:$0xff]  }
 0x359   :  { %8516 = vmatprep.subr.bf16.mxu1 %v14268_v1  ;;  %v14310_v1 = vld [vmem:[#allocation2 + $0x92c] ss:$16 sps:$4 sm:$0xff]  }
 0x35b   :  { %8476 = vmatpush1.bf16.msra.mxu0 %v14263_v33  ;;  %v14305_v33 = vld [vmem:[#allocation2 + $0x728] ss:$16 sps:$4 sm:$0xff]  }
 0x35c   :  { %8517 = vmatpush1.bf16.msra.mxu1 %v14266_v13  ;;  %8477 = vmatprep.subr.bf16.mxu0 %v14271_v49  ;;  %v14308_v13 = vld [vmem:[#allocation2 + $0x928] ss:$16 sps:$4 sm:$0xff]   ;;  %v14313_v49 = vld [vmem:[#allocation2 + $0x70c] ss:$16 sps:$4 sm:$0xff]  }
 0x35d   :  { %8518 = vmatprep.subr.bf16.mxu1 %v14274_v8  ;;  %v14316_v8 = vld [vmem:[#allocation2 + $0x90c] ss:$16 sps:$4 sm:$0xff]  }
 0x35f   :  { %8478 = vmatpush2.bf16.msra.mxu0 %v14269_v31  ;;  %v14311_v31 = vld [vmem:[#allocation2 + $0x708] ss:$16 sps:$4 sm:$0xff]  }
 0x360   :  { %8519 = vmatpush2.bf16.msra.mxu1 %v14272_v14  ;;  %8479 = vmatprep.subr.bf16.mxu0 %v14277_v9  ;;  %v14314_v14 = vld [vmem:[#allocation2 + $0x908] ss:$16 sps:$4 sm:$0xff]   ;;  %v14319_v9 = vld [vmem:[#allocation2 + $0xaec] ss:$16 sps:$4 sm:$0xff]  }
 0x361   :  { %8520 = vmatprep.subr.bf16.mxu1 %v14280_v20  ;;  %v14322_v20 = vld [vmem:[#allocation2 + $0xcec] ss:$16 sps:$4 sm:$0xff]  }
 0x363   :  { %8480 = vmatpush2.bf16.msra.mxu0 %v14275_v15  ;;  %v14317_v15 = vld [vmem:[#allocation2 + $0xae8] ss:$16 sps:$4 sm:$0xff]  }
 0x364   :  { %8521 = vmatpush2.bf16.msra.mxu1 %v14278_v30  ;;  %8481 = vmatprep.subr.bf16.mxu0 %v14283_v26  ;;  %v14320_v30 = vld [vmem:[#allocation2 + $0xce8] ss:$16 sps:$4 sm:$0xff]   ;;  %v14325_v26 = vld [vmem:[#allocation2 + $0xacc] ss:$16 sps:$4 sm:$0xff]  }
 0x365   :  { %8522 = vmatprep.subr.bf16.mxu1 %v14286_v58  ;;  %v14328_v58 = vld [vmem:[#allocation2 + $0xccc] ss:$16 sps:$4 sm:$0xff]  }
 0x367   :  { %8482 = vmatpush2.bf16.msra.mxu0 %v14281_v28  ;;  %v14323_v28 = vld [vmem:[#allocation2 + $0xac8] ss:$16 sps:$4 sm:$0xff]  }
 0x368   :  { %8523 = vmatpush2.bf16.msra.mxu1 %v14284_v55  ;;  %8483 = vmatprep.subr.bf16.mxu0 %v14289_v40  ;;  %v14326_v55 = vld [vmem:[#allocation2 + $0xcc8] ss:$16 sps:$4 sm:$0xff]  }
 0x369   :  { %8524 = vmatprep.subr.bf16.mxu1 %v14292_v29 }
 0x36b   :  { %8484 = vmatpush2.bf16.msra.mxu0 %v14287_v52 }
 0x36c   :  { %8525 = vmatpush2.bf16.msra.mxu1 %v14290_v37  ;;  %8485 = vmatprep.subr.bf16.mxu0 %v14295_v44 }
 0x36d   :  { %8526 = vmatprep.subr.bf16.mxu1 %v14298_v34  ;;  %v14331_v34 = vld [vmem:[#allocation2 + $0xaac] ss:$16 sps:$4 sm:$0xff]  }
 0x36f   :  { %8486 = vmatpush2.bf16.msra.mxu0 %v14293_v46  ;;  %v14334_v46 = vld [vmem:[#allocation2 + $0xcac] ss:$16 sps:$4 sm:$0xff]  }
 0x370   :  { %8527 = vmatpush2.bf16.msra.mxu1 %v14296_v53  ;;  %8487 = vmatprep.subr.bf16.mxu0 %v14301_v54 }
 0x371   :  { %8528 = vmatprep.subr.bf16.mxu1 %v14304_v16  ;;  %v14329_v16 = vld [vmem:[#allocation2 + $0xaa8] ss:$16 sps:$4 sm:$0xff]  }
 0x373   :  { %8488 = vmatpush2.bf16.msra.mxu0 %v14299_v59  ;;  %v14332_v59 = vld [vmem:[#allocation2 + $0xca8] ss:$16 sps:$4 sm:$0xff]  }
 0x374   :  { %8529 = vmatpush2.bf16.msra.mxu1 %v14302_v60  ;;  %8489 = vmatprep.subr.bf16.mxu0 %v14307_v35 }
 0x375   :  { %8530 = vmatprep.subr.bf16.mxu1 %v14310_v1  ;;  %v14337_v1 = vld [vmem:[#allocation2 + $0xa8c] ss:$16 sps:$4 sm:$0xff]  }
 0x377   :  { %8490 = vmatpush2.bf16.msra.mxu0 %v14305_v33  ;;  %v14340_v33 = vld [vmem:[#allocation2 + $0xc8c] ss:$16 sps:$4 sm:$0xff]  }
 0x378   :  { %8531 = vmatpush2.bf16.msra.mxu1 %v14308_v13  ;;  %8491 = vmatprep.subr.bf16.mxu0 %v14313_v49  ;;  %v14338_v13 = vld [vmem:[#allocation2 + $0xc88] ss:$16 sps:$4 sm:$0xff]  }
 0x379   :  { %8532 = vmatprep.subr.bf16.mxu1 %v14316_v8  ;;  %v14341_v49 = vld [vmem:[#allocation2 + $0xa68] ss:$16 sps:$4 sm:$0xff]  }
 0x37a   :  { %v14344_v8 = vld [vmem:[#allocation2 + $0xc68] ss:$16 sps:$4 sm:$0xff]  }
 0x37b   :  { %8492 = vmatpush2.bf16.msra.mxu0 %v14311_v31  ;;  %v14349_v31 = vld [vmem:[#allocation2 + $0xa4c] ss:$16 sps:$4 sm:$0xff]  }
 0x37c   :  { %8533 = vmatpush2.bf16.msra.mxu1 %v14314_v14  ;;  %8543 = vmatprep.subr.bf16.mxu0 %v14319_v9  ;;  %v14352_v14 = vld [vmem:[#allocation2 + $0xc4c] ss:$16 sps:$4 sm:$0xff]   ;;  %v14347_v9 = vld [vmem:[#allocation2 + $0xa48] ss:$16 sps:$4 sm:$0xff]  }
 0x37d   :  { %8584 = vmatprep.subr.bf16.mxu1 %v14322_v20  ;;  %v14350_v20 = vld [vmem:[#allocation2 + $0xc48] ss:$16 sps:$4 sm:$0xff]  }
 0x37e   :  { %v8249_v40 = vpop.f32.mrf.mxu0  ;;  %8494 = vmatmul.mubr.bf16.vlgmr.msra.gmra.mxu0 %v15563_v21 }
 0x37f   :  { %v8290_v29 = vpop.f32.mrf.mxu1  ;;  %8535 = vmatmul.mubr.bf16.vlgmr.msra.gmra.mxu1 %v15588_v42  ;;  %v8250_v52 = vadd.f32 %v8249_v40, %v15805_v27  ;;  %8544 = vmatpush1.bf16.msra.mxu0 %v14317_v15  ;;  %v14355_v15 = vld [vmem:[#allocation2 + $0xa2c] ss:$16 sps:$4 sm:$0xff]   ;;  %v14359_v40 = vld [vmem:[#allocation2 + $0xa08] ss:$16 sps:$4 sm:$0xff]  }
 0x380   :  { %8585 = vmatpush1.bf16.msra.mxu1 %v14320_v30  ;;  %v8251_v37 = vpop.f32.mrf.mxu0  ;;  %8545 = vmatprep.subr.bf16.mxu0 %v14325_v26  ;;  %v14358_v30 = vld [vmem:[#allocation2 + $0xc2c] ss:$16 sps:$4 sm:$0xff]   ;;  %v14353_v26 = vld [vmem:[#allocation2 + $0xa28] ss:$16 sps:$4 sm:$0xff]  }
 0x381   :  { %v8292_v44 = vpop.f32.mrf.mxu1  ;;  %8586 = vmatprep.subr.bf16.mxu1 %v14328_v58  ;;  %v15815_v53 = vadd.f32 %v8290_v29, %v8250_v52  ;;  %v8252_v54 = vadd.f32 %v8251_v37, %v15810_v12  ;;  %8575 = vmatprep.mubr.bf16.mxu0 %v15575_v32  ;;  %v14335_v12 = vld [vmem:[#allocation2 + $0xa88] ss:$16 sps:$4 sm:$0xff]   ;;  %v14343_v32 = vld [vmem:[#allocation2 + $0xa6c] ss:$16 sps:$4 sm:$0xff]  }
 0x382   :  { %8616 = vmatprep.mubr.bf16.mxu1 %v15595_v48  ;;  %v8253_v21 = vpop.f32.mrf.mxu0  ;;  %v14346_v48 = vld [vmem:[#allocation2 + $0xc6c] ss:$16 sps:$4 sm:$0xff]   ;;  %v14356_v58 = vld [vmem:[#allocation2 + $0xc28] ss:$16 sps:$4 sm:$0xff]  }
 0x383   :  { %v8294_v42 = vpop.f32.mrf.mxu1  ;;  %v15820_v27 = vadd.f32 %v8292_v44, %v8252_v54  ;;  %8546 = vmatpush1.bf16.msra.mxu0 %v14323_v28  ;;  %v14361_v28 = vld [vmem:[#allocation2 + $0xa0c] ss:$16 sps:$4 sm:$0xff]   ;;  %v14362_v29 = vld [vmem:[#allocation2 + $0xc08] ss:$16 sps:$4 sm:$0xff]  }
 0x384   :  { %8587 = vmatpush1.bf16.msra.mxu1 %v14326_v55  ;;  %v8254_v60 = vpop.f32.mrf.mxu0  ;;  %8547 = vmatprep.subr.bf16.mxu0 %v14331_v34  ;;  %v14364_v55 = vld [vmem:[#allocation2 + $0xc0c] ss:$16 sps:$4 sm:$0xff]   ;;  %v14365_v44 = vld [vmem:[#allocation2 + $0xbe8] ss:$16 sps:$4 sm:$0xff]  }
 0x385   :  { %v8295_v35 = vpop.f32.mrf.mxu1  ;;  %8588 = vmatprep.subr.bf16.mxu1 %v14334_v46  ;;  %v14367_v52 = vld [vmem:[#allocation2 + $0xbec] ss:$16 sps:$4 sm:$0xff]   ;;  %v14368_v34 = vld [vmem:[#allocation2 + $0xde8] ss:$16 sps:$4 sm:$0xff]  }
 0x386   :  { %v14370_v37 = vld [vmem:[#allocation2 + $0xdec] ss:$16 sps:$4 sm:$0xff]   ;;  %v14377_v60 = vld [vmem:[#allocation2 + $0xba8] ss:$16 sps:$4 sm:$0xff]  }
 0x387   :  { %8548 = vmatpush1.bf16.msra.mxu0 %v14329_v16  ;;  %v14373_v46 = vld [vmem:[#allocation2 + $0xbcc] ss:$16 sps:$4 sm:$0xff]   ;;  %v14371_v16 = vld [vmem:[#allocation2 + $0xbc8] ss:$16 sps:$4 sm:$0xff]  }
 0x388   :  { %8589 = vmatpush1.bf16.msra.mxu1 %v14332_v59  ;;  %8549 = vmatprep.subr.bf16.mxu0 %v14337_v1  ;;  %v14376_v54 = vld [vmem:[#allocation2 + $0xdcc] ss:$16 sps:$4 sm:$0xff]   ;;  %v14374_v59 = vld [vmem:[#allocation2 + $0xdc8] ss:$16 sps:$4 sm:$0xff]  }
 0x389   :  { %8590 = vmatprep.subr.bf16.mxu1 %v14340_v33  ;;  %v14379_v21 = vld [vmem:[#allocation2 + $0xbac] ss:$16 sps:$4 sm:$0xff]   ;;  %v14380_v35 = vld [vmem:[#allocation2 + $0xda8] ss:$16 sps:$4 sm:$0xff]  }
 0x38a   :  { %v14382_v42 = vld [vmem:[#allocation2 + $0xdac] ss:$16 sps:$4 sm:$0xff]  }
 0x38b   :  { %8550 = vmatpush1.bf16.msra.mxu0 %v14335_v12  ;;  %v14385_v1 = vld [vmem:[#allocation2 + $0xb8c] ss:$16 sps:$4 sm:$0xff]   ;;  %v14383_v12 = vld [vmem:[#allocation2 + $0xb88] ss:$16 sps:$4 sm:$0xff]  }
 0x38c   :  { %8591 = vmatpush1.bf16.msra.mxu1 %v14338_v13  ;;  %8551 = vmatprep.subr.bf16.mxu0 %v14343_v32  ;;  %v14388_v33 = vld [vmem:[#allocation2 + $0xd8c] ss:$16 sps:$4 sm:$0xff]   ;;  %v14386_v13 = vld [vmem:[#allocation2 + $0xd88] ss:$16 sps:$4 sm:$0xff]  }
 0x38d   :  { %8592 = vmatprep.subr.bf16.mxu1 %v14346_v48  ;;  %v14391_v32 = vld [vmem:[#allocation2 + $0xb6c] ss:$16 sps:$4 sm:$0xff]  }
 0x38e   :  { %v14394_v48 = vld [vmem:[#allocation2 + $0xd6c] ss:$16 sps:$4 sm:$0xff]  }
 0x38f   :  { %8552 = vmatpush1.bf16.msra.mxu0 %v14341_v49  ;;  %v14389_v49 = vld [vmem:[#allocation2 + $0xb68] ss:$16 sps:$4 sm:$0xff]  }
 0x390   :  { %8593 = vmatpush1.bf16.msra.mxu1 %v14344_v8  ;;  %8553 = vmatprep.subr.bf16.mxu0 %v14349_v31  ;;  %v14392_v8 = vld [vmem:[#allocation2 + $0xd68] ss:$16 sps:$4 sm:$0xff]   ;;  %v14397_v31 = vld [vmem:[#allocation2 + $0xb4c] ss:$16 sps:$4 sm:$0xff]  }
 0x391   :  { %8594 = vmatprep.subr.bf16.mxu1 %v14352_v14  ;;  %v14400_v14 = vld [vmem:[#allocation2 + $0xd4c] ss:$16 sps:$4 sm:$0xff]  }
 0x393   :  { %8554 = vmatpush1.bf16.msra.mxu0 %v14347_v9  ;;  %v14395_v9 = vld [vmem:[#allocation2 + $0xb48] ss:$16 sps:$4 sm:$0xff]  }
 0x394   :  { %8595 = vmatpush1.bf16.msra.mxu1 %v14350_v20  ;;  %8555 = vmatprep.subr.bf16.mxu0 %v14355_v15  ;;  %v14398_v20 = vld [vmem:[#allocation2 + $0xd48] ss:$16 sps:$4 sm:$0xff]   ;;  %v14403_v15 = vld [vmem:[#allocation2 + $0xb2c] ss:$16 sps:$4 sm:$0xff]  }
 0x395   :  { %8596 = vmatprep.subr.bf16.mxu1 %v14358_v30  ;;  %v14406_v30 = vld [vmem:[#allocation2 + $0xd2c] ss:$16 sps:$4 sm:$0xff]  }
 0x397   :  { %8556 = vmatpush1.bf16.msra.mxu0 %v14353_v26  ;;  %v14401_v26 = vld [vmem:[#allocation2 + $0xb28] ss:$16 sps:$4 sm:$0xff]  }
 0x398   :  { %8597 = vmatpush1.bf16.msra.mxu1 %v14356_v58  ;;  %8557 = vmatprep.subr.bf16.mxu0 %v14361_v28  ;;  %v14404_v58 = vld [vmem:[#allocation2 + $0xd28] ss:$16 sps:$4 sm:$0xff]   ;;  %v14409_v28 = vld [vmem:[#allocation2 + $0xb0c] ss:$16 sps:$4 sm:$0xff]  }
 0x399   :  { %8598 = vmatprep.subr.bf16.mxu1 %v14364_v55  ;;  %v14412_v55 = vld [vmem:[#allocation2 + $0xd0c] ss:$16 sps:$4 sm:$0xff]  }
 0x39b   :  { %8558 = vmatpush1.bf16.msra.mxu0 %v14359_v40  ;;  %v14407_v40 = vld [vmem:[#allocation2 + $0xb08] ss:$16 sps:$4 sm:$0xff]  }
 0x39c   :  { %8599 = vmatpush1.bf16.msra.mxu1 %v14362_v29  ;;  %8559 = vmatprep.subr.bf16.mxu0 %v14367_v52  ;;  %v14410_v29 = vld [vmem:[#allocation2 + $0xd08] ss:$16 sps:$4 sm:$0xff]   ;;  %v14415_v52 = vld [vmem:[#allocation2 + $0xeec] ss:$16 sps:$4 sm:$0xff]  }
 0x39d   :  { %8600 = vmatprep.subr.bf16.mxu1 %v14370_v37  ;;  %v14418_v37 = vld [vmem:[#allocation2 + $0x10ec] ss:$16 sps:$4 sm:$0xff]  }
 0x39f   :  { %8560 = vmatpush2.bf16.msra.mxu0 %v14365_v44  ;;  %v14413_v44 = vld [vmem:[#allocation2 + $0xee8] ss:$16 sps:$4 sm:$0xff]  }
 0x3a0   :  { %8601 = vmatpush2.bf16.msra.mxu1 %v14368_v34  ;;  %8561 = vmatprep.subr.bf16.mxu0 %v14373_v46  ;;  %v14416_v34 = vld [vmem:[#allocation2 + $0x10e8] ss:$16 sps:$4 sm:$0xff]   ;;  %v14421_v46 = vld [vmem:[#allocation2 + $0xecc] ss:$16 sps:$4 sm:$0xff]  }
 0x3a1   :  { %8602 = vmatprep.subr.bf16.mxu1 %v14376_v54  ;;  %v14424_v54 = vld [vmem:[#allocation2 + $0x10cc] ss:$16 sps:$4 sm:$0xff]  }
 0x3a3   :  { %8562 = vmatpush2.bf16.msra.mxu0 %v14371_v16 }
 0x3a4   :  { %8603 = vmatpush2.bf16.msra.mxu1 %v14374_v59  ;;  %8563 = vmatprep.subr.bf16.mxu0 %v14379_v21 }
 0x3a5   :  { %8604 = vmatprep.subr.bf16.mxu1 %v14382_v42  ;;  %v14419_v42 = vld [vmem:[#allocation2 + $0xec8] ss:$16 sps:$4 sm:$0xff]  }
 0x3a7   :  { %8564 = vmatpush2.bf16.msra.mxu0 %v14377_v60  ;;  %v14422_v60 = vld [vmem:[#allocation2 + $0x10c8] ss:$16 sps:$4 sm:$0xff]  }
 0x3a8   :  { %8605 = vmatpush2.bf16.msra.mxu1 %v14380_v35  ;;  %8565 = vmatprep.subr.bf16.mxu0 %v14385_v1 }
 0x3a9   :  { %8606 = vmatprep.subr.bf16.mxu1 %v14388_v33  ;;  %v14427_v33 = vld [vmem:[#allocation2 + $0xeac] ss:$16 sps:$4 sm:$0xff]  }
 0x3ab   :  { %8566 = vmatpush2.bf16.msra.mxu0 %v14383_v12  ;;  %v14430_v12 = vld [vmem:[#allocation2 + $0x10ac] ss:$16 sps:$4 sm:$0xff]  }
 0x3ac   :  { %8607 = vmatpush2.bf16.msra.mxu1 %v14386_v13  ;;  %8567 = vmatprep.subr.bf16.mxu0 %v14391_v32  ;;  %v14428_v32 = vld [vmem:[#allocation2 + $0x10a8] ss:$16 sps:$4 sm:$0xff]  }
 0x3ad   :  { %8608 = vmatprep.subr.bf16.mxu1 %v14394_v48 }
 0x3af   :  { %8568 = vmatpush2.bf16.msra.mxu0 %v14389_v49 }
 0x3b0   :  { %8609 = vmatpush2.bf16.msra.mxu1 %v14392_v8  ;;  %8569 = vmatprep.subr.bf16.mxu0 %v14397_v31  ;;  %v14433_v8 = vld [vmem:[#allocation2 + $0xe8c] ss:$16 sps:$4 sm:$0xff]  }
 0x3b1   :  { %8610 = vmatprep.subr.bf16.mxu1 %v14400_v14  ;;  %v14436_v31 = vld [vmem:[#allocation2 + $0x108c] ss:$16 sps:$4 sm:$0xff]   ;;  %v14434_v14 = vld [vmem:[#allocation2 + $0x1088] ss:$16 sps:$4 sm:$0xff]  }
 0x3b3   :  { %8570 = vmatpush2.bf16.msra.mxu0 %v14395_v9  ;;  %v14437_v9 = vld [vmem:[#allocation2 + $0xe68] ss:$16 sps:$4 sm:$0xff]  }
 0x3b4   :  { %8611 = vmatpush2.bf16.msra.mxu1 %v14398_v20  ;;  %8571 = vmatprep.subr.bf16.mxu0 %v14403_v15  ;;  %v14440_v20 = vld [vmem:[#allocation2 + $0x1068] ss:$16 sps:$4 sm:$0xff]   ;;  %v14445_v15 = vld [vmem:[#allocation2 + $0xe4c] ss:$16 sps:$4 sm:$0xff]  }
 0x3b5   :  { %8612 = vmatprep.subr.bf16.mxu1 %v14406_v30  ;;  %v14448_v30 = vld [vmem:[#allocation2 + $0x104c] ss:$16 sps:$4 sm:$0xff]  }
 0x3b7   :  { %8572 = vmatpush2.bf16.msra.mxu0 %v14401_v26  ;;  %v14443_v26 = vld [vmem:[#allocation2 + $0xe48] ss:$16 sps:$4 sm:$0xff]  }
 0x3b8   :  { %8613 = vmatpush2.bf16.msra.mxu1 %v14404_v58  ;;  %8573 = vmatprep.subr.bf16.mxu0 %v14409_v28  ;;  %v14446_v58 = vld [vmem:[#allocation2 + $0x1048] ss:$16 sps:$4 sm:$0xff]   ;;  %v14451_v28 = vld [vmem:[#allocation2 + $0xe2c] ss:$16 sps:$4 sm:$0xff]  }
 0x3b9   :  { %8614 = vmatprep.subr.bf16.mxu1 %v14412_v55  ;;  %v14454_v55 = vld [vmem:[#allocation2 + $0x102c] ss:$16 sps:$4 sm:$0xff]  }
 0x3bb   :  { %8574 = vmatpush2.bf16.msra.mxu0 %v14407_v40  ;;  %v14449_v40 = vld [vmem:[#allocation2 + $0xe28] ss:$16 sps:$4 sm:$0xff]  }
 0x3bc   :  { %8615 = vmatpush2.bf16.msra.mxu1 %v14410_v29  ;;  %8625 = vmatprep.subr.bf16.mxu0 %v14415_v52  ;;  %v14452_v29 = vld [vmem:[#allocation2 + $0x1028] ss:$16 sps:$4 sm:$0xff]   ;;  %v14457_v52 = vld [vmem:[#allocation2 + $0xe0c] ss:$16 sps:$4 sm:$0xff]  }
 0x3bd   :  { %8666 = vmatprep.subr.bf16.mxu1 %v14418_v37  ;;  %v14460_v37 = vld [vmem:[#allocation2 + $0x100c] ss:$16 sps:$4 sm:$0xff]  }
 0x3be   :  { %v8331_v16 = vpop.f32.mrf.mxu0  ;;  %8576 = vmatmul.mubr.bf16.vlgmr.msra.gmra.mxu0 %v15590_v43 }
 0x3bf   :  { %v15822_v59 = vpop.f32.mrf.mxu1  ;;  %8617 = vmatmul.mubr.bf16.vlgmr.msra.gmra.mxu1 %v15621_v7  ;;  %v15827_v21 = vadd.f32 %v8331_v16, %v15815_v53  ;;  %8626 = vmatpush1.bf16.msra.mxu0 %v14413_v44  ;;  %v14425_v53 = vld [vmem:[#allocation2 + $0xea8] ss:$16 sps:$4 sm:$0xff]  }
 0x3c0   :  { %8667 = vmatpush1.bf16.msra.mxu1 %v14416_v34  ;;  %v8333_v35 = vpop.f32.mrf.mxu0  ;;  %8627 = vmatprep.subr.bf16.mxu0 %v14421_v46  ;;  %v14455_v44 = vld [vmem:[#allocation2 + $0xe08] ss:$16 sps:$4 sm:$0xff]   ;;  %v14463_v46 = vld [vmem:[#allocation2 + $0xfec] ss:$16 sps:$4 sm:$0xff]  }
 0x3c1   :  { %v15829_v1 = vpop.f32.mrf.mxu1  ;;  %8668 = vmatprep.subr.bf16.mxu1 %v14424_v54  ;;  %v15832_v13 = vadd.f32 %v8333_v35, %v15820_v27  ;;  %8657 = vmatprep.mubr.bf16.mxu0 %v15597_v50  ;;  %v14431_v27 = vld [vmem:[#allocation2 + $0xe88] ss:$16 sps:$4 sm:$0xff]   ;;  %v14439_v50 = vld [vmem:[#allocation2 + $0xe6c] ss:$16 sps:$4 sm:$0xff]  }
 0x3c2   :  { %8698 = vmatprep.mubr.bf16.mxu1 %v15630_v17  ;;  %v8335_v43 = vpop.f32.mrf.mxu0  ;;  %v14442_v17 = vld [vmem:[#allocation2 + $0x106c] ss:$16 sps:$4 sm:$0xff]   ;;  %v14458_v34 = vld [vmem:[#allocation2 + $0x1008] ss:$16 sps:$4 sm:$0xff]  }
 0x3c3   :  { %v8376_v7 = vpop.f32.mrf.mxu1  ;;  %8628 = vmatpush1.bf16.msra.mxu0 %v14419_v42  ;;  %v14466_v54 = vld [vmem:[#allocation2 + $0x11ec] ss:$16 sps:$4 sm:$0xff]   ;;  %v14461_v16 = vld [vmem:[#allocation2 + $0xfe8] ss:$16 sps:$4 sm:$0xff]  }
 0x3c4   :  { %8669 = vmatpush1.bf16.msra.mxu1 %v14422_v60  ;;  %v8336_v48 = vpop.f32.mrf.mxu0  ;;  %8629 = vmatprep.subr.bf16.mxu0 %v14427_v33  ;;  %v14464_v42 = vld [vmem:[#allocation2 + $0x11e8] ss:$16 sps:$4 sm:$0xff]   ;;  %v14469_v60 = vld [vmem:[#allocation2 + $0xfcc] ss:$16 sps:$4 sm:$0xff]  }
 0x3c5   :  { %v8377_v49 = vpop.f32.mrf.mxu1  ;;  %8670 = vmatprep.subr.bf16.mxu1 %v14430_v12  ;;  %v14472_v35 = vld [vmem:[#allocation2 + $0x11cc] ss:$16 sps:$4 sm:$0xff]   ;;  %v14467_v33 = vld [vmem:[#allocation2 + $0xfc8] ss:$16 sps:$4 sm:$0xff]  }
 0x3c6   :  { %v14470_v12 = vld [vmem:[#allocation2 + $0x11c8] ss:$16 sps:$4 sm:$0xff]   ;;  %v14475_v43 = vld [vmem:[#allocation2 + $0xfac] ss:$16 sps:$4 sm:$0xff]  }
 0x3c7   :  { %8630 = vmatpush1.bf16.msra.mxu0 %v14425_v53  ;;  %v14478_v7 = vld [vmem:[#allocation2 + $0x11ac] ss:$16 sps:$4 sm:$0xff]   ;;  %v14473_v53 = vld [vmem:[#allocation2 + $0xfa8] ss:$16 sps:$4 sm:$0xff]  }
 0x3c8   :  { %8671 = vmatpush1.bf16.msra.mxu1 %v14428_v32  ;;  %8631 = vmatprep.subr.bf16.mxu0 %v14433_v8  ;;  %v14476_v32 = vld [vmem:[#allocation2 + $0x11a8] ss:$16 sps:$4 sm:$0xff]   ;;  %v14481_v48 = vld [vmem:[#allocation2 + $0xf8c] ss:$16 sps:$4 sm:$0xff]  }
 0x3c9   :  { %8672 = vmatprep.subr.bf16.mxu1 %v14436_v31  ;;  %v14484_v49 = vld [vmem:[#allocation2 + $0x118c] ss:$16 sps:$4 sm:$0xff]   ;;  %v14479_v8 = vld [vmem:[#allocation2 + $0xf88] ss:$16 sps:$4 sm:$0xff]  }
 0x3ca   :  { %v14482_v31 = vld [vmem:[#allocation2 + $0x1188] ss:$16 sps:$4 sm:$0xff]  }
 0x3cb   :  { %8632 = vmatpush1.bf16.msra.mxu0 %v14431_v27  ;;  %v14487_v27 = vld [vmem:[#allocation2 + $0xf6c] ss:$16 sps:$4 sm:$0xff]  }
 0x3cc   :  { %8673 = vmatpush1.bf16.msra.mxu1 %v14434_v14  ;;  %8633 = vmatprep.subr.bf16.mxu0 %v14439_v50  ;;  %v14490_v14 = vld [vmem:[#allocation2 + $0x116c] ss:$16 sps:$4 sm:$0xff]   ;;  %v14485_v50 = vld [vmem:[#allocation2 + $0xf68] ss:$16 sps:$4 sm:$0xff]  }
 0x3cd   :  { %8674 = vmatprep.subr.bf16.mxu1 %v14442_v17  ;;  %v14488_v17 = vld [vmem:[#allocation2 + $0x1168] ss:$16 sps:$4 sm:$0xff]  }
 0x3cf   :  { %8634 = vmatpush1.bf16.msra.mxu0 %v14437_v9  ;;  %v14493_v9 = vld [vmem:[#allocation2 + $0xf4c] ss:$16 sps:$4 sm:$0xff]  }
 0x3d0   :  { %8675 = vmatpush1.bf16.msra.mxu1 %v14440_v20  ;;  %8635 = vmatprep.subr.bf16.mxu0 %v14445_v15  ;;  %v14496_v20 = vld [vmem:[#allocation2 + $0x114c] ss:$16 sps:$4 sm:$0xff]   ;;  %v14491_v15 = vld [vmem:[#allocation2 + $0xf48] ss:$16 sps:$4 sm:$0xff]  }
 0x3d1   :  { %8676 = vmatprep.subr.bf16.mxu1 %v14448_v30  ;;  %v14494_v30 = vld [vmem:[#allocation2 + $0x1148] ss:$16 sps:$4 sm:$0xff]  }
 0x3d3   :  { %8636 = vmatpush1.bf16.msra.mxu0 %v14443_v26  ;;  %v14499_v26 = vld [vmem:[#allocation2 + $0xf2c] ss:$16 sps:$4 sm:$0xff]  }
 0x3d4   :  { %8677 = vmatpush1.bf16.msra.mxu1 %v14446_v58  ;;  %8637 = vmatprep.subr.bf16.mxu0 %v14451_v28  ;;  %v14502_v58 = vld [vmem:[#allocation2 + $0x112c] ss:$16 sps:$4 sm:$0xff]   ;;  %v14497_v28 = vld [vmem:[#allocation2 + $0xf28] ss:$16 sps:$4 sm:$0xff]  }
 0x3d5   :  { %8678 = vmatprep.subr.bf16.mxu1 %v14454_v55  ;;  %v14500_v55 = vld [vmem:[#allocation2 + $0x1128] ss:$16 sps:$4 sm:$0xff]  }
 0x3d7   :  { %8638 = vmatpush1.bf16.msra.mxu0 %v14449_v40  ;;  %v14505_v40 = vld [vmem:[#allocation2 + $0xf0c] ss:$16 sps:$4 sm:$0xff]  }
 0x3d8   :  { %8679 = vmatpush1.bf16.msra.mxu1 %v14452_v29  ;;  %8639 = vmatprep.subr.bf16.mxu0 %v14457_v52  ;;  %v14508_v29 = vld [vmem:[#allocation2 + $0x110c] ss:$16 sps:$4 sm:$0xff]   ;;  %v1469_v52 = vsub.s32 2, %v15604_v57 }
 0x3d9   :  { %8680 = vmatprep.subr.bf16.mxu1 %v14460_v37  ;;  %v1473_v37 = vsub.s32 3, %v15604_v57 }
 0x3db   :  { %8640 = vmatpush1.bf16.msra.mxu0 %v14455_v44  ;;  %v14503_v44 = vld [vmem:[#allocation2 + $0xf08] ss:$16 sps:$4 sm:$0xff]  }
 0x3dc   :  { %8681 = vmatpush1.bf16.msra.mxu1 %v14458_v34  ;;  %8641 = vmatprep.subr.bf16.mxu0 %v14463_v46  ;;  %v14506_v34 = vld [vmem:[#allocation2 + $0x1108] ss:$16 sps:$4 sm:$0xff]   ;;  %v14511_v46 = vld [vmem:[#allocation2 + $0x12ec] ss:$16 sps:$4 sm:$0xff]  }
 0x3dd   :  { %8682 = vmatprep.subr.bf16.mxu1 %v14466_v54  ;;  %v14514_v54 = vld [vmem:[#allocation2 + $0x14ec] ss:$16 sps:$4 sm:$0xff]  }
 0x3df   :  { %8642 = vmatpush2.bf16.msra.mxu0 %v14461_v16  ;;  %v15197_v16 = vld [vmem:[#allocation4] sm:$0xf] }
 0x3e0   :  { %8683 = vmatpush2.bf16.msra.mxu1 %v14464_v42  ;;  %8643 = vmatprep.subr.bf16.mxu0 %v14469_v60  ;;  %v1470_v42 = vrot.slane %v15197_v16, %v1469_v52  ;;  %v1474_v60 = vrot.slane %v15197_v16, %v1473_v37  ;;  %v14542_v16 = vld [vmem:[#allocation2 + $0x1448] ss:$16 sps:$4 sm:$0xff]  }
 0x3e1   :  { %8684 = vmatprep.subr.bf16.mxu1 %v14472_v35  ;;  %v14509_v35 = vld [vmem:[#allocation2 + $0x12e8] ss:$16 sps:$4 sm:$0xff]  }
 0x3e3   :  { %8644 = vmatpush2.bf16.msra.mxu0 %v14467_v33  ;;  %v14512_v33 = vld [vmem:[#allocation2 + $0x14e8] ss:$16 sps:$4 sm:$0xff]  }
 0x3e4   :  { %8685 = vmatpush2.bf16.msra.mxu1 %v14470_v12  ;;  %8645 = vmatprep.subr.bf16.mxu0 %v14475_v43  ;;  %v14517_v12 = vld [vmem:[#allocation2 + $0x12cc] ss:$16 sps:$4 sm:$0xff]  }
 0x3e5   :  { %8686 = vmatprep.subr.bf16.mxu1 %v14478_v7  ;;  %v14520_v43 = vld [vmem:[#allocation2 + $0x14cc] ss:$16 sps:$4 sm:$0xff]   ;;  %v8373_v7 = vadd.f32 %v15822_v59, %v1470_v42 }
 0x3e6   :  { %v14547_v42 = vld [vmem:[#allocation2 + $0x122c] ss:$16 sps:$4 sm:$0xff]  }
 0x3e7   :  { %8646 = vmatpush2.bf16.msra.mxu0 %v14473_v53 }
 0x3e8   :  { %8687 = vmatpush2.bf16.msra.mxu1 %v14476_v32  ;;  %8647 = vmatprep.subr.bf16.mxu0 %v14481_v48  ;;  %v8375_v48 = vadd.f32 %v15829_v1, %v1474_v60  ;;  %v14550_v60 = vld [vmem:[#allocation2 + $0x142c] ss:$16 sps:$4 sm:$0xff]  }
 0x3e9   :  { %8688 = vmatprep.subr.bf16.mxu1 %v14484_v49 }
 0x3eb   :  { %8648 = vmatpush2.bf16.msra.mxu0 %v14479_v8  ;;  %v14515_v8 = vld [vmem:[#allocation2 + $0x12c8] ss:$16 sps:$4 sm:$0xff]  }
 0x3ec   :  { %8689 = vmatpush2.bf16.msra.mxu1 %v14482_v31  ;;  %8649 = vmatprep.subr.bf16.mxu0 %v14487_v27  ;;  %v14518_v31 = vld [vmem:[#allocation2 + $0x14c8] ss:$16 sps:$4 sm:$0xff]  }
 0x3ed   :  { %8690 = vmatprep.subr.bf16.mxu1 %v14490_v14 }
 0x3ef   :  { %8650 = vmatpush2.bf16.msra.mxu0 %v14485_v50  ;;  %v14523_v50 = vld [vmem:[#allocation2 + $0x12ac] ss:$16 sps:$4 sm:$0xff]  }
 0x3f0   :  { %8691 = vmatpush2.bf16.msra.mxu1 %v14488_v17  ;;  %8651 = vmatprep.subr.bf16.mxu0 %v14493_v9  ;;  %v14526_v17 = vld [vmem:[#allocation2 + $0x14ac] ss:$16 sps:$4 sm:$0xff]  }
 0x3f1   :  { %8692 = vmatprep.subr.bf16.mxu1 %v14496_v20  ;;  %v14521_v20 = vld [vmem:[#allocation2 + $0x12a8] ss:$16 sps:$4 sm:$0xff]  }
 0x3f3   :  { %8652 = vmatpush2.bf16.msra.mxu0 %v14491_v15  ;;  %v14524_v15 = vld [vmem:[#allocation2 + $0x14a8] ss:$16 sps:$4 sm:$0xff]  }
 0x3f4   :  { %8693 = vmatpush2.bf16.msra.mxu1 %v14494_v30  ;;  %8653 = vmatprep.subr.bf16.mxu0 %v14499_v26 }
 0x3f5   :  { %8694 = vmatprep.subr.bf16.mxu1 %v14502_v58  ;;  %v14529_v58 = vld [vmem:[#allocation2 + $0x128c] ss:$16 sps:$4 sm:$0xff]  }
 0x3f7   :  { %8654 = vmatpush2.bf16.msra.mxu0 %v14497_v28  ;;  %v14532_v28 = vld [vmem:[#allocation2 + $0x148c] ss:$16 sps:$4 sm:$0xff]  }
 0x3f8   :  { %8695 = vmatpush2.bf16.msra.mxu1 %v14500_v55  ;;  %8655 = vmatprep.subr.bf16.mxu0 %v14505_v40  ;;  %v14527_v55 = vld [vmem:[#allocation2 + $0x1288] ss:$16 sps:$4 sm:$0xff]   ;;  %v14538_v40 = vld [vmem:[#allocation2 + $0x146c] ss:$16 sps:$4 sm:$0xff]  }
 0x3f9   :  { %8696 = vmatprep.subr.bf16.mxu1 %v14508_v29  ;;  %v14533_v29 = vld [vmem:[#allocation2 + $0x1268] ss:$16 sps:$4 sm:$0xff]  }
 0x3fb   :  { %8656 = vmatpush2.bf16.msra.mxu0 %v14503_v44  ;;  %v14536_v44 = vld [vmem:[#allocation2 + $0x1468] ss:$16 sps:$4 sm:$0xff]  }
 0x3fc   :  { %8697 = vmatpush2.bf16.msra.mxu1 %v14506_v34  ;;  %8707 = vmatprep.subr.bf16.mxu0 %v14511_v46  ;;  %v14541_v34 = vld [vmem:[#allocation2 + $0x124c] ss:$16 sps:$4 sm:$0xff]  }
 0x3fd   :  { %8748 = vmatprep.subr.bf16.mxu1 %v14514_v54  ;;  %v14544_v46 = vld [vmem:[#allocation2 + $0x144c] ss:$16 sps:$4 sm:$0xff]   ;;  %v14539_v54 = vld [vmem:[#allocation2 + $0x1248] ss:$16 sps:$4 sm:$0xff]  }
 0x3fe   :  { %v8413_v53 = vpop.f32.mrf.mxu0  ;;  %8658 = vmatmul.mubr.bf16.vlgmr.msra.gmra.mxu0 %v15623_v10 }
 0x3ff   :  { %v8454_v32 = vpop.f32.mrf.mxu1  ;;  %8699 = vmatmul.mubr.bf16.vlgmr.msra.gmra.mxu1 %v15648_v4  ;;  %v8414_v49 = vadd.f32 %v8413_v53, %v8373_v7  ;;  %8708 = vmatpush1.bf16.msra.mxu0 %v14509_v35  ;;  %v14545_v35 = vld [vmem:[#allocation2 + $0x1228] ss:$16 sps:$4 sm:$0xff]  }
 0x400   :  { %8749 = vmatpush1.bf16.msra.mxu1 %v14512_v33  ;;  %v8415_v27 = vpop.f32.mrf.mxu0  ;;  %8709 = vmatprep.subr.bf16.mxu0 %v14517_v12  ;;  %v14548_v33 = vld [vmem:[#allocation2 + $0x1428] ss:$16 sps:$4 sm:$0xff]   ;;  %v14553_v12 = vld [vmem:[#allocation2 + $0x120c] ss:$16 sps:$4 sm:$0xff]  }
 0x401   :  { %v8456_v14 = vpop.f32.mrf.mxu1  ;;  %8750 = vmatprep.subr.bf16.mxu1 %v14520_v43  ;;  %v15846_v59 = vadd.f32 %v8454_v32, %v8414_v49  ;;  %v8416_v9 = vadd.f32 %v8415_v27, %v8375_v48  ;;  %8739 = vmatprep.mubr.bf16.mxu0 %v15632_v18  ;;  %v14530_v18 = vld [vmem:[#allocation2 + $0x1488] ss:$16 sps:$4 sm:$0xff]   ;;  %v14556_v43 = vld [vmem:[#allocation2 + $0x140c] ss:$16 sps:$4 sm:$0xff]  }
 0x402   :  { %8780 = vmatprep.mubr.bf16.mxu1 %v15658_v23  ;;  %v8417_v10 = vpop.f32.mrf.mxu0  ;;  %v14535_v23 = vld [vmem:[#allocation2 + $0x126c] ss:$16 sps:$4 sm:$0xff]   ;;  %v14551_v7 = vld [vmem:[#allocation2 + $0x1208] ss:$16 sps:$4 sm:$0xff]  }
 0x403   :  { %v8458_v4 = vpop.f32.mrf.mxu1  ;;  %v15850_v1 = vadd.f32 %v8456_v14, %v8416_v9  ;;  %8710 = vmatpush1.bf16.msra.mxu0 %v14515_v8  ;;  %v14554_v53 = vld [vmem:[#allocation2 + $0x1408] ss:$16 sps:$4 sm:$0xff]   ;;  %v14559_v32 = vld [vmem:[#allocation2 + $0x13ec] ss:$16 sps:$4 sm:$0xff]  }
 0x404   :  { %8751 = vmatpush1.bf16.msra.mxu1 %v14518_v31  ;;  %v8418_v30 = vpop.f32.mrf.mxu0  ;;  %8711 = vmatprep.subr.bf16.mxu0 %v14523_v50  ;;  %v14562_v48 = vld [vmem:[#allocation2 + $0x15ec] ss:$16 sps:$4 sm:$0xff]   ;;  %v14557_v49 = vld [vmem:[#allocation2 + $0x13e8] ss:$16 sps:$4 sm:$0xff]  }
 0x405   :  { %v8459_v26 = vpop.f32.mrf.mxu1  ;;  %8752 = vmatprep.subr.bf16.mxu1 %v14526_v17  ;;  %v14560_v8 = vld [vmem:[#allocation2 + $0x15e8] ss:$16 sps:$4 sm:$0xff]   ;;  %v14565_v31 = vld [vmem:[#allocation2 + $0x13cc] ss:$16 sps:$4 sm:$0xff]  }
 0x406   :  { %v14568_v27 = vld [vmem:[#allocation2 + $0x15cc] ss:$16 sps:$4 sm:$0xff]   ;;  %v14563_v14 = vld [vmem:[#allocation2 + $0x13c8] ss:$16 sps:$4 sm:$0xff]  }
 0x407   :  { %8712 = vmatpush1.bf16.msra.mxu0 %v14521_v20  ;;  %v14566_v50 = vld [vmem:[#allocation2 + $0x15c8] ss:$16 sps:$4 sm:$0xff]   ;;  %v14571_v17 = vld [vmem:[#allocation2 + $0x13ac] ss:$16 sps:$4 sm:$0xff]  }
 0x408   :  { %8753 = vmatpush1.bf16.msra.mxu1 %v14524_v15  ;;  %8713 = vmatprep.subr.bf16.mxu0 %v14529_v58  ;;  %v14574_v9 = vld [vmem:[#allocation2 + $0x15ac] ss:$16 sps:$4 sm:$0xff]   ;;  %v14569_v10 = vld [vmem:[#allocation2 + $0x13a8] ss:$16 sps:$4 sm:$0xff]  }
 0x409   :  { %8754 = vmatprep.subr.bf16.mxu1 %v14532_v28  ;;  %v14572_v4 = vld [vmem:[#allocation2 + $0x15a8] ss:$16 sps:$4 sm:$0xff]   ;;  %v14577_v20 = vld [vmem:[#allocation2 + $0x138c] ss:$16 sps:$4 sm:$0xff]  }
 0x40a   :  { %v14580_v15 = vld [vmem:[#allocation2 + $0x158c] ss:$16 sps:$4 sm:$0xff]   ;;  %v14575_v30 = vld [vmem:[#allocation2 + $0x1388] ss:$16 sps:$4 sm:$0xff]  }
 0x40b   :  { %8714 = vmatpush1.bf16.msra.mxu0 %v14527_v55  ;;  %v14578_v26 = vld [vmem:[#allocation2 + $0x1588] ss:$16 sps:$4 sm:$0xff]   ;;  %v14583_v58 = vld [vmem:[#allocation2 + $0x136c] ss:$16 sps:$4 sm:$0xff]  }
 0x40c   :  { %8755 = vmatpush1.bf16.msra.mxu1 %v14530_v18  ;;  %8715 = vmatprep.subr.bf16.mxu0 %v14535_v23  ;;  %v14586_v28 = vld [vmem:[#allocation2 + $0x156c] ss:$16 sps:$4 sm:$0xff]   ;;  %v14581_v55 = vld [vmem:[#allocation2 + $0x1368] ss:$16 sps:$4 sm:$0xff]  }
 0x40d   :  { %8756 = vmatprep.subr.bf16.mxu1 %v14538_v40  ;;  %v14584_v18 = vld [vmem:[#allocation2 + $0x1568] ss:$16 sps:$4 sm:$0xff]   ;;  %v14589_v23 = vld [vmem:[#allocation2 + $0x134c] ss:$16 sps:$4 sm:$0xff]  }
 0x40e   :  { %v14592_v40 = vld [vmem:[#allocation2 + $0x154c] ss:$16 sps:$4 sm:$0xff]  }
 0x40f   :  { %8716 = vmatpush1.bf16.msra.mxu0 %v14533_v29  ;;  %v14587_v29 = vld [vmem:[#allocation2 + $0x1348] ss:$16 sps:$4 sm:$0xff]  }
 0x410   :  { %8757 = vmatpush1.bf16.msra.mxu1 %v14536_v44  ;;  %8717 = vmatprep.subr.bf16.mxu0 %v14541_v34  ;;  %v14590_v44 = vld [vmem:[#allocation2 + $0x1548] ss:$16 sps:$4 sm:$0xff]   ;;  %v14595_v34 = vld [vmem:[#allocation2 + $0x132c] ss:$16 sps:$4 sm:$0xff]  }
 0x411   :  { %8758 = vmatprep.subr.bf16.mxu1 %v14544_v46  ;;  %v14598_v46 = vld [vmem:[#allocation2 + $0x152c] ss:$16 sps:$4 sm:$0xff]  }
 0x413   :  { %8718 = vmatpush1.bf16.msra.mxu0 %v14539_v54  ;;  %v14593_v54 = vld [vmem:[#allocation2 + $0x1328] ss:$16 sps:$4 sm:$0xff]  }
 0x414   :  { %8759 = vmatpush1.bf16.msra.mxu1 %v14542_v16  ;;  %8719 = vmatprep.subr.bf16.mxu0 %v14547_v42  ;;  %v14596_v16 = vld [vmem:[#allocation2 + $0x1528] ss:$16 sps:$4 sm:$0xff]   ;;  %v14601_v42 = vld [vmem:[#allocation2 + $0x130c] ss:$16 sps:$4 sm:$0xff]  }
 0x415   :  { %8760 = vmatprep.subr.bf16.mxu1 %v14550_v60  ;;  %v14604_v60 = vld [vmem:[#allocation2 + $0x150c] ss:$16 sps:$4 sm:$0xff]  }
 0x417   :  { %8720 = vmatpush1.bf16.msra.mxu0 %v14545_v35  ;;  %v14599_v35 = vld [vmem:[#allocation2 + $0x1308] ss:$16 sps:$4 sm:$0xff]  }
 0x418   :  { %8761 = vmatpush1.bf16.msra.mxu1 %v14548_v33  ;;  %8721 = vmatprep.subr.bf16.mxu0 %v14553_v12  ;;  %v14602_v33 = vld [vmem:[#allocation2 + $0x1508] ss:$16 sps:$4 sm:$0xff]   ;;  %v14607_v12 = vld [vmem:[#allocation2 + $0x16ec] ss:$16 sps:$4 sm:$0xff]  }
 0x419   :  { %8762 = vmatprep.subr.bf16.mxu1 %v14556_v43  ;;  %v14610_v43 = vld [vmem:[#allocation2 + $0x18ec] ss:$16 sps:$4 sm:$0xff]  }
 0x41b   :  { %8722 = vmatpush1.bf16.msra.mxu0 %v14551_v7  ;;  %v14605_v7 = vld [vmem:[#allocation2 + $0x16e8] ss:$16 sps:$4 sm:$0xff]  }
 0x41c   :  { %8763 = vmatpush1.bf16.msra.mxu1 %v14554_v53  ;;  %8723 = vmatprep.subr.bf16.mxu0 %v14559_v32  ;;  %v14608_v53 = vld [vmem:[#allocation2 + $0x18e8] ss:$16 sps:$4 sm:$0xff]   ;;  %v14613_v32 = vld [vmem:[#allocation2 + $0x16cc] ss:$16 sps:$4 sm:$0xff]  }
 0x41d   :  { %8764 = vmatprep.subr.bf16.mxu1 %v14562_v48  ;;  %v14616_v48 = vld [vmem:[#allocation2 + $0x18cc] ss:$16 sps:$4 sm:$0xff]  }
 0x41f   :  { %8724 = vmatpush2.bf16.msra.mxu0 %v14557_v49 }
 0x420   :  { %8765 = vmatpush2.bf16.msra.mxu1 %v14560_v8  ;;  %8725 = vmatprep.subr.bf16.mxu0 %v14565_v31 }
 0x421   :  { %8766 = vmatprep.subr.bf16.mxu1 %v14568_v27  ;;  %v14611_v27 = vld [vmem:[#allocation2 + $0x16c8] ss:$16 sps:$4 sm:$0xff]  }
 0x423   :  { %8726 = vmatpush2.bf16.msra.mxu0 %v14563_v14  ;;  %v14614_v14 = vld [vmem:[#allocation2 + $0x18c8] ss:$16 sps:$4 sm:$0xff]  }
 0x424   :  { %8767 = vmatpush2.bf16.msra.mxu1 %v14566_v50  ;;  %8727 = vmatprep.subr.bf16.mxu0 %v14571_v17 }
 0x425   :  { %8768 = vmatprep.subr.bf16.mxu1 %v14574_v9  ;;  %v14619_v9 = vld [vmem:[#allocation2 + $0x16ac] ss:$16 sps:$4 sm:$0xff]  }
 0x427   :  { %8728 = vmatpush2.bf16.msra.mxu0 %v14569_v10  ;;  %v14622_v10 = vld [vmem:[#allocation2 + $0x18ac] ss:$16 sps:$4 sm:$0xff]  }
 0x428   :  { %8769 = vmatpush2.bf16.msra.mxu1 %v14572_v4  ;;  %8729 = vmatprep.subr.bf16.mxu0 %v14577_v20 }
 0x429   :  { %8770 = vmatprep.subr.bf16.mxu1 %v14580_v15  ;;  %v14617_v15 = vld [vmem:[#allocation2 + $0x16a8] ss:$16 sps:$4 sm:$0xff]  }
 0x42b   :  { %8730 = vmatpush2.bf16.msra.mxu0 %v14575_v30  ;;  %v14620_v30 = vld [vmem:[#allocation2 + $0x18a8] ss:$16 sps:$4 sm:$0xff]  }
 0x42c   :  { %8771 = vmatpush2.bf16.msra.mxu1 %v14578_v26  ;;  %8731 = vmatprep.subr.bf16.mxu0 %v14583_v58 }
 0x42d   :  { %8772 = vmatprep.subr.bf16.mxu1 %v14586_v28  ;;  %v14625_v28 = vld [vmem:[#allocation2 + $0x168c] ss:$16 sps:$4 sm:$0xff]  }
 0x42f   :  { %8732 = vmatpush2.bf16.msra.mxu0 %v14581_v55  ;;  %v14628_v55 = vld [vmem:[#allocation2 + $0x188c] ss:$16 sps:$4 sm:$0xff]  }
 0x430   :  { %8773 = vmatpush2.bf16.msra.mxu1 %v14584_v18  ;;  %8733 = vmatprep.subr.bf16.mxu0 %v14589_v23  ;;  %v14634_v18 = vld [vmem:[#allocation2 + $0x186c] ss:$16 sps:$4 sm:$0xff]   ;;  %v14629_v23 = vld [vmem:[#allocation2 + $0x1668] ss:$16 sps:$4 sm:$0xff]  }
 0x431   :  { %8774 = vmatprep.subr.bf16.mxu1 %v14592_v40  ;;  %v14632_v40 = vld [vmem:[#allocation2 + $0x1868] ss:$16 sps:$4 sm:$0xff]  }
 0x433   :  { %8734 = vmatpush2.bf16.msra.mxu0 %v14587_v29  ;;  %v14637_v29 = vld [vmem:[#allocation2 + $0x164c] ss:$16 sps:$4 sm:$0xff]  }
 0x434   :  { %8775 = vmatpush2.bf16.msra.mxu1 %v14590_v44  ;;  %8735 = vmatprep.subr.bf16.mxu0 %v14595_v34  ;;  %v14640_v44 = vld [vmem:[#allocation2 + $0x184c] ss:$16 sps:$4 sm:$0xff]   ;;  %v14635_v34 = vld [vmem:[#allocation2 + $0x1648] ss:$16 sps:$4 sm:$0xff]  }
 0x435   :  { %8776 = vmatprep.subr.bf16.mxu1 %v14598_v46  ;;  %v14638_v46 = vld [vmem:[#allocation2 + $0x1848] ss:$16 sps:$4 sm:$0xff]  }
 0x437   :  { %8736 = vmatpush2.bf16.msra.mxu0 %v14593_v54  ;;  %v14643_v54 = vld [vmem:[#allocation2 + $0x162c] ss:$16 sps:$4 sm:$0xff]  }
 0x438   :  { %8777 = vmatpush2.bf16.msra.mxu1 %v14596_v16  ;;  %8737 = vmatprep.subr.bf16.mxu0 %v14601_v42  ;;  %v14646_v16 = vld [vmem:[#allocation2 + $0x182c] ss:$16 sps:$4 sm:$0xff]   ;;  %v14641_v42 = vld [vmem:[#allocation2 + $0x1628] ss:$16 sps:$4 sm:$0xff]  }
 0x439   :  { %8778 = vmatprep.subr.bf16.mxu1 %v14604_v60  ;;  %v14644_v60 = vld [vmem:[#allocation2 + $0x1828] ss:$16 sps:$4 sm:$0xff]  }
 0x43b   :  { %8738 = vmatpush2.bf16.msra.mxu0 %v14599_v35  ;;  %v14649_v35 = vld [vmem:[#allocation2 + $0x160c] ss:$16 sps:$4 sm:$0xff]  }
 0x43c   :  { %8779 = vmatpush2.bf16.msra.mxu1 %v14602_v33  ;;  %8789 = vmatprep.subr.bf16.mxu0 %v14607_v12  ;;  %v14652_v33 = vld [vmem:[#allocation2 + $0x180c] ss:$16 sps:$4 sm:$0xff]   ;;  %v14647_v12 = vld [vmem:[#allocation2 + $0x1608] ss:$16 sps:$4 sm:$0xff]  }
 0x43d   :  { %8830 = vmatprep.subr.bf16.mxu1 %v14610_v43  ;;  %v14650_v43 = vld [vmem:[#allocation2 + $0x1808] ss:$16 sps:$4 sm:$0xff]  }
 0x43e   :  { %v8495_v49 = vpop.f32.mrf.mxu0  ;;  %8740 = vmatmul.mubr.bf16.vlgmr.msra.gmra.mxu0 %v15650_v6 }
 0x43f   :  { %v8536_v8 = vpop.f32.mrf.mxu1  ;;  %8781 = vmatmul.mubr.bf16.vlgmr.msra.gmra.mxu1 %v15678_v19  ;;  %v8496_v31 = vadd.f32 %v8495_v49, %v15846_v59  ;;  %8790 = vmatpush1.bf16.msra.mxu0 %v14605_v7  ;;  %v14655_v7 = vld [vmem:[#allocation2 + $0x17ec] ss:$16 sps:$4 sm:$0xff]  }
 0x440   :  { %8831 = vmatpush1.bf16.msra.mxu1 %v14608_v53  ;;  %v8497_v50 = vpop.f32.mrf.mxu0  ;;  %8791 = vmatprep.subr.bf16.mxu0 %v14613_v32  ;;  %v14658_v53 = vld [vmem:[#allocation2 + $0x19ec] ss:$16 sps:$4 sm:$0xff]   ;;  %v14653_v32 = vld [vmem:[#allocation2 + $0x17e8] ss:$16 sps:$4 sm:$0xff]  }
 0x441   :  { %v8538_v17 = vpop.f32.mrf.mxu1  ;;  %8832 = vmatprep.subr.bf16.mxu1 %v14616_v48  ;;  %v15855_v4 = vadd.f32 %v8536_v8, %v8496_v31  ;;  %v8498_v20 = vadd.f32 %v8497_v50, %v15850_v1  ;;  %8821 = vmatprep.mubr.bf16.mxu0 %v15660_v24  ;;  %v14623_v1 = vld [vmem:[#allocation2 + $0x1688] ss:$16 sps:$4 sm:$0xff]   ;;  %v14661_v49 = vld [vmem:[#allocation2 + $0x17cc] ss:$16 sps:$4 sm:$0xff]  }
 0x442   :  { %8862 = vmatprep.mubr.bf16.mxu1 %v15688_v39  ;;  %v8499_v6 = vpop.f32.mrf.mxu0  ;;  %v14626_v24 = vld [vmem:[#allocation2 + $0x1888] ss:$16 sps:$4 sm:$0xff]   ;;  %v14631_v39 = vld [vmem:[#allocation2 + $0x166c] ss:$16 sps:$4 sm:$0xff]  }
 0x443   :  { %v8540_v19 = vpop.f32.mrf.mxu1  ;;  %v15860_v59 = vadd.f32 %v8538_v17, %v8498_v20  ;;  %8792 = vmatpush1.bf16.msra.mxu0 %v14611_v27  ;;  %v14656_v48 = vld [vmem:[#allocation2 + $0x19e8] ss:$16 sps:$4 sm:$0xff]   ;;  %v14664_v8 = vld [vmem:[#allocation2 + $0x19cc] ss:$16 sps:$4 sm:$0xff]  }
 0x444   :  { %8833 = vmatpush1.bf16.msra.mxu1 %v14614_v14  ;;  %v8500_v26 = vpop.f32.mrf.mxu0  ;;  %8793 = vmatprep.subr.bf16.mxu0 %v14619_v9  ;;  %v14659_v31 = vld [vmem:[#allocation2 + $0x17c8] ss:$16 sps:$4 sm:$0xff]   ;;  %v14667_v14 = vld [vmem:[#allocation2 + $0x17ac] ss:$16 sps:$4 sm:$0xff]  }
 0x445   :  { %v8541_v58 = vpop.f32.mrf.mxu1  ;;  %8834 = vmatprep.subr.bf16.mxu1 %v14622_v10  ;;  %v14662_v27 = vld [vmem:[#allocation2 + $0x19c8] ss:$16 sps:$4 sm:$0xff]   ;;  %v14670_v50 = vld [vmem:[#allocation2 + $0x19ac] ss:$16 sps:$4 sm:$0xff]  }
 0x446   :  { %v14665_v17 = vld [vmem:[#allocation2 + $0x17a8] ss:$16 sps:$4 sm:$0xff]   ;;  %v14673_v10 = vld [vmem:[#allocation2 + $0x178c] ss:$16 sps:$4 sm:$0xff]  }
 0x447   :  { %8794 = vmatpush1.bf16.msra.mxu0 %v14617_v15  ;;  %v14668_v9 = vld [vmem:[#allocation2 + $0x19a8] ss:$16 sps:$4 sm:$0xff]   ;;  %v14676_v20 = vld [vmem:[#allocation2 + $0x198c] ss:$16 sps:$4 sm:$0xff]  }
 0x448   :  { %8835 = vmatpush1.bf16.msra.mxu1 %v14620_v30  ;;  %8795 = vmatprep.subr.bf16.mxu0 %v14625_v28  ;;  %v14671_v6 = vld [vmem:[#allocation2 + $0x1788] ss:$16 sps:$4 sm:$0xff]   ;;  %v14679_v15 = vld [vmem:[#allocation2 + $0x176c] ss:$16 sps:$4 sm:$0xff]  }
 0x449   :  { %8836 = vmatprep.subr.bf16.mxu1 %v14628_v55  ;;  %v14674_v19 = vld [vmem:[#allocation2 + $0x1988] ss:$16 sps:$4 sm:$0xff]   ;;  %v14682_v30 = vld [vmem:[#allocation2 + $0x196c] ss:$16 sps:$4 sm:$0xff]  }
 0x44a   :  { %v14677_v26 = vld [vmem:[#allocation2 + $0x1768] ss:$16 sps:$4 sm:$0xff]   ;;  %v14685_v28 = vld [vmem:[#allocation2 + $0x174c] ss:$16 sps:$4 sm:$0xff]  }
 0x44b   :  { %8796 = vmatpush1.bf16.msra.mxu0 %v14623_v1  ;;  %v14680_v58 = vld [vmem:[#allocation2 + $0x1968] ss:$16 sps:$4 sm:$0xff]   ;;  %v14688_v55 = vld [vmem:[#allocation2 + $0x194c] ss:$16 sps:$4 sm:$0xff]  }
 0x44c   :  { %8837 = vmatpush1.bf16.msra.mxu1 %v14626_v24  ;;  %8797 = vmatprep.subr.bf16.mxu0 %v14631_v39  ;;  %v14683_v1 = vld [vmem:[#allocation2 + $0x1748] ss:$16 sps:$4 sm:$0xff]   ;;  %v14691_v39 = vld [vmem:[#allocation2 + $0x172c] ss:$16 sps:$4 sm:$0xff]  }
 0x44d   :  { %8838 = vmatprep.subr.bf16.mxu1 %v14634_v18  ;;  %v14686_v24 = vld [vmem:[#allocation2 + $0x1948] ss:$16 sps:$4 sm:$0xff]   ;;  %v14694_v18 = vld [vmem:[#allocation2 + $0x192c] ss:$16 sps:$4 sm:$0xff]  }
 0x44f   :  { %8798 = vmatpush1.bf16.msra.mxu0 %v14629_v23  ;;  %v14689_v23 = vld [vmem:[#allocation2 + $0x1728] ss:$16 sps:$4 sm:$0xff]  }
 0x450   :  { %8839 = vmatpush1.bf16.msra.mxu1 %v14632_v40  ;;  %8799 = vmatprep.subr.bf16.mxu0 %v14637_v29  ;;  %v14692_v40 = vld [vmem:[#allocation2 + $0x1928] ss:$16 sps:$4 sm:$0xff]   ;;  %v14697_v29 = vld [vmem:[#allocation2 + $0x170c] ss:$16 sps:$4 sm:$0xff]  }
 0x451   :  { %8840 = vmatprep.subr.bf16.mxu1 %v14640_v44  ;;  %v14700_v44 = vld [vmem:[#allocation2 + $0x190c] ss:$16 sps:$4 sm:$0xff]  }
 0x453   :  { %8800 = vmatpush1.bf16.msra.mxu0 %v14635_v34  ;;  %v14695_v34 = vld [vmem:[#allocation2 + $0x1708] ss:$16 sps:$4 sm:$0xff]  }
 0x454   :  { %8841 = vmatpush1.bf16.msra.mxu1 %v14638_v46  ;;  %8801 = vmatprep.subr.bf16.mxu0 %v14643_v54  ;;  %v14698_v46 = vld [vmem:[#allocation2 + $0x1908] ss:$16 sps:$4 sm:$0xff]   ;;  %v14703_v54 = vld [vmem:[#allocation2 + $0x1aec] ss:$16 sps:$4 sm:$0xff]  }
 0x455   :  { %8842 = vmatprep.subr.bf16.mxu1 %v14646_v16  ;;  %v14706_v16 = vld [vmem:[#allocation2 + $0x1cec] ss:$16 sps:$4 sm:$0xff]  }
 0x457   :  { %8802 = vmatpush1.bf16.msra.mxu0 %v14641_v42  ;;  %v14701_v42 = vld [vmem:[#allocation2 + $0x1ae8] ss:$16 sps:$4 sm:$0xff]  }
 0x458   :  { %8843 = vmatpush1.bf16.msra.mxu1 %v14644_v60  ;;  %8803 = vmatprep.subr.bf16.mxu0 %v14649_v35  ;;  %v14704_v60 = vld [vmem:[#allocation2 + $0x1ce8] ss:$16 sps:$4 sm:$0xff]   ;;  %v14709_v35 = vld [vmem:[#allocation2 + $0x1acc] ss:$16 sps:$4 sm:$0xff]  }
 0x459   :  { %8844 = vmatprep.subr.bf16.mxu1 %v14652_v33  ;;  %v14712_v33 = vld [vmem:[#allocation2 + $0x1ccc] ss:$16 sps:$4 sm:$0xff]  }
 0x45b   :  { %8804 = vmatpush1.bf16.msra.mxu0 %v14647_v12 }
 0x45c   :  { %8845 = vmatpush1.bf16.msra.mxu1 %v14650_v43  ;;  %8805 = vmatprep.subr.bf16.mxu0 %v14655_v7 }
 0x45d   :  { %8846 = vmatprep.subr.bf16.mxu1 %v14658_v53  ;;  %v14707_v53 = vld [vmem:[#allocation2 + $0x1ac8] ss:$16 sps:$4 sm:$0xff]  }
 0x45f   :  { %8806 = vmatpush2.bf16.msra.mxu0 %v14653_v32  ;;  %v14710_v32 = vld [vmem:[#allocation2 + $0x1cc8] ss:$16 sps:$4 sm:$0xff]  }
 0x460   :  { %8847 = vmatpush2.bf16.msra.mxu1 %v14656_v48  ;;  %8807 = vmatprep.subr.bf16.mxu0 %v14661_v49 }
 0x461   :  { %8848 = vmatprep.subr.bf16.mxu1 %v14664_v8  ;;  %v14715_v8 = vld [vmem:[#allocation2 + $0x1aac] ss:$16 sps:$4 sm:$0xff]  }
 0x463   :  { %8808 = vmatpush2.bf16.msra.mxu0 %v14659_v31  ;;  %v14718_v31 = vld [vmem:[#allocation2 + $0x1cac] ss:$16 sps:$4 sm:$0xff]  }
 0x464   :  { %8849 = vmatpush2.bf16.msra.mxu1 %v14662_v27  ;;  %8809 = vmatprep.subr.bf16.mxu0 %v14667_v14 }
 0x465   :  { %8850 = vmatprep.subr.bf16.mxu1 %v14670_v50  ;;  %v14713_v50 = vld [vmem:[#allocation2 + $0x1aa8] ss:$16 sps:$4 sm:$0xff]  }
 0x467   :  { %8810 = vmatpush2.bf16.msra.mxu0 %v14665_v17  ;;  %v14716_v17 = vld [vmem:[#allocation2 + $0x1ca8] ss:$16 sps:$4 sm:$0xff]  }
 0x468   :  { %8851 = vmatpush2.bf16.msra.mxu1 %v14668_v9  ;;  %8811 = vmatprep.subr.bf16.mxu0 %v14673_v10 }
 0x469   :  { %8852 = vmatprep.subr.bf16.mxu1 %v14676_v20  ;;  %v14721_v20 = vld [vmem:[#allocation2 + $0x1a8c] ss:$16 sps:$4 sm:$0xff]  }
 0x46b   :  { %8812 = vmatpush2.bf16.msra.mxu0 %v14671_v6  ;;  %v14724_v6 = vld [vmem:[#allocation2 + $0x1c8c] ss:$16 sps:$4 sm:$0xff]  }
 0x46c   :  { %8853 = vmatpush2.bf16.msra.mxu1 %v14674_v19  ;;  %8813 = vmatprep.subr.bf16.mxu0 %v14679_v15  ;;  %v14730_v19 = vld [vmem:[#allocation2 + $0x1c6c] ss:$16 sps:$4 sm:$0xff]   ;;  %v14725_v15 = vld [vmem:[#allocation2 + $0x1a68] ss:$16 sps:$4 sm:$0xff]  }
 0x46d   :  { %8854 = vmatprep.subr.bf16.mxu1 %v14682_v30  ;;  %v14728_v30 = vld [vmem:[#allocation2 + $0x1c68] ss:$16 sps:$4 sm:$0xff]  }
 0x46f   :  { %8814 = vmatpush2.bf16.msra.mxu0 %v14677_v26  ;;  %v14733_v26 = vld [vmem:[#allocation2 + $0x1a4c] ss:$16 sps:$4 sm:$0xff]  }
 0x470   :  { %8855 = vmatpush2.bf16.msra.mxu1 %v14680_v58  ;;  %8815 = vmatprep.subr.bf16.mxu0 %v14685_v28  ;;  %v14736_v58 = vld [vmem:[#allocation2 + $0x1c4c] ss:$16 sps:$4 sm:$0xff]   ;;  %v14731_v28 = vld [vmem:[#allocation2 + $0x1a48] ss:$16 sps:$4 sm:$0xff]  }
 0x471   :  { %8856 = vmatprep.subr.bf16.mxu1 %v14688_v55  ;;  %v14734_v55 = vld [vmem:[#allocation2 + $0x1c48] ss:$16 sps:$4 sm:$0xff]  }
 0x473   :  { %8816 = vmatpush2.bf16.msra.mxu0 %v14683_v1  ;;  %v14739_v1 = vld [vmem:[#allocation2 + $0x1a2c] ss:$16 sps:$4 sm:$0xff]  }
 0x474   :  { %8857 = vmatpush2.bf16.msra.mxu1 %v14686_v24  ;;  %8817 = vmatprep.subr.bf16.mxu0 %v14691_v39  ;;  %v14742_v24 = vld [vmem:[#allocation2 + $0x1c2c] ss:$16 sps:$4 sm:$0xff]   ;;  %v14737_v39 = vld [vmem:[#allocation2 + $0x1a28] ss:$16 sps:$4 sm:$0xff]  }
 0x475   :  { %8858 = vmatprep.subr.bf16.mxu1 %v14694_v18  ;;  %v14740_v18 = vld [vmem:[#allocation2 + $0x1c28] ss:$16 sps:$4 sm:$0xff]  }
 0x477   :  { %8818 = vmatpush2.bf16.msra.mxu0 %v14689_v23  ;;  %v14745_v23 = vld [vmem:[#allocation2 + $0x1a0c] ss:$16 sps:$4 sm:$0xff]  }
 0x478   :  { %8859 = vmatpush2.bf16.msra.mxu1 %v14692_v40  ;;  %8819 = vmatprep.subr.bf16.mxu0 %v14697_v29  ;;  %v14748_v40 = vld [vmem:[#allocation2 + $0x1c0c] ss:$16 sps:$4 sm:$0xff]   ;;  %v14743_v29 = vld [vmem:[#allocation2 + $0x1a08] ss:$16 sps:$4 sm:$0xff]  }
 0x479   :  { %8860 = vmatprep.subr.bf16.mxu1 %v14700_v44  ;;  %v14746_v44 = vld [vmem:[#allocation2 + $0x1c08] ss:$16 sps:$4 sm:$0xff]  }
 0x47b   :  { %8820 = vmatpush2.bf16.msra.mxu0 %v14695_v34  ;;  %v14751_v34 = vld [vmem:[#allocation2 + $0x1bec] ss:$16 sps:$4 sm:$0xff]  }
 0x47c   :  { %8861 = vmatpush2.bf16.msra.mxu1 %v14698_v46  ;;  %8871 = vmatprep.subr.bf16.mxu0 %v14703_v54  ;;  %v14754_v46 = vld [vmem:[#allocation2 + $0x1dec] ss:$16 sps:$4 sm:$0xff]   ;;  %v14749_v54 = vld [vmem:[#allocation2 + $0x1be8] ss:$16 sps:$4 sm:$0xff]  }
 0x47d   :  { %8912 = vmatprep.subr.bf16.mxu1 %v14706_v16  ;;  %v14752_v16 = vld [vmem:[#allocation2 + $0x1de8] ss:$16 sps:$4 sm:$0xff]  }
 0x47e   :  { %v8577_v12 = vpop.f32.mrf.mxu0  ;;  %8822 = vmatmul.mubr.bf16.vlgmr.msra.gmra.mxu0 %v15680_v22 }
 0x47f   :  { %v8618_v43 = vpop.f32.mrf.mxu1  ;;  %8863 = vmatmul.mubr.bf16.vlgmr.msra.gmra.mxu1 %v15708_v38  ;;  %v8578_v7 = vadd.f32 %v8577_v12, %v15855_v4  ;;  %8872 = vmatpush1.bf16.msra.mxu0 %v14701_v42  ;;  %v14757_v42 = vld [vmem:[#allocation2 + $0x1bcc] ss:$16 sps:$4 sm:$0xff]  }
 0x480   :  { %8913 = vmatpush1.bf16.msra.mxu1 %v14704_v60  ;;  %v8579_v48 = vpop.f32.mrf.mxu0  ;;  %8873 = vmatprep.subr.bf16.mxu0 %v14709_v35  ;;  %v14760_v60 = vld [vmem:[#allocation2 + $0x1dcc] ss:$16 sps:$4 sm:$0xff]   ;;  %v14755_v35 = vld [vmem:[#allocation2 + $0x1bc8] ss:$16 sps:$4 sm:$0xff]  }
 0x481   :  { %v8620_v49 = vpop.f32.mrf.mxu1  ;;  %8914 = vmatprep.subr.bf16.mxu1 %v14712_v33  ;;  %v15865_v27 = vadd.f32 %v8618_v43, %v8578_v7  ;;  %v8580_v14 = vadd.f32 %v8579_v48, %v15860_v59  ;;  %8903 = vmatprep.mubr.bf16.mxu0 %v15690_v41  ;;  %v14719_v59 = vld [vmem:[#allocation2 + $0x1a88] ss:$16 sps:$4 sm:$0xff]   ;;  %v14763_v12 = vld [vmem:[#allocation2 + $0x1bac] ss:$16 sps:$4 sm:$0xff]  }
 0x482   :  { %8944 = vmatprep.mubr.bf16.mxu1 %v15718_v45  ;;  %v8581_v22 = vpop.f32.mrf.mxu0  ;;  %v14722_v41 = vld [vmem:[#allocation2 + $0x1c88] ss:$16 sps:$4 sm:$0xff]   ;;  %v14727_v45 = vld [vmem:[#allocation2 + $0x1a6c] ss:$16 sps:$4 sm:$0xff]  }
 0x483   :  { %v8622_v38 = vpop.f32.mrf.mxu1  ;;  %v15870_v4 = vadd.f32 %v8620_v49, %v8580_v14  ;;  %8874 = vmatpush1.bf16.msra.mxu0 %v14707_v53  ;;  %v14758_v33 = vld [vmem:[#allocation2 + $0x1dc8] ss:$16 sps:$4 sm:$0xff]   ;;  %v14766_v43 = vld [vmem:[#allocation2 + $0x1dac] ss:$16 sps:$4 sm:$0xff]  }
 0x484   :  { %8915 = vmatpush1.bf16.msra.mxu1 %v14710_v32  ;;  %v8582_v9 = vpop.f32.mrf.mxu0  ;;  %8875 = vmatprep.subr.bf16.mxu0 %v14715_v8  ;;  %v14761_v7 = vld [vmem:[#allocation2 + $0x1ba8] ss:$16 sps:$4 sm:$0xff]   ;;  %v14769_v32 = vld [vmem:[#allocation2 + $0x1b8c] ss:$16 sps:$4 sm:$0xff]  }
 0x485   :  { %v8623_v10 = vpop.f32.mrf.mxu1  ;;  %8916 = vmatprep.subr.bf16.mxu1 %v14718_v31  ;;  %v14764_v53 = vld [vmem:[#allocation2 + $0x1da8] ss:$16 sps:$4 sm:$0xff]   ;;  %v14772_v48 = vld [vmem:[#allocation2 + $0x1d8c] ss:$16 sps:$4 sm:$0xff]  }
 0x486   :  { %v14767_v49 = vld [vmem:[#allocation2 + $0x1b88] ss:$16 sps:$4 sm:$0xff]   ;;  %v14775_v31 = vld [vmem:[#allocation2 + $0x1b6c] ss:$16 sps:$4 sm:$0xff]  }
 0x487   :  { %8876 = vmatpush1.bf16.msra.mxu0 %v14713_v50  ;;  %v14770_v8 = vld [vmem:[#allocation2 + $0x1d88] ss:$16 sps:$4 sm:$0xff]   ;;  %v14778_v14 = vld [vmem:[#allocation2 + $0x1d6c] ss:$16 sps:$4 sm:$0xff]  }
 0x488   :  { %8917 = vmatpush1.bf16.msra.mxu1 %v14716_v17  ;;  %8877 = vmatprep.subr.bf16.mxu0 %v14721_v20  ;;  %v14773_v22 = vld [vmem:[#allocation2 + $0x1b68] ss:$16 sps:$4 sm:$0xff]   ;;  %v14781_v50 = vld [vmem:[#allocation2 + $0x1b4c] ss:$16 sps:$4 sm:$0xff]  }
 0x489   :  { %8918 = vmatprep.subr.bf16.mxu1 %v14724_v6  ;;  %v14776_v38 = vld [vmem:[#allocation2 + $0x1d68] ss:$16 sps:$4 sm:$0xff]   ;;  %v14784_v17 = vld [vmem:[#allocation2 + $0x1d4c] ss:$16 sps:$4 sm:$0xff]  }
 0x48a   :  { %v14779_v9 = vld [vmem:[#allocation2 + $0x1b48] ss:$16 sps:$4 sm:$0xff]   ;;  %v14787_v20 = vld [vmem:[#allocation2 + $0x1b2c] ss:$16 sps:$4 sm:$0xff]  }
 0x48b   :  { %8878 = vmatpush1.bf16.msra.mxu0 %v14719_v59  ;;  %v14782_v10 = vld [vmem:[#allocation2 + $0x1d48] ss:$16 sps:$4 sm:$0xff]   ;;  %v14790_v6 = vld [vmem:[#allocation2 + $0x1d2c] ss:$16 sps:$4 sm:$0xff]  }
 0x48c   :  { %8919 = vmatpush1.bf16.msra.mxu1 %v14722_v41  ;;  %8879 = vmatprep.subr.bf16.mxu0 %v14727_v45  ;;  %v14785_v59 = vld [vmem:[#allocation2 + $0x1b28] ss:$16 sps:$4 sm:$0xff]   ;;  %v14793_v45 = vld [vmem:[#allocation2 + $0x1b0c] ss:$16 sps:$4 sm:$0xff]  }
 0x48d   :  { %8920 = vmatprep.subr.bf16.mxu1 %v14730_v19  ;;  %v14788_v41 = vld [vmem:[#allocation2 + $0x1d28] ss:$16 sps:$4 sm:$0xff]   ;;  %v14796_v19 = vld [vmem:[#allocation2 + $0x1d0c] ss:$16 sps:$4 sm:$0xff]  }
 0x48f   :  { %8880 = vmatpush1.bf16.msra.mxu0 %v14725_v15  ;;  %v14791_v15 = vld [vmem:[#allocation2 + $0x1b08] ss:$16 sps:$4 sm:$0xff]  }
 0x490   :  { %8921 = vmatpush1.bf16.msra.mxu1 %v14728_v30  ;;  %8881 = vmatprep.subr.bf16.mxu0 %v14733_v26  ;;  %v14794_v30 = vld [vmem:[#allocation2 + $0x1d08] ss:$16 sps:$4 sm:$0xff]   ;;  %v14799_v26 = vld [vmem:[#allocation2 + $0x1eec] ss:$16 sps:$4 sm:$0xff]  }
 0x491   :  { %8922 = vmatprep.subr.bf16.mxu1 %v14736_v58  ;;  %v14802_v58 = vld [vmem:[#allocation2 + $0x20ec] ss:$16 sps:$4 sm:$0xff]  }
 0x493   :  { %8882 = vmatpush1.bf16.msra.mxu0 %v14731_v28  ;;  %v14797_v28 = vld [vmem:[#allocation2 + $0x1ee8] ss:$16 sps:$4 sm:$0xff]  }
 0x494   :  { %8923 = vmatpush1.bf16.msra.mxu1 %v14734_v55  ;;  %8883 = vmatprep.subr.bf16.mxu0 %v14739_v1  ;;  %v14800_v55 = vld [vmem:[#allocation2 + $0x20e8] ss:$16 sps:$4 sm:$0xff]   ;;  %v14805_v1 = vld [vmem:[#allocation2 + $0x1ecc] ss:$16 sps:$4 sm:$0xff]  }
 0x495   :  { %8924 = vmatprep.subr.bf16.mxu1 %v14742_v24  ;;  %v14808_v24 = vld [vmem:[#allocation2 + $0x20cc] ss:$16 sps:$4 sm:$0xff]  }
 0x497   :  { %8884 = vmatpush1.bf16.msra.mxu0 %v14737_v39 }
 0x498   :  { %8925 = vmatpush1.bf16.msra.mxu1 %v14740_v18  ;;  %8885 = vmatprep.subr.bf16.mxu0 %v14745_v23 }
 0x499   :  { %8926 = vmatprep.subr.bf16.mxu1 %v14748_v40  ;;  %v14803_v40 = vld [vmem:[#allocation2 + $0x1ec8] ss:$16 sps:$4 sm:$0xff]  }
 0x49b   :  { %8886 = vmatpush1.bf16.msra.mxu0 %v14743_v29  ;;  %v14806_v29 = vld [vmem:[#allocation2 + $0x20c8] ss:$16 sps:$4 sm:$0xff]  }
 0x49c   :  { %8927 = vmatpush1.bf16.msra.mxu1 %v14746_v44  ;;  %8887 = vmatprep.subr.bf16.mxu0 %v14751_v34 }
 0x49d   :  { %8928 = vmatprep.subr.bf16.mxu1 %v14754_v46  ;;  %v14811_v46 = vld [vmem:[#allocation2 + $0x1eac] ss:$16 sps:$4 sm:$0xff]  }
 0x49f   :  { %8888 = vmatpush2.bf16.msra.mxu0 %v14749_v54  ;;  %v14814_v54 = vld [vmem:[#allocation2 + $0x20ac] ss:$16 sps:$4 sm:$0xff]  }
 0x4a0   :  { %8929 = vmatpush2.bf16.msra.mxu1 %v14752_v16  ;;  %8889 = vmatprep.subr.bf16.mxu0 %v14757_v42 }
 0x4a1   :  { %8930 = vmatprep.subr.bf16.mxu1 %v14760_v60  ;;  %v14809_v60 = vld [vmem:[#allocation2 + $0x1ea8] ss:$16 sps:$4 sm:$0xff]  }
 0x4a3   :  { %8890 = vmatpush2.bf16.msra.mxu0 %v14755_v35  ;;  %v14812_v35 = vld [vmem:[#allocation2 + $0x20a8] ss:$16 sps:$4 sm:$0xff]  }
 0x4a4   :  { %8931 = vmatpush2.bf16.msra.mxu1 %v14758_v33  ;;  %8891 = vmatprep.subr.bf16.mxu0 %v14763_v12 }
 0x4a5   :  { %8932 = vmatprep.subr.bf16.mxu1 %v14766_v43  ;;  %v14817_v43 = vld [vmem:[#allocation2 + $0x1e8c] ss:$16 sps:$4 sm:$0xff]  }
 0x4a7   :  { %8892 = vmatpush2.bf16.msra.mxu0 %v14761_v7  ;;  %v14820_v7 = vld [vmem:[#allocation2 + $0x208c] ss:$16 sps:$4 sm:$0xff]  }
 0x4a8   :  { %8933 = vmatpush2.bf16.msra.mxu1 %v14764_v53  ;;  %8893 = vmatprep.subr.bf16.mxu0 %v14769_v32  ;;  %v14826_v53 = vld [vmem:[#allocation2 + $0x206c] ss:$16 sps:$4 sm:$0xff]   ;;  %v14821_v32 = vld [vmem:[#allocation2 + $0x1e68] ss:$16 sps:$4 sm:$0xff]  }
 0x4a9   :  { %8934 = vmatprep.subr.bf16.mxu1 %v14772_v48  ;;  %v14824_v48 = vld [vmem:[#allocation2 + $0x2068] ss:$16 sps:$4 sm:$0xff]  }
 0x4ab   :  { %8894 = vmatpush2.bf16.msra.mxu0 %v14767_v49  ;;  %v14829_v49 = vld [vmem:[#allocation2 + $0x1e4c] ss:$16 sps:$4 sm:$0xff]  }
 0x4ac   :  { %8935 = vmatpush2.bf16.msra.mxu1 %v14770_v8  ;;  %8895 = vmatprep.subr.bf16.mxu0 %v14775_v31  ;;  %v14832_v8 = vld [vmem:[#allocation2 + $0x204c] ss:$16 sps:$4 sm:$0xff]   ;;  %v14827_v31 = vld [vmem:[#allocation2 + $0x1e48] ss:$16 sps:$4 sm:$0xff]  }
 0x4ad   :  { %8936 = vmatprep.subr.bf16.mxu1 %v14778_v14  ;;  %v14830_v14 = vld [vmem:[#allocation2 + $0x2048] ss:$16 sps:$4 sm:$0xff]  }
 0x4af   :  { %8896 = vmatpush2.bf16.msra.mxu0 %v14773_v22  ;;  %v14835_v22 = vld [vmem:[#allocation2 + $0x1e2c] ss:$16 sps:$4 sm:$0xff]  }
 0x4b0   :  { %8937 = vmatpush2.bf16.msra.mxu1 %v14776_v38  ;;  %8897 = vmatprep.subr.bf16.mxu0 %v14781_v50  ;;  %v14838_v38 = vld [vmem:[#allocation2 + $0x202c] ss:$16 sps:$4 sm:$0xff]   ;;  %v14833_v50 = vld [vmem:[#allocation2 + $0x1e28] ss:$16 sps:$4 sm:$0xff]  }
 0x4b1   :  { %8938 = vmatprep.subr.bf16.mxu1 %v14784_v17  ;;  %v14836_v17 = vld [vmem:[#allocation2 + $0x2028] ss:$16 sps:$4 sm:$0xff]  }
 0x4b3   :  { %8898 = vmatpush2.bf16.msra.mxu0 %v14779_v9  ;;  %v14841_v9 = vld [vmem:[#allocation2 + $0x1e0c] ss:$16 sps:$4 sm:$0xff]  }
 0x4b4   :  { %8939 = vmatpush2.bf16.msra.mxu1 %v14782_v10  ;;  %8899 = vmatprep.subr.bf16.mxu0 %v14787_v20  ;;  %v14844_v10 = vld [vmem:[#allocation2 + $0x200c] ss:$16 sps:$4 sm:$0xff]   ;;  %v14839_v20 = vld [vmem:[#allocation2 + $0x1e08] ss:$16 sps:$4 sm:$0xff]  }
 0x4b5   :  { %8940 = vmatprep.subr.bf16.mxu1 %v14790_v6  ;;  %v14842_v6 = vld [vmem:[#allocation2 + $0x2008] ss:$16 sps:$4 sm:$0xff]  }
 0x4b7   :  { %8900 = vmatpush2.bf16.msra.mxu0 %v14785_v59  ;;  %v14847_v59 = vld [vmem:[#allocation2 + $0x1fec] ss:$16 sps:$4 sm:$0xff]  }
 0x4b8   :  { %8941 = vmatpush2.bf16.msra.mxu1 %v14788_v41  ;;  %8901 = vmatprep.subr.bf16.mxu0 %v14793_v45  ;;  %v14850_v41 = vld [vmem:[#allocation2 + $0x21ec] ss:$16 sps:$4 sm:$0xff]   ;;  %v14845_v45 = vld [vmem:[#allocation2 + $0x1fe8] ss:$16 sps:$4 sm:$0xff]  }
 0x4b9   :  { %8942 = vmatprep.subr.bf16.mxu1 %v14796_v19  ;;  %v14848_v19 = vld [vmem:[#allocation2 + $0x21e8] ss:$16 sps:$4 sm:$0xff]  }
 0x4bb   :  { %8902 = vmatpush2.bf16.msra.mxu0 %v14791_v15  ;;  %v14853_v15 = vld [vmem:[#allocation2 + $0x1fcc] ss:$16 sps:$4 sm:$0xff]  }
 0x4bc   :  { %8943 = vmatpush2.bf16.msra.mxu1 %v14794_v30  ;;  %8953 = vmatprep.subr.bf16.mxu0 %v14799_v26  ;;  %v14856_v30 = vld [vmem:[#allocation2 + $0x21cc] ss:$16 sps:$4 sm:$0xff]   ;;  %v14851_v26 = vld [vmem:[#allocation2 + $0x1fc8] ss:$16 sps:$4 sm:$0xff]  }
 0x4bd   :  { %8994 = vmatprep.subr.bf16.mxu1 %v14802_v58  ;;  %v14854_v58 = vld [vmem:[#allocation2 + $0x21c8] ss:$16 sps:$4 sm:$0xff]  }
 0x4be   :  { %v8659_v39 = vpop.f32.mrf.mxu0  ;;  %8904 = vmatmul.mubr.bf16.vlgmr.msra.gmra.mxu0 %v15710_v56 }
 0x4bf   :  { %v8700_v18 = vpop.f32.mrf.mxu1  ;;  %8945 = vmatmul.mubr.bf16.vlgmr.msra.gmra.mxu1 %v15741_v61  ;;  %v8660_v23 = vadd.f32 %v8659_v39, %v15865_v27  ;;  %8954 = vmatpush1.bf16.msra.mxu0 %v14797_v28  ;;  %v14859_v28 = vld [vmem:[#allocation2 + $0x1fac] ss:$16 sps:$4 sm:$0xff]  }
 0x4c0   :  { %8995 = vmatpush1.bf16.msra.mxu1 %v14800_v55  ;;  %v8661_v44 = vpop.f32.mrf.mxu0  ;;  %8955 = vmatprep.subr.bf16.mxu0 %v14805_v1  ;;  %v14862_v55 = vld [vmem:[#allocation2 + $0x21ac] ss:$16 sps:$4 sm:$0xff]   ;;  %v14857_v1 = vld [vmem:[#allocation2 + $0x1fa8] ss:$16 sps:$4 sm:$0xff]  }
 0x4c1   :  { %v8702_v34 = vpop.f32.mrf.mxu1  ;;  %8996 = vmatprep.subr.bf16.mxu1 %v14808_v24  ;;  %v15875_v16 = vadd.f32 %v8700_v18, %v8660_v23  ;;  %v8662_v42 = vadd.f32 %v8661_v44, %v15870_v4  ;;  %8985 = vmatprep.mubr.bf16.mxu0 %v15720_v3  ;;  %v14815_v4 = vld [vmem:[#allocation2 + $0x1e88] ss:$16 sps:$4 sm:$0xff]   ;;  %v14865_v39 = vld [vmem:[#allocation2 + $0x1f8c] ss:$16 sps:$4 sm:$0xff]  }
 0x4c2   :  { %9026 = vmatprep.mubr.bf16.mxu1 %v15748_v62  ;;  %v8663_v56 = vpop.f32.mrf.mxu0  ;;  %v14818_v3 = vld [vmem:[#allocation2 + $0x2088] ss:$16 sps:$4 sm:$0xff]   ;;  %v14823_v62 = vld [vmem:[#allocation2 + $0x1e6c] ss:$16 sps:$4 sm:$0xff]  }
 0x4c3   :  { %v8704_v61 = vpop.f32.mrf.mxu1  ;;  %v15880_v27 = vadd.f32 %v8702_v34, %v8662_v42  ;;  %8956 = vmatpush1.bf16.msra.mxu0 %v14803_v40  ;;  %v14860_v24 = vld [vmem:[#allocation2 + $0x21a8] ss:$16 sps:$4 sm:$0xff]   ;;  %v14868_v18 = vld [vmem:[#allocation2 + $0x218c] ss:$16 sps:$4 sm:$0xff]  }
 0x4c4   :  { %8997 = vmatpush1.bf16.msra.mxu1 %v14806_v29  ;;  %v8664_v33 = vpop.f32.mrf.mxu0  ;;  %8957 = vmatprep.subr.bf16.mxu0 %v14811_v46  ;;  %v14863_v23 = vld [vmem:[#allocation2 + $0x1f88] ss:$16 sps:$4 sm:$0xff]   ;;  %v14871_v29 = vld [vmem:[#allocation2 + $0x1f6c] ss:$16 sps:$4 sm:$0xff]  }
 0x4c5   :  { %v8705_v12 = vpop.f32.mrf.mxu1  ;;  %8998 = vmatprep.subr.bf16.mxu1 %v14814_v54  ;;  %v14866_v40 = vld [vmem:[#allocation2 + $0x2188] ss:$16 sps:$4 sm:$0xff]   ;;  %v14874_v44 = vld [vmem:[#allocation2 + $0x216c] ss:$16 sps:$4 sm:$0xff]  }
 0x4c6   :  { %v14869_v34 = vld [vmem:[#allocation2 + $0x1f68] ss:$16 sps:$4 sm:$0xff]   ;;  %v14877_v54 = vld [vmem:[#allocation2 + $0x1f4c] ss:$16 sps:$4 sm:$0xff]  }
 0x4c7   :  { %8958 = vmatpush1.bf16.msra.mxu0 %v14809_v60  ;;  %v14872_v46 = vld [vmem:[#allocation2 + $0x2168] ss:$16 sps:$4 sm:$0xff]   ;;  %v14880_v42 = vld [vmem:[#allocation2 + $0x214c] ss:$16 sps:$4 sm:$0xff]  }
 0x4c8   :  { %8999 = vmatpush1.bf16.msra.mxu1 %v14812_v35  ;;  %8959 = vmatprep.subr.bf16.mxu0 %v14817_v43  ;;  %v14875_v56 = vld [vmem:[#allocation2 + $0x1f48] ss:$16 sps:$4 sm:$0xff]   ;;  %v14883_v60 = vld [vmem:[#allocation2 + $0x1f2c] ss:$16 sps:$4 sm:$0xff]  }
 0x4c9   :  { %9000 = vmatprep.subr.bf16.mxu1 %v14820_v7  ;;  %v14878_v61 = vld [vmem:[#allocation2 + $0x2148] ss:$16 sps:$4 sm:$0xff]   ;;  %v14886_v35 = vld [vmem:[#allocation2 + $0x212c] ss:$16 sps:$4 sm:$0xff]  }
 0x4ca   :  { %v14881_v33 = vld [vmem:[#allocation2 + $0x1f28] ss:$16 sps:$4 sm:$0xff]   ;;  %v14889_v43 = vld [vmem:[#allocation2 + $0x1f0c] ss:$16 sps:$4 sm:$0xff]  }
 0x4cb   :  { %8960 = vmatpush1.bf16.msra.mxu0 %v14815_v4  ;;  %v14884_v12 = vld [vmem:[#allocation2 + $0x2128] ss:$16 sps:$4 sm:$0xff]   ;;  %v14892_v7 = vld [vmem:[#allocation2 + $0x210c] ss:$16 sps:$4 sm:$0xff]  }
 0x4cc   :  { %9001 = vmatpush1.bf16.msra.mxu1 %v14818_v3  ;;  %8961 = vmatprep.subr.bf16.mxu0 %v14823_v62  ;;  %v14887_v4 = vld [vmem:[#allocation2 + $0x1f08] ss:$16 sps:$4 sm:$0xff]   ;;  %v14895_v62 = vld [vmem:[#allocation2 + $0x22ec] ss:$16 sps:$4 sm:$0xff]  }
 0x4cd   :  { %9002 = vmatprep.subr.bf16.mxu1 %v14826_v53  ;;  %v14890_v3 = vld [vmem:[#allocation2 + $0x2108] ss:$16 sps:$4 sm:$0xff]   ;;  %v14898_v53 = vld [vmem:[#allocation2 + $0x24ec] ss:$16 sps:$4 sm:$0xff]  }
 0x4cf   :  { %8962 = vmatpush1.bf16.msra.mxu0 %v14821_v32  ;;  %v14893_v32 = vld [vmem:[#allocation2 + $0x22e8] ss:$16 sps:$4 sm:$0xff]  }
 0x4d0   :  { %9003 = vmatpush1.bf16.msra.mxu1 %v14824_v48  ;;  %8963 = vmatprep.subr.bf16.mxu0 %v14829_v49  ;;  %v14896_v48 = vld [vmem:[#allocation2 + $0x24e8] ss:$16 sps:$4 sm:$0xff]   ;;  %v14901_v49 = vld [vmem:[#allocation2 + $0x22cc] ss:$16 sps:$4 sm:$0xff]  }
 0x4d1   :  { %9004 = vmatprep.subr.bf16.mxu1 %v14832_v8  ;;  %v14904_v8 = vld [vmem:[#allocation2 + $0x24cc] ss:$16 sps:$4 sm:$0xff]  }
 0x4d3   :  { %8964 = vmatpush1.bf16.msra.mxu0 %v14827_v31 }
 0x4d4   :  { %9005 = vmatpush1.bf16.msra.mxu1 %v14830_v14  ;;  %8965 = vmatprep.subr.bf16.mxu0 %v14835_v22 }
 0x4d5   :  { %9006 = vmatprep.subr.bf16.mxu1 %v14838_v38  ;;  %v14899_v38 = vld [vmem:[#allocation2 + $0x22c8] ss:$16 sps:$4 sm:$0xff]  }
 0x4d7   :  { %8966 = vmatpush1.bf16.msra.mxu0 %v14833_v50  ;;  %v14902_v50 = vld [vmem:[#allocation2 + $0x24c8] ss:$16 sps:$4 sm:$0xff]  }
 0x4d8   :  { %9007 = vmatpush1.bf16.msra.mxu1 %v14836_v17  ;;  %8967 = vmatprep.subr.bf16.mxu0 %v14841_v9 }
 0x4d9   :  { %9008 = vmatprep.subr.bf16.mxu1 %v14844_v10  ;;  %v14907_v10 = vld [vmem:[#allocation2 + $0x22ac] ss:$16 sps:$4 sm:$0xff]  }
 0x4db   :  { %8968 = vmatpush1.bf16.msra.mxu0 %v14839_v20  ;;  %v14910_v20 = vld [vmem:[#allocation2 + $0x24ac] ss:$16 sps:$4 sm:$0xff]  }
 0x4dc   :  { %9009 = vmatpush1.bf16.msra.mxu1 %v14842_v6  ;;  %8969 = vmatprep.subr.bf16.mxu0 %v14847_v59 }
 0x4dd   :  { %9010 = vmatprep.subr.bf16.mxu1 %v14850_v41  ;;  %v14905_v41 = vld [vmem:[#allocation2 + $0x22a8] ss:$16 sps:$4 sm:$0xff]  }
 0x4df   :  { %8970 = vmatpush2.bf16.msra.mxu0 %v14845_v45  ;;  %v14908_v45 = vld [vmem:[#allocation2 + $0x24a8] ss:$16 sps:$4 sm:$0xff]  }
 0x4e0   :  { %9011 = vmatpush2.bf16.msra.mxu1 %v14848_v19  ;;  %8971 = vmatprep.subr.bf16.mxu0 %v14853_v15 }
 0x4e1   :  { %9012 = vmatprep.subr.bf16.mxu1 %v14856_v30  ;;  %v14913_v30 = vld [vmem:[#allocation2 + $0x228c] ss:$16 sps:$4 sm:$0xff]  }
 0x4e3   :  { %8972 = vmatpush2.bf16.msra.mxu0 %v14851_v26  ;;  %v14916_v26 = vld [vmem:[#allocation2 + $0x248c] ss:$16 sps:$4 sm:$0xff]  }
 0x4e4   :  { %9013 = vmatpush2.bf16.msra.mxu1 %v14854_v58  ;;  %8973 = vmatprep.subr.bf16.mxu0 %v14859_v28  ;;  %v14922_v58 = vld [vmem:[#allocation2 + $0x246c] ss:$16 sps:$4 sm:$0xff]   ;;  %v14917_v28 = vld [vmem:[#allocation2 + $0x2268] ss:$16 sps:$4 sm:$0xff]  }
 0x4e5   :  { %9014 = vmatprep.subr.bf16.mxu1 %v14862_v55  ;;  %v14920_v55 = vld [vmem:[#allocation2 + $0x2468] ss:$16 sps:$4 sm:$0xff]  }
 0x4e7   :  { %8974 = vmatpush2.bf16.msra.mxu0 %v14857_v1  ;;  %v14925_v1 = vld [vmem:[#allocation2 + $0x224c] ss:$16 sps:$4 sm:$0xff]  }
 0x4e8   :  { %9015 = vmatpush2.bf16.msra.mxu1 %v14860_v24  ;;  %8975 = vmatprep.subr.bf16.mxu0 %v14865_v39  ;;  %v14928_v24 = vld [vmem:[#allocation2 + $0x244c] ss:$16 sps:$4 sm:$0xff]   ;;  %v14923_v39 = vld [vmem:[#allocation2 + $0x2248] ss:$16 sps:$4 sm:$0xff]  }
 0x4e9   :  { %9016 = vmatprep.subr.bf16.mxu1 %v14868_v18  ;;  %v14926_v18 = vld [vmem:[#allocation2 + $0x2448] ss:$16 sps:$4 sm:$0xff]  }
 0x4eb   :  { %8976 = vmatpush2.bf16.msra.mxu0 %v14863_v23  ;;  %v14931_v23 = vld [vmem:[#allocation2 + $0x222c] ss:$16 sps:$4 sm:$0xff]  }
 0x4ec   :  { %9017 = vmatpush2.bf16.msra.mxu1 %v14866_v40  ;;  %8977 = vmatprep.subr.bf16.mxu0 %v14871_v29  ;;  %v14934_v40 = vld [vmem:[#allocation2 + $0x242c] ss:$16 sps:$4 sm:$0xff]   ;;  %v14929_v29 = vld [vmem:[#allocation2 + $0x2228] ss:$16 sps:$4 sm:$0xff]  }
 0x4ed   :  { %9018 = vmatprep.subr.bf16.mxu1 %v14874_v44  ;;  %v14932_v44 = vld [vmem:[#allocation2 + $0x2428] ss:$16 sps:$4 sm:$0xff]  }
 0x4ef   :  { %8978 = vmatpush2.bf16.msra.mxu0 %v14869_v34  ;;  %v14937_v34 = vld [vmem:[#allocation2 + $0x220c] ss:$16 sps:$4 sm:$0xff]  }
 0x4f0   :  { %9019 = vmatpush2.bf16.msra.mxu1 %v14872_v46  ;;  %8979 = vmatprep.subr.bf16.mxu0 %v14877_v54  ;;  %v14940_v46 = vld [vmem:[#allocation2 + $0x240c] ss:$16 sps:$4 sm:$0xff]   ;;  %v14935_v54 = vld [vmem:[#allocation2 + $0x2208] ss:$16 sps:$4 sm:$0xff]  }
 0x4f1   :  { %9020 = vmatprep.subr.bf16.mxu1 %v14880_v42  ;;  %v14938_v42 = vld [vmem:[#allocation2 + $0x2408] ss:$16 sps:$4 sm:$0xff]  }
 0x4f3   :  { %8980 = vmatpush2.bf16.msra.mxu0 %v14875_v56  ;;  %v14943_v56 = vld [vmem:[#allocation2 + $0x23ec] ss:$16 sps:$4 sm:$0xff]  }
 0x4f4   :  { %9021 = vmatpush2.bf16.msra.mxu1 %v14878_v61  ;;  %8981 = vmatprep.subr.bf16.mxu0 %v14883_v60  ;;  %v14946_v61 = vld [vmem:[#allocation2 + $0x25ec] ss:$16 sps:$4 sm:$0xff]   ;;  %v14941_v60 = vld [vmem:[#allocation2 + $0x23e8] ss:$16 sps:$4 sm:$0xff]  }
 0x4f5   :  { %9022 = vmatprep.subr.bf16.mxu1 %v14886_v35  ;;  %v14944_v35 = vld [vmem:[#allocation2 + $0x25e8] ss:$16 sps:$4 sm:$0xff]  }
 0x4f7   :  { %8982 = vmatpush2.bf16.msra.mxu0 %v14881_v33  ;;  %v14949_v33 = vld [vmem:[#allocation2 + $0x23cc] ss:$16 sps:$4 sm:$0xff]  }
 0x4f8   :  { %9023 = vmatpush2.bf16.msra.mxu1 %v14884_v12  ;;  %8983 = vmatprep.subr.bf16.mxu0 %v14889_v43  ;;  %v14952_v12 = vld [vmem:[#allocation2 + $0x25cc] ss:$16 sps:$4 sm:$0xff]   ;;  %v14947_v43 = vld [vmem:[#allocation2 + $0x23c8] ss:$16 sps:$4 sm:$0xff]  }
 0x4f9   :  { %9024 = vmatprep.subr.bf16.mxu1 %v14892_v7  ;;  %v14950_v7 = vld [vmem:[#allocation2 + $0x25c8] ss:$16 sps:$4 sm:$0xff]  }
 0x4fb   :  { %8984 = vmatpush2.bf16.msra.mxu0 %v14887_v4  ;;  %v14955_v4 = vld [vmem:[#allocation2 + $0x23ac] ss:$16 sps:$4 sm:$0xff]  }
 0x4fc   :  { %9025 = vmatpush2.bf16.msra.mxu1 %v14890_v3  ;;  %9035 = vmatprep.subr.bf16.mxu0 %v14895_v62  ;;  %v14958_v3 = vld [vmem:[#allocation2 + $0x25ac] ss:$16 sps:$4 sm:$0xff]   ;;  %v14953_v62 = vld [vmem:[#allocation2 + $0x23a8] ss:$16 sps:$4 sm:$0xff]  }
 0x4fd   :  { %9076 = vmatprep.subr.bf16.mxu1 %v14898_v53  ;;  %v14956_v53 = vld [vmem:[#allocation2 + $0x25a8] ss:$16 sps:$4 sm:$0xff]  }
 0x4fe   :  { %v8741_v31 = vpop.f32.mrf.mxu0  ;;  %8986 = vmatmul.mubr.bf16.vlgmr.msra.gmra.mxu0 %v15743_v47 }
 0x4ff   :  { %v8782_v14 = vpop.f32.mrf.mxu1  ;;  %9027 = vmatmul.mubr.bf16.vlgmr.msra.gmra.mxu1 %v15771_v2  ;;  %v8742_v22 = vadd.f32 %v8741_v31, %v15875_v16  ;;  %9036 = vmatpush1.bf16.msra.mxu0 %v14893_v32  ;;  %v14961_v32 = vld [vmem:[#allocation2 + $0x238c] ss:$16 sps:$4 sm:$0xff]  }
 0x500   :  { %9077 = vmatpush1.bf16.msra.mxu1 %v14896_v48  ;;  %v8743_v17 = vpop.f32.mrf.mxu0  ;;  %9037 = vmatprep.subr.bf16.mxu0 %v14901_v49  ;;  %v14964_v48 = vld [vmem:[#allocation2 + $0x258c] ss:$16 sps:$4 sm:$0xff]   ;;  %v14959_v49 = vld [vmem:[#allocation2 + $0x2388] ss:$16 sps:$4 sm:$0xff]  }
 0x501   :  { %v8784_v9 = vpop.f32.mrf.mxu1  ;;  %9078 = vmatprep.subr.bf16.mxu1 %v14904_v8  ;;  %v15885_v6 = vadd.f32 %v8782_v14, %v8742_v22  ;;  %v8744_v59 = vadd.f32 %v8743_v17, %v15880_v27  ;;  %9067 = vmatprep.mubr.bf16.mxu0 %v15750_v63  ;;  %v14911_v27 = vld [vmem:[#allocation2 + $0x2288] ss:$16 sps:$4 sm:$0xff]   ;;  %v14967_v31 = vld [vmem:[#allocation2 + $0x236c] ss:$16 sps:$4 sm:$0xff]  }
 0x502   :  { %9108 = vmatprep.mubr.bf16.mxu1 %v15775_v25  ;;  %v8745_v47 = vpop.f32.mrf.mxu0  ;;  %v14914_v63 = vld [vmem:[#allocation2 + $0x2488] ss:$16 sps:$4 sm:$0xff]   ;;  %v14919_v25 = vld [vmem:[#allocation2 + $0x226c] ss:$16 sps:$4 sm:$0xff]  }
 0x503   :  { %v8786_v2 = vpop.f32.mrf.mxu1  ;;  %v15890_v16 = vadd.f32 %v8784_v9, %v8744_v59  ;;  %9038 = vmatpush1.bf16.msra.mxu0 %v14899_v38  ;;  %v14962_v8 = vld [vmem:[#allocation2 + $0x2588] ss:$16 sps:$4 sm:$0xff]   ;;  %v14970_v14 = vld [vmem:[#allocation2 + $0x256c] ss:$16 sps:$4 sm:$0xff]  }
 0x504   :  { %9079 = vmatpush1.bf16.msra.mxu1 %v14902_v50  ;;  %v8746_v19 = vpop.f32.mrf.mxu0  ;;  %9039 = vmatprep.subr.bf16.mxu0 %v14907_v10  ;;  %v14965_v22 = vld [vmem:[#allocation2 + $0x2368] ss:$16 sps:$4 sm:$0xff]   ;;  %v14973_v50 = vld [vmem:[#allocation2 + $0x234c] ss:$16 sps:$4 sm:$0xff]  }
 0x505   :  { %v8787_v15 = vpop.f32.mrf.mxu1  ;;  %9080 = vmatprep.subr.bf16.mxu1 %v14910_v20  ;;  %v14968_v38 = vld [vmem:[#allocation2 + $0x2568] ss:$16 sps:$4 sm:$0xff]   ;;  %v14976_v17 = vld [vmem:[#allocation2 + $0x254c] ss:$16 sps:$4 sm:$0xff]  }
 0x506   :  { %v14971_v9 = vld [vmem:[#allocation2 + $0x2348] ss:$16 sps:$4 sm:$0xff]   ;;  %v14979_v20 = vld [vmem:[#allocation2 + $0x232c] ss:$16 sps:$4 sm:$0xff]  }
 0x507   :  { %9040 = vmatpush1.bf16.msra.mxu0 %v14905_v41  ;;  %v14974_v10 = vld [vmem:[#allocation2 + $0x2548] ss:$16 sps:$4 sm:$0xff]   ;;  %v14982_v59 = vld [vmem:[#allocation2 + $0x252c] ss:$16 sps:$4 sm:$0xff]  }
 0x508   :  { %9081 = vmatpush1.bf16.msra.mxu1 %v14908_v45  ;;  %9041 = vmatprep.subr.bf16.mxu0 %v14913_v30  ;;  %v14977_v47 = vld [vmem:[#allocation2 + $0x2328] ss:$16 sps:$4 sm:$0xff]   ;;  %v14985_v41 = vld [vmem:[#allocation2 + $0x230c] ss:$16 sps:$4 sm:$0xff]  }
 0x509   :  { %9082 = vmatprep.subr.bf16.mxu1 %v14916_v26  ;;  %v14980_v2 = vld [vmem:[#allocation2 + $0x2528] ss:$16 sps:$4 sm:$0xff]   ;;  %v14988_v45 = vld [vmem:[#allocation2 + $0x250c] ss:$16 sps:$4 sm:$0xff]   ;;  %v9118_v26 = vmax.f32 %v15832_v13, 0.0 }
 0x50a   :  { %v14983_v19 = vld [vmem:[#allocation2 + $0x2308] ss:$16 sps:$4 sm:$0xff]  }
 0x50b   :  { %9042 = vmatpush1.bf16.msra.mxu0 %v14911_v27  ;;  %v14986_v15 = vld [vmem:[#allocation2 + $0x2508] ss:$16 sps:$4 sm:$0xff]   ;;  %v14989_v27 = vld [vmem:[#allocation6 + $0x70] ss:$8 sps:$4 sm:$0xff]  }
 0x50c   :  { %9083 = vmatpush1.bf16.msra.mxu1 %v14914_v63  ;;  %9043 = vmatprep.subr.bf16.mxu0 %v14919_v25  ;;  %v14991_v30 = vld [vmem:[#allocation6 + $0x74] ss:$8 sps:$4 sm:$0xff]   ;;  %v14994_v63 = vld [vmem:[#allocation6 + $0x64] ss:$8 sps:$4 sm:$0xff]   ;;  %v9122_v25 = vpack.c.bf16 %v9118_v26, %v9118_v26 }
 0x50d   :  { %9084 = vmatprep.subr.bf16.mxu1 %v14922_v58  ;;  %v14997_v13 = vld [vmem:[#allocation6 + $0x54] ss:$8 sps:$4 sm:$0xff]  }
 0x50e   :  { %v15027_v26 = vld [vmem:[#allocation6 + $0xb4] ss:$8 sps:$4 sm:$0xff]  }
 0x50f   :  { %9044 = vmatpush1.bf16.msra.mxu0 %v14917_v28 }
 0x510   :  { %9085 = vmatpush1.bf16.msra.mxu1 %v14920_v55  ;;  %9045 = vmatprep.subr.bf16.mxu0 %v14925_v1  ;;  %v14992_v1 = vld [vmem:[#allocation6 + $0x60] ss:$8 sps:$4 sm:$0xff]  }
 0x511   :  { %9086 = vmatprep.subr.bf16.mxu1 %v14928_v24 }
 0x513   :  { %9046 = vmatpush1.bf16.msra.mxu0 %v14923_v39 }
 0x514   :  { %9087 = vmatpush1.bf16.msra.mxu1 %v14926_v18  ;;  %9047 = vmatprep.subr.bf16.mxu0 %v14931_v23 }
 0x515   :  { %9088 = vmatprep.subr.bf16.mxu1 %v14934_v40 }
 0x517   :  { %9048 = vmatpush1.bf16.msra.mxu0 %v14929_v29 }
 0x518   :  { %9089 = vmatpush1.bf16.msra.mxu1 %v14932_v44  ;;  %9049 = vmatprep.subr.bf16.mxu0 %v14937_v34 }
 0x519   :  { %9090 = vmatprep.subr.bf16.mxu1 %v14940_v46  ;;  %v15037_v46 = vld [vmem:[#allocation6 + $0x170] ss:$8 sps:$4 sm:$0xff]  }
 0x51b   :  { %9050 = vmatpush1.bf16.msra.mxu0 %v14935_v54  ;;  %v15039_v54 = vld [vmem:[#allocation6 + $0x174] ss:$8 sps:$4 sm:$0xff]  }
 0x51c   :  { %9091 = vmatpush1.bf16.msra.mxu1 %v14938_v42  ;;  %9051 = vmatprep.subr.bf16.mxu0 %v14943_v56  ;;  %v15042_v42 = vld [vmem:[#allocation6 + $0x164] ss:$8 sps:$4 sm:$0xff]   ;;  %v14998_v56 = vld [vmem:[#allocation6 + $0x40] ss:$8 sps:$4 sm:$0xff]  }
 0x51d   :  { %9092 = vmatprep.subr.bf16.mxu1 %v14946_v61  ;;  %v15040_v61 = vld [vmem:[#allocation6 + $0x160] ss:$8 sps:$4 sm:$0xff]  }
 0x51f   :  { %9052 = vmatpush2.bf16.msra.mxu0 %v14941_v60  ;;  %v15045_v60 = vld [vmem:[#allocation6 + $0x154] ss:$8 sps:$4 sm:$0xff]  }
 0x520   :  { %9093 = vmatpush2.bf16.msra.mxu1 %v14944_v35  ;;  %9053 = vmatprep.subr.bf16.mxu0 %v14949_v33  ;;  %v15001_v35 = vld [vmem:[#allocation6 + $0x30] ss:$8 sps:$4 sm:$0xff]  }
 0x521   :  { %9094 = vmatprep.subr.bf16.mxu1 %v14952_v12  ;;  %v15043_v33 = vld [vmem:[#allocation6 + $0x150] ss:$8 sps:$4 sm:$0xff]   ;;  %v15006_v12 = vld [vmem:[#allocation6 + $0x24] ss:$8 sps:$4 sm:$0xff]  }
 0x523   :  { %9054 = vmatpush2.bf16.msra.mxu0 %v14947_v43  ;;  %v15048_v43 = vld [vmem:[#allocation6 + $0x144] ss:$8 sps:$4 sm:$0xff]  }
 0x524   :  { %9095 = vmatpush2.bf16.msra.mxu1 %v14950_v7  ;;  %9055 = vmatprep.subr.bf16.mxu0 %v14955_v4  ;;  %v15004_v7 = vld [vmem:[#allocation6 + $0x20] ss:$8 sps:$4 sm:$0xff]  }
 0x525   :  { %9096 = vmatprep.subr.bf16.mxu1 %v14958_v3  ;;  %v15046_v4 = vld [vmem:[#allocation6 + $0x140] ss:$8 sps:$4 sm:$0xff]   ;;  %v15009_v3 = vld [vmem:[#allocation6 + $0x14] ss:$8 sps:$4 sm:$0xff]  }
 0x527   :  { %9056 = vmatpush2.bf16.msra.mxu0 %v14953_v62  ;;  %v15051_v62 = vld [vmem:[#allocation6 + $0x134] ss:$8 sps:$4 sm:$0xff]  }
 0x528   :  { %9097 = vmatpush2.bf16.msra.mxu1 %v14956_v53  ;;  %9057 = vmatprep.subr.bf16.mxu0 %v14961_v32  ;;  %v15007_v53 = vld [vmem:[#allocation6 + $0x10] ss:$8 sps:$4 sm:$0xff]  }
 0x529   :  { %9098 = vmatprep.subr.bf16.mxu1 %v14964_v48  ;;  %v15049_v32 = vld [vmem:[#allocation6 + $0x130] ss:$8 sps:$4 sm:$0xff]   ;;  %v15012_v48 = vld [vmem:[#allocation6 + $0x4] ss:$8 sps:$4 sm:$0xff]  }
 0x52b   :  { %9058 = vmatpush2.bf16.msra.mxu0 %v14959_v49  ;;  %v15054_v49 = vld [vmem:[#allocation6 + $0x124] ss:$8 sps:$4 sm:$0xff]  }
 0x52c   :  { %9099 = vmatpush2.bf16.msra.mxu1 %v14962_v8  ;;  %9059 = vmatprep.subr.bf16.mxu0 %v14967_v31  ;;  %v15010_v8 = vld [vmem:[#allocation6] ss:$8 sps:$4 sm:$0xff]  }
 0x52d   :  { %9100 = vmatprep.subr.bf16.mxu1 %v14970_v14  ;;  %v15052_v31 = vld [vmem:[#allocation6 + $0x120] ss:$8 sps:$4 sm:$0xff]   ;;  %v15015_v14 = vld [vmem:[#allocation6 + $0xf4] ss:$8 sps:$4 sm:$0xff]  }
 0x52f   :  { %9060 = vmatpush2.bf16.msra.mxu0 %v14965_v22  ;;  %v15057_v22 = vld [vmem:[#allocation6 + $0x114] ss:$8 sps:$4 sm:$0xff]  }
 0x530   :  { %9101 = vmatpush2.bf16.msra.mxu1 %v14968_v38  ;;  %9061 = vmatprep.subr.bf16.mxu0 %v14973_v50  ;;  %v15013_v38 = vld [vmem:[#allocation6 + $0xf0] ss:$8 sps:$4 sm:$0xff]  }
 0x531   :  { %9102 = vmatprep.subr.bf16.mxu1 %v14976_v17  ;;  %v15055_v50 = vld [vmem:[#allocation6 + $0x110] ss:$8 sps:$4 sm:$0xff]   ;;  %v15018_v17 = vld [vmem:[#allocation6 + $0xe4] ss:$8 sps:$4 sm:$0xff]  }
 0x533   :  { %9062 = vmatpush2.bf16.msra.mxu0 %v14971_v9  ;;  %v15060_v9 = vld [vmem:[#allocation6 + $0x104] ss:$8 sps:$4 sm:$0xff]  }
 0x534   :  { %9103 = vmatpush2.bf16.msra.mxu1 %v14974_v10  ;;  %9063 = vmatprep.subr.bf16.mxu0 %v14979_v20  ;;  %v15016_v10 = vld [vmem:[#allocation6 + $0xe0] ss:$8 sps:$4 sm:$0xff]  }
 0x535   :  { %9104 = vmatprep.subr.bf16.mxu1 %v14982_v59  ;;  %v15058_v20 = vld [vmem:[#allocation6 + $0x100] ss:$8 sps:$4 sm:$0xff]   ;;  %v15021_v59 = vld [vmem:[#allocation6 + $0xd4] ss:$8 sps:$4 sm:$0xff]  }
 0x537   :  { %9064 = vmatpush2.bf16.msra.mxu0 %v14977_v47  ;;  %v15063_v47 = vld [vmem:[#allocation6 + $0x1f4] ss:$8 sps:$4 sm:$0xff]  }
 0x538   :  { %9105 = vmatpush2.bf16.msra.mxu1 %v14980_v2  ;;  %9065 = vmatprep.subr.bf16.mxu0 %v14985_v41  ;;  %v15019_v2 = vld [vmem:[#allocation6 + $0xd0] ss:$8 sps:$4 sm:$0xff]  }
 0x539   :  { %9106 = vmatprep.subr.bf16.mxu1 %v14988_v45  ;;  %v15061_v41 = vld [vmem:[#allocation6 + $0x1f0] ss:$8 sps:$4 sm:$0xff]   ;;  %v15024_v45 = vld [vmem:[#allocation6 + $0xc4] ss:$8 sps:$4 sm:$0xff]  }
 0x53b   :  { %9066 = vmatpush2.bf16.msra.mxu0 %v14983_v19  ;;  %v15066_v19 = vld [vmem:[#allocation6 + $0x1e4] ss:$8 sps:$4 sm:$0xff]  }
 0x53c   :  { %9107 = vmatpush2.bf16.msra.mxu1 %v14986_v15  ;;  %9521 = vmatprep.subr.bf16.mxu0 %v14991_v30  ;;  %v15022_v15 = vld [vmem:[#allocation6 + $0xc0] ss:$8 sps:$4 sm:$0xff]  }
 0x53d   :  { %9562 = vmatprep.subr.bf16.mxu1 %v15039_v54  ;;  %v15064_v30 = vld [vmem:[#allocation6 + $0x1e0] ss:$8 sps:$4 sm:$0xff]  }
 0x53e   :  { %v8823_v58 = vpop.f32.mrf.mxu0  ;;  %9068 = vmatmul.mubr.bf16.vlgmr.msra.gmra.mxu0 %v15773_v11  ;;  %v14995_v11 = vld [vmem:[#allocation6 + $0x50] ss:$8 sps:$4 sm:$0xff]  }
 0x53f   :  { %v8864_v28 = vpop.f32.mrf.mxu1  ;;  %9109 = vmatmul.mubr.bf16.vlgmr.msra.gmra.mxu1 %v15790_v36  ;;  %v8824_v55 = vadd.f32 %v8823_v58, %v15885_v6  ;;  %9522 = vmatpush1.bf16.msra.mxu0 %v14989_v27  ;;  %v15000_v6 = vld [vmem:[#allocation6 + $0x44] ss:$8 sps:$4 sm:$0xff]   ;;  %v15069_v27 = vld [vmem:[#allocation6 + $0x1d4] ss:$8 sps:$4 sm:$0xff]  }
 0x540   :  { %9553 = vmatprep.mubr.bf16.mxu0 %v9122_v25  ;;  %v8825_v24 = vpop.f32.mrf.mxu0  ;;  %9523 = vmatprep.subr.bf16.mxu0 %v14994_v63  ;;  %v15025_v63 = vld [vmem:[#allocation6 + $0xb0] ss:$8 sps:$4 sm:$0xff]   ;;  %v15030_v58 = vld [vmem:[#allocation6 + $0xa4] ss:$8 sps:$4 sm:$0xff]  }
 0x541   :  { %v8866_v39 = vpop.f32.mrf.mxu1  ;;  %v15896_v18 = vadd.f32 %v8864_v28, %v8824_v55  ;;  %v8826_v23 = vadd.f32 %v8825_v24, %v15890_v16  ;;  %9563 = vmatpush1.bf16.msra.mxu1 %v15037_v46  ;;  %v15003_v16 = vld [vmem:[#allocation6 + $0x34] ss:$8 sps:$4 sm:$0xff]   ;;  %v15067_v25 = vld [vmem:[#allocation6 + $0x1d0] ss:$8 sps:$4 sm:$0xff]   ;;  %v15072_v28 = vld [vmem:[#allocation6 + $0x1c4] ss:$8 sps:$4 sm:$0xff]  }
 0x542   :  { %v8827_v40 = vpop.f32.mrf.mxu0  ;;  %9564 = vmatprep.subr.bf16.mxu1 %v15042_v42  ;;  %v15028_v55 = vld [vmem:[#allocation6 + $0xa0] ss:$8 sps:$4 sm:$0xff]   ;;  %v15033_v24 = vld [vmem:[#allocation6 + $0x94] ss:$8 sps:$4 sm:$0xff]  }
 0x543   :  { %v8868_v29 = vpop.f32.mrf.mxu1  ;;  %v15899_v44 = vadd.f32 %v8866_v39, %v8826_v23  ;;  %9524 = vmatpush1.bf16.msra.mxu0 %v14992_v1  ;;  %v15070_v1 = vld [vmem:[#allocation6 + $0x1c0] ss:$8 sps:$4 sm:$0xff]   ;;  %v15075_v39 = vld [vmem:[#allocation6 + $0x1b4] ss:$8 sps:$4 sm:$0xff]   ;;  %v15073_v23 = vld [vmem:[#allocation6 + $0x1b0] ss:$8 sps:$4 sm:$0xff]  }
 0x544   :  { %v8828_v36 = vpop.f32.mrf.mxu0  ;;  %9525 = vmatprep.subr.bf16.mxu0 %v14997_v13  ;;  %v15031_v13 = vld [vmem:[#allocation6 + $0x90] ss:$8 sps:$4 sm:$0xff]   ;;  %v15036_v40 = vld [vmem:[#allocation6 + $0x84] ss:$8 sps:$4 sm:$0xff]   ;;  %v15034_v29 = vld [vmem:[#allocation6 + $0x80] ss:$8 sps:$4 sm:$0xff]  }
 0x545   :  { %v8869_v34 = vpop.f32.mrf.mxu1  ;;  %9565 = vmatpush1.bf16.msra.mxu1 %v15040_v61 }
 0x546   :  { %9566 = vmatprep.subr.bf16.mxu1 %v15045_v60  ;;  %v15078_v34 = vld [vmem:[#allocation6 + $0x1a4] ss:$8 sps:$4 sm:$0xff]  }
 0x547   :  { %9526 = vmatpush1.bf16.msra.mxu0 %v14995_v11  ;;  %v9117_v11 = vmax.f32 %v15827_v21, 0.0 }
 0x548   :  { %9527 = vmatprep.subr.bf16.mxu0 %v15000_v6  ;;  %v15076_v6 = vld [vmem:[#allocation6 + $0x1a0] ss:$8 sps:$4 sm:$0xff]  }
 0x549   :  { %9567 = vmatpush1.bf16.msra.mxu1 %v15043_v33  ;;  %v9121_v36 = vpack.c.bf16 %v9117_v11, %v9117_v11  ;;  %v15079_v33 = vld [vmem:[#allocation6 + $0x190] ss:$8 sps:$4 sm:$0xff]  }
 0x54a   :  { %9568 = vmatprep.subr.bf16.mxu1 %v15048_v43 }
 0x54b   :  { %9528 = vmatpush1.bf16.msra.mxu0 %v14998_v56 }
 0x54c   :  { %9529 = vmatprep.subr.bf16.mxu0 %v15003_v16  ;;  %v15081_v16 = vld [vmem:[#allocation6 + $0x194] ss:$8 sps:$4 sm:$0xff]  }
 0x54d   :  { %9569 = vmatpush1.bf16.msra.mxu1 %v15046_v4 }
 0x54e   :  { %9570 = vmatprep.subr.bf16.mxu1 %v15051_v62  ;;  %v15082_v62 = vld [vmem:[#allocation6 + $0x180] ss:$8 sps:$4 sm:$0xff]  }
 0x54f   :  { %9530 = vmatpush1.bf16.msra.mxu0 %v15001_v35 }
 0x550   :  { %9531 = vmatprep.subr.bf16.mxu0 %v15006_v12 }
 0x551   :  { %9571 = vmatpush1.bf16.msra.mxu1 %v15049_v32 }
 0x552   :  { %9572 = vmatprep.subr.bf16.mxu1 %v15054_v49 }
 0x553   :  { %9532 = vmatpush1.bf16.msra.mxu0 %v15004_v7 }
 0x554   :  { %9533 = vmatprep.subr.bf16.mxu0 %v15009_v3  ;;  %v15084_v3 = vld [vmem:[#allocation6 + $0x184] ss:$8 sps:$4 sm:$0xff]  }
 0x555   :  { %9573 = vmatpush1.bf16.msra.mxu1 %v15052_v31 }
 0x556   :  { %9574 = vmatprep.subr.bf16.mxu1 %v15057_v22 }
 0x557   :  { %9534 = vmatpush1.bf16.msra.mxu0 %v15007_v53 }
 0x558   :  { %9535 = vmatprep.subr.bf16.mxu0 %v15012_v48 }
 0x559   :  { %9575 = vmatpush1.bf16.msra.mxu1 %v15055_v50  ;;  %v15087_v50 = vld [vmem:[#allocation9 + $0x74] ss:$8 sps:$4 sm:$0xff]  }
 0x55a   :  { %9576 = vmatprep.subr.bf16.mxu1 %v15060_v9  ;;  %v15088_v9 = vld [vmem:[#allocation9 + $0x60] ss:$8 sps:$4 sm:$0xff]  }
 0x55b   :  { %9536 = vmatpush1.bf16.msra.mxu0 %v15010_v8 }
 0x55c   :  { %9537 = vmatprep.subr.bf16.mxu0 %v15015_v14 }
 0x55d   :  { %9577 = vmatpush1.bf16.msra.mxu1 %v15058_v20  ;;  %v15091_v20 = vld [vmem:[#allocation9 + $0x50] ss:$8 sps:$4 sm:$0xff]  }
 0x55e   :  { %9578 = vmatprep.subr.bf16.mxu1 %v15063_v47  ;;  %v15094_v47 = vld [vmem:[#allocation9 + $0x40] ss:$8 sps:$4 sm:$0xff]  }
 0x55f   :  { %9538 = vmatpush2.bf16.msra.mxu0 %v15013_v38  ;;  %v15085_v38 = vld [vmem:[#allocation9 + $0x70] ss:$8 sps:$4 sm:$0xff]  }
 0x560   :  { %9539 = vmatprep.subr.bf16.mxu0 %v15018_v17  ;;  %v15090_v17 = vld [vmem:[#allocation9 + $0x64] ss:$8 sps:$4 sm:$0xff]  }
 0x561   :  { %9579 = vmatpush2.bf16.msra.mxu1 %v15061_v41  ;;  %v15097_v41 = vld [vmem:[#allocation9 + $0x30] ss:$8 sps:$4 sm:$0xff]  }
 0x562   :  { %9580 = vmatprep.subr.bf16.mxu1 %v15066_v19  ;;  %v15100_v19 = vld [vmem:[#allocation9 + $0x20] ss:$8 sps:$4 sm:$0xff]  }
 0x563   :  { %9540 = vmatpush2.bf16.msra.mxu0 %v15016_v10  ;;  %v15093_v10 = vld [vmem:[#allocation9 + $0x54] ss:$8 sps:$4 sm:$0xff]  }
 0x564   :  { %9541 = vmatprep.subr.bf16.mxu0 %v15021_v59  ;;  %v15096_v59 = vld [vmem:[#allocation9 + $0x44] ss:$8 sps:$4 sm:$0xff]  }
 0x565   :  { %9581 = vmatpush2.bf16.msra.mxu1 %v15064_v30  ;;  %v15103_v30 = vld [vmem:[#allocation9 + $0x10] ss:$8 sps:$4 sm:$0xff]  }
 0x566   :  { %9582 = vmatprep.subr.bf16.mxu1 %v15069_v27  ;;  %v15106_v27 = vld [vmem:[#allocation9] ss:$8 sps:$4 sm:$0xff]  }
 0x567   :  { %9542 = vmatpush2.bf16.msra.mxu0 %v15019_v2  ;;  %v15099_v2 = vld [vmem:[#allocation9 + $0x34] ss:$8 sps:$4 sm:$0xff]  }
 0x568   :  { %9543 = vmatprep.subr.bf16.mxu0 %v15024_v45  ;;  %v15102_v45 = vld [vmem:[#allocation9 + $0x24] ss:$8 sps:$4 sm:$0xff]  }
 0x569   :  { %9583 = vmatpush2.bf16.msra.mxu1 %v15067_v25  ;;  %v15109_v25 = vld [vmem:[#allocation9 + $0xf0] ss:$8 sps:$4 sm:$0xff]  }
 0x56a   :  { %9584 = vmatprep.subr.bf16.mxu1 %v15072_v28  ;;  %v15112_v28 = vld [vmem:[#allocation9 + $0xe0] ss:$8 sps:$4 sm:$0xff]  }
 0x56b   :  { %9544 = vmatpush2.bf16.msra.mxu0 %v15022_v15  ;;  %v15105_v15 = vld [vmem:[#allocation9 + $0x14] ss:$8 sps:$4 sm:$0xff]  }
 0x56c   :  { %9545 = vmatprep.subr.bf16.mxu0 %v15027_v26  ;;  %v15108_v26 = vld [vmem:[#allocation9 + $0x4] ss:$8 sps:$4 sm:$0xff]  }
 0x56d   :  { %9585 = vmatpush2.bf16.msra.mxu1 %v15070_v1  ;;  %v15115_v1 = vld [vmem:[#allocation9 + $0xd0] ss:$8 sps:$4 sm:$0xff]  }
 0x56e   :  { %9586 = vmatprep.subr.bf16.mxu1 %v15075_v39  ;;  %v15118_v39 = vld [vmem:[#allocation9 + $0xc0] ss:$8 sps:$4 sm:$0xff]  }
 0x56f   :  { %9546 = vmatpush2.bf16.msra.mxu0 %v15025_v63  ;;  %v15111_v63 = vld [vmem:[#allocation9 + $0xf4] ss:$8 sps:$4 sm:$0xff]  }
 0x570   :  { %9547 = vmatprep.subr.bf16.mxu0 %v15030_v58  ;;  %v15114_v58 = vld [vmem:[#allocation9 + $0xe4] ss:$8 sps:$4 sm:$0xff]  }
 0x571   :  { %9587 = vmatpush2.bf16.msra.mxu1 %v15073_v23  ;;  %v15121_v23 = vld [vmem:[#allocation9 + $0xb0] ss:$8 sps:$4 sm:$0xff]  }
 0x572   :  { %9588 = vmatprep.subr.bf16.mxu1 %v15078_v34 }
 0x573   :  { %9548 = vmatpush2.bf16.msra.mxu0 %v15028_v55  ;;  %v15117_v55 = vld [vmem:[#allocation9 + $0xd4] ss:$8 sps:$4 sm:$0xff]  }
 0x574   :  { %9549 = vmatprep.subr.bf16.mxu0 %v15033_v24  ;;  %v15120_v24 = vld [vmem:[#allocation9 + $0xc4] ss:$8 sps:$4 sm:$0xff]  }
 0x575   :  { %9589 = vmatpush2.bf16.msra.mxu1 %v15076_v6 }
 0x576   :  { %9590 = vmatprep.subr.bf16.mxu1 %v15081_v16 }
 0x577   :  { %9550 = vmatpush2.bf16.msra.mxu0 %v15031_v13  ;;  %v15123_v13 = vld [vmem:[#allocation9 + $0xb4] ss:$8 sps:$4 sm:$0xff]  }
 0x578   :  { %9551 = vmatprep.subr.bf16.mxu0 %v15036_v40  ;;  %v15126_v40 = vld [vmem:[#allocation9 + $0xa4] ss:$8 sps:$4 sm:$0xff]  }
 0x579   :  { %9591 = vmatpush2.bf16.msra.mxu1 %v15079_v33 }
 0x57a   :  { %9592 = vmatprep.subr.bf16.mxu1 %v15084_v3 }
 0x57b   :  { %9552 = vmatpush2.bf16.msra.mxu0 %v15034_v29  ;;  %v15124_v29 = vld [vmem:[#allocation9 + $0xa0] ss:$8 sps:$4 sm:$0xff]  }
 0x57c   :  { %9811 = vmatprep.subr.bf16.mxu0 %v15087_v50  ;;  %v15919_v50 = vld [vmem:[#allocation12 + $0x1e8] sm:$0xff] }
 0x57d   :  { %9593 = vmatpush2.bf16.msra.mxu1 %v15082_v62 }
 0x57e   :  { %v8905_v46 = vpop.f32.mrf.mxu0  ;;  %9554 = vmatmul.mubr.bf16.vlgmr.msra.gmra.mxu0 %v9121_v36 }
 0x57f   :  { %v8946_v54 = vpop.f32.mrf.mxu1  ;;  %v8906_v42 = vadd.f32 %v8905_v46, %v15896_v18  ;;  %9812 = vmatpush1.bf16.msra.mxu0 %v15085_v38 }
 0x580   :  { %v8907_v56 = vpop.f32.mrf.mxu0  ;;  %9813 = vmatprep.subr.bf16.mxu0 %v15090_v17  ;;  %v9904_v17 = vld [vmem:[#allocation12 + $0x180] sm:$0xff] }
 0x581   :  { %v8948_v61 = vpop.f32.mrf.mxu1  ;;  %v8947_v60 = vadd.f32 %v8946_v54, %v8906_v42  ;;  %v8908_v35 = vadd.f32 %v8907_v56, %v15899_v44 }
 0x582   :  { %v8909_v21 = vpop.f32.mrf.mxu0 }
 0x583   :  { %v8950_v12 = vpop.f32.mrf.mxu1  ;;  %v15904_v43 = vadd.f32 %v8948_v61, %v8908_v35  ;;  %9814 = vmatpush1.bf16.msra.mxu0 %v15088_v9  ;;  %v9908_v9 = vld [vmem:[#allocation12 + $0x1a0] sm:$0xff] }
 0x584   :  { %v8910_v7 = vpop.f32.mrf.mxu0  ;;  %9815 = vmatprep.subr.bf16.mxu0 %v15093_v10 }
 0x585   :  { %v8951_v4 = vpop.f32.mrf.mxu1 }
 0x587   :  { %9816 = vmatpush1.bf16.msra.mxu0 %v15091_v20 }
 0x588   :  { %9817 = vmatprep.subr.bf16.mxu0 %v15096_v59  ;;  %v12913_v59 = vcombine.high %v9904_v17, %v9908_v9 }
 0x58b   :  { %9818 = vmatpush1.bf16.msra.mxu0 %v15094_v47  ;;  %v12912_v47 = vcombine.low %v9904_v17, %v9908_v9  ;;  %v9189_v17 = vld [vmem:[#allocation7] sm:$0x3] }
 0x58c   :  { %9819 = vmatprep.subr.bf16.mxu0 %v15099_v2  ;;  %v9896_v2 = vld [vmem:[#allocation12 + $0x140] sm:$0xff]  ;;  %v9194_v9 = vrot.slane %v9189_v17, %v15610_v0 }
 0x58f   :  { %9820 = vmatpush1.bf16.msra.mxu0 %v15097_v41  ;;  %v9900_v41 = vld [vmem:[#allocation12 + $0x160] sm:$0xff] }
 0x590   :  { %9821 = vmatprep.subr.bf16.mxu0 %v15102_v45  ;;  %v12905_v45 = vcombine.high %v9896_v2, %v9900_v41 }
 0x593   :  { %9822 = vmatpush1.bf16.msra.mxu0 %v15100_v19  ;;  %v12904_v19 = vcombine.low %v9896_v2, %v9900_v41 }
 0x594   :  { %9823 = vmatprep.subr.bf16.mxu0 %v15105_v15  ;;  %v9888_v15 = vld [vmem:[#allocation12 + $0x100] sm:$0xff] }
 0x597   :  { %9824 = vmatpush1.bf16.msra.mxu0 %v15103_v30  ;;  %v9892_v30 = vld [vmem:[#allocation12 + $0x120] sm:$0xff] }
 0x598   :  { %9825 = vmatprep.subr.bf16.mxu0 %v15108_v26  ;;  %v12897_v26 = vcombine.high %v9888_v15, %v9892_v30 }
 0x59b   :  { %9826 = vmatpush1.bf16.msra.mxu0 %v15106_v27  ;;  %v12896_v27 = vcombine.low %v9888_v15, %v9892_v30 }
 0x59c   :  { %9827 = vmatprep.subr.bf16.mxu0 %v15111_v63  ;;  %v9880_v63 = vld [vmem:[#allocation12 + $0xc0] sm:$0xff] }
 0x59f   :  { %9828 = vmatpush2.bf16.msra.mxu0 %v15109_v25  ;;  %v9884_v25 = vld [vmem:[#allocation12 + $0xe0] sm:$0xff] }
 0x5a0   :  { %9829 = vmatprep.subr.bf16.mxu0 %v15114_v58  ;;  %v12889_v58 = vcombine.high %v9880_v63, %v9884_v25 }
 0x5a3   :  { %9830 = vmatpush2.bf16.msra.mxu0 %v15112_v28  ;;  %v12888_v28 = vcombine.low %v9880_v63, %v9884_v25  ;;  %v9909_v63 = vld [vmem:[#allocation12 + $0x1a8] sm:$0xff] }
 0x5a4   :  { %9831 = vmatprep.subr.bf16.mxu0 %v15117_v55  ;;  %v9872_v55 = vld [vmem:[#allocation12 + $0x80] sm:$0xff] }
 0x5a7   :  { %9832 = vmatpush2.bf16.msra.mxu0 %v15115_v1  ;;  %v9876_v1 = vld [vmem:[#allocation12 + $0xa0] sm:$0xff] }
 0x5a8   :  { %9833 = vmatprep.subr.bf16.mxu0 %v15120_v24  ;;  %v12881_v24 = vcombine.high %v9872_v55, %v9876_v1 }
 0x5ab   :  { %9834 = vmatpush2.bf16.msra.mxu0 %v15118_v39  ;;  %v12880_v39 = vcombine.low %v9872_v55, %v9876_v1  ;;  %v9897_v1 = vld [vmem:[#allocation12 + $0x148] sm:$0xff] }
 0x5ac   :  { %9835 = vmatprep.subr.bf16.mxu0 %v15123_v13  ;;  %v9864_v13 = vld [vmem:[#allocation12 + $0x40] sm:$0xff] }
 0x5af   :  { %9836 = vmatpush2.bf16.msra.mxu0 %v15121_v23  ;;  %v9868_v23 = vld [vmem:[#allocation12 + $0x60] sm:$0xff] }
 0x5b0   :  { %9837 = vmatprep.subr.bf16.mxu0 %v15126_v40  ;;  %v12873_v40 = vcombine.high %v9864_v13, %v9868_v23 }
 0x5b3   :  { %9838 = vmatpush2.bf16.msra.mxu0 %v15124_v29  ;;  %v12872_v29 = vcombine.low %v9864_v13, %v9868_v23  ;;  %v9893_v13 = vld [vmem:[#allocation12 + $0x128] sm:$0xff] }
 0x5be   :  { %v8987_v18 = vpop.f32.mrf.mxu0 }
 0x5bf   :  { %v9028_v53 = vpop.f32.mrf.mxu1  ;;  %v8988_v32 = vadd.f32 %v8987_v18, %v8947_v60 }
 0x5c0   :  { %v8989_v48 = vpop.f32.mrf.mxu0 }
 0x5c1   :  { %v15906_v49 = vpop.f32.mrf.mxu1  ;;  %v15908_v44 = vadd.f32 %v9028_v53, %v8988_v32  ;;  %v8990_v11 = vadd.f32 %v8989_v48, %v15904_v43  ;;  %v15129_v32 = vld [vmem:[#allocation9 + $0x94] ss:$8 sps:$4 sm:$0xff]   ;;  %v15127_v48 = vld [vmem:[#allocation9 + $0x90] ss:$8 sps:$4 sm:$0xff]  }
 0x5c2   :  { %v8991_v8 = vpop.f32.mrf.mxu0  ;;  %9839 = vmatprep.subr.bf16.mxu0 %v15129_v32  ;;  %v9944_v32 = vld [vmem:[#allocation12 + $0x2c0] sm:$0xff] }
 0x5c3   :  { %v9032_v31 = vpop.f32.mrf.mxu1  ;;  %v9031_v6 = vadd.f32 %v15906_v49, %v8990_v11  ;;  %9840 = vmatpush2.bf16.msra.mxu0 %v15127_v48  ;;  %v15132_v49 = vld [vmem:[#allocation9 + $0x84] ss:$8 sps:$4 sm:$0xff]  }
 0x5c4   :  { %v8992_v14 = vpop.f32.mrf.mxu0  ;;  %9841 = vmatprep.subr.bf16.mxu0 %v15132_v49  ;;  %v9912_v8 = vld [vmem:[#allocation12 + $0x1c0] sm:$0xff] }
 0x5c5   :  { %v9033_v22 = vpop.f32.mrf.mxu1  ;;  %v9916_v31 = vld [vmem:[#allocation12 + $0x1e0] sm:$0xff]  ;;  %v15917_v14 = vld [vmem:[#allocation12 + $0x1c8] sm:$0xff] }
 0x5c6   :  { %v12920_v22 = vcombine.low %v9912_v8, %v9916_v31  ;;  %v12921_v38 = vcombine.high %v9912_v8, %v9916_v31  ;;  %v12922_v10 = vcombine.low %v15917_v14, %v15919_v50  ;;  %v12923_v20 = vcombine.high %v15917_v14, %v15919_v50  ;;  %v9856_v11 = vld [vmem:[#allocation12] sm:$0xff] }
 0x5c7   :  { %v9948_v48 = vld [vmem:[#allocation12 + $0x2e0] sm:$0xff] }
 0x5c8   :  { %10666 = vmatprep.subr.bf16.mxu1 %v12921_v38  ;;  %v12953_v49 = vcombine.high %v9944_v32, %v9948_v48  ;;  %v9936_v8 = vld [vmem:[#allocation12 + $0x280] sm:$0xff] }
 0x5c9   :  { %v9940_v31 = vld [vmem:[#allocation12 + $0x2a0] sm:$0xff] }
 0x5ca   :  { %v12944_v38 = vcombine.low %v9936_v8, %v9940_v31 }
 0x5fe   :  { %v9069_v36 = vpop.f32.mrf.mxu0 }
 0x5ff   :  { %v9110_v34 = vpop.f32.mrf.mxu1  ;;  %v9070_v46 = vadd.f32 %v9069_v36, %v15908_v44  ;;  %v15130_v44 = vld [vmem:[#allocation9 + $0x80] ss:$8 sps:$4 sm:$0xff]  }
 0x600   :  { %v9071_v54 = vpop.f32.mrf.mxu0  ;;  %9842 = vmatpush2.bf16.msra.mxu0 %v15130_v44  ;;  %v9860_v36 = vld [vmem:[#allocation12 + $0x20] sm:$0xff]  ;;  %v12952_v44 = vcombine.low %v9944_v32, %v9948_v48  ;;  %v9961_v32 = vld [vmem:[#allocation12 + $0x348] sm:$0xff] }
 0x601   :  { %v9112_v42 = vpop.f32.mrf.mxu1  ;;  %v9111_v56 = vadd.f32 %v9110_v34, %v9070_v46  ;;  %v9072_v61 = vadd.f32 %v9071_v54, %v9031_v6  ;;  %10707 = vmatprep.subr.bf16.mxu0 %v12923_v20  ;;  %v12865_v34 = vcombine.high %v9856_v11, %v9860_v36  ;;  %v12864_v6 = vcombine.low %v9856_v11, %v9860_v36  ;;  %v9976_v46 = vld [vmem:[#allocation12 + $0x3c0] sm:$0xff]  ;;  %v9885_v11 = vld [vmem:[#allocation12 + $0xe8] sm:$0xff] }
 0x602   :  { %v9073_v16 = vpop.f32.mrf.mxu0  ;;  %v9980_v54 = vld [vmem:[#allocation12 + $0x3e0] sm:$0xff]  ;;  %v9198_v20 = vrot.slane %v9189_v17, %v15616_v5  ;;  %v9965_v48 = vld [vmem:[#allocation12 + $0x368] sm:$0xff] }
 0x603   :  { %v9114_v60 = vpop.f32.mrf.mxu1  ;;  %v9113_v35 = vadd.f32 %v9112_v42, %v9072_v61  ;;  %v9119_v33 = vmax.f32 %v9111_v56, 0.0  ;;  %v12985_v42 = vcombine.high %v9976_v46, %v9980_v54  ;;  %v12984_v56 = vcombine.low %v9976_v46, %v9980_v54  ;;  %v9968_v61 = vld [vmem:[#allocation12 + $0x380] sm:$0xff]  ;;  %v9877_v46 = vld [vmem:[#allocation12 + $0xa8] sm:$0xff] }
 0x604   :  { %v9074_v21 = vpop.f32.mrf.mxu0  ;;  %v9972_v16 = vld [vmem:[#allocation12 + $0x3a0] sm:$0xff]  ;;  %v9869_v54 = vld [vmem:[#allocation12 + $0x68] sm:$0xff] }
 0x605   :  { %v9115_v12 = vpop.f32.mrf.mxu1  ;;  %v9120_v7 = vmax.f32 %v9113_v35, 0.0  ;;  %v9123_v43 = vpack.c.bf16 %v9119_v33, %v9119_v33  ;;  %v12977_v60 = vcombine.high %v9968_v61, %v9972_v16  ;;  %v12976_v35 = vcombine.low %v9968_v61, %v9972_v16  ;;  %v9960_v33 = vld [vmem:[#allocation12 + $0x340] sm:$0xff]  ;;  %v9857_v61 = vld [vmem:[#allocation12 + $0x8] sm:$0xff] }
 0x606   :  { %v9964_v21 = vld [vmem:[#allocation12 + $0x360] sm:$0xff]  ;;  %v9861_v16 = vld [vmem:[#allocation12 + $0x28] sm:$0xff] }
 0x607   :  { %v9124_v4 = vpack.c.bf16 %v9120_v7, %v9120_v7  ;;  %v12969_v12 = vcombine.high %v9960_v33, %v9964_v21  ;;  %v12968_v7 = vcombine.low %v9960_v33, %v9964_v21  ;;  %v9977_v33 = vld [vmem:[#allocation12 + $0x3c8] sm:$0xff] }
 0x608   :  { %v9981_v21 = vld [vmem:[#allocation12 + $0x3e8] sm:$0xff] }
 0x609   :  { %9594 = vmatprep.mubr.bf16.mxu1 %v9124_v4  ;;  %v9952_v4 = vld [vmem:[#allocation12 + $0x300] sm:$0xff]  ;;  %v9945_v17 = vld [vmem:[#allocation12 + $0x2c8] sm:$0xff] }
 0x60a   :  { %9595 = vmatmul.mubr.bf16.vlgmr.msra.gmra.mxu1 %v9123_v43  ;;  %v9956_v43 = vld [vmem:[#allocation12 + $0x320] sm:$0xff] }
 0x60b   :  { %10667 = vmatpush1.bf16.msra.mxu1 %v12920_v22  ;;  %v12945_v22 = vcombine.high %v9936_v8, %v9940_v31  ;;  %v9953_v8 = vld [vmem:[#allocation12 + $0x308] sm:$0xff] }
 0x60c   :  { %10668 = vmatprep.subr.bf16.mxu1 %v12913_v59  ;;  %v9957_v31 = vld [vmem:[#allocation12 + $0x328] sm:$0xff] }
 0x60f   :  { %10669 = vmatpush1.bf16.msra.mxu1 %v12912_v47 }
 0x610   :  { %10670 = vmatprep.subr.bf16.mxu1 %v12905_v45 }
 0x613   :  { %10671 = vmatpush1.bf16.msra.mxu1 %v12904_v19 }
 0x614   :  { %10672 = vmatprep.subr.bf16.mxu1 %v12897_v26 }
 0x617   :  { %10673 = vmatpush1.bf16.msra.mxu1 %v12896_v27  ;;  %v9905_v27 = vld [vmem:[#allocation12 + $0x188] sm:$0xff] }
 0x618   :  { %10674 = vmatprep.subr.bf16.mxu1 %v12889_v58  ;;  %v12915_v55 = vcombine.high %v9905_v27, %v9909_v63 }
 0x61b   :  { %10675 = vmatpush1.bf16.msra.mxu1 %v12888_v28 }
 0x61c   :  { %10676 = vmatprep.subr.bf16.mxu1 %v12881_v24  ;;  %v9901_v24 = vld [vmem:[#allocation12 + $0x168] sm:$0xff] }
 0x61d   :  { %v12906_v23 = vcombine.low %v9897_v1, %v9901_v24 }
 0x61f   :  { %10677 = vmatpush1.bf16.msra.mxu1 %v12880_v39  ;;  %v9889_v39 = vld [vmem:[#allocation12 + $0x108] sm:$0xff] }
 0x620   :  { %10678 = vmatprep.subr.bf16.mxu1 %v12873_v40  ;;  %v12899_v40 = vcombine.high %v9889_v39, %v9893_v13  ;;  %v12898_v36 = vcombine.low %v9889_v39, %v9893_v13 }
 0x623   :  { %10679 = vmatpush1.bf16.msra.mxu1 %v12872_v29  ;;  %v9881_v29 = vld [vmem:[#allocation12 + $0xc8] sm:$0xff] }
 0x624   :  { %10680 = vmatprep.subr.bf16.mxu1 %v12865_v34  ;;  %v12891_v34 = vcombine.high %v9881_v29, %v9885_v11  ;;  %v12890_v14 = vcombine.low %v9881_v29, %v9885_v11  ;;  %v9918_v29 = vld [vmem:[#allocation12 + $0x1f0] sm:$0xff]  ;;  %v9915_v11 = vld [vmem:[#allocation12 + $0x1d8] sm:$0xff] }
 0x627   :  { %10681 = vmatpush1.bf16.msra.mxu1 %v12864_v6  ;;  %v9873_v6 = vld [vmem:[#allocation12 + $0x88] sm:$0xff] }
 0x628   :  { %10682 = vmatprep.subr.bf16.mxu1 %v12985_v42  ;;  %v12883_v50 = vcombine.high %v9873_v6, %v9877_v46  ;;  %v12882_v42 = vcombine.low %v9873_v6, %v9877_v46 }
 0x62b   :  { %10683 = vmatpush2.bf16.msra.mxu1 %v12984_v56 }
 0x62c   :  { %10684 = vmatprep.subr.bf16.mxu1 %v12977_v60 }
 0x62f   :  { %10685 = vmatpush2.bf16.msra.mxu1 %v12976_v35  ;;  %v12867_v35 = vcombine.high %v9857_v61, %v9861_v16 }
 0x630   :  { %10686 = vmatprep.subr.bf16.mxu1 %v12969_v12  ;;  %v12866_v12 = vcombine.low %v9857_v61, %v9861_v16 }
 0x633   :  { %10687 = vmatpush2.bf16.msra.mxu1 %v12968_v7  ;;  %v12987_v7 = vcombine.high %v9977_v33, %v9981_v21 }
 0x63e   :  { %v15913_v3 = vpop.f32.mrf.mxu0 }
 0x63f   :  { %v9556_v59 = vadd.f32 %v15913_v3, %v9194_v9  ;;  %v12914_v3 = vcombine.low %v9905_v27, %v9909_v63  ;;  %v9949_v9 = vld [vmem:[#allocation12 + $0x2e8] sm:$0xff] }
 0x640   :  { %v15915_v62 = vpop.f32.mrf.mxu0  ;;  %v9933_v63 = vld [vmem:[#allocation12 + $0x268] sm:$0xff] }
 0x641   :  { %v9558_v2 = vadd.f32 %v15915_v62, %v9198_v20  ;;  %v12907_v62 = vcombine.high %v9897_v1, %v9901_v24  ;;  %v12962_v20 = vcombine.low %v9953_v8, %v9957_v31  ;;  %v9924_v1 = vld [vmem:[#allocation12 + $0x220] sm:$0xff]  ;;  %v9921_v24 = vld [vmem:[#allocation12 + $0x208] sm:$0xff] }
 0x642   :  { %v9559_v18 = vpop.f32.mrf.mxu0 }
 0x643   :  { %v12961_v18 = vcombine.high %v9952_v4, %v9956_v43 }
 0x644   :  { %v9560_v53 = vpop.f32.mrf.mxu0 }
 0x645   :  { %v12960_v53 = vcombine.low %v9952_v4, %v9956_v43  ;;  %10688 = vmatprep.subr.bf16.mxu1 %v12961_v18  ;;  %v9969_v4 = vld [vmem:[#allocation12 + $0x388] sm:$0xff]  ;;  %v12986_v18 = vcombine.low %v9977_v33, %v9981_v21  ;;  %v9906_v21 = vld [vmem:[#allocation12 + $0x190] sm:$0xff] }
 0x646   :  { %v9973_v43 = vld [vmem:[#allocation12 + $0x3a8] sm:$0xff] }
 0x647   :  { %10689 = vmatpush2.bf16.msra.mxu1 %v12960_v53  ;;  %v12979_v53 = vcombine.high %v9969_v4, %v9973_v43 }
 0x648   :  { %10690 = vmatprep.subr.bf16.mxu1 %v12953_v49  ;;  %v12978_v49 = vcombine.low %v9969_v4, %v9973_v43  ;;  %v9907_v4 = vld [vmem:[#allocation12 + $0x198] sm:$0xff] }
 0x649   :  { %v9911_v43 = vld [vmem:[#allocation12 + $0x1b8] sm:$0xff] }
 0x64b   :  { %10691 = vmatpush2.bf16.msra.mxu1 %v12952_v44  ;;  %v12971_v44 = vcombine.high %v9961_v32, %v9965_v48 }
 0x64c   :  { %10692 = vmatprep.subr.bf16.mxu1 %v12945_v22  ;;  %v12970_v22 = vcombine.low %v9961_v32, %v9965_v48  ;;  %v9898_v32 = vld [vmem:[#allocation12 + $0x150] sm:$0xff] }
 0x64f   :  { %10693 = vmatpush2.bf16.msra.mxu1 %v12944_v38  ;;  %v12963_v38 = vcombine.high %v9953_v8, %v9957_v31  ;;  %v9899_v8 = vld [vmem:[#allocation12 + $0x158] sm:$0xff] }
 0x650   :  { %v9903_v31 = vld [vmem:[#allocation12 + $0x178] sm:$0xff] }
 0x6ca   :  { %v9596_v47 = vpop.f32.mrf.mxu1 }
 0x6cb   :  { %v9597_v41 = vadd.f32 %v9596_v47, %v9556_v59  ;;  %v12955_v59 = vcombine.high %v9945_v17, %v9949_v9  ;;  %v9937_v47 = vld [vmem:[#allocation12 + $0x288] sm:$0xff] }
 0x6cc   :  { %v9598_v45 = vpop.f32.mrf.mxu1 }
 0x6cd   :  { %v9599_v19 = vadd.f32 %v9598_v45, %v9558_v2  ;;  %v9603_v15 = vmax.f32 %v9597_v41, 0.0  ;;  %v9941_v2 = vld [vmem:[#allocation12 + $0x2a8] sm:$0xff]  ;;  %v12954_v41 = vcombine.low %v9945_v17, %v9949_v9  ;;  %v12911_v9 = vcombine.high %v9899_v8, %v9903_v31 }
 0x6ce   :  { %v9600_v30 = vpop.f32.mrf.mxu1  ;;  %v12947_v45 = vcombine.high %v9937_v47, %v9941_v2 }
 0x6cf   :  { %v9604_v26 = vmax.f32 %v9599_v19, 0.0  ;;  %v9605_v28 = vpack.c.bf16 %v9603_v15, %v9603_v15  ;;  %v12946_v19 = vcombine.low %v9937_v47, %v9941_v2  ;;  %v9928_v15 = vld [vmem:[#allocation12 + $0x240] sm:$0xff]  ;;  %v9891_v47 = vld [vmem:[#allocation12 + $0x118] sm:$0xff] }
 0x6d0   :  { %v9601_v25 = vpop.f32.mrf.mxu1  ;;  %v9932_v30 = vld [vmem:[#allocation12 + $0x260] sm:$0xff]  ;;  %v9895_v2 = vld [vmem:[#allocation12 + $0x138] sm:$0xff] }
 0x6d1   :  { %v9606_v58 = vpack.c.bf16 %v9604_v26, %v9604_v26  ;;  %v9929_v26 = vld [vmem:[#allocation12 + $0x248] sm:$0xff]  ;;  %v12937_v27 = vcombine.high %v9928_v15, %v9932_v30  ;;  %v12936_v25 = vcombine.low %v9928_v15, %v9932_v30  ;;  %v12903_v15 = vcombine.high %v9891_v47, %v9895_v2  ;;  %v9882_v30 = vld [vmem:[#allocation12 + $0xd0] sm:$0xff] }
 0x6d3   :  { %9843 = vmatprep.mubr.bf16.mxu0 %v9606_v58  ;;  %v12938_v58 = vcombine.low %v9929_v26, %v9933_v63  ;;  %10694 = vmatprep.subr.bf16.mxu1 %v12937_v27  ;;  %v9883_v27 = vld [vmem:[#allocation12 + $0xd8] sm:$0xff] }
 0x6d4   :  { %9844 = vmatmul.mubr.bf16.vlgmr.msra.gmra.mxu0 %v9605_v28  ;;  %v12939_v28 = vcombine.high %v9929_v26, %v9933_v63  ;;  %10695 = vmatpush2.bf16.msra.mxu1 %v12936_v25  ;;  %v9886_v26 = vld [vmem:[#allocation12 + $0xf0] sm:$0xff]  ;;  %v9887_v63 = vld [vmem:[#allocation12 + $0xf8] sm:$0xff] }
 0x6d5   :  { %10708 = vmatpush1.bf16.msra.mxu0 %v12922_v10  ;;  %v9865_v10 = vld [vmem:[#allocation12 + $0x48] sm:$0xff] }
 0x6d6   :  { %10709 = vmatprep.subr.bf16.mxu0 %v12915_v55  ;;  %v12875_v56 = vcombine.high %v9865_v10, %v9869_v54  ;;  %v12874_v60 = vcombine.low %v9865_v10, %v9869_v54  ;;  %v9920_v55 = vld [vmem:[#allocation12 + $0x200] sm:$0xff] }
 0x6d7   :  { %v12928_v39 = vcombine.low %v9920_v55, %v9924_v1 }
 0x6d9   :  { %10710 = vmatpush1.bf16.msra.mxu0 %v12914_v3  ;;  %v12929_v3 = vcombine.high %v9920_v55, %v9924_v1  ;;  %v12895_v55 = vcombine.high %v9883_v27, %v9887_v63  ;;  %v9874_v1 = vld [vmem:[#allocation12 + $0x90] sm:$0xff] }
 0x6da   :  { %10711 = vmatprep.subr.bf16.mxu0 %v12907_v62  ;;  %v9925_v62 = vld [vmem:[#allocation12 + $0x228] sm:$0xff] }
 0x6db   :  { %v12930_v13 = vcombine.low %v9921_v24, %v9925_v62  ;;  %10696 = vmatprep.subr.bf16.mxu1 %v12929_v3  ;;  %v9875_v3 = vld [vmem:[#allocation12 + $0x98] sm:$0xff] }
 0x6dc   :  { %10697 = vmatpush2.bf16.msra.mxu1 %v12928_v39  ;;  %v12892_v39 = vcombine.low %v9882_v30, %v9886_v26 }
 0x6dd   :  { %10712 = vmatpush1.bf16.msra.mxu0 %v12906_v23  ;;  %v12931_v23 = vcombine.high %v9921_v24, %v9925_v62  ;;  %v9878_v24 = vld [vmem:[#allocation12 + $0xb0] sm:$0xff]  ;;  %v9879_v62 = vld [vmem:[#allocation12 + $0xb8] sm:$0xff] }
 0x6de   :  { %10713 = vmatprep.subr.bf16.mxu0 %v12899_v40  ;;  %v9914_v40 = vld [vmem:[#allocation12 + $0x1d0] sm:$0xff] }
 0x6df   :  { %v12924_v6 = vcombine.low %v9914_v40, %v9918_v29 }
 0x6e1   :  { %10714 = vmatpush1.bf16.msra.mxu0 %v12898_v36  ;;  %v12925_v36 = vcombine.high %v9914_v40, %v9918_v29  ;;  %v12887_v40 = vcombine.high %v9875_v3, %v9879_v62  ;;  %v9866_v29 = vld [vmem:[#allocation12 + $0x50] sm:$0xff] }
 0x6e2   :  { %10715 = vmatprep.subr.bf16.mxu0 %v12891_v34  ;;  %v9919_v34 = vld [vmem:[#allocation12 + $0x1f8] sm:$0xff] }
 0x6e3   :  { %v12926_v46 = vcombine.low %v9915_v11, %v9919_v34  ;;  %10748 = vmatprep.subr.bf16.mxu1 %v12925_v36  ;;  %v9867_v36 = vld [vmem:[#allocation12 + $0x58] sm:$0xff] }
 0x6e5   :  { %10716 = vmatpush1.bf16.msra.mxu0 %v12890_v14  ;;  %v12927_v14 = vcombine.high %v9915_v11, %v9919_v34  ;;  %v9870_v11 = vld [vmem:[#allocation12 + $0x70] sm:$0xff]  ;;  %v9871_v34 = vld [vmem:[#allocation12 + $0x78] sm:$0xff] }
 0x6e6   :  { %10717 = vmatprep.subr.bf16.mxu0 %v12883_v50  ;;  %v9639_v50 = vld [vmem:[#allocation10] sm:$0x3] }
 0x6e7   :  { %v9644_v10 = vrot.slane %v9639_v50, %v15610_v0  ;;  %v9648_v54 = vrot.slane %v9639_v50, %v15616_v5  ;;  %v12879_v50 = vcombine.high %v9867_v36, %v9871_v34 }
 0x6e9   :  { %10718 = vmatpush1.bf16.msra.mxu0 %v12882_v42 }
 0x6ea   :  { %10719 = vmatprep.subr.bf16.mxu0 %v12875_v56 }
 0x6ed   :  { %10720 = vmatpush1.bf16.msra.mxu0 %v12874_v60 }
 0x6ee   :  { %10721 = vmatprep.subr.bf16.mxu0 %v12867_v35 }
 0x6f1   :  { %10722 = vmatpush1.bf16.msra.mxu0 %v12866_v12 }
 0x6f2   :  { %10723 = vmatprep.subr.bf16.mxu0 %v12987_v7  ;;  %v9910_v7 = vld [vmem:[#allocation12 + $0x1b0] sm:$0xff] }
 0x6f3   :  { %v12917_v48 = vcombine.high %v9906_v21, %v9910_v7 }
 0x6f5   :  { %10724 = vmatpush2.bf16.msra.mxu0 %v12986_v18 }
 0x6f6   :  { %10725 = vmatprep.subr.bf16.mxu0 %v12979_v53 }
 0x6f9   :  { %10726 = vmatpush2.bf16.msra.mxu0 %v12978_v49  ;;  %v12919_v49 = vcombine.high %v9907_v4, %v9911_v43 }
 0x6fa   :  { %10727 = vmatprep.subr.bf16.mxu0 %v12971_v44  ;;  %v9902_v44 = vld [vmem:[#allocation12 + $0x170] sm:$0xff] }
 0x6fb   :  { %v12909_v17 = vcombine.high %v9898_v32, %v9902_v44 }
 0x6fd   :  { %10728 = vmatpush2.bf16.msra.mxu0 %v12970_v22  ;;  %v12916_v22 = vcombine.low %v9906_v21, %v9910_v7  ;;  %v9982_v21 = vld [vmem:[#allocation12 + $0x3f0] sm:$0xff]  ;;  %v9983_v7 = vld [vmem:[#allocation12 + $0x3f8] sm:$0xff] }
 0x6fe   :  { %10729 = vmatprep.subr.bf16.mxu0 %v12963_v38  ;;  %v12918_v38 = vcombine.low %v9907_v4, %v9911_v43 }
 0x701   :  { %10730 = vmatpush2.bf16.msra.mxu0 %v12962_v20  ;;  %v9890_v20 = vld [vmem:[#allocation12 + $0x110] sm:$0xff] }
 0x702   :  { %10731 = vmatprep.subr.bf16.mxu0 %v12955_v59  ;;  %v9894_v59 = vld [vmem:[#allocation12 + $0x130] sm:$0xff] }
 0x703   :  { %v12900_v25 = vcombine.low %v9890_v20, %v9894_v59 }
 0x705   :  { %10732 = vmatpush2.bf16.msra.mxu0 %v12954_v41  ;;  %v12908_v41 = vcombine.low %v9898_v32, %v9902_v44  ;;  %v9971_v44 = vld [vmem:[#allocation12 + $0x398] sm:$0xff] }
 0x706   :  { %10733 = vmatprep.subr.bf16.mxu0 %v12947_v45  ;;  %v12910_v45 = vcombine.low %v9899_v8, %v9903_v31  ;;  %v9975_v8 = vld [vmem:[#allocation12 + $0x3b8] sm:$0xff] }
 0x709   :  { %10734 = vmatpush2.bf16.msra.mxu0 %v12946_v19  ;;  %v12901_v19 = vcombine.high %v9890_v20, %v9894_v59  ;;  %v9966_v20 = vld [vmem:[#allocation12 + $0x370] sm:$0xff]  ;;  %v9963_v59 = vld [vmem:[#allocation12 + $0x358] sm:$0xff] }
 0x70a   :  { %10735 = vmatprep.subr.bf16.mxu0 %v12939_v28  ;;  %v12893_v28 = vcombine.high %v9882_v30, %v9886_v26  ;;  %v9958_v30 = vld [vmem:[#allocation12 + $0x330] sm:$0xff]  ;;  %v9955_v26 = vld [vmem:[#allocation12 + $0x318] sm:$0xff] }
 0x70d   :  { %10736 = vmatpush2.bf16.msra.mxu0 %v12938_v58  ;;  %v12902_v58 = vcombine.low %v9891_v47, %v9895_v2  ;;  %v9967_v47 = vld [vmem:[#allocation12 + $0x378] sm:$0xff] }
 0x70e   :  { %10737 = vmatprep.subr.bf16.mxu0 %v12931_v23  ;;  %v12885_v23 = vcombine.high %v9874_v1, %v9878_v24 }
 0x711   :  { %10738 = vmatpush2.bf16.msra.mxu0 %v12930_v13  ;;  %v12894_v13 = vcombine.low %v9883_v27, %v9887_v63  ;;  %v9959_v27 = vld [vmem:[#allocation12 + $0x338] sm:$0xff] }
 0x712   :  { %10789 = vmatprep.subr.bf16.mxu0 %v12927_v14  ;;  %v12877_v14 = vcombine.high %v9866_v29, %v9870_v11 }
 0x794   :  { %v9845_v42 = vpop.f32.mrf.mxu0 }
 0x795   :  { %v9846_v56 = vadd.f32 %v9845_v42, %v9644_v10  ;;  %v9858_v10 = vld [vmem:[#allocation12 + $0x10] sm:$0xff]  ;;  %v9859_v42 = vld [vmem:[#allocation12 + $0x18] sm:$0xff] }
 0x796   :  { %v9847_v61 = vpop.f32.mrf.mxu0 }
 0x797   :  { %v9848_v16 = vadd.f32 %v9847_v61, %v9648_v54  ;;  %v9852_v60 = vmax.f32 %v9846_v56, 0.0  ;;  %v9862_v54 = vld [vmem:[#allocation12 + $0x30] sm:$0xff]  ;;  %v9863_v56 = vld [vmem:[#allocation12 + $0x38] sm:$0xff]  ;;  %v12876_v61 = vcombine.low %v9866_v29, %v9870_v11 }
 0x798   :  { %v9849_v35 = vpop.f32.mrf.mxu0  ;;  %v12868_v4 = vcombine.low %v9858_v10, %v9862_v54  ;;  %v12870_v43 = vcombine.low %v9859_v42, %v9863_v56  ;;  %v9942_v29 = vld [vmem:[#allocation12 + $0x2b0] sm:$0xff]  ;;  %v9939_v11 = vld [vmem:[#allocation12 + $0x298] sm:$0xff] }
 0x799   :  { %v9853_v33 = vmax.f32 %v9848_v16, 0.0  ;;  %v15934_v53 = vpack.c.bf16 %v9852_v60, %v9852_v60  ;;  %v12878_v16 = vcombine.low %v9867_v36, %v9871_v34  ;;  %v12869_v60 = vcombine.high %v9858_v10, %v9862_v54  ;;  %v9943_v36 = vld [vmem:[#allocation12 + $0x2b8] sm:$0xff]  ;;  %v9934_v10 = vld [vmem:[#allocation12 + $0x270] sm:$0xff] }
 0x79a   :  { %v9850_v12 = vpop.f32.mrf.mxu0  ;;  %v12871_v35 = vcombine.high %v9859_v42, %v9863_v56  ;;  %v9931_v54 = vld [vmem:[#allocation12 + $0x258] sm:$0xff] }
 0x79b   :  { %v9855_v18 = vpack.c.bf16 %v9853_v33, %v9853_v33  ;;  %v9978_v33 = vld [vmem:[#allocation12 + $0x3d0] sm:$0xff]  ;;  %v9979_v12 = vld [vmem:[#allocation12 + $0x3d8] sm:$0xff] }
 0x79c   :  { %v12991_v32 = vcombine.high %v9979_v12, %v9983_v7  ;;  %v12988_v31 = vcombine.low %v9978_v33, %v9982_v21  ;;  %v9935_v42 = vld [vmem:[#allocation12 + $0x278] sm:$0xff] }
 0x79d   :  { %10698 = vmatprep.mubr.bf16.mxu1 %v9855_v18  ;;  %10739 = vmatprep.mubr.bf16.mxu0 %v9855_v18 }
 0x79e   :  { %10699 = vmatmul.mubr.bf16.vlgmr.msra.gmra.mxu1 %v15934_v53  ;;  %10740 = vmatmul.mubr.bf16.vlgmr.msra.gmra.mxu0 %v15934_v53 }
 0x79f   :  { %10749 = vmatpush1.bf16.msra.mxu1 %v12924_v6  ;;  %10790 = vmatpush1.bf16.msra.mxu0 %v12926_v46  ;;  %v12884_v6 = vcombine.low %v9874_v1, %v9878_v24  ;;  %v12886_v46 = vcombine.low %v9875_v3, %v9879_v62  ;;  %v9950_v1 = vld [vmem:[#allocation12 + $0x2f0] sm:$0xff]  ;;  %v9947_v24 = vld [vmem:[#allocation12 + $0x2d8] sm:$0xff] }
 0x7a0   :  { %10780 = vmatprep.mubr.bf16.mxu1 %v9855_v18  ;;  %10821 = vmatprep.mubr.bf16.mxu0 %v9855_v18  ;;  %v12989_v18 = vcombine.high %v9978_v33, %v9982_v21  ;;  %v9951_v3 = vld [vmem:[#allocation12 + $0x2f8] sm:$0xff]  ;;  %v9926_v33 = vld [vmem:[#allocation12 + $0x230] sm:$0xff] }
 0x7a1   :  { %10750 = vmatprep.subr.bf16.mxu1 %v12917_v48  ;;  %10791 = vmatprep.subr.bf16.mxu0 %v12919_v49  ;;  %v9970_v48 = vld [vmem:[#allocation12 + $0x390] sm:$0xff]  ;;  %v9923_v21 = vld [vmem:[#allocation12 + $0x218] sm:$0xff] }
 0x7a2   :  { %v9974_v49 = vld [vmem:[#allocation12 + $0x3b0] sm:$0xff] }
 0x7a3   :  { %10751 = vmatpush1.bf16.msra.mxu1 %v12916_v22  ;;  %10792 = vmatpush1.bf16.msra.mxu0 %v12918_v38  ;;  %v12990_v22 = vcombine.low %v9979_v12, %v9983_v7  ;;  %v12981_v38 = vcombine.high %v9970_v48, %v9974_v49  ;;  %v12980_v2 = vcombine.low %v9970_v48, %v9974_v49  ;;  %v9927_v12 = vld [vmem:[#allocation12 + $0x238] sm:$0xff]  ;;  %v15133_v49 = vld [vmem:[#allocation15 + $0x78] sm:$0xff]  }
 0x7a4   :  { %10752 = vmatprep.subr.bf16.mxu1 %v12909_v17  ;;  %10793 = vmatprep.subr.bf16.mxu0 %v12911_v9  ;;  %v12983_v17 = vcombine.high %v9971_v44, %v9975_v8  ;;  %v9962_v9 = vld [vmem:[#allocation12 + $0x350] sm:$0xff]  ;;  %v12934_v48 = vcombine.low %v9923_v21, %v9927_v12 }
 0x7a5   :  { %v12972_v63 = vcombine.low %v9962_v9, %v9966_v20 }
 0x7a7   :  { %10753 = vmatpush1.bf16.msra.mxu1 %v12908_v41  ;;  %10794 = vmatpush1.bf16.msra.mxu0 %v12910_v45  ;;  %v12982_v41 = vcombine.low %v9971_v44, %v9975_v8  ;;  %v12973_v45 = vcombine.high %v9962_v9, %v9966_v20  ;;  %v15134_v44 = vld [vmem:[#allocation15 + $0x38] sm:$0xff]   ;;  %v15135_v8 = vld [vmem:[#allocation15 + $0x70] sm:$0xff]   ;;  %v15140_v9 = vld [vmem:[#allocation15 + $0x20] sm:$0xff]  }
 0x7a8   :  { %10754 = vmatprep.subr.bf16.mxu1 %v12901_v19  ;;  %10795 = vmatprep.subr.bf16.mxu0 %v12903_v15  ;;  %v12975_v19 = vcombine.high %v9963_v59, %v9967_v47  ;;  %v9954_v15 = vld [vmem:[#allocation12 + $0x310] sm:$0xff]  ;;  %v15141_v20 = vld [vmem:[#allocation15 + $0x58] sm:$0xff]  }
 0x7a9   :  { %v12964_v62 = vcombine.low %v9954_v15, %v9958_v30 }
 0x7ab   :  { %10755 = vmatpush1.bf16.msra.mxu1 %v12900_v25  ;;  %10796 = vmatpush1.bf16.msra.mxu0 %v12902_v58  ;;  %v12974_v25 = vcombine.low %v9963_v59, %v9967_v47  ;;  %v12965_v58 = vcombine.high %v9954_v15, %v9958_v30  ;;  %v15142_v59 = vld [vmem:[#allocation15 + $0x18] sm:$0xff]   ;;  %v15143_v47 = vld [vmem:[#allocation15 + $0x50] sm:$0xff]  }
 0x7ac   :  { %10756 = vmatprep.subr.bf16.mxu1 %v12893_v28  ;;  %10797 = vmatprep.subr.bf16.mxu0 %v12895_v55  ;;  %v12967_v28 = vcombine.high %v9955_v26, %v9959_v27  ;;  %v9946_v55 = vld [vmem:[#allocation12 + $0x2d0] sm:$0xff]  ;;  %v15149_v15 = vld [vmem:[#allocation15 + $0xf8] sm:$0xff]  }
 0x7ad   :  { %v12956_v34 = vcombine.low %v9946_v55, %v9950_v1  ;;  %v15165_v30 = vld [vmem:[#allocation15 + $0x178] sm:$0xff]  }
 0x7af   :  { %10757 = vmatpush1.bf16.msra.mxu1 %v12892_v39  ;;  %10798 = vmatpush1.bf16.msra.mxu0 %v12894_v13  ;;  %v12966_v39 = vcombine.low %v9955_v26, %v9959_v27  ;;  %v12957_v13 = vcombine.high %v9946_v55, %v9950_v1  ;;  %v15167_v26 = vld [vmem:[#allocation15 + $0x138] sm:$0xff]   ;;  %v15169_v27 = vld [vmem:[#allocation15 + $0x170] sm:$0xff]   ;;  %v15179_v55 = vld [vmem:[#allocation15 + $0x120] sm:$0xff]  }
 0x7b0   :  { %10758 = vmatprep.subr.bf16.mxu1 %v12885_v23  ;;  %10799 = vmatprep.subr.bf16.mxu0 %v12887_v40  ;;  %v12959_v23 = vcombine.high %v9947_v24, %v9951_v3  ;;  %v9938_v40 = vld [vmem:[#allocation12 + $0x290] sm:$0xff]  ;;  %v15181_v1 = vld [vmem:[#allocation15 + $0x158] sm:$0xff]  }
 0x7b1   :  { %v12948_v56 = vcombine.low %v9938_v40, %v9942_v29 }
 0x7b3   :  { %10759 = vmatpush1.bf16.msra.mxu1 %v12884_v6  ;;  %10800 = vmatpush1.bf16.msra.mxu0 %v12886_v46  ;;  %v12958_v6 = vcombine.low %v9947_v24, %v9951_v3  ;;  %v12949_v46 = vcombine.high %v9938_v40, %v9942_v29  ;;  %v15183_v24 = vld [vmem:[#allocation15 + $0x118] sm:$0xff]   ;;  %v15185_v3 = vld [vmem:[#allocation15 + $0x150] sm:$0xff]   ;;  %v15195_v40 = vld [vmem:[#allocation15 + $0x100] sm:$0xff]  }
 0x7b4   :  { %10760 = vmatprep.subr.bf16.mxu1 %v12877_v14  ;;  %10801 = vmatprep.subr.bf16.mxu0 %v12879_v50  ;;  %v12951_v14 = vcombine.high %v9939_v11, %v9943_v36  ;;  %v9930_v50 = vld [vmem:[#allocation12 + $0x250] sm:$0xff]  ;;  %v15940_v29 = vld [vmem:[#allocation13] sm:$0xff] }
 0x7b5   :  { %v12940_v7 = vcombine.low %v9930_v50, %v9934_v10 }
 0x7b7   :  { %10761 = vmatpush1.bf16.msra.mxu1 %v12876_v61  ;;  %10802 = vmatpush1.bf16.msra.mxu0 %v12878_v16  ;;  %v12950_v61 = vcombine.low %v9939_v11, %v9943_v36  ;;  %v12941_v16 = vcombine.high %v9930_v50, %v9934_v10  ;;  %v9989_v11 = vrot.slane %v15940_v29, %v15610_v0 }
 0x7b8   :  { %10762 = vmatprep.subr.bf16.mxu1 %v12869_v60  ;;  %10803 = vmatprep.subr.bf16.mxu0 %v12871_v35  ;;  %v12943_v60 = vcombine.high %v9931_v54, %v9935_v42  ;;  %v9922_v35 = vld [vmem:[#allocation12 + $0x210] sm:$0xff]  ;;  %v9993_v36 = vrot.slane %v15940_v29, %v15616_v5  ;;  %v15150_v5 = vld [vmem:[#allocation15 + $0xb8] sm:$0xff]  }
 0x7bb   :  { %10763 = vmatpush1.bf16.msra.mxu1 %v12868_v4  ;;  %10804 = vmatpush1.bf16.msra.mxu0 %v12870_v43  ;;  %v12942_v4 = vcombine.low %v9931_v54, %v9935_v42  ;;  %v12933_v43 = vcombine.high %v9922_v35, %v9926_v33 }
 0x7bc   :  { %10764 = vmatprep.subr.bf16.mxu1 %v12989_v18  ;;  %10805 = vmatprep.subr.bf16.mxu0 %v12991_v32  ;;  %v12935_v18 = vcombine.high %v9923_v21, %v9927_v12  ;;  %v12932_v32 = vcombine.low %v9922_v35, %v9926_v33 }
 0x7bf   :  { %10765 = vmatpush2.bf16.msra.mxu1 %v12988_v31  ;;  %10806 = vmatpush2.bf16.msra.mxu0 %v12990_v22  ;;  %v15136_v31 = vld [vmem:[#allocation15 + $0x30] sm:$0xff]   ;;  %v15137_v22 = vld [vmem:[#allocation15 + $0x68] sm:$0xff]  }
 0x7c0   :  { %10766 = vmatprep.subr.bf16.mxu1 %v12981_v38  ;;  %10807 = vmatprep.subr.bf16.mxu0 %v12983_v17  ;;  %v15138_v38 = vld [vmem:[#allocation15 + $0x28] sm:$0xff]   ;;  %v15139_v17 = vld [vmem:[#allocation15 + $0x60] sm:$0xff]  }
 0x7c3   :  { %10767 = vmatpush2.bf16.msra.mxu1 %v12980_v2  ;;  %10808 = vmatpush2.bf16.msra.mxu0 %v12982_v41  ;;  %v15144_v2 = vld [vmem:[#allocation15 + $0x10] sm:$0xff]   ;;  %v15146_v41 = vld [vmem:[#allocation15 + $0x8] sm:$0xff]  }
 0x7c4   :  { %10768 = vmatprep.subr.bf16.mxu1 %v12973_v45  ;;  %10809 = vmatprep.subr.bf16.mxu0 %v12975_v19  ;;  %v15147_v45 = vld [vmem:[#allocation15 + $0x40] sm:$0xff]  }
 0x7c5   :  { %v15148_v19 = vld [vmem:[#allocation15] sm:$0xff]  }
 0x7c7   :  { %10769 = vmatpush2.bf16.msra.mxu1 %v12972_v63  ;;  %10810 = vmatpush2.bf16.msra.mxu0 %v12974_v25  ;;  %v15171_v63 = vld [vmem:[#allocation15 + $0x130] sm:$0xff]   ;;  %v15173_v25 = vld [vmem:[#allocation15 + $0x168] sm:$0xff]  }
 0x7c8   :  { %10770 = vmatprep.subr.bf16.mxu1 %v12965_v58  ;;  %10811 = vmatprep.subr.bf16.mxu0 %v12967_v28  ;;  %v15175_v58 = vld [vmem:[#allocation15 + $0x128] sm:$0xff]   ;;  %v15177_v28 = vld [vmem:[#allocation15 + $0x160] sm:$0xff]  }
 0x7cb   :  { %10771 = vmatpush2.bf16.msra.mxu1 %v12964_v62  ;;  %10812 = vmatpush2.bf16.msra.mxu0 %v12966_v39  ;;  %v15187_v62 = vld [vmem:[#allocation15 + $0x110] sm:$0xff]   ;;  %v15189_v39 = vld [vmem:[#allocation15 + $0x148] sm:$0xff]  }
 0x7cc   :  { %10772 = vmatprep.subr.bf16.mxu1 %v12957_v13  ;;  %10813 = vmatprep.subr.bf16.mxu0 %v12959_v23  ;;  %v15191_v13 = vld [vmem:[#allocation15 + $0x108] sm:$0xff]   ;;  %v15193_v23 = vld [vmem:[#allocation15 + $0x140] sm:$0xff]  }
 0x7cf   :  { %10773 = vmatpush2.bf16.msra.mxu1 %v12956_v34  ;;  %10814 = vmatpush2.bf16.msra.mxu0 %v12958_v6  ;;  %v10001_v34 = vrot.slane %v15940_v29, %v1473_v37  ;;  %v15152_v37 = vld [vmem:[#allocation15 + $0xb0] sm:$0xff]  }
 0x7d0   :  { %10774 = vmatprep.subr.bf16.mxu1 %v12949_v46  ;;  %10815 = vmatprep.subr.bf16.mxu0 %v12951_v14 }
 0x7d3   :  { %10775 = vmatpush2.bf16.msra.mxu1 %v12948_v56  ;;  %10816 = vmatpush2.bf16.msra.mxu0 %v12950_v61 }
 0x7d4   :  { %10776 = vmatprep.subr.bf16.mxu1 %v12941_v16  ;;  %10817 = vmatprep.subr.bf16.mxu0 %v12943_v60 }
 0x7d7   :  { %10777 = vmatpush2.bf16.msra.mxu1 %v12940_v7  ;;  %10818 = vmatpush2.bf16.msra.mxu0 %v12942_v4  ;;  %v15151_v7 = vld [vmem:[#allocation15 + $0xf0] sm:$0xff]  }
 0x7d8   :  { %10778 = vmatprep.subr.bf16.mxu1 %v12933_v43  ;;  %10819 = vmatprep.subr.bf16.mxu0 %v12935_v18  ;;  %v15153_v43 = vld [vmem:[#allocation15 + $0xe8] sm:$0xff]  }
 0x7d9   :  { %v15154_v18 = vld [vmem:[#allocation15 + $0xa8] sm:$0xff]  }
 0x7db   :  { %10779 = vmatpush2.bf16.msra.mxu1 %v12932_v32  ;;  %10820 = vmatpush2.bf16.msra.mxu0 %v12934_v48  ;;  %v15155_v32 = vld [vmem:[#allocation15 + $0xe0] sm:$0xff]  }
 0x7dc   :  { %13057 = vmatprep.subr.bf16.mxu1 %v15133_v49  ;;  %13101 = vmatprep.subr.bf16.mxu0 %v15165_v30  ;;  %v15156_v48 = vld [vmem:[#allocation15 + $0xa0] sm:$0xff]   ;;  %v15157_v49 = vld [vmem:[#allocation15 + $0xd8] sm:$0xff]  }
 0x7dd   :  { %v15178_v30 = vld [vmem:[#allocation15 + $0x1e0] sm:$0xff]  }
 0x7de   :  { %10781 = vmatmul.mubr.bf16.vlgmr.msra.gmra.mxu1 %v15934_v53  ;;  %10822 = vmatmul.mubr.bf16.vlgmr.msra.gmra.mxu0 %v15934_v53  ;;  %v15145_v53 = vld [vmem:[#allocation15 + $0x48] sm:$0xff]  }
 0x7df   :  { %13058 = vmatpush3.bf16.msra.mxu1 %v15134_v44  ;;  %13102 = vmatpush3.bf16.msra.mxu0 %v15167_v26  ;;  %v15158_v44 = vld [vmem:[#allocation15 + $0x98] sm:$0xff]   ;;  %v15180_v26 = vld [vmem:[#allocation15 + $0x1a0] sm:$0xff]  }
 0x7e0   :  { %13059 = vmatprep.subr.bf16.mxu1 %v15135_v8  ;;  %13103 = vmatprep.subr.bf16.mxu0 %v15169_v27  ;;  %v15159_v8 = vld [vmem:[#allocation15 + $0xd0] sm:$0xff]   ;;  %v15182_v27 = vld [vmem:[#allocation15 + $0x1d8] sm:$0xff]  }
 0x7e3   :  { %13060 = vmatpush3.bf16.msra.mxu1 %v15136_v31  ;;  %13104 = vmatpush3.bf16.msra.mxu0 %v15171_v63  ;;  %v15160_v31 = vld [vmem:[#allocation15 + $0x90] sm:$0xff]   ;;  %v15184_v63 = vld [vmem:[#allocation15 + $0x198] sm:$0xff]  }
 0x7e4   :  { %13061 = vmatprep.subr.bf16.mxu1 %v15137_v22  ;;  %13105 = vmatprep.subr.bf16.mxu0 %v15173_v25  ;;  %v9997_v22 = vrot.slane %v15940_v29, %v1469_v52  ;;  %v15172_v52 = vld [vmem:[#allocation15 + $0x1b0] sm:$0xff]  }
 0x7e5   :  { %v15186_v25 = vld [vmem:[#allocation15 + $0x1d0] sm:$0xff]  }
 0x7e7   :  { %13062 = vmatpush3.bf16.msra.mxu1 %v15138_v38  ;;  %13106 = vmatpush3.bf16.msra.mxu0 %v15175_v58  ;;  %v15161_v38 = vld [vmem:[#allocation15 + $0xc8] sm:$0xff]   ;;  %v10004_v58 = vsub.s32 4, %v15604_v57 }
 0x7e8   :  { %13063 = vmatprep.subr.bf16.mxu1 %v15139_v17  ;;  %13107 = vmatprep.subr.bf16.mxu0 %v15177_v28  ;;  %v15162_v17 = vld [vmem:[#allocation15 + $0x88] sm:$0xff]   ;;  %v10012_v28 = vsub.s32 6, %v15604_v57 }
 0x7eb   :  { %13064 = vmatpush3.bf16.msra.mxu1 %v15140_v9  ;;  %13108 = vmatpush3.bf16.msra.mxu0 %v15179_v55  ;;  %v15188_v55 = vld [vmem:[#allocation15 + $0x190] sm:$0xff]  }
 0x7ec   :  { %13065 = vmatprep.subr.bf16.mxu1 %v15141_v20  ;;  %13109 = vmatprep.subr.bf16.mxu0 %v15181_v1  ;;  %v15163_v20 = vld [vmem:[#allocation15 + $0xc0] sm:$0xff]   ;;  %v10008_v1 = vsub.s32 5, %v15604_v57 }
 0x7ef   :  { %13066 = vmatpush3.bf16.msra.mxu1 %v15142_v59  ;;  %13110 = vmatpush3.bf16.msra.mxu0 %v15183_v24  ;;  %v15164_v59 = vld [vmem:[#allocation15 + $0x80] sm:$0xff]   ;;  %v10016_v24 = vsub.s32 7, %v15604_v57 }
 0x7f0   :  { %13067 = vmatprep.subr.bf16.mxu1 %v15143_v47  ;;  %13111 = vmatprep.subr.bf16.mxu0 %v15185_v3  ;;  %v15190_v3 = vld [vmem:[#allocation15 + $0x1c8] sm:$0xff]  }
 0x7f3   :  { %13068 = vmatpush3.bf16.msra.mxu1 %v15144_v2  ;;  %13112 = vmatpush3.bf16.msra.mxu0 %v15187_v62  ;;  %v15166_v2 = vld [vmem:[#allocation15 + $0x1f8] sm:$0xff]   ;;  %v10005_v62 = vrot.slane %v15940_v29, %v10004_v58 }
 0x7f4   :  { %13069 = vmatprep.subr.bf16.mxu1 %v15145_v53  ;;  %13113 = vmatprep.subr.bf16.mxu0 %v15189_v39  ;;  %v15168_v53 = vld [vmem:[#allocation15 + $0x1b8] sm:$0xff]   ;;  %v10013_v39 = vrot.slane %v15940_v29, %v10012_v28 }
 0x7f7   :  { %13070 = vmatpush3.bf16.msra.mxu1 %v15146_v41  ;;  %13114 = vmatpush3.bf16.msra.mxu0 %v15191_v13  ;;  %v10009_v13 = vrot.slane %v15940_v29, %v10008_v1 }
 0x7f8   :  { %13071 = vmatprep.subr.bf16.mxu1 %v15147_v45  ;;  %13115 = vmatprep.subr.bf16.mxu0 %v15193_v23  ;;  %v15170_v45 = vld [vmem:[#allocation15 + $0x1f0] sm:$0xff]   ;;  %v10017_v23 = vrot.slane %v15940_v29, %v10016_v24 }
 0x7fb   :  { %13072 = vmatpush3.bf16.msra.mxu1 %v15148_v19  ;;  %13116 = vmatpush3.bf16.msra.mxu0 %v15195_v40  ;;  %v15174_v19 = vld [vmem:[#allocation15 + $0x1e8] sm:$0xff]  }
 0x7fc   :  { %13079 = vmatprep.subr.bf16.mxu1 %v15149_v15  ;;  %v15176_v15 = vld [vmem:[#allocation15 + $0x1a8] sm:$0xff]  }
 0x7fd   :  { %v15192_v40 = vld [vmem:[#allocation15 + $0x188] sm:$0xff]  }
 0x85e   :  { %v10700_v6 = vpop.f32.mrf.mxu1  ;;  %v10741_v46 = vpop.f32.mrf.mxu0 }
 0x85f   :  { %v10701_v14 = vadd.f32 %v10700_v6, %v9989_v11  ;;  %v10742_v9 = vadd.f32 %v10741_v46, %v9997_v22 }
 0x860   :  { %v10702_v50 = vpop.f32.mrf.mxu1  ;;  %v10743_v10 = vpop.f32.mrf.mxu0 }
 0x861   :  { %v10703_v54 = vadd.f32 %v10702_v50, %v9993_v36  ;;  %v10744_v42 = vadd.f32 %v10743_v10, %v10001_v34  ;;  %v10830_v56 = vmax.f32 %v10701_v14, 0.0  ;;  %v10832_v47 = vmax.f32 %v10742_v9, 0.0  ;;  %v15194_v34 = vld [vmem:[#allocation15 + $0x1c0] sm:$0xff]  }
 0x862   :  { %v10704_v61 = vpop.f32.mrf.mxu1  ;;  %v10745_v16 = vpop.f32.mrf.mxu0 }
 0x863   :  { %v10831_v60 = vmax.f32 %v10703_v54, 0.0  ;;  %v10833_v35 = vmax.f32 %v10744_v42, 0.0  ;;  %v10838_v12 = vpack.c.bf16 %v10830_v56, %v10830_v56  ;;  %v10840_v41 = vpack.c.bf16 %v10832_v47, %v10832_v47  ;;  %v15196_v54 = vld [vmem:[#allocation15 + $0x180] sm:$0xff]  }
 0x864   :  { %v10705_v0 = vpop.f32.mrf.mxu1  ;;  %v10746_v33 = vpop.f32.mrf.mxu0 }
 0x865   :  { %v10839_v21 = vpack.c.bf16 %v10831_v60, %v10831_v60  ;;  %v10841_v4 = vpack.c.bf16 %v10833_v35, %v10833_v35 }
 0x867   :  { %11397 = vmatprep.mubr.bf16.mxu1 %v10839_v21 }
 0x868   :  { %11398 = vmatmul.mubr.bf16.vlgmr.msra.gmra.mxu1 %v10838_v12 }
 0x869   :  { %13080 = vmatpush3.bf16.msra.mxu1 %v15150_v5  ;;  %11437 = vmatprep.mubr.bf16.mxu1 %v10841_v4 }
 0x86a   :  { %13081 = vmatprep.subr.bf16.mxu1 %v15151_v7  ;;  %v15428_v7 = vmov 64  }
 0x86b   :  { %13164 = vset.pattern.permute.xlu0 %v15428_v7 }
 0x86d   :  { %13082 = vmatpush3.bf16.msra.mxu1 %v15152_v37 }
 0x86e   :  { %13083 = vmatprep.subr.bf16.mxu1 %v15153_v43 }
 0x871   :  { %13084 = vmatpush3.bf16.msra.mxu1 %v15154_v18 }
 0x872   :  { %13085 = vmatprep.subr.bf16.mxu1 %v15155_v32 }
 0x875   :  { %13086 = vmatpush3.bf16.msra.mxu1 %v15156_v48 }
 0x876   :  { %13087 = vmatprep.subr.bf16.mxu1 %v15157_v49 }
 0x879   :  { %13088 = vmatpush3.bf16.msra.mxu1 %v15158_v44 }
 0x87a   :  { %13089 = vmatprep.subr.bf16.mxu1 %v15159_v8 }
 0x87d   :  { %13090 = vmatpush3.bf16.msra.mxu1 %v15160_v31  ;;  %v12992_v31 = vld [vmem:[#allocation16] ss:$0 sm:$0xff] }
 0x87e   :  { %13091 = vmatprep.subr.bf16.mxu1 %v15161_v38 }
 0x881   :  { %13092 = vmatpush3.bf16.msra.mxu1 %v15162_v17 }
 0x882   :  { %13093 = vmatprep.subr.bf16.mxu1 %v15163_v20 }
 0x885   :  { %13094 = vmatpush3.bf16.msra.mxu1 %v15164_v59 }
 0x886   :  { %13123 = vmatprep.subr.bf16.mxu1 %v15166_v2 }
 0x888   :  { %11438 = vmatmul.mubr.bf16.vlgmr.msra.gmra.mxu1 %v10840_v41 }
 0x889   :  { %13124 = vmatpush3.bf16.msra.mxu1 %v15168_v53 }
 0x88a   :  { %13125 = vmatprep.subr.bf16.mxu1 %v15170_v45  ;;  %v11527_v45 = vand.u32 127, %v1459_v51 }
 0x88c   :  { %vm11528_vm0 = vcmp.lt.s32.totalorder %v11527_v45, 6 }
 0x88d   :  { %13126 = vmatpush3.bf16.msra.mxu1 %v15172_v52 }
 0x88e   :  { %13127 = vmatprep.subr.bf16.mxu1 %v15174_v19 }
 0x891   :  { %13128 = vmatpush3.bf16.msra.mxu1 %v15176_v15 }
 0x892   :  { %13129 = vmatprep.subr.bf16.mxu1 %v15178_v30 }
 0x895   :  { %13130 = vmatpush3.bf16.msra.mxu1 %v15180_v26 }
 0x896   :  { %13131 = vmatprep.subr.bf16.mxu1 %v15182_v27 }
 0x899   :  { %13132 = vmatpush3.bf16.msra.mxu1 %v15184_v63 }
 0x89a   :  { %13133 = vmatprep.subr.bf16.mxu1 %v15186_v25 }
 0x89d   :  { %13134 = vmatpush3.bf16.msra.mxu1 %v15188_v55 }
 0x89e   :  { %v10782_v11 = vpop.f32.mrf.mxu1  ;;  %v10823_v36 = vpop.f32.mrf.mxu0  ;;  %13135 = vmatprep.subr.bf16.mxu1 %v15190_v3 }
 0x89f   :  { %v10783_v6 = vadd.f32 %v10782_v11, %v10005_v62  ;;  %v10824_v46 = vadd.f32 %v10823_v36, %v10013_v39 }
 0x8a0   :  { %v10784_v14 = vpop.f32.mrf.mxu1  ;;  %v10825_v57 = vpop.f32.mrf.mxu0 }
 0x8a1   :  { %v10785_v50 = vadd.f32 %v10784_v14, %v10009_v13  ;;  %v10826_v10 = vadd.f32 %v10825_v57, %v10017_v23  ;;  %13136 = vmatpush3.bf16.msra.mxu1 %v15192_v40  ;;  %v10834_v42 = vmax.f32 %v10783_v6, 0.0  ;;  %v10836_v56 = vmax.f32 %v10824_v46, 0.0 }
 0x8a2   :  { %v10786_v61 = vpop.f32.mrf.mxu1  ;;  %v10827_v16 = vpop.f32.mrf.mxu0  ;;  %13137 = vmatprep.subr.bf16.mxu1 %v15194_v34 }
 0x8a3   :  { %v10835_v60 = vmax.f32 %v10785_v50, 0.0  ;;  %v10837_v29 = vmax.f32 %v10826_v10, 0.0  ;;  %v10842_v5 = vpack.c.bf16 %v10834_v42, %v10834_v42  ;;  %v10844_v12 = vpack.c.bf16 %v10836_v56, %v10836_v56 }
 0x8a4   :  { %v10787_v35 = vpop.f32.mrf.mxu1  ;;  %v10828_v0 = vpop.f32.mrf.mxu0 }
 0x8a5   :  { %v10843_v33 = vpack.c.bf16 %v10835_v60, %v10835_v60  ;;  %v10845_v21 = vpack.c.bf16 %v10837_v29, %v10837_v29  ;;  %13138 = vmatpush3.bf16.msra.mxu1 %v15196_v54 }
 0x8a7   :  { %11477 = vmatprep.mubr.bf16.mxu0 %v10843_v33  ;;  %11517 = vmatprep.mubr.bf16.mxu1 %v10845_v21 }
 0x8a8   :  { %11478 = vmatmul.mubr.bf16.vlgmr.msra.gmra.mxu0 %v10842_v5  ;;  %11518 = vmatmul.mubr.bf16.vlgmr.msra.gmra.mxu1 %v10844_v12 }
 0x928   :  { %v13073_v4 = vpop.f32.mrf.mxu1 }
 0x92a   :  { %v13074_v37 = vpop.f32.mrf.mxu1 }
 0x92b   :  { %v13075_v8 = vadd.f32 %v13074_v37, %v13073_v4 }
 0x92c   :  { %v13076_v43 = vpop.f32.mrf.mxu1 }
 0x92d   :  { %v11400_v9 = vadd.f32 %v13075_v8, %v12992_v31 }
 0x92e   :  { %v13077_v18 = vpop.f32.mrf.mxu1 }
 0x948   :  { %v13095_v32 = vpop.f32.mrf.mxu1 }
 0x94a   :  { %v13096_v48 = vpop.f32.mrf.mxu1 }
 0x94b   :  { %v13097_v22 = vadd.f32 %v13096_v48, %v13095_v32 }
 0x94c   :  { %v13098_v49 = vpop.f32.mrf.mxu1 }
 0x94d   :  { %v11440_v47 = vadd.f32 %v13097_v22, %v11400_v9 }
 0x94e   :  { %v13099_v44 = vpop.f32.mrf.mxu1 }
 0x968   :  { %v13117_v38 = vpop.f32.mrf.mxu0  ;;  %v13139_v17 = vpop.f32.mrf.mxu1 }
 0x96a   :  { %v13118_v20 = vpop.f32.mrf.mxu0  ;;  %v13140_v59 = vpop.f32.mrf.mxu1 }
 0x96b   :  { %v13119_v2 = vadd.f32 %v13118_v20, %v13117_v38  ;;  %v13141_v19 = vadd.f32 %v13140_v59, %v13139_v17 }
 0x96c   :  { %v13120_v53 = vpop.f32.mrf.mxu0  ;;  %v13142_v41 = vpop.f32.mrf.mxu1 }
 0x96d   :  { %v11480_v52 = vadd.f32 %v13119_v2, %v11440_v47 }
 0x96e   :  { %v13121_v15 = vpop.f32.mrf.mxu0  ;;  %v13143_v30 = vpop.f32.mrf.mxu1 }
 0x96f   :  { %v11520_v26 = vadd.f32 %v13141_v19, %v11480_v52 }
 0x971   :  { %v11525_v27 = vmax.f32 %v11520_v26, 0.0 }
 0x973   :  { %v11529_v63 = vsel %vm11528_vm0, %v11525_v27, 0.0 }
 0x974   :  { %11530 = vadd.xlane.f32.xlu0 %v11529_v63 }
 0x98a   :  { %11536 = vperm.xlu0 %13164, %v11525_v27  }
 0x9fd   :  { %v11531_v25 = vpop.xlane.xlu0 %11530 }
 0x9fe   :  { %v11532_v58 = vmul.f32 0.16666667, %v11531_v25 }
 0xa00   :  { %v11533_v28 = vsub.f32 %v11529_v63, %v11532_v58 }
 0xa05   :  { %v11537_v55 = vpop.permute.xlu0 %11536 }
 0xa06   :  { %v11539_v1 = vadd.f32 %v11537_v55, %v11533_v28 }
 0xa08   :  { %v11540_v24 = vsel %vm11528_vm0, %v11539_v1, 0.0 }
 0xa09   :  { %11541 = vst [vmem:[%s15975_s11] sm:$0xff] %v11540_v24 }
 0xa0a   :  { %11546 = vsyncpa [#allocation3], 1 }
 0xa0b   :  { %11547 = vsyncpa [#allocation5], 1 }
 0xa0c   :  { %11548 = vsyncpa [#allocation8], 1 }
 0xa0d   :  { %11549 = vsyncpa [#allocation11], 1 }
 0xa0e   :  { %11550 = vsyncpa [#allocation14], 1 }
 0xa0f   :  { %11551 = vsyncpa [#allocation17], 1 }

</bundles_post_ra>
